<compile_context>
chip_gen: v5e
topology: v5e:2x2
jax: 0.10.0
libtpu: 0.0.40
codegen_flags: <defaults>
</compile_context>

<pallas_src>
import jax
import jax.numpy as jnp
from jax.experimental import pallas as pl
from jax.experimental.pallas import tpu as pltpu

NEG_INF = -1e30  # finite stand-in for masked_fill(-inf); identical softmax result
LN_EPS = 1e-5    # torch.nn.LayerNorm default


def make_kernel(n_head, d_k, d_v, bb, Lq, Lk, d_model):
    inv_temp = 1.0 / float(d_k) ** 0.5
    bf16 = jnp.bfloat16
    f32 = jnp.float32
    rq = bb * Lq        # query-side rows per channel in one grid step
    rk = bb * Lk        # kv-side rows per channel in one grid step

    def _layer_norm(x, gamma, beta):
        mu = jnp.mean(x, axis=-1, keepdims=True)
        var = jnp.mean((x - mu) ** 2, axis=-1, keepdims=True)
        return (x - mu) * jax.lax.rsqrt(var + LN_EPS) * gamma + beta

    def _softmax(s):
        m = jnp.max(s, axis=-1, keepdims=True)
        e = jnp.exp(s - m)
        denom = jnp.sum(e, axis=-1, keepdims=True)
        return e * pl.reciprocal(denom, approx=True)

    def mha(q_in, kv_in, bias, lkv, wq, bq, wk, bk, wv, bv, fcw, fcb, g, be):
        # q_in: (2*rq, D) f32 (both channels stacked on rows)
        # kv_in: (2*bb*lkv, D) f32, bias: (bb, Lq, lkv) f32 additive bias
        residual = q_in
        qs = q_in.astype(bf16)
        kvs = kv_in.astype(bf16)
        # Lane-dense fused QKV projections (one matmul per projection).
        q = (jnp.dot(qs, wq, preferred_element_type=f32) + bq) * inv_temp
        k = jnp.dot(kvs, wk, preferred_element_type=f32) + bk
        v = jnp.dot(kvs, wv, preferred_element_type=f32) + bv

        head_outs = []
        for h in range(n_head):                       # small, unrolled
            qh = q[:, h * d_k:(h + 1) * d_k]
            kh = k[:, h * d_k:(h + 1) * d_k]
            vh = v[:, h * d_v:(h + 1) * d_v]
            blocks = []
            # 2*bb (channel, batch) blocks -- no cross-channel quadrants.
            for blk in range(2 * bb):
                q0 = blk * Lq
                k0 = blk * lkv
                qb = qh[q0:q0 + Lq].astype(bf16)
                kb = kh[k0:k0 + lkv].astype(bf16)
                vb = vh[k0:k0 + lkv].astype(bf16)
                s = jax.lax.dot_general(
                    qb, kb, (((1,), (1,)), ((), ())),
                    preferred_element_type=f32) + bias[blk % bb]
                p = _softmax(s)
                blocks.append(jnp.dot(p.astype(bf16), vb,
                                      preferred_element_type=f32))
            head_outs.append(jnp.concatenate(blocks, axis=0))   # (2*rq, d_v)
        hv = jnp.concatenate(head_outs, axis=-1).astype(bf16)   # (2*rq, H*d_v)
        o = jnp.dot(hv, fcw, preferred_element_type=f32) + fcb  # lane-dense
        return _layer_norm(o + residual, g, be)

    def ffn(x, w1, b1, w2, b2, g, be):
        residual = x
        h = jnp.dot(x.astype(bf16), w1, preferred_element_type=f32) + b1
        h = jnp.maximum(h, 0.0)
        o = jnp.dot(h.astype(bf16), w2, preferred_element_type=f32) + b2
        return _layer_norm(o + residual, g, be)

    def kernel(
        dec0_ref, dec1_ref, enc0_ref, enc1_ref, npm_ref, smask_ref, dmask_ref,
        # shared self-attention weights (fused-head layout)
        s_wq, s_bq, s_wk, s_bk, s_wv, s_bv, s_fcw, s_fcb, s_g, s_b,
        # shared enc-dec attention weights
        e_wq, e_bq, e_wk, e_bk, e_wv, e_bv, e_fcw, e_fcb, e_g, e_b,
        # shared position-wise FFN weights
        f_w1, f_b1, f_w2, f_b2, f_g, f_b,
        # merge linear, split into top/bottom halves
        m_w0, m_w1, m_b,
        out_ref,
    ):
        # Channel row-stack built in VMEM -- no fused arrays materialized in HBM.
        x = jnp.concatenate([dec0_ref[...].reshape(rq, d_model),
                             dec1_ref[...].reshape(rq, d_model)], axis=0)
        enc = jnp.concatenate([enc0_ref[...].reshape(rk, d_model),
                               enc1_ref[...].reshape(rk, d_model)], axis=0)
        npm1 = npm_ref[...].reshape(rq, 1)
        npm = jnp.concatenate([npm1, npm1], axis=0)

        # Additive mask biases from the raw (bb, Lq, L) masks (hoisted compare).
        sbias = jnp.where(smask_ref[...] > 0, NEG_INF, 0.0)   # (bb, Lq, Lq)
        dbias = jnp.where(dmask_ref[...] > 0, NEG_INF, 0.0)   # (bb, Lq, Lk)

        o = mha(x, x, sbias, Lq,
                s_wq[...], s_bq[...], s_wk[...], s_bk[...], s_wv[...], s_bv[...],
                s_fcw[...], s_fcb[...], s_g[...], s_b[...])
        o = o * npm
        o = mha(o, enc, dbias, Lk,
                e_wq[...], e_bq[...], e_wk[...], e_bk[...], e_wv[...], e_bv[...],
                e_fcw[...], e_fcb[...], e_g[...], e_b[...])
        o = o * npm
        o = ffn(o, f_w1[...], f_b1[...], f_w2[...], f_b2[...], f_g[...], f_b[...])
        o = o * npm

        # merge: split-weight form avoids the o0 || o1 lane concatenation
        o0 = o[:rq]
        o1 = o[rq:]
        merged = (jnp.dot(o0.astype(bf16), m_w0[...], preferred_element_type=f32)
                  + jnp.dot(o1.astype(bf16), m_w1[...], preferred_element_type=f32)
                  + m_b[...])
        out = jnp.where(merged >= 0, merged, 0.125 * merged)   # LeakyReLU(0.125)
        out_ref[...] = out.reshape(bb, Lq, d_model)

    return kernel


def _pick_bb(B, Lq, target_rows=256):
    """Batch elements per grid step: M ~= target_rows for the MXU, but keep
    >= 2 parallel grid steps when possible (v7x has 2 TensorCores)."""
    bb = max(1, target_rows // max(1, 2 * Lq))
    bb = min(bb, B)
    if B >= 2:
        bb = min(bb, max(1, B // 2))
    while B % bb:
        bb -= 1
    return max(bb, 1)


def decoder_layer_double_channel_fuse(
    dec0, enc0, dec1, enc1, non_pad_mask, slf_attn_mask, dec_enc_attn_mask,
    params, *, n_head, d_k, d_v, bb=None,
):
    B, Lq, d_model = dec0.shape
    Lk = enc0.shape[1]
    bf16 = jnp.bfloat16
    if bb is None:
        bb = _pick_bb(B, Lq)
    assert B % bb == 0

    (s_wq, s_bq, s_wk, s_bk, s_wv, s_bv, s_fcw, s_fcb, s_g, s_b,
     e_wq, e_bq, e_wk, e_bk, e_wv, e_bv, e_fcw, e_fcb, e_g, e_b,
     f_w1, f_b1, f_w2, f_b2, f_g, f_b,
     m_w, m_b) = params

    # ---- wrapper-time weight prep: just dtype casts (fused-head layout) -----
    def attn_pack(wq, bq, wk, bk, wv, bv, fcw, fcb, g, be):
        return [wq.astype(bf16), bq, wk.astype(bf16), bk, wv.astype(bf16), bv,
                fcw.astype(bf16), fcb, g, be]

    weights = (
        attn_pack(s_wq, s_bq, s_wk, s_bk, s_wv, s_bv, s_fcw, s_fcb, s_g, s_b)
        + attn_pack(e_wq, e_bq, e_wk, e_bk, e_wv, e_bv, e_fcw, e_fcb, e_g, e_b)
        + [f_w1.astype(bf16), f_b1, f_w2.astype(bf16), f_b2, f_g, f_b]
        + [m_w[:d_model].astype(bf16), m_w[d_model:].astype(bf16), m_b]
    )

    acts = (dec0, dec1, enc0, enc1, non_pad_mask, slf_attn_mask, dec_enc_attn_mask)
    kernel = make_kernel(n_head, d_k, d_v, bb, Lq, Lk, d_model)

    def batched(arr):
        nd = arr.ndim
        return pl.BlockSpec((bb,) + tuple(arr.shape[1:]),
                            lambda g, _n=nd: (g,) + (0,) * (_n - 1))

    def run(single_buffer_weights):
        def whole(arr):
            nd = arr.ndim
            idx = lambda g, _n=nd: (0,) * _n
            if single_buffer_weights:
                # Grid-invariant weights: don't double-buffer them (halves the
                # resident weight footprint; matters most on v7x's 64 MiB VMEM).
                return pl.BlockSpec(arr.shape, idx, pipeline_mode=pl.Buffered(1))
            return pl.BlockSpec(arr.shape, idx)

        in_specs = [batched(a) for a in acts] + [whole(w) for w in weights]
        out_spec = pl.BlockSpec((bb, Lq, d_model), lambda g: (g, 0, 0))

        fn = pl.pallas_call(
            kernel,
            out_shape=jax.ShapeDtypeStruct((B, Lq, d_model), jnp.float32),
            grid_spec=pltpu.PrefetchScalarGridSpec(
                num_scalar_prefetch=0,
                grid=(B // bb,),
                in_specs=in_specs,
                out_specs=out_spec,
            ),
            compiler_params=pltpu.CompilerParams(
                dimension_semantics=("parallel",),
                # Raise the scoped VMEM limit (v5e default is only 16 MiB) while
                # staying under v7x's 64 MiB physical VMEM.
                vmem_limit_bytes=48 * 1024 * 1024,
            ),
        )
        return fn(*acts, *weights)

    try:
        return jax.block_until_ready(run(True))
    except Exception:
        # Fallback for JAX versions that reject pipeline_mode=pl.Buffered(1)
        # on top-level pallas_call BlockSpecs.
        return jax.block_until_ready(run(False))


def init_params(key, d_model, d_inner, n_head, d_k, d_v):
    """Deterministic synthetic init.  Linear weights stored as (in, out)."""
    def lin(k, fan_in, fan_out):
        kw, kb = jax.random.split(k)
        w = jax.random.normal(kw, (fan_in, fan_out), jnp.float32) / jnp.sqrt(fan_in)
        b = 0.01 * jax.random.normal(kb, (1, fan_out), jnp.float32)
        return w, b

    keys = jax.random.split(key, 16)
    ki = iter(keys)

    def mha_params():
        wq, bq = lin(next(ki), d_model, n_head * d_k)
        wk, bk = lin(next(ki), d_model, n_head * d_k)
        wv, bv = lin(next(ki), d_model, n_head * d_v)
        fcw, fcb = lin(next(ki), n_head * d_v, d_model)
        g = jnp.ones((1, d_model), jnp.float32)
        b = jnp.zeros((1, d_model), jnp.float32)
        return [wq, bq, wk, bk, wv, bv, fcw, fcb, g, b]

    slf = mha_params()
    enc = mha_params()

    w1, b1 = lin(next(ki), d_model, d_inner)   # Conv1d(d_model, d_inner, 1)
    w2, b2 = lin(next(ki), d_inner, d_model)   # Conv1d(d_inner, d_model, 1)
    f_g = jnp.ones((1, d_model), jnp.float32)
    f_b = jnp.zeros((1, d_model), jnp.float32)
    ffn = [w1, b1, w2, b2, f_g, f_b]

    m_w, m_b = lin(next(ki), 2 * d_model, d_model)
    merge = [m_w, m_b]

    return slf + enc + ffn + merge


if __name__ == "__main__":
    B, Lq, Lk = 2, 8, 8
    d_model, d_inner, n_head, d_k, d_v = 32, 64, 2, 16, 16

    key = jax.random.PRNGKey(0)
    k_in, k_par = jax.random.split(key)
    k0, k1, k2, k3 = jax.random.split(k_in, 4)

    dec_input_0 = jax.random.normal(k0, (B, Lq, d_model), jnp.float32)
    enc_output_0 = jax.random.normal(k1, (B, Lk, d_model), jnp.float32)
    dec_input_1 = jax.random.normal(k2, (B, Lq, d_model), jnp.float32)
    enc_output_1 = jax.random.normal(k3, (B, Lk, d_model), jnp.float32)

    # non_pad_mask: all positions valid; slf_attn_mask: causal (subsequent) mask;
    # dec_enc_attn_mask: no masking.  Masks are float (>0 means "masked").
    non_pad_mask = jnp.ones((B, Lq, 1), jnp.float32)
    slf_attn_mask = jnp.triu(jnp.ones((Lq, Lq), jnp.float32), k=1)[None].repeat(B, 0)
    dec_enc_attn_mask = jnp.zeros((B, Lq, Lk), jnp.float32)

    params = init_params(k_par, d_model, d_inner, n_head, d_k, d_v)

    out = decoder_layer_double_channel_fuse(
        dec_input_0, enc_output_0, dec_input_1, enc_output_1,
        non_pad_mask, slf_attn_mask, dec_enc_attn_mask,
        params, n_head=n_head, d_k=d_k, d_v=d_v,
    )
    out = jax.block_until_ready(out)
    assert out.shape == (B, Lq, d_model)
    assert bool(jnp.all(jnp.isfinite(out)))
    print("KERNEL_OK")
</pallas_src>

<mosaic_0001>
module attributes {stable_mosaic.version = 11 : i64} {
  func.func @kernel(%arg0: i32, %arg1: memref<1x8x32xf32, #tpu.memory_space<vmem>>, %arg2: memref<1x8x32xf32, #tpu.memory_space<vmem>>, %arg3: memref<1x8x32xf32, #tpu.memory_space<vmem>>, %arg4: memref<1x8x32xf32, #tpu.memory_space<vmem>>, %arg5: memref<1x8x1xf32, #tpu.memory_space<vmem>>, %arg6: memref<1x8x8xf32, #tpu.memory_space<vmem>>, %arg7: memref<1x8x8xf32, #tpu.memory_space<vmem>>, %arg8: memref<32x32xbf16, #tpu.memory_space<vmem>>, %arg9: memref<1x32xf32, #tpu.memory_space<vmem>>, %arg10: memref<32x32xbf16, #tpu.memory_space<vmem>>, %arg11: memref<1x32xf32, #tpu.memory_space<vmem>>, %arg12: memref<32x32xbf16, #tpu.memory_space<vmem>>, %arg13: memref<1x32xf32, #tpu.memory_space<vmem>>, %arg14: memref<32x32xbf16, #tpu.memory_space<vmem>>, %arg15: memref<1x32xf32, #tpu.memory_space<vmem>>, %arg16: memref<1x32xf32, #tpu.memory_space<vmem>>, %arg17: memref<1x32xf32, #tpu.memory_space<vmem>>, %arg18: memref<32x32xbf16, #tpu.memory_space<vmem>>, %arg19: memref<1x32xf32, #tpu.memory_space<vmem>>, %arg20: memref<32x32xbf16, #tpu.memory_space<vmem>>, %arg21: memref<1x32xf32, #tpu.memory_space<vmem>>, %arg22: memref<32x32xbf16, #tpu.memory_space<vmem>>, %arg23: memref<1x32xf32, #tpu.memory_space<vmem>>, %arg24: memref<32x32xbf16, #tpu.memory_space<vmem>>, %arg25: memref<1x32xf32, #tpu.memory_space<vmem>>, %arg26: memref<1x32xf32, #tpu.memory_space<vmem>>, %arg27: memref<1x32xf32, #tpu.memory_space<vmem>>, %arg28: memref<32x64xbf16, #tpu.memory_space<vmem>>, %arg29: memref<1x64xf32, #tpu.memory_space<vmem>>, %arg30: memref<64x32xbf16, #tpu.memory_space<vmem>>, %arg31: memref<1x32xf32, #tpu.memory_space<vmem>>, %arg32: memref<1x32xf32, #tpu.memory_space<vmem>>, %arg33: memref<1x32xf32, #tpu.memory_space<vmem>>, %arg34: memref<32x32xbf16, #tpu.memory_space<vmem>>, %arg35: memref<32x32xbf16, #tpu.memory_space<vmem>>, %arg36: memref<1x32xf32, #tpu.memory_space<vmem>>, %arg37: memref<1x8x32xf32, #tpu.memory_space<vmem>>) attributes {dimension_semantics = [#tpu.dimension_semantics<parallel>], iteration_bounds = array<i64: 2>, scalar_prefetch = 0 : i64, scratch_operands = 0 : i64, tpu.core_type = #tpu.core_type<tc>, window_params = [{transform_indices = @transform_0, window_bounds = array<i64: 1, 8, 32>}, {transform_indices = @transform_1, window_bounds = array<i64: 1, 8, 32>}, {transform_indices = @transform_2, window_bounds = array<i64: 1, 8, 32>}, {transform_indices = @transform_3, window_bounds = array<i64: 1, 8, 32>}, {transform_indices = @transform_4, window_bounds = array<i64: 1, 8, 1>}, {transform_indices = @transform_5, window_bounds = array<i64: 1, 8, 8>}, {transform_indices = @transform_6, window_bounds = array<i64: 1, 8, 8>}, {pipeline_mode = #tpu.pipeline_mode<synchronous>, transform_indices = @transform_7, window_bounds = array<i64: 32, 32>}, {pipeline_mode = #tpu.pipeline_mode<synchronous>, transform_indices = @transform_8, window_bounds = array<i64: 1, 32>}, {pipeline_mode = #tpu.pipeline_mode<synchronous>, transform_indices = @transform_9, window_bounds = array<i64: 32, 32>}, {pipeline_mode = #tpu.pipeline_mode<synchronous>, transform_indices = @transform_10, window_bounds = array<i64: 1, 32>}, {pipeline_mode = #tpu.pipeline_mode<synchronous>, transform_indices = @transform_11, window_bounds = array<i64: 32, 32>}, {pipeline_mode = #tpu.pipeline_mode<synchronous>, transform_indices = @transform_12, window_bounds = array<i64: 1, 32>}, {pipeline_mode = #tpu.pipeline_mode<synchronous>, transform_indices = @transform_13, window_bounds = array<i64: 32, 32>}, {pipeline_mode = #tpu.pipeline_mode<synchronous>, transform_indices = @transform_14, window_bounds = array<i64: 1, 32>}, {pipeline_mode = #tpu.pipeline_mode<synchronous>, transform_indices = @transform_15, window_bounds = array<i64: 1, 32>}, {pipeline_mode = #tpu.pipeline_mode<synchronous>, transform_indices = @transform_16, window_bounds = array<i64: 1, 32>}, {pipeline_mode = #tpu.pipeline_mode<synchronous>, transform_indices = @transform_17, window_bounds = array<i64: 32, 32>}, {pipeline_mode = #tpu.pipeline_mode<synchronous>, transform_indices = @transform_18, window_bounds = array<i64: 1, 32>}, {pipeline_mode = #tpu.pipeline_mode<synchronous>, transform_indices = @transform_19, window_bounds = array<i64: 32, 32>}, {pipeline_mode = #tpu.pipeline_mode<synchronous>, transform_indices = @transform_20, window_bounds = array<i64: 1, 32>}, {pipeline_mode = #tpu.pipeline_mode<synchronous>, transform_indices = @transform_21, window_bounds = array<i64: 32, 32>}, {pipeline_mode = #tpu.pipeline_mode<synchronous>, transform_indices = @transform_22, window_bounds = array<i64: 1, 32>}, {pipeline_mode = #tpu.pipeline_mode<synchronous>, transform_indices = @transform_23, window_bounds = array<i64: 32, 32>}, {pipeline_mode = #tpu.pipeline_mode<synchronous>, transform_indices = @transform_24, window_bounds = array<i64: 1, 32>}, {pipeline_mode = #tpu.pipeline_mode<synchronous>, transform_indices = @transform_25, window_bounds = array<i64: 1, 32>}, {pipeline_mode = #tpu.pipeline_mode<synchronous>, transform_indices = @transform_26, window_bounds = array<i64: 1, 32>}, {pipeline_mode = #tpu.pipeline_mode<synchronous>, transform_indices = @transform_27, window_bounds = array<i64: 32, 64>}, {pipeline_mode = #tpu.pipeline_mode<synchronous>, transform_indices = @transform_28, window_bounds = array<i64: 1, 64>}, {pipeline_mode = #tpu.pipeline_mode<synchronous>, transform_indices = @transform_29, window_bounds = array<i64: 64, 32>}, {pipeline_mode = #tpu.pipeline_mode<synchronous>, transform_indices = @transform_30, window_bounds = array<i64: 1, 32>}, {pipeline_mode = #tpu.pipeline_mode<synchronous>, transform_indices = @transform_31, window_bounds = array<i64: 1, 32>}, {pipeline_mode = #tpu.pipeline_mode<synchronous>, transform_indices = @transform_32, window_bounds = array<i64: 1, 32>}, {pipeline_mode = #tpu.pipeline_mode<synchronous>, transform_indices = @transform_33, window_bounds = array<i64: 32, 32>}, {pipeline_mode = #tpu.pipeline_mode<synchronous>, transform_indices = @transform_34, window_bounds = array<i64: 32, 32>}, {pipeline_mode = #tpu.pipeline_mode<synchronous>, transform_indices = @transform_35, window_bounds = array<i64: 1, 32>}, {transform_indices = @transform_36, window_bounds = array<i64: 1, 8, 32>}]} {
    %c0 = arith.constant 0 : index
    %c0_0 = arith.constant 0 : index
    %c0_1 = arith.constant 0 : index
    %0 = vector.load %arg1[%c0, %c0_0, %c0_1] : memref<1x8x32xf32, #tpu.memory_space<vmem>>, vector<1x8x32xf32>
    %1 = vector.shape_cast %0 : vector<1x8x32xf32> to vector<8x32xf32>
    %c0_2 = arith.constant 0 : index
    %c0_3 = arith.constant 0 : index
    %c0_4 = arith.constant 0 : index
    %2 = vector.load %arg2[%c0_2, %c0_3, %c0_4] : memref<1x8x32xf32, #tpu.memory_space<vmem>>, vector<1x8x32xf32>
    %3 = vector.shape_cast %2 : vector<1x8x32xf32> to vector<8x32xf32>
    %4 = tpu.concatenate %1, %3 in 0 : vector<8x32xf32>, vector<8x32xf32> -> vector<16x32xf32>
    %c0_5 = arith.constant 0 : index
    %c0_6 = arith.constant 0 : index
    %c0_7 = arith.constant 0 : index
    %5 = vector.load %arg3[%c0_5, %c0_6, %c0_7] : memref<1x8x32xf32, #tpu.memory_space<vmem>>, vector<1x8x32xf32>
    %6 = vector.shape_cast %5 : vector<1x8x32xf32> to vector<8x32xf32>
    %c0_8 = arith.constant 0 : index
    %c0_9 = arith.constant 0 : index
    %c0_10 = arith.constant 0 : index
    %7 = vector.load %arg4[%c0_8, %c0_9, %c0_10] : memref<1x8x32xf32, #tpu.memory_space<vmem>>, vector<1x8x32xf32>
    %8 = vector.shape_cast %7 : vector<1x8x32xf32> to vector<8x32xf32>
    %9 = tpu.concatenate %6, %8 in 0 : vector<8x32xf32>, vector<8x32xf32> -> vector<16x32xf32>
    %c0_11 = arith.constant 0 : index
    %c0_12 = arith.constant 0 : index
    %c0_13 = arith.constant 0 : index
    %10 = vector.load %arg5[%c0_11, %c0_12, %c0_13] : memref<1x8x1xf32, #tpu.memory_space<vmem>>, vector<1x8x1xf32>
    %11 = vector.shape_cast %10 : vector<1x8x1xf32> to vector<8x1xf32>
    %12 = tpu.concatenate %11, %11 in 0 : vector<8x1xf32>, vector<8x1xf32> -> vector<16x1xf32>
    %c0_14 = arith.constant 0 : index
    %c0_15 = arith.constant 0 : index
    %c0_16 = arith.constant 0 : index
    %13 = vector.load %arg6[%c0_14, %c0_15, %c0_16] : memref<1x8x8xf32, #tpu.memory_space<vmem>>, vector<1x8x8xf32>
    %cst = arith.constant 0.000000e+00 : f32
    %14 = vector.broadcast %cst : f32 to vector<1x8x8xf32>
    %15 = arith.cmpf ogt, %13, %14 : vector<1x8x8xf32>
    %cst_17 = arith.constant -1.000000e+30 : f32
    %cst_18 = arith.constant 0.000000e+00 : f32
    %16 = vector.broadcast %cst_17 : f32 to vector<1x8x8xf32>
    %17 = vector.broadcast %cst_18 : f32 to vector<1x8x8xf32>
    %18 = arith.select %15, %16, %17 : vector<1x8x8xi1>, vector<1x8x8xf32>
    %c0_19 = arith.constant 0 : index
    %c0_20 = arith.constant 0 : index
    %c0_21 = arith.constant 0 : index
    %19 = vector.load %arg7[%c0_19, %c0_20, %c0_21] : memref<1x8x8xf32, #tpu.memory_space<vmem>>, vector<1x8x8xf32>
    %cst_22 = arith.constant 0.000000e+00 : f32
    %20 = vector.broadcast %cst_22 : f32 to vector<1x8x8xf32>
    %21 = arith.cmpf ogt, %19, %20 : vector<1x8x8xf32>
    %cst_23 = arith.constant -1.000000e+30 : f32
    %cst_24 = arith.constant 0.000000e+00 : f32
    %22 = vector.broadcast %cst_23 : f32 to vector<1x8x8xf32>
    %23 = vector.broadcast %cst_24 : f32 to vector<1x8x8xf32>
    %24 = arith.select %21, %22, %23 : vector<1x8x8xi1>, vector<1x8x8xf32>
    %c0_25 = arith.constant 0 : index
    %c0_26 = arith.constant 0 : index
    %25 = vector.load %arg8[%c0_25, %c0_26] : memref<32x32xbf16, #tpu.memory_space<vmem>>, vector<32x32xbf16>
    %c0_27 = arith.constant 0 : index
    %c0_28 = arith.constant 0 : index
    %26 = vector.load %arg9[%c0_27, %c0_28] : memref<1x32xf32, #tpu.memory_space<vmem>>, vector<1x32xf32>
    %c0_29 = arith.constant 0 : index
    %c0_30 = arith.constant 0 : index
    %27 = vector.load %arg10[%c0_29, %c0_30] : memref<32x32xbf16, #tpu.memory_space<vmem>>, vector<32x32xbf16>
    %c0_31 = arith.constant 0 : index
    %c0_32 = arith.constant 0 : index
    %28 = vector.load %arg11[%c0_31, %c0_32] : memref<1x32xf32, #tpu.memory_space<vmem>>, vector<1x32xf32>
    %c0_33 = arith.constant 0 : index
    %c0_34 = arith.constant 0 : index
    %29 = vector.load %arg12[%c0_33, %c0_34] : memref<32x32xbf16, #tpu.memory_space<vmem>>, vector<32x32xbf16>
    %c0_35 = arith.constant 0 : index
    %c0_36 = arith.constant 0 : index
    %30 = vector.load %arg13[%c0_35, %c0_36] : memref<1x32xf32, #tpu.memory_space<vmem>>, vector<1x32xf32>
    %c0_37 = arith.constant 0 : index
    %c0_38 = arith.constant 0 : index
    %31 = vector.load %arg14[%c0_37, %c0_38] : memref<32x32xbf16, #tpu.memory_space<vmem>>, vector<32x32xbf16>
    %c0_39 = arith.constant 0 : index
    %c0_40 = arith.constant 0 : index
    %32 = vector.load %arg15[%c0_39, %c0_40] : memref<1x32xf32, #tpu.memory_space<vmem>>, vector<1x32xf32>
    %c0_41 = arith.constant 0 : index
    %c0_42 = arith.constant 0 : index
    %33 = vector.load %arg16[%c0_41, %c0_42] : memref<1x32xf32, #tpu.memory_space<vmem>>, vector<1x32xf32>
    %c0_43 = arith.constant 0 : index
    %c0_44 = arith.constant 0 : index
    %34 = vector.load %arg17[%c0_43, %c0_44] : memref<1x32xf32, #tpu.memory_space<vmem>>, vector<1x32xf32>
    %35 = arith.truncf %4 : vector<16x32xf32> to vector<16x32xbf16>
    %36 = arith.truncf %4 : vector<16x32xf32> to vector<16x32xbf16>
    %cst_45 = arith.constant dense<0.000000e+00> : vector<16x32xf32>
    %37 = tpu.matmul %35, %25, %cst_45 {dimension_numbers = #tpu.dot_dimension_numbers<[1], [0], [0], [1], [0, 0, 1, 1], [], []>} : vector<16x32xbf16>, vector<32x32xbf16>, vector<16x32xf32> -> vector<16x32xf32>
    %38 = vector.broadcast %26 : vector<1x32xf32> to vector<16x32xf32>
    %39 = arith.addf %37, %38 : vector<16x32xf32>
    %cst_46 = arith.constant 2.500000e-01 : f32
    %40 = vector.broadcast %cst_46 : f32 to vector<16x32xf32>
    %41 = arith.mulf %39, %40 : vector<16x32xf32>
    %cst_47 = arith.constant dense<0.000000e+00> : vector<16x32xf32>
    %42 = tpu.matmul %36, %27, %cst_47 {dimension_numbers = #tpu.dot_dimension_numbers<[1], [0], [0], [1], [0, 0, 1, 1], [], []>} : vector<16x32xbf16>, vector<32x32xbf16>, vector<16x32xf32> -> vector<16x32xf32>
    %43 = vector.broadcast %28 : vector<1x32xf32> to vector<16x32xf32>
    %44 = arith.addf %42, %43 : vector<16x32xf32>
    %cst_48 = arith.constant dense<0.000000e+00> : vector<16x32xf32>
    %45 = tpu.matmul %36, %29, %cst_48 {dimension_numbers = #tpu.dot_dimension_numbers<[1], [0], [0], [1], [0, 0, 1, 1], [], []>} : vector<16x32xbf16>, vector<32x32xbf16>, vector<16x32xf32> -> vector<16x32xf32>
    %46 = vector.broadcast %30 : vector<1x32xf32> to vector<16x32xf32>
    %47 = arith.addf %45, %46 : vector<16x32xf32>
    %48 = vector.extract_strided_slice %41 {offsets = [0, 0], sizes = [16, 16], strides = [1, 1]} : vector<16x32xf32> to vector<16x16xf32>
    %49 = vector.extract_strided_slice %44 {offsets = [0, 0], sizes = [16, 16], strides = [1, 1]} : vector<16x32xf32> to vector<16x16xf32>
    %50 = vector.extract_strided_slice %47 {offsets = [0, 0], sizes = [16, 16], strides = [1, 1]} : vector<16x32xf32> to vector<16x16xf32>
    %51 = vector.extract_strided_slice %48 {offsets = [0, 0], sizes = [8, 16], strides = [1, 1]} : vector<16x16xf32> to vector<8x16xf32>
    %52 = arith.truncf %51 : vector<8x16xf32> to vector<8x16xbf16>
    %53 = vector.extract_strided_slice %49 {offsets = [0, 0], sizes = [8, 16], strides = [1, 1]} : vector<16x16xf32> to vector<8x16xf32>
    %54 = arith.truncf %53 : vector<8x16xf32> to vector<8x16xbf16>
    %55 = vector.extract_strided_slice %50 {offsets = [0, 0], sizes = [8, 16], strides = [1, 1]} : vector<16x16xf32> to vector<8x16xf32>
    %56 = arith.truncf %55 : vector<8x16xf32> to vector<8x16xbf16>
    %cst_49 = arith.constant dense<0.000000e+00> : vector<8x8xf32>
    %57 = tpu.matmul %52, %54, %cst_49 {dimension_numbers = #tpu.dot_dimension_numbers<[1], [1], [0], [0], [0, 0, 1, 0], [], []>} : vector<8x16xbf16>, vector<8x16xbf16>, vector<8x8xf32> -> vector<8x8xf32>
    %58 = vector.shape_cast %18 : vector<1x8x8xf32> to vector<8x8xf32>
    %59 = arith.addf %57, %58 : vector<8x8xf32>
    %cst_50 = arith.constant dense<0xFF800000> : vector<8xf32>
    %60 = vector.multi_reduction <maximumf>, %59, %cst_50 [1] : vector<8x8xf32> to vector<8xf32>
    %61 = vector.shape_cast %60 : vector<8xf32> to vector<8x1xf32>
    %62 = vector.broadcast %61 : vector<8x1xf32> to vector<8x8xf32>
    %63 = arith.subf %59, %62 : vector<8x8xf32>
    %64 = math.exp %63 : vector<8x8xf32>
    %cst_51 = arith.constant dense<0.000000e+00> : vector<8xf32>
    %65 = vector.multi_reduction <add>, %64, %cst_51 [1] : vector<8x8xf32> to vector<8xf32>
    %66 = vector.shape_cast %65 : vector<8xf32> to vector<8x1xf32>
    %67 = tpu.reciprocal %66 {approx = true} : vector<8x1xf32> -> vector<8x1xf32>
    %68 = vector.broadcast %67 : vector<8x1xf32> to vector<8x8xf32>
    %69 = arith.mulf %64, %68 : vector<8x8xf32>
    %70 = arith.truncf %69 : vector<8x8xf32> to vector<8x8xbf16>
    %cst_52 = arith.constant dense<0.000000e+00> : vector<8x16xf32>
    %71 = tpu.matmul %70, %56, %cst_52 {dimension_numbers = #tpu.dot_dimension_numbers<[1], [0], [0], [1], [0, 0, 1, 1], [], []>} : vector<8x8xbf16>, vector<8x16xbf16>, vector<8x16xf32> -> vector<8x16xf32>
    %72 = vector.extract_strided_slice %48 {offsets = [8, 0], sizes = [8, 16], strides = [1, 1]} : vector<16x16xf32> to vector<8x16xf32>
    %73 = arith.truncf %72 : vector<8x16xf32> to vector<8x16xbf16>
    %74 = vector.extract_strided_slice %49 {offsets = [8, 0], sizes = [8, 16], strides = [1, 1]} : vector<16x16xf32> to vector<8x16xf32>
    %75 = arith.truncf %74 : vector<8x16xf32> to vector<8x16xbf16>
    %76 = vector.extract_strided_slice %50 {offsets = [8, 0], sizes = [8, 16], strides = [1, 1]} : vector<16x16xf32> to vector<8x16xf32>
    %77 = arith.truncf %76 : vector<8x16xf32> to vector<8x16xbf16>
    %cst_53 = arith.constant dense<0.000000e+00> : vector<8x8xf32>
    %78 = tpu.matmul %73, %75, %cst_53 {dimension_numbers = #tpu.dot_dimension_numbers<[1], [1], [0], [0], [0, 0, 1, 0], [], []>} : vector<8x16xbf16>, vector<8x16xbf16>, vector<8x8xf32> -> vector<8x8xf32>
    %79 = vector.shape_cast %18 : vector<1x8x8xf32> to vector<8x8xf32>
    %80 = arith.addf %78, %79 : vector<8x8xf32>
    %cst_54 = arith.constant dense<0xFF800000> : vector<8xf32>
    %81 = vector.multi_reduction <maximumf>, %80, %cst_54 [1] : vector<8x8xf32> to vector<8xf32>
    %82 = vector.shape_cast %81 : vector<8xf32> to vector<8x1xf32>
    %83 = vector.broadcast %82 : vector<8x1xf32> to vector<8x8xf32>
    %84 = arith.subf %80, %83 : vector<8x8xf32>
    %85 = math.exp %84 : vector<8x8xf32>
    %cst_55 = arith.constant dense<0.000000e+00> : vector<8xf32>
    %86 = vector.multi_reduction <add>, %85, %cst_55 [1] : vector<8x8xf32> to vector<8xf32>
    %87 = vector.shape_cast %86 : vector<8xf32> to vector<8x1xf32>
    %88 = tpu.reciprocal %87 {approx = true} : vector<8x1xf32> -> vector<8x1xf32>
    %89 = vector.broadcast %88 : vector<8x1xf32> to vector<8x8xf32>
    %90 = arith.mulf %85, %89 : vector<8x8xf32>
    %91 = arith.truncf %90 : vector<8x8xf32> to vector<8x8xbf16>
    %cst_56 = arith.constant dense<0.000000e+00> : vector<8x16xf32>
    %92 = tpu.matmul %91, %77, %cst_56 {dimension_numbers = #tpu.dot_dimension_numbers<[1], [0], [0], [1], [0, 0, 1, 1], [], []>} : vector<8x8xbf16>, vector<8x16xbf16>, vector<8x16xf32> -> vector<8x16xf32>
    %93 = tpu.concatenate %71, %92 in 0 : vector<8x16xf32>, vector<8x16xf32> -> vector<16x16xf32>
    %94 = vector.extract_strided_slice %41 {offsets = [0, 16], sizes = [16, 16], strides = [1, 1]} : vector<16x32xf32> to vector<16x16xf32>
    %95 = vector.extract_strided_slice %44 {offsets = [0, 16], sizes = [16, 16], strides = [1, 1]} : vector<16x32xf32> to vector<16x16xf32>
    %96 = vector.extract_strided_slice %47 {offsets = [0, 16], sizes = [16, 16], strides = [1, 1]} : vector<16x32xf32> to vector<16x16xf32>
    %97 = vector.extract_strided_slice %94 {offsets = [0, 0], sizes = [8, 16], strides = [1, 1]} : vector<16x16xf32> to vector<8x16xf32>
    %98 = arith.truncf %97 : vector<8x16xf32> to vector<8x16xbf16>
    %99 = vector.extract_strided_slice %95 {offsets = [0, 0], sizes = [8, 16], strides = [1, 1]} : vector<16x16xf32> to vector<8x16xf32>
    %100 = arith.truncf %99 : vector<8x16xf32> to vector<8x16xbf16>
    %101 = vector.extract_strided_slice %96 {offsets = [0, 0], sizes = [8, 16], strides = [1, 1]} : vector<16x16xf32> to vector<8x16xf32>
    %102 = arith.truncf %101 : vector<8x16xf32> to vector<8x16xbf16>
    %cst_57 = arith.constant dense<0.000000e+00> : vector<8x8xf32>
    %103 = tpu.matmul %98, %100, %cst_57 {dimension_numbers = #tpu.dot_dimension_numbers<[1], [1], [0], [0], [0, 0, 1, 0], [], []>} : vector<8x16xbf16>, vector<8x16xbf16>, vector<8x8xf32> -> vector<8x8xf32>
    %104 = vector.shape_cast %18 : vector<1x8x8xf32> to vector<8x8xf32>
    %105 = arith.addf %103, %104 : vector<8x8xf32>
    %cst_58 = arith.constant dense<0xFF800000> : vector<8xf32>
    %106 = vector.multi_reduction <maximumf>, %105, %cst_58 [1] : vector<8x8xf32> to vector<8xf32>
    %107 = vector.shape_cast %106 : vector<8xf32> to vector<8x1xf32>
    %108 = vector.broadcast %107 : vector<8x1xf32> to vector<8x8xf32>
    %109 = arith.subf %105, %108 : vector<8x8xf32>
    %110 = math.exp %109 : vector<8x8xf32>
    %cst_59 = arith.constant dense<0.000000e+00> : vector<8xf32>
    %111 = vector.multi_reduction <add>, %110, %cst_59 [1] : vector<8x8xf32> to vector<8xf32>
    %112 = vector.shape_cast %111 : vector<8xf32> to vector<8x1xf32>
    %113 = tpu.reciprocal %112 {approx = true} : vector<8x1xf32> -> vector<8x1xf32>
    %114 = vector.broadcast %113 : vector<8x1xf32> to vector<8x8xf32>
    %115 = arith.mulf %110, %114 : vector<8x8xf32>
    %116 = arith.truncf %115 : vector<8x8xf32> to vector<8x8xbf16>
    %cst_60 = arith.constant dense<0.000000e+00> : vector<8x16xf32>
    %117 = tpu.matmul %116, %102, %cst_60 {dimension_numbers = #tpu.dot_dimension_numbers<[1], [0], [0], [1], [0, 0, 1, 1], [], []>} : vector<8x8xbf16>, vector<8x16xbf16>, vector<8x16xf32> -> vector<8x16xf32>
    %118 = vector.extract_strided_slice %94 {offsets = [8, 0], sizes = [8, 16], strides = [1, 1]} : vector<16x16xf32> to vector<8x16xf32>
    %119 = arith.truncf %118 : vector<8x16xf32> to vector<8x16xbf16>
    %120 = vector.extract_strided_slice %95 {offsets = [8, 0], sizes = [8, 16], strides = [1, 1]} : vector<16x16xf32> to vector<8x16xf32>
    %121 = arith.truncf %120 : vector<8x16xf32> to vector<8x16xbf16>
    %122 = vector.extract_strided_slice %96 {offsets = [8, 0], sizes = [8, 16], strides = [1, 1]} : vector<16x16xf32> to vector<8x16xf32>
    %123 = arith.truncf %122 : vector<8x16xf32> to vector<8x16xbf16>
    %cst_61 = arith.constant dense<0.000000e+00> : vector<8x8xf32>
    %124 = tpu.matmul %119, %121, %cst_61 {dimension_numbers = #tpu.dot_dimension_numbers<[1], [1], [0], [0], [0, 0, 1, 0], [], []>} : vector<8x16xbf16>, vector<8x16xbf16>, vector<8x8xf32> -> vector<8x8xf32>
    %125 = vector.shape_cast %18 : vector<1x8x8xf32> to vector<8x8xf32>
    %126 = arith.addf %124, %125 : vector<8x8xf32>
    %cst_62 = arith.constant dense<0xFF800000> : vector<8xf32>
    %127 = vector.multi_reduction <maximumf>, %126, %cst_62 [1] : vector<8x8xf32> to vector<8xf32>
    %128 = vector.shape_cast %127 : vector<8xf32> to vector<8x1xf32>
    %129 = vector.broadcast %128 : vector<8x1xf32> to vector<8x8xf32>
    %130 = arith.subf %126, %129 : vector<8x8xf32>
    %131 = math.exp %130 : vector<8x8xf32>
    %cst_63 = arith.constant dense<0.000000e+00> : vector<8xf32>
    %132 = vector.multi_reduction <add>, %131, %cst_63 [1] : vector<8x8xf32> to vector<8xf32>
    %133 = vector.shape_cast %132 : vector<8xf32> to vector<8x1xf32>
    %134 = tpu.reciprocal %133 {approx = true} : vector<8x1xf32> -> vector<8x1xf32>
    %135 = vector.broadcast %134 : vector<8x1xf32> to vector<8x8xf32>
    %136 = arith.mulf %131, %135 : vector<8x8xf32>
    %137 = arith.truncf %136 : vector<8x8xf32> to vector<8x8xbf16>
    %cst_64 = arith.constant dense<0.000000e+00> : vector<8x16xf32>
    %138 = tpu.matmul %137, %123, %cst_64 {dimension_numbers = #tpu.dot_dimension_numbers<[1], [0], [0], [1], [0, 0, 1, 1], [], []>} : vector<8x8xbf16>, vector<8x16xbf16>, vector<8x16xf32> -> vector<8x16xf32>
    %139 = tpu.concatenate %117, %138 in 0 : vector<8x16xf32>, vector<8x16xf32> -> vector<16x16xf32>
    %140 = tpu.concatenate %93, %139 in 1 : vector<16x16xf32>, vector<16x16xf32> -> vector<16x32xf32>
    %141 = arith.truncf %140 : vector<16x32xf32> to vector<16x32xbf16>
    %cst_65 = arith.constant dense<0.000000e+00> : vector<16x32xf32>
    %142 = tpu.matmul %141, %31, %cst_65 {dimension_numbers = #tpu.dot_dimension_numbers<[1], [0], [0], [1], [0, 0, 1, 1], [], []>} : vector<16x32xbf16>, vector<32x32xbf16>, vector<16x32xf32> -> vector<16x32xf32>
    %143 = vector.broadcast %32 : vector<1x32xf32> to vector<16x32xf32>
    %144 = arith.addf %142, %143 : vector<16x32xf32>
    %145 = arith.addf %144, %4 : vector<16x32xf32>
    %cst_66 = arith.constant dense<0.000000e+00> : vector<16xf32>
    %146 = vector.multi_reduction <add>, %145, %cst_66 [1] : vector<16x32xf32> to vector<16xf32>
    %147 = vector.shape_cast %146 : vector<16xf32> to vector<16x1xf32>
    %cst_67 = arith.constant 3.200000e+01 : f32
    %148 = vector.broadcast %cst_67 : f32 to vector<16x1xf32>
    %149 = arith.divf %147, %148 : vector<16x1xf32>
    %150 = vector.broadcast %149 : vector<16x1xf32> to vector<16x32xf32>
    %151 = arith.subf %145, %150 : vector<16x32xf32>
    %152 = arith.mulf %151, %151 : vector<16x32xf32>
    %cst_68 = arith.constant dense<0.000000e+00> : vector<16xf32>
    %153 = vector.multi_reduction <add>, %152, %cst_68 [1] : vector<16x32xf32> to vector<16xf32>
    %154 = vector.shape_cast %153 : vector<16xf32> to vector<16x1xf32>
    %cst_69 = arith.constant 3.200000e+01 : f32
    %155 = vector.broadcast %cst_69 : f32 to vector<16x1xf32>
    %156 = arith.divf %154, %155 : vector<16x1xf32>
    %157 = vector.broadcast %149 : vector<16x1xf32> to vector<16x32xf32>
    %158 = arith.subf %145, %157 : vector<16x32xf32>
    %cst_70 = arith.constant 9.99999974E-6 : f32
    %159 = vector.broadcast %cst_70 : f32 to vector<16x1xf32>
    %160 = arith.addf %156, %159 : vector<16x1xf32>
    %161 = math.rsqrt %160 : vector<16x1xf32>
    %162 = vector.broadcast %161 : vector<16x1xf32> to vector<16x32xf32>
    %163 = arith.mulf %158, %162 : vector<16x32xf32>
    %164 = vector.broadcast %33 : vector<1x32xf32> to vector<16x32xf32>
    %165 = arith.mulf %163, %164 : vector<16x32xf32>
    %166 = vector.broadcast %34 : vector<1x32xf32> to vector<16x32xf32>
    %167 = arith.addf %165, %166 : vector<16x32xf32>
    %168 = vector.broadcast %12 : vector<16x1xf32> to vector<16x32xf32>
    %169 = arith.mulf %167, %168 : vector<16x32xf32>
    %c0_71 = arith.constant 0 : index
    %c0_72 = arith.constant 0 : index
    %170 = vector.load %arg18[%c0_71, %c0_72] : memref<32x32xbf16, #tpu.memory_space<vmem>>, vector<32x32xbf16>
    %c0_73 = arith.constant 0 : index
    %c0_74 = arith.constant 0 : index
    %171 = vector.load %arg19[%c0_73, %c0_74] : memref<1x32xf32, #tpu.memory_space<vmem>>, vector<1x32xf32>
    %c0_75 = arith.constant 0 : index
    %c0_76 = arith.constant 0 : index
    %172 = vector.load %arg20[%c0_75, %c0_76] : memref<32x32xbf16, #tpu.memory_space<vmem>>, vector<32x32xbf16>
    %c0_77 = arith.constant 0 : index
    %c0_78 = arith.constant 0 : index
    %173 = vector.load %arg21[%c0_77, %c0_78] : memref<1x32xf32, #tpu.memory_space<vmem>>, vector<1x32xf32>
    %c0_79 = arith.constant 0 : index
    %c0_80 = arith.constant 0 : index
    %174 = vector.load %arg22[%c0_79, %c0_80] : memref<32x32xbf16, #tpu.memory_space<vmem>>, vector<32x32xbf16>
    %c0_81 = arith.constant 0 : index
    %c0_82 = arith.constant 0 : index
    %175 = vector.load %arg23[%c0_81, %c0_82] : memref<1x32xf32, #tpu.memory_space<vmem>>, vector<1x32xf32>
    %c0_83 = arith.constant 0 : index
    %c0_84 = arith.constant 0 : index
    %176 = vector.load %arg24[%c0_83, %c0_84] : memref<32x32xbf16, #tpu.memory_space<vmem>>, vector<32x32xbf16>
    %c0_85 = arith.constant 0 : index
    %c0_86 = arith.constant 0 : index
    %177 = vector.load %arg25[%c0_85, %c0_86] : memref<1x32xf32, #tpu.memory_space<vmem>>, vector<1x32xf32>
    %c0_87 = arith.constant 0 : index
    %c0_88 = arith.constant 0 : index
    %178 = vector.load %arg26[%c0_87, %c0_88] : memref<1x32xf32, #tpu.memory_space<vmem>>, vector<1x32xf32>
    %c0_89 = arith.constant 0 : index
    %c0_90 = arith.constant 0 : index
    %179 = vector.load %arg27[%c0_89, %c0_90] : memref<1x32xf32, #tpu.memory_space<vmem>>, vector<1x32xf32>
    %180 = arith.truncf %169 : vector<16x32xf32> to vector<16x32xbf16>
    %181 = arith.truncf %9 : vector<16x32xf32> to vector<16x32xbf16>
    %cst_91 = arith.constant dense<0.000000e+00> : vector<16x32xf32>
    %182 = tpu.matmul %180, %170, %cst_91 {dimension_numbers = #tpu.dot_dimension_numbers<[1], [0], [0], [1], [0, 0, 1, 1], [], []>} : vector<16x32xbf16>, vector<32x32xbf16>, vector<16x32xf32> -> vector<16x32xf32>
    %183 = vector.broadcast %171 : vector<1x32xf32> to vector<16x32xf32>
    %184 = arith.addf %182, %183 : vector<16x32xf32>
    %cst_92 = arith.constant 2.500000e-01 : f32
    %185 = vector.broadcast %cst_92 : f32 to vector<16x32xf32>
    %186 = arith.mulf %184, %185 : vector<16x32xf32>
    %cst_93 = arith.constant dense<0.000000e+00> : vector<16x32xf32>
    %187 = tpu.matmul %181, %172, %cst_93 {dimension_numbers = #tpu.dot_dimension_numbers<[1], [0], [0], [1], [0, 0, 1, 1], [], []>} : vector<16x32xbf16>, vector<32x32xbf16>, vector<16x32xf32> -> vector<16x32xf32>
    %188 = vector.broadcast %173 : vector<1x32xf32> to vector<16x32xf32>
    %189 = arith.addf %187, %188 : vector<16x32xf32>
    %cst_94 = arith.constant dense<0.000000e+00> : vector<16x32xf32>
    %190 = tpu.matmul %181, %174, %cst_94 {dimension_numbers = #tpu.dot_dimension_numbers<[1], [0], [0], [1], [0, 0, 1, 1], [], []>} : vector<16x32xbf16>, vector<32x32xbf16>, vector<16x32xf32> -> vector<16x32xf32>
    %191 = vector.broadcast %175 : vector<1x32xf32> to vector<16x32xf32>
    %192 = arith.addf %190, %191 : vector<16x32xf32>
    %193 = vector.extract_strided_slice %186 {offsets = [0, 0], sizes = [16, 16], strides = [1, 1]} : vector<16x32xf32> to vector<16x16xf32>
    %194 = vector.extract_strided_slice %189 {offsets = [0, 0], sizes = [16, 16], strides = [1, 1]} : vector<16x32xf32> to vector<16x16xf32>
    %195 = vector.extract_strided_slice %192 {offsets = [0, 0], sizes = [16, 16], strides = [1, 1]} : vector<16x32xf32> to vector<16x16xf32>
    %196 = vector.extract_strided_slice %193 {offsets = [0, 0], sizes = [8, 16], strides = [1, 1]} : vector<16x16xf32> to vector<8x16xf32>
    %197 = arith.truncf %196 : vector<8x16xf32> to vector<8x16xbf16>
    %198 = vector.extract_strided_slice %194 {offsets = [0, 0], sizes = [8, 16], strides = [1, 1]} : vector<16x16xf32> to vector<8x16xf32>
    %199 = arith.truncf %198 : vector<8x16xf32> to vector<8x16xbf16>
    %200 = vector.extract_strided_slice %195 {offsets = [0, 0], sizes = [8, 16], strides = [1, 1]} : vector<16x16xf32> to vector<8x16xf32>
    %201 = arith.truncf %200 : vector<8x16xf32> to vector<8x16xbf16>
    %cst_95 = arith.constant dense<0.000000e+00> : vector<8x8xf32>
    %202 = tpu.matmul %197, %199, %cst_95 {dimension_numbers = #tpu.dot_dimension_numbers<[1], [1], [0], [0], [0, 0, 1, 0], [], []>} : vector<8x16xbf16>, vector<8x16xbf16>, vector<8x8xf32> -> vector<8x8xf32>
    %203 = vector.shape_cast %24 : vector<1x8x8xf32> to vector<8x8xf32>
    %204 = arith.addf %202, %203 : vector<8x8xf32>
    %cst_96 = arith.constant dense<0xFF800000> : vector<8xf32>
    %205 = vector.multi_reduction <maximumf>, %204, %cst_96 [1] : vector<8x8xf32> to vector<8xf32>
    %206 = vector.shape_cast %205 : vector<8xf32> to vector<8x1xf32>
    %207 = vector.broadcast %206 : vector<8x1xf32> to vector<8x8xf32>
    %208 = arith.subf %204, %207 : vector<8x8xf32>
    %209 = math.exp %208 : vector<8x8xf32>
    %cst_97 = arith.constant dense<0.000000e+00> : vector<8xf32>
    %210 = vector.multi_reduction <add>, %209, %cst_97 [1] : vector<8x8xf32> to vector<8xf32>
    %211 = vector.shape_cast %210 : vector<8xf32> to vector<8x1xf32>
    %212 = tpu.reciprocal %211 {approx = true} : vector<8x1xf32> -> vector<8x1xf32>
    %213 = vector.broadcast %212 : vector<8x1xf32> to vector<8x8xf32>
    %214 = arith.mulf %209, %213 : vector<8x8xf32>
    %215 = arith.truncf %214 : vector<8x8xf32> to vector<8x8xbf16>
    %cst_98 = arith.constant dense<0.000000e+00> : vector<8x16xf32>
    %216 = tpu.matmul %215, %201, %cst_98 {dimension_numbers = #tpu.dot_dimension_numbers<[1], [0], [0], [1], [0, 0, 1, 1], [], []>} : vector<8x8xbf16>, vector<8x16xbf16>, vector<8x16xf32> -> vector<8x16xf32>
    %217 = vector.extract_strided_slice %193 {offsets = [8, 0], sizes = [8, 16], strides = [1, 1]} : vector<16x16xf32> to vector<8x16xf32>
    %218 = arith.truncf %217 : vector<8x16xf32> to vector<8x16xbf16>
    %219 = vector.extract_strided_slice %194 {offsets = [8, 0], sizes = [8, 16], strides = [1, 1]} : vector<16x16xf32> to vector<8x16xf32>
    %220 = arith.truncf %219 : vector<8x16xf32> to vector<8x16xbf16>
    %221 = vector.extract_strided_slice %195 {offsets = [8, 0], sizes = [8, 16], strides = [1, 1]} : vector<16x16xf32> to vector<8x16xf32>
    %222 = arith.truncf %221 : vector<8x16xf32> to vector<8x16xbf16>
    %cst_99 = arith.constant dense<0.000000e+00> : vector<8x8xf32>
    %223 = tpu.matmul %218, %220, %cst_99 {dimension_numbers = #tpu.dot_dimension_numbers<[1], [1], [0], [0], [0, 0, 1, 0], [], []>} : vector<8x16xbf16>, vector<8x16xbf16>, vector<8x8xf32> -> vector<8x8xf32>
    %224 = vector.shape_cast %24 : vector<1x8x8xf32> to vector<8x8xf32>
    %225 = arith.addf %223, %224 : vector<8x8xf32>
    %cst_100 = arith.constant dense<0xFF800000> : vector<8xf32>
    %226 = vector.multi_reduction <maximumf>, %225, %cst_100 [1] : vector<8x8xf32> to vector<8xf32>
    %227 = vector.shape_cast %226 : vector<8xf32> to vector<8x1xf32>
    %228 = vector.broadcast %227 : vector<8x1xf32> to vector<8x8xf32>
    %229 = arith.subf %225, %228 : vector<8x8xf32>
    %230 = math.exp %229 : vector<8x8xf32>
    %cst_101 = arith.constant dense<0.000000e+00> : vector<8xf32>
    %231 = vector.multi_reduction <add>, %230, %cst_101 [1] : vector<8x8xf32> to vector<8xf32>
    %232 = vector.shape_cast %231 : vector<8xf32> to vector<8x1xf32>
    %233 = tpu.reciprocal %232 {approx = true} : vector<8x1xf32> -> vector<8x1xf32>
    %234 = vector.broadcast %233 : vector<8x1xf32> to vector<8x8xf32>
    %235 = arith.mulf %230, %234 : vector<8x8xf32>
    %236 = arith.truncf %235 : vector<8x8xf32> to vector<8x8xbf16>
    %cst_102 = arith.constant dense<0.000000e+00> : vector<8x16xf32>
    %237 = tpu.matmul %236, %222, %cst_102 {dimension_numbers = #tpu.dot_dimension_numbers<[1], [0], [0], [1], [0, 0, 1, 1], [], []>} : vector<8x8xbf16>, vector<8x16xbf16>, vector<8x16xf32> -> vector<8x16xf32>
    %238 = tpu.concatenate %216, %237 in 0 : vector<8x16xf32>, vector<8x16xf32> -> vector<16x16xf32>
    %239 = vector.extract_strided_slice %186 {offsets = [0, 16], sizes = [16, 16], strides = [1, 1]} : vector<16x32xf32> to vector<16x16xf32>
    %240 = vector.extract_strided_slice %189 {offsets = [0, 16], sizes = [16, 16], strides = [1, 1]} : vector<16x32xf32> to vector<16x16xf32>
    %241 = vector.extract_strided_slice %192 {offsets = [0, 16], sizes = [16, 16], strides = [1, 1]} : vector<16x32xf32> to vector<16x16xf32>
    %242 = vector.extract_strided_slice %239 {offsets = [0, 0], sizes = [8, 16], strides = [1, 1]} : vector<16x16xf32> to vector<8x16xf32>
    %243 = arith.truncf %242 : vector<8x16xf32> to vector<8x16xbf16>
    %244 = vector.extract_strided_slice %240 {offsets = [0, 0], sizes = [8, 16], strides = [1, 1]} : vector<16x16xf32> to vector<8x16xf32>
    %245 = arith.truncf %244 : vector<8x16xf32> to vector<8x16xbf16>
    %246 = vector.extract_strided_slice %241 {offsets = [0, 0], sizes = [8, 16], strides = [1, 1]} : vector<16x16xf32> to vector<8x16xf32>
    %247 = arith.truncf %246 : vector<8x16xf32> to vector<8x16xbf16>
    %cst_103 = arith.constant dense<0.000000e+00> : vector<8x8xf32>
    %248 = tpu.matmul %243, %245, %cst_103 {dimension_numbers = #tpu.dot_dimension_numbers<[1], [1], [0], [0], [0, 0, 1, 0], [], []>} : vector<8x16xbf16>, vector<8x16xbf16>, vector<8x8xf32> -> vector<8x8xf32>
    %249 = vector.shape_cast %24 : vector<1x8x8xf32> to vector<8x8xf32>
    %250 = arith.addf %248, %249 : vector<8x8xf32>
    %cst_104 = arith.constant dense<0xFF800000> : vector<8xf32>
    %251 = vector.multi_reduction <maximumf>, %250, %cst_104 [1] : vector<8x8xf32> to vector<8xf32>
    %252 = vector.shape_cast %251 : vector<8xf32> to vector<8x1xf32>
    %253 = vector.broadcast %252 : vector<8x1xf32> to vector<8x8xf32>
    %254 = arith.subf %250, %253 : vector<8x8xf32>
    %255 = math.exp %254 : vector<8x8xf32>
    %cst_105 = arith.constant dense<0.000000e+00> : vector<8xf32>
    %256 = vector.multi_reduction <add>, %255, %cst_105 [1] : vector<8x8xf32> to vector<8xf32>
    %257 = vector.shape_cast %256 : vector<8xf32> to vector<8x1xf32>
    %258 = tpu.reciprocal %257 {approx = true} : vector<8x1xf32> -> vector<8x1xf32>
    %259 = vector.broadcast %258 : vector<8x1xf32> to vector<8x8xf32>
    %260 = arith.mulf %255, %259 : vector<8x8xf32>
    %261 = arith.truncf %260 : vector<8x8xf32> to vector<8x8xbf16>
    %cst_106 = arith.constant dense<0.000000e+00> : vector<8x16xf32>
    %262 = tpu.matmul %261, %247, %cst_106 {dimension_numbers = #tpu.dot_dimension_numbers<[1], [0], [0], [1], [0, 0, 1, 1], [], []>} : vector<8x8xbf16>, vector<8x16xbf16>, vector<8x16xf32> -> vector<8x16xf32>
    %263 = vector.extract_strided_slice %239 {offsets = [8, 0], sizes = [8, 16], strides = [1, 1]} : vector<16x16xf32> to vector<8x16xf32>
    %264 = arith.truncf %263 : vector<8x16xf32> to vector<8x16xbf16>
    %265 = vector.extract_strided_slice %240 {offsets = [8, 0], sizes = [8, 16], strides = [1, 1]} : vector<16x16xf32> to vector<8x16xf32>
    %266 = arith.truncf %265 : vector<8x16xf32> to vector<8x16xbf16>
    %267 = vector.extract_strided_slice %241 {offsets = [8, 0], sizes = [8, 16], strides = [1, 1]} : vector<16x16xf32> to vector<8x16xf32>
    %268 = arith.truncf %267 : vector<8x16xf32> to vector<8x16xbf16>
    %cst_107 = arith.constant dense<0.000000e+00> : vector<8x8xf32>
    %269 = tpu.matmul %264, %266, %cst_107 {dimension_numbers = #tpu.dot_dimension_numbers<[1], [1], [0], [0], [0, 0, 1, 0], [], []>} : vector<8x16xbf16>, vector<8x16xbf16>, vector<8x8xf32> -> vector<8x8xf32>
    %270 = vector.shape_cast %24 : vector<1x8x8xf32> to vector<8x8xf32>
    %271 = arith.addf %269, %270 : vector<8x8xf32>
    %cst_108 = arith.constant dense<0xFF800000> : vector<8xf32>
    %272 = vector.multi_reduction <maximumf>, %271, %cst_108 [1] : vector<8x8xf32> to vector<8xf32>
    %273 = vector.shape_cast %272 : vector<8xf32> to vector<8x1xf32>
    %274 = vector.broadcast %273 : vector<8x1xf32> to vector<8x8xf32>
    %275 = arith.subf %271, %274 : vector<8x8xf32>
    %276 = math.exp %275 : vector<8x8xf32>
    %cst_109 = arith.constant dense<0.000000e+00> : vector<8xf32>
    %277 = vector.multi_reduction <add>, %276, %cst_109 [1] : vector<8x8xf32> to vector<8xf32>
    %278 = vector.shape_cast %277 : vector<8xf32> to vector<8x1xf32>
    %279 = tpu.reciprocal %278 {approx = true} : vector<8x1xf32> -> vector<8x1xf32>
    %280 = vector.broadcast %279 : vector<8x1xf32> to vector<8x8xf32>
    %281 = arith.mulf %276, %280 : vector<8x8xf32>
    %282 = arith.truncf %281 : vector<8x8xf32> to vector<8x8xbf16>
    %cst_110 = arith.constant dense<0.000000e+00> : vector<8x16xf32>
    %283 = tpu.matmul %282, %268, %cst_110 {dimension_numbers = #tpu.dot_dimension_numbers<[1], [0], [0], [1], [0, 0, 1, 1], [], []>} : vector<8x8xbf16>, vector<8x16xbf16>, vector<8x16xf32> -> vector<8x16xf32>
    %284 = tpu.concatenate %262, %283 in 0 : vector<8x16xf32>, vector<8x16xf32> -> vector<16x16xf32>
    %285 = tpu.concatenate %238, %284 in 1 : vector<16x16xf32>, vector<16x16xf32> -> vector<16x32xf32>
    %286 = arith.truncf %285 : vector<16x32xf32> to vector<16x32xbf16>
    %cst_111 = arith.constant dense<0.000000e+00> : vector<16x32xf32>
    %287 = tpu.matmul %286, %176, %cst_111 {dimension_numbers = #tpu.dot_dimension_numbers<[1], [0], [0], [1], [0, 0, 1, 1], [], []>} : vector<16x32xbf16>, vector<32x32xbf16>, vector<16x32xf32> -> vector<16x32xf32>
    %288 = vector.broadcast %177 : vector<1x32xf32> to vector<16x32xf32>
    %289 = arith.addf %287, %288 : vector<16x32xf32>
    %290 = arith.addf %289, %169 : vector<16x32xf32>
    %cst_112 = arith.constant dense<0.000000e+00> : vector<16xf32>
    %291 = vector.multi_reduction <add>, %290, %cst_112 [1] : vector<16x32xf32> to vector<16xf32>
    %292 = vector.shape_cast %291 : vector<16xf32> to vector<16x1xf32>
    %cst_113 = arith.constant 3.200000e+01 : f32
    %293 = vector.broadcast %cst_113 : f32 to vector<16x1xf32>
    %294 = arith.divf %292, %293 : vector<16x1xf32>
    %295 = vector.broadcast %294 : vector<16x1xf32> to vector<16x32xf32>
    %296 = arith.subf %290, %295 : vector<16x32xf32>
    %297 = arith.mulf %296, %296 : vector<16x32xf32>
    %cst_114 = arith.constant dense<0.000000e+00> : vector<16xf32>
    %298 = vector.multi_reduction <add>, %297, %cst_114 [1] : vector<16x32xf32> to vector<16xf32>
    %299 = vector.shape_cast %298 : vector<16xf32> to vector<16x1xf32>
    %cst_115 = arith.constant 3.200000e+01 : f32
    %300 = vector.broadcast %cst_115 : f32 to vector<16x1xf32>
    %301 = arith.divf %299, %300 : vector<16x1xf32>
    %302 = vector.broadcast %294 : vector<16x1xf32> to vector<16x32xf32>
    %303 = arith.subf %290, %302 : vector<16x32xf32>
    %cst_116 = arith.constant 9.99999974E-6 : f32
    %304 = vector.broadcast %cst_116 : f32 to vector<16x1xf32>
    %305 = arith.addf %301, %304 : vector<16x1xf32>
    %306 = math.rsqrt %305 : vector<16x1xf32>
    %307 = vector.broadcast %306 : vector<16x1xf32> to vector<16x32xf32>
    %308 = arith.mulf %303, %307 : vector<16x32xf32>
    %309 = vector.broadcast %178 : vector<1x32xf32> to vector<16x32xf32>
    %310 = arith.mulf %308, %309 : vector<16x32xf32>
    %311 = vector.broadcast %179 : vector<1x32xf32> to vector<16x32xf32>
    %312 = arith.addf %310, %311 : vector<16x32xf32>
    %313 = vector.broadcast %12 : vector<16x1xf32> to vector<16x32xf32>
    %314 = arith.mulf %312, %313 : vector<16x32xf32>
    %c0_117 = arith.constant 0 : index
    %c0_118 = arith.constant 0 : index
    %315 = vector.load %arg28[%c0_117, %c0_118] : memref<32x64xbf16, #tpu.memory_space<vmem>>, vector<32x64xbf16>
    %c0_119 = arith.constant 0 : index
    %c0_120 = arith.constant 0 : index
    %316 = vector.load %arg29[%c0_119, %c0_120] : memref<1x64xf32, #tpu.memory_space<vmem>>, vector<1x64xf32>
    %c0_121 = arith.constant 0 : index
    %c0_122 = arith.constant 0 : index
    %317 = vector.load %arg30[%c0_121, %c0_122] : memref<64x32xbf16, #tpu.memory_space<vmem>>, vector<64x32xbf16>
    %c0_123 = arith.constant 0 : index
    %c0_124 = arith.constant 0 : index
    %318 = vector.load %arg31[%c0_123, %c0_124] : memref<1x32xf32, #tpu.memory_space<vmem>>, vector<1x32xf32>
    %c0_125 = arith.constant 0 : index
    %c0_126 = arith.constant 0 : index
    %319 = vector.load %arg32[%c0_125, %c0_126] : memref<1x32xf32, #tpu.memory_space<vmem>>, vector<1x32xf32>
    %c0_127 = arith.constant 0 : index
    %c0_128 = arith.constant 0 : index
    %320 = vector.load %arg33[%c0_127, %c0_128] : memref<1x32xf32, #tpu.memory_space<vmem>>, vector<1x32xf32>
    %321 = arith.truncf %314 : vector<16x32xf32> to vector<16x32xbf16>
    %cst_129 = arith.constant dense<0.000000e+00> : vector<16x64xf32>
    %322 = tpu.matmul %321, %315, %cst_129 {dimension_numbers = #tpu.dot_dimension_numbers<[1], [0], [0], [1], [0, 0, 1, 1], [], []>} : vector<16x32xbf16>, vector<32x64xbf16>, vector<16x64xf32> -> vector<16x64xf32>
    %323 = vector.broadcast %316 : vector<1x64xf32> to vector<16x64xf32>
    %324 = arith.addf %322, %323 : vector<16x64xf32>
    %cst_130 = arith.constant 0.000000e+00 : f32
    %325 = vector.broadcast %cst_130 : f32 to vector<16x64xf32>
    %326 = arith.maximumf %324, %325 : vector<16x64xf32>
    %327 = arith.truncf %326 : vector<16x64xf32> to vector<16x64xbf16>
    %cst_131 = arith.constant dense<0.000000e+00> : vector<16x32xf32>
    %328 = tpu.matmul %327, %317, %cst_131 {dimension_numbers = #tpu.dot_dimension_numbers<[1], [0], [0], [1], [0, 0, 1, 1], [], []>} : vector<16x64xbf16>, vector<64x32xbf16>, vector<16x32xf32> -> vector<16x32xf32>
    %329 = vector.broadcast %318 : vector<1x32xf32> to vector<16x32xf32>
    %330 = arith.addf %328, %329 : vector<16x32xf32>
    %331 = arith.addf %330, %314 : vector<16x32xf32>
    %cst_132 = arith.constant dense<0.000000e+00> : vector<16xf32>
    %332 = vector.multi_reduction <add>, %331, %cst_132 [1] : vector<16x32xf32> to vector<16xf32>
    %333 = vector.shape_cast %332 : vector<16xf32> to vector<16x1xf32>
    %cst_133 = arith.constant 3.200000e+01 : f32
    %334 = vector.broadcast %cst_133 : f32 to vector<16x1xf32>
    %335 = arith.divf %333, %334 : vector<16x1xf32>
    %336 = vector.broadcast %335 : vector<16x1xf32> to vector<16x32xf32>
    %337 = arith.subf %331, %336 : vector<16x32xf32>
    %338 = arith.mulf %337, %337 : vector<16x32xf32>
    %cst_134 = arith.constant dense<0.000000e+00> : vector<16xf32>
    %339 = vector.multi_reduction <add>, %338, %cst_134 [1] : vector<16x32xf32> to vector<16xf32>
    %340 = vector.shape_cast %339 : vector<16xf32> to vector<16x1xf32>
    %cst_135 = arith.constant 3.200000e+01 : f32
    %341 = vector.broadcast %cst_135 : f32 to vector<16x1xf32>
    %342 = arith.divf %340, %341 : vector<16x1xf32>
    %343 = vector.broadcast %335 : vector<16x1xf32> to vector<16x32xf32>
    %344 = arith.subf %331, %343 : vector<16x32xf32>
    %cst_136 = arith.constant 9.99999974E-6 : f32
    %345 = vector.broadcast %cst_136 : f32 to vector<16x1xf32>
    %346 = arith.addf %342, %345 : vector<16x1xf32>
    %347 = math.rsqrt %346 : vector<16x1xf32>
    %348 = vector.broadcast %347 : vector<16x1xf32> to vector<16x32xf32>
    %349 = arith.mulf %344, %348 : vector<16x32xf32>
    %350 = vector.broadcast %319 : vector<1x32xf32> to vector<16x32xf32>
    %351 = arith.mulf %349, %350 : vector<16x32xf32>
    %352 = vector.broadcast %320 : vector<1x32xf32> to vector<16x32xf32>
    %353 = arith.addf %351, %352 : vector<16x32xf32>
    %354 = vector.broadcast %12 : vector<16x1xf32> to vector<16x32xf32>
    %355 = arith.mulf %353, %354 : vector<16x32xf32>
    %356 = vector.extract_strided_slice %355 {offsets = [0, 0], sizes = [8, 32], strides = [1, 1]} : vector<16x32xf32> to vector<8x32xf32>
    %357 = vector.extract_strided_slice %355 {offsets = [8, 0], sizes = [8, 32], strides = [1, 1]} : vector<16x32xf32> to vector<8x32xf32>
    %358 = arith.truncf %356 : vector<8x32xf32> to vector<8x32xbf16>
    %c0_137 = arith.constant 0 : index
    %c0_138 = arith.constant 0 : index
    %359 = vector.load %arg34[%c0_137, %c0_138] : memref<32x32xbf16, #tpu.memory_space<vmem>>, vector<32x32xbf16>
    %cst_139 = arith.constant dense<0.000000e+00> : vector<8x32xf32>
    %360 = tpu.matmul %358, %359, %cst_139 {dimension_numbers = #tpu.dot_dimension_numbers<[1], [0], [0], [1], [0, 0, 1, 1], [], []>} : vector<8x32xbf16>, vector<32x32xbf16>, vector<8x32xf32> -> vector<8x32xf32>
    %361 = arith.truncf %357 : vector<8x32xf32> to vector<8x32xbf16>
    %c0_140 = arith.constant 0 : index
    %c0_141 = arith.constant 0 : index
    %362 = vector.load %arg35[%c0_140, %c0_141] : memref<32x32xbf16, #tpu.memory_space<vmem>>, vector<32x32xbf16>
    %cst_142 = arith.constant dense<0.000000e+00> : vector<8x32xf32>
    %363 = tpu.matmul %361, %362, %cst_142 {dimension_numbers = #tpu.dot_dimension_numbers<[1], [0], [0], [1], [0, 0, 1, 1], [], []>} : vector<8x32xbf16>, vector<32x32xbf16>, vector<8x32xf32> -> vector<8x32xf32>
    %364 = arith.addf %360, %363 : vector<8x32xf32>
    %c0_143 = arith.constant 0 : index
    %c0_144 = arith.constant 0 : index
    %365 = vector.load %arg36[%c0_143, %c0_144] : memref<1x32xf32, #tpu.memory_space<vmem>>, vector<1x32xf32>
    %366 = vector.broadcast %365 : vector<1x32xf32> to vector<8x32xf32>
    %367 = arith.addf %364, %366 : vector<8x32xf32>
    %cst_145 = arith.constant 0.000000e+00 : f32
    %368 = vector.broadcast %cst_145 : f32 to vector<8x32xf32>
    %369 = arith.cmpf oge, %367, %368 : vector<8x32xf32>
    %cst_146 = arith.constant 1.250000e-01 : f32
    %370 = vector.broadcast %cst_146 : f32 to vector<8x32xf32>
    %371 = arith.mulf %370, %367 : vector<8x32xf32>
    %372 = arith.select %369, %367, %371 : vector<8x32xi1>, vector<8x32xf32>
    %373 = vector.shape_cast %372 : vector<8x32xf32> to vector<1x8x32xf32>
    %c0_147 = arith.constant 0 : index
    %c0_148 = arith.constant 0 : index
    %c0_149 = arith.constant 0 : index
    %374 = vector.load %arg37[%c0_147, %c0_148, %c0_149] : memref<1x8x32xf32, #tpu.memory_space<vmem>>, vector<1x8x32xf32>
    tpu.vector_store %arg37[%c0_147, %c0_148, %c0_149], %373 {strides = array<i32>} : memref<1x8x32xf32, #tpu.memory_space<vmem>>, vector<1x8x32xf32>,
    return
  }
  func.func @transform_0(%arg0: i32) -> (i32, i32, i32) {
    %c0_i32 = arith.constant 0 : i32
    %c0_i32_0 = arith.constant 0 : i32
    %c0_i32_1 = arith.constant 0 : i32
    return %arg0, %c0_i32, %c0_i32_0 : i32, i32, i32
  }
  func.func @transform_1(%arg0: i32) -> (i32, i32, i32) {
    %c0_i32 = arith.constant 0 : i32
    %c0_i32_0 = arith.constant 0 : i32
    %c0_i32_1 = arith.constant 0 : i32
    return %arg0, %c0_i32, %c0_i32_0 : i32, i32, i32
  }
  func.func @transform_2(%arg0: i32) -> (i32, i32, i32) {
    %c0_i32 = arith.constant 0 : i32
    %c0_i32_0 = arith.constant 0 : i32
    %c0_i32_1 = arith.constant 0 : i32
    return %arg0, %c0_i32, %c0_i32_0 : i32, i32, i32
  }
  func.func @transform_3(%arg0: i32) -> (i32, i32, i32) {
    %c0_i32 = arith.constant 0 : i32
    %c0_i32_0 = arith.constant 0 : i32
    %c0_i32_1 = arith.constant 0 : i32
    return %arg0, %c0_i32, %c0_i32_0 : i32, i32, i32
  }
  func.func @transform_4(%arg0: i32) -> (i32, i32, i32) {
    %c0_i32 = arith.constant 0 : i32
    %c0_i32_0 = arith.constant 0 : i32
    %c0_i32_1 = arith.constant 0 : i32
    return %arg0, %c0_i32, %c0_i32_0 : i32, i32, i32
  }
  func.func @transform_5(%arg0: i32) -> (i32, i32, i32) {
    %c0_i32 = arith.constant 0 : i32
    %c0_i32_0 = arith.constant 0 : i32
    %c0_i32_1 = arith.constant 0 : i32
    return %arg0, %c0_i32, %c0_i32_0 : i32, i32, i32
  }
  func.func @transform_6(%arg0: i32) -> (i32, i32, i32) {
    %c0_i32 = arith.constant 0 : i32
    %c0_i32_0 = arith.constant 0 : i32
    %c0_i32_1 = arith.constant 0 : i32
    return %arg0, %c0_i32, %c0_i32_0 : i32, i32, i32
  }
  func.func @transform_7(%arg0: i32) -> (i32, i32) {
    %c0_i32 = arith.constant 0 : i32
    %c0_i32_0 = arith.constant 0 : i32
    %c0_i32_1 = arith.constant 0 : i32
    return %c0_i32, %c0_i32_0 : i32, i32
  }
  func.func @transform_8(%arg0: i32) -> (i32, i32) {
    %c0_i32 = arith.constant 0 : i32
    %c0_i32_0 = arith.constant 0 : i32
    %c0_i32_1 = arith.constant 0 : i32
    return %c0_i32, %c0_i32_0 : i32, i32
  }
  func.func @transform_9(%arg0: i32) -> (i32, i32) {
    %c0_i32 = arith.constant 0 : i32
    %c0_i32_0 = arith.constant 0 : i32
    %c0_i32_1 = arith.constant 0 : i32
    return %c0_i32, %c0_i32_0 : i32, i32
  }
  func.func @transform_10(%arg0: i32) -> (i32, i32) {
    %c0_i32 = arith.constant 0 : i32
    %c0_i32_0 = arith.constant 0 : i32
    %c0_i32_1 = arith.constant 0 : i32
    return %c0_i32, %c0_i32_0 : i32, i32
  }
  func.func @transform_11(%arg0: i32) -> (i32, i32) {
    %c0_i32 = arith.constant 0 : i32
    %c0_i32_0 = arith.constant 0 : i32
    %c0_i32_1 = arith.constant 0 : i32
    return %c0_i32, %c0_i32_0 : i32, i32
  }
  func.func @transform_12(%arg0: i32) -> (i32, i32) {
    %c0_i32 = arith.constant 0 : i32
    %c0_i32_0 = arith.constant 0 : i32
    %c0_i32_1 = arith.constant 0 : i32
    return %c0_i32, %c0_i32_0 : i32, i32
  }
  func.func @transform_13(%arg0: i32) -> (i32, i32) {
    %c0_i32 = arith.constant 0 : i32
    %c0_i32_0 = arith.constant 0 : i32
    %c0_i32_1 = arith.constant 0 : i32
    return %c0_i32, %c0_i32_0 : i32, i32
  }
  func.func @transform_14(%arg0: i32) -> (i32, i32) {
    %c0_i32 = arith.constant 0 : i32
    %c0_i32_0 = arith.constant 0 : i32
    %c0_i32_1 = arith.constant 0 : i32
    return %c0_i32, %c0_i32_0 : i32, i32
  }
  func.func @transform_15(%arg0: i32) -> (i32, i32) {
    %c0_i32 = arith.constant 0 : i32
    %c0_i32_0 = arith.constant 0 : i32
    %c0_i32_1 = arith.constant 0 : i32
    return %c0_i32, %c0_i32_0 : i32, i32
  }
  func.func @transform_16(%arg0: i32) -> (i32, i32) {
    %c0_i32 = arith.constant 0 : i32
    %c0_i32_0 = arith.constant 0 : i32
    %c0_i32_1 = arith.constant 0 : i32
    return %c0_i32, %c0_i32_0 : i32, i32
  }
  func.func @transform_17(%arg0: i32) -> (i32, i32) {
    %c0_i32 = arith.constant 0 : i32
    %c0_i32_0 = arith.constant 0 : i32
    %c0_i32_1 = arith.constant 0 : i32
    return %c0_i32, %c0_i32_0 : i32, i32
  }
  func.func @transform_18(%arg0: i32) -> (i32, i32) {
    %c0_i32 = arith.constant 0 : i32
    %c0_i32_0 = arith.constant 0 : i32
    %c0_i32_1 = arith.constant 0 : i32
    return %c0_i32, %c0_i32_0 : i32, i32
  }
  func.func @transform_19(%arg0: i32) -> (i32, i32) {
    %c0_i32 = arith.constant 0 : i32
    %c0_i32_0 = arith.constant 0 : i32
    %c0_i32_1 = arith.constant 0 : i32
    return %c0_i32, %c0_i32_0 : i32, i32
  }
  func.func @transform_20(%arg0: i32) -> (i32, i32) {
    %c0_i32 = arith.constant 0 : i32
    %c0_i32_0 = arith.constant 0 : i32
    %c0_i32_1 = arith.constant 0 : i32
    return %c0_i32, %c0_i32_0 : i32, i32
  }
  func.func @transform_21(%arg0: i32) -> (i32, i32) {
    %c0_i32 = arith.constant 0 : i32
    %c0_i32_0 = arith.constant 0 : i32
    %c0_i32_1 = arith.constant 0 : i32
    return %c0_i32, %c0_i32_0 : i32, i32
  }
  func.func @transform_22(%arg0: i32) -> (i32, i32) {
    %c0_i32 = arith.constant 0 : i32
    %c0_i32_0 = arith.constant 0 : i32
    %c0_i32_1 = arith.constant 0 : i32
    return %c0_i32, %c0_i32_0 : i32, i32
  }
  func.func @transform_23(%arg0: i32) -> (i32, i32) {
    %c0_i32 = arith.constant 0 : i32
    %c0_i32_0 = arith.constant 0 : i32
    %c0_i32_1 = arith.constant 0 : i32
    return %c0_i32, %c0_i32_0 : i32, i32
  }
  func.func @transform_24(%arg0: i32) -> (i32, i32) {
    %c0_i32 = arith.constant 0 : i32
    %c0_i32_0 = arith.constant 0 : i32
    %c0_i32_1 = arith.constant 0 : i32
    return %c0_i32, %c0_i32_0 : i32, i32
  }
  func.func @transform_25(%arg0: i32) -> (i32, i32) {
    %c0_i32 = arith.constant 0 : i32
    %c0_i32_0 = arith.constant 0 : i32
    %c0_i32_1 = arith.constant 0 : i32
    return %c0_i32, %c0_i32_0 : i32, i32
  }
  func.func @transform_26(%arg0: i32) -> (i32, i32) {
    %c0_i32 = arith.constant 0 : i32
    %c0_i32_0 = arith.constant 0 : i32
    %c0_i32_1 = arith.constant 0 : i32
    return %c0_i32, %c0_i32_0 : i32, i32
  }
  func.func @transform_27(%arg0: i32) -> (i32, i32) {
    %c0_i32 = arith.constant 0 : i32
    %c0_i32_0 = arith.constant 0 : i32
    %c0_i32_1 = arith.constant 0 : i32
    return %c0_i32, %c0_i32_0 : i32, i32
  }
  func.func @transform_28(%arg0: i32) -> (i32, i32) {
    %c0_i32 = arith.constant 0 : i32
    %c0_i32_0 = arith.constant 0 : i32
    %c0_i32_1 = arith.constant 0 : i32
    return %c0_i32, %c0_i32_0 : i32, i32
  }
  func.func @transform_29(%arg0: i32) -> (i32, i32) {
    %c0_i32 = arith.constant 0 : i32
    %c0_i32_0 = arith.constant 0 : i32
    %c0_i32_1 = arith.constant 0 : i32
    return %c0_i32, %c0_i32_0 : i32, i32
  }
  func.func @transform_30(%arg0: i32) -> (i32, i32) {
    %c0_i32 = arith.constant 0 : i32
    %c0_i32_0 = arith.constant 0 : i32
    %c0_i32_1 = arith.constant 0 : i32
    return %c0_i32, %c0_i32_0 : i32, i32
  }
  func.func @transform_31(%arg0: i32) -> (i32, i32) {
    %c0_i32 = arith.constant 0 : i32
    %c0_i32_0 = arith.constant 0 : i32
    %c0_i32_1 = arith.constant 0 : i32
    return %c0_i32, %c0_i32_0 : i32, i32
  }
  func.func @transform_32(%arg0: i32) -> (i32, i32) {
    %c0_i32 = arith.constant 0 : i32
    %c0_i32_0 = arith.constant 0 : i32
    %c0_i32_1 = arith.constant 0 : i32
    return %c0_i32, %c0_i32_0 : i32, i32
  }
  func.func @transform_33(%arg0: i32) -> (i32, i32) {
    %c0_i32 = arith.constant 0 : i32
    %c0_i32_0 = arith.constant 0 : i32
    %c0_i32_1 = arith.constant 0 : i32
    return %c0_i32, %c0_i32_0 : i32, i32
  }
  func.func @transform_34(%arg0: i32) -> (i32, i32) {
    %c0_i32 = arith.constant 0 : i32
    %c0_i32_0 = arith.constant 0 : i32
    %c0_i32_1 = arith.constant 0 : i32
    return %c0_i32, %c0_i32_0 : i32, i32
  }
  func.func @transform_35(%arg0: i32) -> (i32, i32) {
    %c0_i32 = arith.constant 0 : i32
    %c0_i32_0 = arith.constant 0 : i32
    %c0_i32_1 = arith.constant 0 : i32
    return %c0_i32, %c0_i32_0 : i32, i32
  }
  func.func @transform_36(%arg0: i32) -> (i32, i32, i32) {
    %c0_i32 = arith.constant 0 : i32
    %c0_i32_0 = arith.constant 0 : i32
    %c0_i32_1 = arith.constant 0 : i32
    return %arg0, %c0_i32, %c0_i32_0 : i32, i32, i32
  }
}

module attributes {stable_mosaic.version = 11 : i64} {
  func.func @kernel(%arg0: i32, %arg1: memref<1x8x32xf32, #tpu.memory_space<vmem>>, %arg2: memref<1x8x32xf32, #tpu.memory_space<vmem>>, %arg3: memref<1x8x32xf32, #tpu.memory_space<vmem>>, %arg4: memref<1x8x32xf32, #tpu.memory_space<vmem>>, %arg5: memref<1x8x1xf32, #tpu.memory_space<vmem>>, %arg6: memref<1x8x8xf32, #tpu.memory_space<vmem>>, %arg7: memref<1x8x8xf32, #tpu.memory_space<vmem>>, %arg8: memref<32x32xbf16, #tpu.memory_space<vmem>>, %arg9: memref<1x32xf32, #tpu.memory_space<vmem>>, %arg10: memref<32x32xbf16, #tpu.memory_space<vmem>>, %arg11: memref<1x32xf32, #tpu.memory_space<vmem>>, %arg12: memref<32x32xbf16, #tpu.memory_space<vmem>>, %arg13: memref<1x32xf32, #tpu.memory_space<vmem>>, %arg14: memref<32x32xbf16, #tpu.memory_space<vmem>>, %arg15: memref<1x32xf32, #tpu.memory_space<vmem>>, %arg16: memref<1x32xf32, #tpu.memory_space<vmem>>, %arg17: memref<1x32xf32, #tpu.memory_space<vmem>>, %arg18: memref<32x32xbf16, #tpu.memory_space<vmem>>, %arg19: memref<1x32xf32, #tpu.memory_space<vmem>>, %arg20: memref<32x32xbf16, #tpu.memory_space<vmem>>, %arg21: memref<1x32xf32, #tpu.memory_space<vmem>>, %arg22: memref<32x32xbf16, #tpu.memory_space<vmem>>, %arg23: memref<1x32xf32, #tpu.memory_space<vmem>>, %arg24: memref<32x32xbf16, #tpu.memory_space<vmem>>, %arg25: memref<1x32xf32, #tpu.memory_space<vmem>>, %arg26: memref<1x32xf32, #tpu.memory_space<vmem>>, %arg27: memref<1x32xf32, #tpu.memory_space<vmem>>, %arg28: memref<32x64xbf16, #tpu.memory_space<vmem>>, %arg29: memref<1x64xf32, #tpu.memory_space<vmem>>, %arg30: memref<64x32xbf16, #tpu.memory_space<vmem>>, %arg31: memref<1x32xf32, #tpu.memory_space<vmem>>, %arg32: memref<1x32xf32, #tpu.memory_space<vmem>>, %arg33: memref<1x32xf32, #tpu.memory_space<vmem>>, %arg34: memref<32x32xbf16, #tpu.memory_space<vmem>>, %arg35: memref<32x32xbf16, #tpu.memory_space<vmem>>, %arg36: memref<1x32xf32, #tpu.memory_space<vmem>>, %arg37: memref<1x8x32xf32, #tpu.memory_space<vmem>>) attributes {dimension_semantics = [#tpu.dimension_semantics<parallel>], iteration_bounds = array<i64: 2>, scalar_prefetch = 0 : i64, scratch_operands = 0 : i64, tpu.core_type = #tpu.core_type<tc>, window_params = [{transform_indices = @transform_0, window_bounds = array<i64: 1, 8, 32>}, {transform_indices = @transform_1, window_bounds = array<i64: 1, 8, 32>}, {transform_indices = @transform_2, window_bounds = array<i64: 1, 8, 32>}, {transform_indices = @transform_3, window_bounds = array<i64: 1, 8, 32>}, {transform_indices = @transform_4, window_bounds = array<i64: 1, 8, 1>}, {transform_indices = @transform_5, window_bounds = array<i64: 1, 8, 8>}, {transform_indices = @transform_6, window_bounds = array<i64: 1, 8, 8>}, {pipeline_mode = #tpu.pipeline_mode<synchronous>, transform_indices = @transform_7, window_bounds = array<i64: 32, 32>}, {pipeline_mode = #tpu.pipeline_mode<synchronous>, transform_indices = @transform_8, window_bounds = array<i64: 1, 32>}, {pipeline_mode = #tpu.pipeline_mode<synchronous>, transform_indices = @transform_9, window_bounds = array<i64: 32, 32>}, {pipeline_mode = #tpu.pipeline_mode<synchronous>, transform_indices = @transform_10, window_bounds = array<i64: 1, 32>}, {pipeline_mode = #tpu.pipeline_mode<synchronous>, transform_indices = @transform_11, window_bounds = array<i64: 32, 32>}, {pipeline_mode = #tpu.pipeline_mode<synchronous>, transform_indices = @transform_12, window_bounds = array<i64: 1, 32>}, {pipeline_mode = #tpu.pipeline_mode<synchronous>, transform_indices = @transform_13, window_bounds = array<i64: 32, 32>}, {pipeline_mode = #tpu.pipeline_mode<synchronous>, transform_indices = @transform_14, window_bounds = array<i64: 1, 32>}, {pipeline_mode = #tpu.pipeline_mode<synchronous>, transform_indices = @transform_15, window_bounds = array<i64: 1, 32>}, {pipeline_mode = #tpu.pipeline_mode<synchronous>, transform_indices = @transform_16, window_bounds = array<i64: 1, 32>}, {pipeline_mode = #tpu.pipeline_mode<synchronous>, transform_indices = @transform_17, window_bounds = array<i64: 32, 32>}, {pipeline_mode = #tpu.pipeline_mode<synchronous>, transform_indices = @transform_18, window_bounds = array<i64: 1, 32>}, {pipeline_mode = #tpu.pipeline_mode<synchronous>, transform_indices = @transform_19, window_bounds = array<i64: 32, 32>}, {pipeline_mode = #tpu.pipeline_mode<synchronous>, transform_indices = @transform_20, window_bounds = array<i64: 1, 32>}, {pipeline_mode = #tpu.pipeline_mode<synchronous>, transform_indices = @transform_21, window_bounds = array<i64: 32, 32>}, {pipeline_mode = #tpu.pipeline_mode<synchronous>, transform_indices = @transform_22, window_bounds = array<i64: 1, 32>}, {pipeline_mode = #tpu.pipeline_mode<synchronous>, transform_indices = @transform_23, window_bounds = array<i64: 32, 32>}, {pipeline_mode = #tpu.pipeline_mode<synchronous>, transform_indices = @transform_24, window_bounds = array<i64: 1, 32>}, {pipeline_mode = #tpu.pipeline_mode<synchronous>, transform_indices = @transform_25, window_bounds = array<i64: 1, 32>}, {pipeline_mode = #tpu.pipeline_mode<synchronous>, transform_indices = @transform_26, window_bounds = array<i64: 1, 32>}, {pipeline_mode = #tpu.pipeline_mode<synchronous>, transform_indices = @transform_27, window_bounds = array<i64: 32, 64>}, {pipeline_mode = #tpu.pipeline_mode<synchronous>, transform_indices = @transform_28, window_bounds = array<i64: 1, 64>}, {pipeline_mode = #tpu.pipeline_mode<synchronous>, transform_indices = @transform_29, window_bounds = array<i64: 64, 32>}, {pipeline_mode = #tpu.pipeline_mode<synchronous>, transform_indices = @transform_30, window_bounds = array<i64: 1, 32>}, {pipeline_mode = #tpu.pipeline_mode<synchronous>, transform_indices = @transform_31, window_bounds = array<i64: 1, 32>}, {pipeline_mode = #tpu.pipeline_mode<synchronous>, transform_indices = @transform_32, window_bounds = array<i64: 1, 32>}, {pipeline_mode = #tpu.pipeline_mode<synchronous>, transform_indices = @transform_33, window_bounds = array<i64: 32, 32>}, {pipeline_mode = #tpu.pipeline_mode<synchronous>, transform_indices = @transform_34, window_bounds = array<i64: 32, 32>}, {pipeline_mode = #tpu.pipeline_mode<synchronous>, transform_indices = @transform_35, window_bounds = array<i64: 1, 32>}, {transform_indices = @transform_36, window_bounds = array<i64: 1, 8, 32>}]} {
    %c0 = arith.constant 0 : index
    %c0_0 = arith.constant 0 : index
    %c0_1 = arith.constant 0 : index
    %0 = vector.load %arg1[%c0, %c0_0, %c0_1] : memref<1x8x32xf32, #tpu.memory_space<vmem>>, vector<1x8x32xf32>
    %1 = vector.shape_cast %0 : vector<1x8x32xf32> to vector<8x32xf32>
    %c0_2 = arith.constant 0 : index
    %c0_3 = arith.constant 0 : index
    %c0_4 = arith.constant 0 : index
    %2 = vector.load %arg2[%c0_2, %c0_3, %c0_4] : memref<1x8x32xf32, #tpu.memory_space<vmem>>, vector<1x8x32xf32>
    %3 = vector.shape_cast %2 : vector<1x8x32xf32> to vector<8x32xf32>
    %4 = tpu.concatenate %1, %3 in 0 : vector<8x32xf32>, vector<8x32xf32> -> vector<16x32xf32>
    %c0_5 = arith.constant 0 : index
    %c0_6 = arith.constant 0 : index
    %c0_7 = arith.constant 0 : index
    %5 = vector.load %arg3[%c0_5, %c0_6, %c0_7] : memref<1x8x32xf32, #tpu.memory_space<vmem>>, vector<1x8x32xf32>
    %6 = vector.shape_cast %5 : vector<1x8x32xf32> to vector<8x32xf32>
    %c0_8 = arith.constant 0 : index
    %c0_9 = arith.constant 0 : index
    %c0_10 = arith.constant 0 : index
    %7 = vector.load %arg4[%c0_8, %c0_9, %c0_10] : memref<1x8x32xf32, #tpu.memory_space<vmem>>, vector<1x8x32xf32>
    %8 = vector.shape_cast %7 : vector<1x8x32xf32> to vector<8x32xf32>
    %9 = tpu.concatenate %6, %8 in 0 : vector<8x32xf32>, vector<8x32xf32> -> vector<16x32xf32>
    %c0_11 = arith.constant 0 : index
    %c0_12 = arith.constant 0 : index
    %c0_13 = arith.constant 0 : index
    %10 = vector.load %arg5[%c0_11, %c0_12, %c0_13] : memref<1x8x1xf32, #tpu.memory_space<vmem>>, vector<1x8x1xf32>
    %11 = vector.shape_cast %10 : vector<1x8x1xf32> to vector<8x1xf32>
    %12 = tpu.concatenate %11, %11 in 0 : vector<8x1xf32>, vector<8x1xf32> -> vector<16x1xf32>
    %c0_14 = arith.constant 0 : index
    %c0_15 = arith.constant 0 : index
    %c0_16 = arith.constant 0 : index
    %13 = vector.load %arg6[%c0_14, %c0_15, %c0_16] : memref<1x8x8xf32, #tpu.memory_space<vmem>>, vector<1x8x8xf32>
    %cst = arith.constant 0.000000e+00 : f32
    %14 = vector.broadcast %cst : f32 to vector<1x8x8xf32>
    %15 = arith.cmpf ogt, %13, %14 : vector<1x8x8xf32>
    %cst_17 = arith.constant -1.000000e+30 : f32
    %cst_18 = arith.constant 0.000000e+00 : f32
    %16 = vector.broadcast %cst_17 : f32 to vector<1x8x8xf32>
    %17 = vector.broadcast %cst_18 : f32 to vector<1x8x8xf32>
    %18 = arith.select %15, %16, %17 : vector<1x8x8xi1>, vector<1x8x8xf32>
    %c0_19 = arith.constant 0 : index
    %c0_20 = arith.constant 0 : index
    %c0_21 = arith.constant 0 : index
    %19 = vector.load %arg7[%c0_19, %c0_20, %c0_21] : memref<1x8x8xf32, #tpu.memory_space<vmem>>, vector<1x8x8xf32>
    %cst_22 = arith.constant 0.000000e+00 : f32
    %20 = vector.broadcast %cst_22 : f32 to vector<1x8x8xf32>
    %21 = arith.cmpf ogt, %19, %20 : vector<1x8x8xf32>
    %cst_23 = arith.constant -1.000000e+30 : f32
    %cst_24 = arith.constant 0.000000e+00 : f32
    %22 = vector.broadcast %cst_23 : f32 to vector<1x8x8xf32>
    %23 = vector.broadcast %cst_24 : f32 to vector<1x8x8xf32>
    %24 = arith.select %21, %22, %23 : vector<1x8x8xi1>, vector<1x8x8xf32>
    %c0_25 = arith.constant 0 : index
    %c0_26 = arith.constant 0 : index
    %25 = vector.load %arg8[%c0_25, %c0_26] : memref<32x32xbf16, #tpu.memory_space<vmem>>, vector<32x32xbf16>
    %c0_27 = arith.constant 0 : index
    %c0_28 = arith.constant 0 : index
    %26 = vector.load %arg9[%c0_27, %c0_28] : memref<1x32xf32, #tpu.memory_space<vmem>>, vector<1x32xf32>
    %c0_29 = arith.constant 0 : index
    %c0_30 = arith.constant 0 : index
    %27 = vector.load %arg10[%c0_29, %c0_30] : memref<32x32xbf16, #tpu.memory_space<vmem>>, vector<32x32xbf16>
    %c0_31 = arith.constant 0 : index
    %c0_32 = arith.constant 0 : index
    %28 = vector.load %arg11[%c0_31, %c0_32] : memref<1x32xf32, #tpu.memory_space<vmem>>, vector<1x32xf32>
    %c0_33 = arith.constant 0 : index
    %c0_34 = arith.constant 0 : index
    %29 = vector.load %arg12[%c0_33, %c0_34] : memref<32x32xbf16, #tpu.memory_space<vmem>>, vector<32x32xbf16>
    %c0_35 = arith.constant 0 : index
    %c0_36 = arith.constant 0 : index
    %30 = vector.load %arg13[%c0_35, %c0_36] : memref<1x32xf32, #tpu.memory_space<vmem>>, vector<1x32xf32>
    %c0_37 = arith.constant 0 : index
    %c0_38 = arith.constant 0 : index
    %31 = vector.load %arg14[%c0_37, %c0_38] : memref<32x32xbf16, #tpu.memory_space<vmem>>, vector<32x32xbf16>
    %c0_39 = arith.constant 0 : index
    %c0_40 = arith.constant 0 : index
    %32 = vector.load %arg15[%c0_39, %c0_40] : memref<1x32xf32, #tpu.memory_space<vmem>>, vector<1x32xf32>
    %c0_41 = arith.constant 0 : index
    %c0_42 = arith.constant 0 : index
    %33 = vector.load %arg16[%c0_41, %c0_42] : memref<1x32xf32, #tpu.memory_space<vmem>>, vector<1x32xf32>
    %c0_43 = arith.constant 0 : index
    %c0_44 = arith.constant 0 : index
    %34 = vector.load %arg17[%c0_43, %c0_44] : memref<1x32xf32, #tpu.memory_space<vmem>>, vector<1x32xf32>
    %35 = arith.truncf %4 : vector<16x32xf32> to vector<16x32xbf16>
    %36 = arith.truncf %4 : vector<16x32xf32> to vector<16x32xbf16>
    %cst_45 = arith.constant dense<0.000000e+00> : vector<16x32xf32>
    %37 = tpu.matmul %35, %25, %cst_45 {dimension_numbers = #tpu.dot_dimension_numbers<[1], [0], [0], [1], [0, 0, 1, 1], [], []>} : vector<16x32xbf16>, vector<32x32xbf16>, vector<16x32xf32> -> vector<16x32xf32>
    %38 = vector.broadcast %26 : vector<1x32xf32> to vector<16x32xf32>
    %39 = arith.addf %37, %38 : vector<16x32xf32>
    %cst_46 = arith.constant 2.500000e-01 : f32
    %40 = vector.broadcast %cst_46 : f32 to vector<16x32xf32>
    %41 = arith.mulf %39, %40 : vector<16x32xf32>
    %cst_47 = arith.constant dense<0.000000e+00> : vector<16x32xf32>
    %42 = tpu.matmul %36, %27, %cst_47 {dimension_numbers = #tpu.dot_dimension_numbers<[1], [0], [0], [1], [0, 0, 1, 1], [], []>} : vector<16x32xbf16>, vector<32x32xbf16>, vector<16x32xf32> -> vector<16x32xf32>
    %43 = vector.broadcast %28 : vector<1x32xf32> to vector<16x32xf32>
    %44 = arith.addf %42, %43 : vector<16x32xf32>
    %cst_48 = arith.constant dense<0.000000e+00> : vector<16x32xf32>
    %45 = tpu.matmul %36, %29, %cst_48 {dimension_numbers = #tpu.dot_dimension_numbers<[1], [0], [0], [1], [0, 0, 1, 1], [], []>} : vector<16x32xbf16>, vector<32x32xbf16>, vector<16x32xf32> -> vector<16x32xf32>
    %46 = vector.broadcast %30 : vector<1x32xf32> to vector<16x32xf32>
    %47 = arith.addf %45, %46 : vector<16x32xf32>
    %48 = vector.extract_strided_slice %41 {offsets = [0, 0], sizes = [16, 16], strides = [1, 1]} : vector<16x32xf32> to vector<16x16xf32>
    %49 = vector.extract_strided_slice %44 {offsets = [0, 0], sizes = [16, 16], strides = [1, 1]} : vector<16x32xf32> to vector<16x16xf32>
    %50 = vector.extract_strided_slice %47 {offsets = [0, 0], sizes = [16, 16], strides = [1, 1]} : vector<16x32xf32> to vector<16x16xf32>
    %51 = vector.extract_strided_slice %48 {offsets = [0, 0], sizes = [8, 16], strides = [1, 1]} : vector<16x16xf32> to vector<8x16xf32>
    %52 = arith.truncf %51 : vector<8x16xf32> to vector<8x16xbf16>
    %53 = vector.extract_strided_slice %49 {offsets = [0, 0], sizes = [8, 16], strides = [1, 1]} : vector<16x16xf32> to vector<8x16xf32>
    %54 = arith.truncf %53 : vector<8x16xf32> to vector<8x16xbf16>
    %55 = vector.extract_strided_slice %50 {offsets = [0, 0], sizes = [8, 16], strides = [1, 1]} : vector<16x16xf32> to vector<8x16xf32>
    %56 = arith.truncf %55 : vector<8x16xf32> to vector<8x16xbf16>
    %cst_49 = arith.constant dense<0.000000e+00> : vector<8x8xf32>
    %57 = tpu.matmul %52, %54, %cst_49 {dimension_numbers = #tpu.dot_dimension_numbers<[1], [1], [0], [0], [0, 0, 1, 0], [], []>} : vector<8x16xbf16>, vector<8x16xbf16>, vector<8x8xf32> -> vector<8x8xf32>
    %58 = vector.shape_cast %18 : vector<1x8x8xf32> to vector<8x8xf32>
    %59 = arith.addf %57, %58 : vector<8x8xf32>
    %cst_50 = arith.constant dense<0xFF800000> : vector<8xf32>
    %60 = vector.multi_reduction <maximumf>, %59, %cst_50 [1] : vector<8x8xf32> to vector<8xf32>
    %61 = vector.shape_cast %60 : vector<8xf32> to vector<8x1xf32>
    %62 = vector.broadcast %61 : vector<8x1xf32> to vector<8x8xf32>
    %63 = arith.subf %59, %62 : vector<8x8xf32>
    %64 = math.exp %63 : vector<8x8xf32>
    %cst_51 = arith.constant dense<0.000000e+00> : vector<8xf32>
    %65 = vector.multi_reduction <add>, %64, %cst_51 [1] : vector<8x8xf32> to vector<8xf32>
    %66 = vector.shape_cast %65 : vector<8xf32> to vector<8x1xf32>
    %67 = tpu.reciprocal %66 {approx = true} : vector<8x1xf32> -> vector<8x1xf32>
    %68 = vector.broadcast %67 : vector<8x1xf32> to vector<8x8xf32>
    %69 = arith.mulf %64, %68 : vector<8x8xf32>
    %70 = arith.truncf %69 : vector<8x8xf32> to vector<8x8xbf16>
    %cst_52 = arith.constant dense<0.000000e+00> : vector<8x16xf32>
    %71 = tpu.matmul %70, %56, %cst_52 {dimension_numbers = #tpu.dot_dimension_numbers<[1], [0], [0], [1], [0, 0, 1, 1], [], []>} : vector<8x8xbf16>, vector<8x16xbf16>, vector<8x16xf32> -> vector<8x16xf32>
    %72 = vector.extract_strided_slice %48 {offsets = [8, 0], sizes = [8, 16], strides = [1, 1]} : vector<16x16xf32> to vector<8x16xf32>
    %73 = arith.truncf %72 : vector<8x16xf32> to vector<8x16xbf16>
    %74 = vector.extract_strided_slice %49 {offsets = [8, 0], sizes = [8, 16], strides = [1, 1]} : vector<16x16xf32> to vector<8x16xf32>
    %75 = arith.truncf %74 : vector<8x16xf32> to vector<8x16xbf16>
    %76 = vector.extract_strided_slice %50 {offsets = [8, 0], sizes = [8, 16], strides = [1, 1]} : vector<16x16xf32> to vector<8x16xf32>
    %77 = arith.truncf %76 : vector<8x16xf32> to vector<8x16xbf16>
    %cst_53 = arith.constant dense<0.000000e+00> : vector<8x8xf32>
    %78 = tpu.matmul %73, %75, %cst_53 {dimension_numbers = #tpu.dot_dimension_numbers<[1], [1], [0], [0], [0, 0, 1, 0], [], []>} : vector<8x16xbf16>, vector<8x16xbf16>, vector<8x8xf32> -> vector<8x8xf32>
    %79 = vector.shape_cast %18 : vector<1x8x8xf32> to vector<8x8xf32>
    %80 = arith.addf %78, %79 : vector<8x8xf32>
    %cst_54 = arith.constant dense<0xFF800000> : vector<8xf32>
    %81 = vector.multi_reduction <maximumf>, %80, %cst_54 [1] : vector<8x8xf32> to vector<8xf32>
    %82 = vector.shape_cast %81 : vector<8xf32> to vector<8x1xf32>
    %83 = vector.broadcast %82 : vector<8x1xf32> to vector<8x8xf32>
    %84 = arith.subf %80, %83 : vector<8x8xf32>
    %85 = math.exp %84 : vector<8x8xf32>
    %cst_55 = arith.constant dense<0.000000e+00> : vector<8xf32>
    %86 = vector.multi_reduction <add>, %85, %cst_55 [1] : vector<8x8xf32> to vector<8xf32>
    %87 = vector.shape_cast %86 : vector<8xf32> to vector<8x1xf32>
    %88 = tpu.reciprocal %87 {approx = true} : vector<8x1xf32> -> vector<8x1xf32>
    %89 = vector.broadcast %88 : vector<8x1xf32> to vector<8x8xf32>
    %90 = arith.mulf %85, %89 : vector<8x8xf32>
    %91 = arith.truncf %90 : vector<8x8xf32> to vector<8x8xbf16>
    %cst_56 = arith.constant dense<0.000000e+00> : vector<8x16xf32>
    %92 = tpu.matmul %91, %77, %cst_56 {dimension_numbers = #tpu.dot_dimension_numbers<[1], [0], [0], [1], [0, 0, 1, 1], [], []>} : vector<8x8xbf16>, vector<8x16xbf16>, vector<8x16xf32> -> vector<8x16xf32>
    %93 = tpu.concatenate %71, %92 in 0 : vector<8x16xf32>, vector<8x16xf32> -> vector<16x16xf32>
    %94 = vector.extract_strided_slice %41 {offsets = [0, 16], sizes = [16, 16], strides = [1, 1]} : vector<16x32xf32> to vector<16x16xf32>
    %95 = vector.extract_strided_slice %44 {offsets = [0, 16], sizes = [16, 16], strides = [1, 1]} : vector<16x32xf32> to vector<16x16xf32>
    %96 = vector.extract_strided_slice %47 {offsets = [0, 16], sizes = [16, 16], strides = [1, 1]} : vector<16x32xf32> to vector<16x16xf32>
    %97 = vector.extract_strided_slice %94 {offsets = [0, 0], sizes = [8, 16], strides = [1, 1]} : vector<16x16xf32> to vector<8x16xf32>
    %98 = arith.truncf %97 : vector<8x16xf32> to vector<8x16xbf16>
    %99 = vector.extract_strided_slice %95 {offsets = [0, 0], sizes = [8, 16], strides = [1, 1]} : vector<16x16xf32> to vector<8x16xf32>
    %100 = arith.truncf %99 : vector<8x16xf32> to vector<8x16xbf16>
    %101 = vector.extract_strided_slice %96 {offsets = [0, 0], sizes = [8, 16], strides = [1, 1]} : vector<16x16xf32> to vector<8x16xf32>
    %102 = arith.truncf %101 : vector<8x16xf32> to vector<8x16xbf16>
    %cst_57 = arith.constant dense<0.000000e+00> : vector<8x8xf32>
    %103 = tpu.matmul %98, %100, %cst_57 {dimension_numbers = #tpu.dot_dimension_numbers<[1], [1], [0], [0], [0, 0, 1, 0], [], []>} : vector<8x16xbf16>, vector<8x16xbf16>, vector<8x8xf32> -> vector<8x8xf32>
    %104 = vector.shape_cast %18 : vector<1x8x8xf32> to vector<8x8xf32>
    %105 = arith.addf %103, %104 : vector<8x8xf32>
    %cst_58 = arith.constant dense<0xFF800000> : vector<8xf32>
    %106 = vector.multi_reduction <maximumf>, %105, %cst_58 [1] : vector<8x8xf32> to vector<8xf32>
    %107 = vector.shape_cast %106 : vector<8xf32> to vector<8x1xf32>
    %108 = vector.broadcast %107 : vector<8x1xf32> to vector<8x8xf32>
    %109 = arith.subf %105, %108 : vector<8x8xf32>
    %110 = math.exp %109 : vector<8x8xf32>
    %cst_59 = arith.constant dense<0.000000e+00> : vector<8xf32>
    %111 = vector.multi_reduction <add>, %110, %cst_59 [1] : vector<8x8xf32> to vector<8xf32>
    %112 = vector.shape_cast %111 : vector<8xf32> to vector<8x1xf32>
    %113 = tpu.reciprocal %112 {approx = true} : vector<8x1xf32> -> vector<8x1xf32>
    %114 = vector.broadcast %113 : vector<8x1xf32> to vector<8x8xf32>
    %115 = arith.mulf %110, %114 : vector<8x8xf32>
    %116 = arith.truncf %115 : vector<8x8xf32> to vector<8x8xbf16>
    %cst_60 = arith.constant dense<0.000000e+00> : vector<8x16xf32>
    %117 = tpu.matmul %116, %102, %cst_60 {dimension_numbers = #tpu.dot_dimension_numbers<[1], [0], [0], [1], [0, 0, 1, 1], [], []>} : vector<8x8xbf16>, vector<8x16xbf16>, vector<8x16xf32> -> vector<8x16xf32>
    %118 = vector.extract_strided_slice %94 {offsets = [8, 0], sizes = [8, 16], strides = [1, 1]} : vector<16x16xf32> to vector<8x16xf32>
    %119 = arith.truncf %118 : vector<8x16xf32> to vector<8x16xbf16>
    %120 = vector.extract_strided_slice %95 {offsets = [8, 0], sizes = [8, 16], strides = [1, 1]} : vector<16x16xf32> to vector<8x16xf32>
    %121 = arith.truncf %120 : vector<8x16xf32> to vector<8x16xbf16>
    %122 = vector.extract_strided_slice %96 {offsets = [8, 0], sizes = [8, 16], strides = [1, 1]} : vector<16x16xf32> to vector<8x16xf32>
    %123 = arith.truncf %122 : vector<8x16xf32> to vector<8x16xbf16>
    %cst_61 = arith.constant dense<0.000000e+00> : vector<8x8xf32>
    %124 = tpu.matmul %119, %121, %cst_61 {dimension_numbers = #tpu.dot_dimension_numbers<[1], [1], [0], [0], [0, 0, 1, 0], [], []>} : vector<8x16xbf16>, vector<8x16xbf16>, vector<8x8xf32> -> vector<8x8xf32>
    %125 = vector.shape_cast %18 : vector<1x8x8xf32> to vector<8x8xf32>
    %126 = arith.addf %124, %125 : vector<8x8xf32>
    %cst_62 = arith.constant dense<0xFF800000> : vector<8xf32>
    %127 = vector.multi_reduction <maximumf>, %126, %cst_62 [1] : vector<8x8xf32> to vector<8xf32>
    %128 = vector.shape_cast %127 : vector<8xf32> to vector<8x1xf32>
    %129 = vector.broadcast %128 : vector<8x1xf32> to vector<8x8xf32>
    %130 = arith.subf %126, %129 : vector<8x8xf32>
    %131 = math.exp %130 : vector<8x8xf32>
    %cst_63 = arith.constant dense<0.000000e+00> : vector<8xf32>
    %132 = vector.multi_reduction <add>, %131, %cst_63 [1] : vector<8x8xf32> to vector<8xf32>
    %133 = vector.shape_cast %132 : vector<8xf32> to vector<8x1xf32>
    %134 = tpu.reciprocal %133 {approx = true} : vector<8x1xf32> -> vector<8x1xf32>
    %135 = vector.broadcast %134 : vector<8x1xf32> to vector<8x8xf32>
    %136 = arith.mulf %131, %135 : vector<8x8xf32>
    %137 = arith.truncf %136 : vector<8x8xf32> to vector<8x8xbf16>
    %cst_64 = arith.constant dense<0.000000e+00> : vector<8x16xf32>
    %138 = tpu.matmul %137, %123, %cst_64 {dimension_numbers = #tpu.dot_dimension_numbers<[1], [0], [0], [1], [0, 0, 1, 1], [], []>} : vector<8x8xbf16>, vector<8x16xbf16>, vector<8x16xf32> -> vector<8x16xf32>
    %139 = tpu.concatenate %117, %138 in 0 : vector<8x16xf32>, vector<8x16xf32> -> vector<16x16xf32>
    %140 = tpu.concatenate %93, %139 in 1 : vector<16x16xf32>, vector<16x16xf32> -> vector<16x32xf32>
    %141 = arith.truncf %140 : vector<16x32xf32> to vector<16x32xbf16>
    %cst_65 = arith.constant dense<0.000000e+00> : vector<16x32xf32>
    %142 = tpu.matmul %141, %31, %cst_65 {dimension_numbers = #tpu.dot_dimension_numbers<[1], [0], [0], [1], [0, 0, 1, 1], [], []>} : vector<16x32xbf16>, vector<32x32xbf16>, vector<16x32xf32> -> vector<16x32xf32>
    %143 = vector.broadcast %32 : vector<1x32xf32> to vector<16x32xf32>
    %144 = arith.addf %142, %143 : vector<16x32xf32>
    %145 = arith.addf %144, %4 : vector<16x32xf32>
    %cst_66 = arith.constant dense<0.000000e+00> : vector<16xf32>
    %146 = vector.multi_reduction <add>, %145, %cst_66 [1] : vector<16x32xf32> to vector<16xf32>
    %147 = vector.shape_cast %146 : vector<16xf32> to vector<16x1xf32>
    %cst_67 = arith.constant 3.200000e+01 : f32
    %148 = vector.broadcast %cst_67 : f32 to vector<16x1xf32>
    %149 = arith.divf %147, %148 : vector<16x1xf32>
    %150 = vector.broadcast %149 : vector<16x1xf32> to vector<16x32xf32>
    %151 = arith.subf %145, %150 : vector<16x32xf32>
    %152 = arith.mulf %151, %151 : vector<16x32xf32>
    %cst_68 = arith.constant dense<0.000000e+00> : vector<16xf32>
    %153 = vector.multi_reduction <add>, %152, %cst_68 [1] : vector<16x32xf32> to vector<16xf32>
    %154 = vector.shape_cast %153 : vector<16xf32> to vector<16x1xf32>
    %cst_69 = arith.constant 3.200000e+01 : f32
    %155 = vector.broadcast %cst_69 : f32 to vector<16x1xf32>
    %156 = arith.divf %154, %155 : vector<16x1xf32>
    %157 = vector.broadcast %149 : vector<16x1xf32> to vector<16x32xf32>
    %158 = arith.subf %145, %157 : vector<16x32xf32>
    %cst_70 = arith.constant 9.99999974E-6 : f32
    %159 = vector.broadcast %cst_70 : f32 to vector<16x1xf32>
    %160 = arith.addf %156, %159 : vector<16x1xf32>
    %161 = math.rsqrt %160 : vector<16x1xf32>
    %162 = vector.broadcast %161 : vector<16x1xf32> to vector<16x32xf32>
    %163 = arith.mulf %158, %162 : vector<16x32xf32>
    %164 = vector.broadcast %33 : vector<1x32xf32> to vector<16x32xf32>
    %165 = arith.mulf %163, %164 : vector<16x32xf32>
    %166 = vector.broadcast %34 : vector<1x32xf32> to vector<16x32xf32>
    %167 = arith.addf %165, %166 : vector<16x32xf32>
    %168 = vector.broadcast %12 : vector<16x1xf32> to vector<16x32xf32>
    %169 = arith.mulf %167, %168 : vector<16x32xf32>
    %c0_71 = arith.constant 0 : index
    %c0_72 = arith.constant 0 : index
    %170 = vector.load %arg18[%c0_71, %c0_72] : memref<32x32xbf16, #tpu.memory_space<vmem>>, vector<32x32xbf16>
    %c0_73 = arith.constant 0 : index
    %c0_74 = arith.constant 0 : index
    %171 = vector.load %arg19[%c0_73, %c0_74] : memref<1x32xf32, #tpu.memory_space<vmem>>, vector<1x32xf32>
    %c0_75 = arith.constant 0 : index
    %c0_76 = arith.constant 0 : index
    %172 = vector.load %arg20[%c0_75, %c0_76] : memref<32x32xbf16, #tpu.memory_space<vmem>>, vector<32x32xbf16>
    %c0_77 = arith.constant 0 : index
    %c0_78 = arith.constant 0 : index
    %173 = vector.load %arg21[%c0_77, %c0_78] : memref<1x32xf32, #tpu.memory_space<vmem>>, vector<1x32xf32>
    %c0_79 = arith.constant 0 : index
    %c0_80 = arith.constant 0 : index
    %174 = vector.load %arg22[%c0_79, %c0_80] : memref<32x32xbf16, #tpu.memory_space<vmem>>, vector<32x32xbf16>
    %c0_81 = arith.constant 0 : index
    %c0_82 = arith.constant 0 : index
    %175 = vector.load %arg23[%c0_81, %c0_82] : memref<1x32xf32, #tpu.memory_space<vmem>>, vector<1x32xf32>
    %c0_83 = arith.constant 0 : index
    %c0_84 = arith.constant 0 : index
    %176 = vector.load %arg24[%c0_83, %c0_84] : memref<32x32xbf16, #tpu.memory_space<vmem>>, vector<32x32xbf16>
    %c0_85 = arith.constant 0 : index
    %c0_86 = arith.constant 0 : index
    %177 = vector.load %arg25[%c0_85, %c0_86] : memref<1x32xf32, #tpu.memory_space<vmem>>, vector<1x32xf32>
    %c0_87 = arith.constant 0 : index
    %c0_88 = arith.constant 0 : index
    %178 = vector.load %arg26[%c0_87, %c0_88] : memref<1x32xf32, #tpu.memory_space<vmem>>, vector<1x32xf32>
    %c0_89 = arith.constant 0 : index
    %c0_90 = arith.constant 0 : index
    %179 = vector.load %arg27[%c0_89, %c0_90] : memref<1x32xf32, #tpu.memory_space<vmem>>, vector<1x32xf32>
    %180 = arith.truncf %169 : vector<16x32xf32> to vector<16x32xbf16>
    %181 = arith.truncf %9 : vector<16x32xf32> to vector<16x32xbf16>
    %cst_91 = arith.constant dense<0.000000e+00> : vector<16x32xf32>
    %182 = tpu.matmul %180, %170, %cst_91 {dimension_numbers = #tpu.dot_dimension_numbers<[1], [0], [0], [1], [0, 0, 1, 1], [], []>} : vector<16x32xbf16>, vector<32x32xbf16>, vector<16x32xf32> -> vector<16x32xf32>
    %183 = vector.broadcast %171 : vector<1x32xf32> to vector<16x32xf32>
    %184 = arith.addf %182, %183 : vector<16x32xf32>
    %cst_92 = arith.constant 2.500000e-01 : f32
    %185 = vector.broadcast %cst_92 : f32 to vector<16x32xf32>
    %186 = arith.mulf %184, %185 : vector<16x32xf32>
    %cst_93 = arith.constant dense<0.000000e+00> : vector<16x32xf32>
    %187 = tpu.matmul %181, %172, %cst_93 {dimension_numbers = #tpu.dot_dimension_numbers<[1], [0], [0], [1], [0, 0, 1, 1], [], []>} : vector<16x32xbf16>, vector<32x32xbf16>, vector<16x32xf32> -> vector<16x32xf32>
    %188 = vector.broadcast %173 : vector<1x32xf32> to vector<16x32xf32>
    %189 = arith.addf %187, %188 : vector<16x32xf32>
    %cst_94 = arith.constant dense<0.000000e+00> : vector<16x32xf32>
    %190 = tpu.matmul %181, %174, %cst_94 {dimension_numbers = #tpu.dot_dimension_numbers<[1], [0], [0], [1], [0, 0, 1, 1], [], []>} : vector<16x32xbf16>, vector<32x32xbf16>, vector<16x32xf32> -> vector<16x32xf32>
    %191 = vector.broadcast %175 : vector<1x32xf32> to vector<16x32xf32>
    %192 = arith.addf %190, %191 : vector<16x32xf32>
    %193 = vector.extract_strided_slice %186 {offsets = [0, 0], sizes = [16, 16], strides = [1, 1]} : vector<16x32xf32> to vector<16x16xf32>
    %194 = vector.extract_strided_slice %189 {offsets = [0, 0], sizes = [16, 16], strides = [1, 1]} : vector<16x32xf32> to vector<16x16xf32>
    %195 = vector.extract_strided_slice %192 {offsets = [0, 0], sizes = [16, 16], strides = [1, 1]} : vector<16x32xf32> to vector<16x16xf32>
    %196 = vector.extract_strided_slice %193 {offsets = [0, 0], sizes = [8, 16], strides = [1, 1]} : vector<16x16xf32> to vector<8x16xf32>
    %197 = arith.truncf %196 : vector<8x16xf32> to vector<8x16xbf16>
    %198 = vector.extract_strided_slice %194 {offsets = [0, 0], sizes = [8, 16], strides = [1, 1]} : vector<16x16xf32> to vector<8x16xf32>
    %199 = arith.truncf %198 : vector<8x16xf32> to vector<8x16xbf16>
    %200 = vector.extract_strided_slice %195 {offsets = [0, 0], sizes = [8, 16], strides = [1, 1]} : vector<16x16xf32> to vector<8x16xf32>
    %201 = arith.truncf %200 : vector<8x16xf32> to vector<8x16xbf16>
    %cst_95 = arith.constant dense<0.000000e+00> : vector<8x8xf32>
    %202 = tpu.matmul %197, %199, %cst_95 {dimension_numbers = #tpu.dot_dimension_numbers<[1], [1], [0], [0], [0, 0, 1, 0], [], []>} : vector<8x16xbf16>, vector<8x16xbf16>, vector<8x8xf32> -> vector<8x8xf32>
    %203 = vector.shape_cast %24 : vector<1x8x8xf32> to vector<8x8xf32>
    %204 = arith.addf %202, %203 : vector<8x8xf32>
    %cst_96 = arith.constant dense<0xFF800000> : vector<8xf32>
    %205 = vector.multi_reduction <maximumf>, %204, %cst_96 [1] : vector<8x8xf32> to vector<8xf32>
    %206 = vector.shape_cast %205 : vector<8xf32> to vector<8x1xf32>
    %207 = vector.broadcast %206 : vector<8x1xf32> to vector<8x8xf32>
    %208 = arith.subf %204, %207 : vector<8x8xf32>
    %209 = math.exp %208 : vector<8x8xf32>
    %cst_97 = arith.constant dense<0.000000e+00> : vector<8xf32>
    %210 = vector.multi_reduction <add>, %209, %cst_97 [1] : vector<8x8xf32> to vector<8xf32>
    %211 = vector.shape_cast %210 : vector<8xf32> to vector<8x1xf32>
    %212 = tpu.reciprocal %211 {approx = true} : vector<8x1xf32> -> vector<8x1xf32>
    %213 = vector.broadcast %212 : vector<8x1xf32> to vector<8x8xf32>
    %214 = arith.mulf %209, %213 : vector<8x8xf32>
    %215 = arith.truncf %214 : vector<8x8xf32> to vector<8x8xbf16>
    %cst_98 = arith.constant dense<0.000000e+00> : vector<8x16xf32>
    %216 = tpu.matmul %215, %201, %cst_98 {dimension_numbers = #tpu.dot_dimension_numbers<[1], [0], [0], [1], [0, 0, 1, 1], [], []>} : vector<8x8xbf16>, vector<8x16xbf16>, vector<8x16xf32> -> vector<8x16xf32>
    %217 = vector.extract_strided_slice %193 {offsets = [8, 0], sizes = [8, 16], strides = [1, 1]} : vector<16x16xf32> to vector<8x16xf32>
    %218 = arith.truncf %217 : vector<8x16xf32> to vector<8x16xbf16>
    %219 = vector.extract_strided_slice %194 {offsets = [8, 0], sizes = [8, 16], strides = [1, 1]} : vector<16x16xf32> to vector<8x16xf32>
    %220 = arith.truncf %219 : vector<8x16xf32> to vector<8x16xbf16>
    %221 = vector.extract_strided_slice %195 {offsets = [8, 0], sizes = [8, 16], strides = [1, 1]} : vector<16x16xf32> to vector<8x16xf32>
    %222 = arith.truncf %221 : vector<8x16xf32> to vector<8x16xbf16>
    %cst_99 = arith.constant dense<0.000000e+00> : vector<8x8xf32>
    %223 = tpu.matmul %218, %220, %cst_99 {dimension_numbers = #tpu.dot_dimension_numbers<[1], [1], [0], [0], [0, 0, 1, 0], [], []>} : vector<8x16xbf16>, vector<8x16xbf16>, vector<8x8xf32> -> vector<8x8xf32>
    %224 = vector.shape_cast %24 : vector<1x8x8xf32> to vector<8x8xf32>
    %225 = arith.addf %223, %224 : vector<8x8xf32>
    %cst_100 = arith.constant dense<0xFF800000> : vector<8xf32>
    %226 = vector.multi_reduction <maximumf>, %225, %cst_100 [1] : vector<8x8xf32> to vector<8xf32>
    %227 = vector.shape_cast %226 : vector<8xf32> to vector<8x1xf32>
    %228 = vector.broadcast %227 : vector<8x1xf32> to vector<8x8xf32>
    %229 = arith.subf %225, %228 : vector<8x8xf32>
    %230 = math.exp %229 : vector<8x8xf32>
    %cst_101 = arith.constant dense<0.000000e+00> : vector<8xf32>
    %231 = vector.multi_reduction <add>, %230, %cst_101 [1] : vector<8x8xf32> to vector<8xf32>
    %232 = vector.shape_cast %231 : vector<8xf32> to vector<8x1xf32>
    %233 = tpu.reciprocal %232 {approx = true} : vector<8x1xf32> -> vector<8x1xf32>
    %234 = vector.broadcast %233 : vector<8x1xf32> to vector<8x8xf32>
    %235 = arith.mulf %230, %234 : vector<8x8xf32>
    %236 = arith.truncf %235 : vector<8x8xf32> to vector<8x8xbf16>
    %cst_102 = arith.constant dense<0.000000e+00> : vector<8x16xf32>
    %237 = tpu.matmul %236, %222, %cst_102 {dimension_numbers = #tpu.dot_dimension_numbers<[1], [0], [0], [1], [0, 0, 1, 1], [], []>} : vector<8x8xbf16>, vector<8x16xbf16>, vector<8x16xf32> -> vector<8x16xf32>
    %238 = tpu.concatenate %216, %237 in 0 : vector<8x16xf32>, vector<8x16xf32> -> vector<16x16xf32>
    %239 = vector.extract_strided_slice %186 {offsets = [0, 16], sizes = [16, 16], strides = [1, 1]} : vector<16x32xf32> to vector<16x16xf32>
    %240 = vector.extract_strided_slice %189 {offsets = [0, 16], sizes = [16, 16], strides = [1, 1]} : vector<16x32xf32> to vector<16x16xf32>
    %241 = vector.extract_strided_slice %192 {offsets = [0, 16], sizes = [16, 16], strides = [1, 1]} : vector<16x32xf32> to vector<16x16xf32>
    %242 = vector.extract_strided_slice %239 {offsets = [0, 0], sizes = [8, 16], strides = [1, 1]} : vector<16x16xf32> to vector<8x16xf32>
    %243 = arith.truncf %242 : vector<8x16xf32> to vector<8x16xbf16>
    %244 = vector.extract_strided_slice %240 {offsets = [0, 0], sizes = [8, 16], strides = [1, 1]} : vector<16x16xf32> to vector<8x16xf32>
    %245 = arith.truncf %244 : vector<8x16xf32> to vector<8x16xbf16>
    %246 = vector.extract_strided_slice %241 {offsets = [0, 0], sizes = [8, 16], strides = [1, 1]} : vector<16x16xf32> to vector<8x16xf32>
    %247 = arith.truncf %246 : vector<8x16xf32> to vector<8x16xbf16>
    %cst_103 = arith.constant dense<0.000000e+00> : vector<8x8xf32>
    %248 = tpu.matmul %243, %245, %cst_103 {dimension_numbers = #tpu.dot_dimension_numbers<[1], [1], [0], [0], [0, 0, 1, 0], [], []>} : vector<8x16xbf16>, vector<8x16xbf16>, vector<8x8xf32> -> vector<8x8xf32>
    %249 = vector.shape_cast %24 : vector<1x8x8xf32> to vector<8x8xf32>
    %250 = arith.addf %248, %249 : vector<8x8xf32>
    %cst_104 = arith.constant dense<0xFF800000> : vector<8xf32>
    %251 = vector.multi_reduction <maximumf>, %250, %cst_104 [1] : vector<8x8xf32> to vector<8xf32>
    %252 = vector.shape_cast %251 : vector<8xf32> to vector<8x1xf32>
    %253 = vector.broadcast %252 : vector<8x1xf32> to vector<8x8xf32>
    %254 = arith.subf %250, %253 : vector<8x8xf32>
    %255 = math.exp %254 : vector<8x8xf32>
    %cst_105 = arith.constant dense<0.000000e+00> : vector<8xf32>
    %256 = vector.multi_reduction <add>, %255, %cst_105 [1] : vector<8x8xf32> to vector<8xf32>
    %257 = vector.shape_cast %256 : vector<8xf32> to vector<8x1xf32>
    %258 = tpu.reciprocal %257 {approx = true} : vector<8x1xf32> -> vector<8x1xf32>
    %259 = vector.broadcast %258 : vector<8x1xf32> to vector<8x8xf32>
    %260 = arith.mulf %255, %259 : vector<8x8xf32>
    %261 = arith.truncf %260 : vector<8x8xf32> to vector<8x8xbf16>
    %cst_106 = arith.constant dense<0.000000e+00> : vector<8x16xf32>
    %262 = tpu.matmul %261, %247, %cst_106 {dimension_numbers = #tpu.dot_dimension_numbers<[1], [0], [0], [1], [0, 0, 1, 1], [], []>} : vector<8x8xbf16>, vector<8x16xbf16>, vector<8x16xf32> -> vector<8x16xf32>
    %263 = vector.extract_strided_slice %239 {offsets = [8, 0], sizes = [8, 16], strides = [1, 1]} : vector<16x16xf32> to vector<8x16xf32>
    %264 = arith.truncf %263 : vector<8x16xf32> to vector<8x16xbf16>
    %265 = vector.extract_strided_slice %240 {offsets = [8, 0], sizes = [8, 16], strides = [1, 1]} : vector<16x16xf32> to vector<8x16xf32>
    %266 = arith.truncf %265 : vector<8x16xf32> to vector<8x16xbf16>
    %267 = vector.extract_strided_slice %241 {offsets = [8, 0], sizes = [8, 16], strides = [1, 1]} : vector<16x16xf32> to vector<8x16xf32>
    %268 = arith.truncf %267 : vector<8x16xf32> to vector<8x16xbf16>
    %cst_107 = arith.constant dense<0.000000e+00> : vector<8x8xf32>
    %269 = tpu.matmul %264, %266, %cst_107 {dimension_numbers = #tpu.dot_dimension_numbers<[1], [1], [0], [0], [0, 0, 1, 0], [], []>} : vector<8x16xbf16>, vector<8x16xbf16>, vector<8x8xf32> -> vector<8x8xf32>
    %270 = vector.shape_cast %24 : vector<1x8x8xf32> to vector<8x8xf32>
    %271 = arith.addf %269, %270 : vector<8x8xf32>
    %cst_108 = arith.constant dense<0xFF800000> : vector<8xf32>
    %272 = vector.multi_reduction <maximumf>, %271, %cst_108 [1] : vector<8x8xf32> to vector<8xf32>
    %273 = vector.shape_cast %272 : vector<8xf32> to vector<8x1xf32>
    %274 = vector.broadcast %273 : vector<8x1xf32> to vector<8x8xf32>
    %275 = arith.subf %271, %274 : vector<8x8xf32>
    %276 = math.exp %275 : vector<8x8xf32>
    %cst_109 = arith.constant dense<0.000000e+00> : vector<8xf32>
    %277 = vector.multi_reduction <add>, %276, %cst_109 [1] : vector<8x8xf32> to vector<8xf32>
    %278 = vector.shape_cast %277 : vector<8xf32> to vector<8x1xf32>
    %279 = tpu.reciprocal %278 {approx = true} : vector<8x1xf32> -> vector<8x1xf32>
    %280 = vector.broadcast %279 : vector<8x1xf32> to vector<8x8xf32>
    %281 = arith.mulf %276, %280 : vector<8x8xf32>
    %282 = arith.truncf %281 : vector<8x8xf32> to vector<8x8xbf16>
    %cst_110 = arith.constant dense<0.000000e+00> : vector<8x16xf32>
    %283 = tpu.matmul %282, %268, %cst_110 {dimension_numbers = #tpu.dot_dimension_numbers<[1], [0], [0], [1], [0, 0, 1, 1], [], []>} : vector<8x8xbf16>, vector<8x16xbf16>, vector<8x16xf32> -> vector<8x16xf32>
    %284 = tpu.concatenate %262, %283 in 0 : vector<8x16xf32>, vector<8x16xf32> -> vector<16x16xf32>
    %285 = tpu.concatenate %238, %284 in 1 : vector<16x16xf32>, vector<16x16xf32> -> vector<16x32xf32>
    %286 = arith.truncf %285 : vector<16x32xf32> to vector<16x32xbf16>
    %cst_111 = arith.constant dense<0.000000e+00> : vector<16x32xf32>
    %287 = tpu.matmul %286, %176, %cst_111 {dimension_numbers = #tpu.dot_dimension_numbers<[1], [0], [0], [1], [0, 0, 1, 1], [], []>} : vector<16x32xbf16>, vector<32x32xbf16>, vector<16x32xf32> -> vector<16x32xf32>
    %288 = vector.broadcast %177 : vector<1x32xf32> to vector<16x32xf32>
    %289 = arith.addf %287, %288 : vector<16x32xf32>
    %290 = arith.addf %289, %169 : vector<16x32xf32>
    %cst_112 = arith.constant dense<0.000000e+00> : vector<16xf32>
    %291 = vector.multi_reduction <add>, %290, %cst_112 [1] : vector<16x32xf32> to vector<16xf32>
    %292 = vector.shape_cast %291 : vector<16xf32> to vector<16x1xf32>
    %cst_113 = arith.constant 3.200000e+01 : f32
    %293 = vector.broadcast %cst_113 : f32 to vector<16x1xf32>
    %294 = arith.divf %292, %293 : vector<16x1xf32>
    %295 = vector.broadcast %294 : vector<16x1xf32> to vector<16x32xf32>
    %296 = arith.subf %290, %295 : vector<16x32xf32>
    %297 = arith.mulf %296, %296 : vector<16x32xf32>
    %cst_114 = arith.constant dense<0.000000e+00> : vector<16xf32>
    %298 = vector.multi_reduction <add>, %297, %cst_114 [1] : vector<16x32xf32> to vector<16xf32>
    %299 = vector.shape_cast %298 : vector<16xf32> to vector<16x1xf32>
    %cst_115 = arith.constant 3.200000e+01 : f32
    %300 = vector.broadcast %cst_115 : f32 to vector<16x1xf32>
    %301 = arith.divf %299, %300 : vector<16x1xf32>
    %302 = vector.broadcast %294 : vector<16x1xf32> to vector<16x32xf32>
    %303 = arith.subf %290, %302 : vector<16x32xf32>
    %cst_116 = arith.constant 9.99999974E-6 : f32
    %304 = vector.broadcast %cst_116 : f32 to vector<16x1xf32>
    %305 = arith.addf %301, %304 : vector<16x1xf32>
    %306 = math.rsqrt %305 : vector<16x1xf32>
    %307 = vector.broadcast %306 : vector<16x1xf32> to vector<16x32xf32>
    %308 = arith.mulf %303, %307 : vector<16x32xf32>
    %309 = vector.broadcast %178 : vector<1x32xf32> to vector<16x32xf32>
    %310 = arith.mulf %308, %309 : vector<16x32xf32>
    %311 = vector.broadcast %179 : vector<1x32xf32> to vector<16x32xf32>
    %312 = arith.addf %310, %311 : vector<16x32xf32>
    %313 = vector.broadcast %12 : vector<16x1xf32> to vector<16x32xf32>
    %314 = arith.mulf %312, %313 : vector<16x32xf32>
    %c0_117 = arith.constant 0 : index
    %c0_118 = arith.constant 0 : index
    %315 = vector.load %arg28[%c0_117, %c0_118] : memref<32x64xbf16, #tpu.memory_space<vmem>>, vector<32x64xbf16>
    %c0_119 = arith.constant 0 : index
    %c0_120 = arith.constant 0 : index
    %316 = vector.load %arg29[%c0_119, %c0_120] : memref<1x64xf32, #tpu.memory_space<vmem>>, vector<1x64xf32>
    %c0_121 = arith.constant 0 : index
    %c0_122 = arith.constant 0 : index
    %317 = vector.load %arg30[%c0_121, %c0_122] : memref<64x32xbf16, #tpu.memory_space<vmem>>, vector<64x32xbf16>
    %c0_123 = arith.constant 0 : index
    %c0_124 = arith.constant 0 : index
    %318 = vector.load %arg31[%c0_123, %c0_124] : memref<1x32xf32, #tpu.memory_space<vmem>>, vector<1x32xf32>
    %c0_125 = arith.constant 0 : index
    %c0_126 = arith.constant 0 : index
    %319 = vector.load %arg32[%c0_125, %c0_126] : memref<1x32xf32, #tpu.memory_space<vmem>>, vector<1x32xf32>
    %c0_127 = arith.constant 0 : index
    %c0_128 = arith.constant 0 : index
    %320 = vector.load %arg33[%c0_127, %c0_128] : memref<1x32xf32, #tpu.memory_space<vmem>>, vector<1x32xf32>
    %321 = arith.truncf %314 : vector<16x32xf32> to vector<16x32xbf16>
    %cst_129 = arith.constant dense<0.000000e+00> : vector<16x64xf32>
    %322 = tpu.matmul %321, %315, %cst_129 {dimension_numbers = #tpu.dot_dimension_numbers<[1], [0], [0], [1], [0, 0, 1, 1], [], []>} : vector<16x32xbf16>, vector<32x64xbf16>, vector<16x64xf32> -> vector<16x64xf32>
    %323 = vector.broadcast %316 : vector<1x64xf32> to vector<16x64xf32>
    %324 = arith.addf %322, %323 : vector<16x64xf32>
    %cst_130 = arith.constant 0.000000e+00 : f32
    %325 = vector.broadcast %cst_130 : f32 to vector<16x64xf32>
    %326 = arith.maximumf %324, %325 : vector<16x64xf32>
    %327 = arith.truncf %326 : vector<16x64xf32> to vector<16x64xbf16>
    %cst_131 = arith.constant dense<0.000000e+00> : vector<16x32xf32>
    %328 = tpu.matmul %327, %317, %cst_131 {dimension_numbers = #tpu.dot_dimension_numbers<[1], [0], [0], [1], [0, 0, 1, 1], [], []>} : vector<16x64xbf16>, vector<64x32xbf16>, vector<16x32xf32> -> vector<16x32xf32>
    %329 = vector.broadcast %318 : vector<1x32xf32> to vector<16x32xf32>
    %330 = arith.addf %328, %329 : vector<16x32xf32>
    %331 = arith.addf %330, %314 : vector<16x32xf32>
    %cst_132 = arith.constant dense<0.000000e+00> : vector<16xf32>
    %332 = vector.multi_reduction <add>, %331, %cst_132 [1] : vector<16x32xf32> to vector<16xf32>
    %333 = vector.shape_cast %332 : vector<16xf32> to vector<16x1xf32>
    %cst_133 = arith.constant 3.200000e+01 : f32
    %334 = vector.broadcast %cst_133 : f32 to vector<16x1xf32>
    %335 = arith.divf %333, %334 : vector<16x1xf32>
    %336 = vector.broadcast %335 : vector<16x1xf32> to vector<16x32xf32>
    %337 = arith.subf %331, %336 : vector<16x32xf32>
    %338 = arith.mulf %337, %337 : vector<16x32xf32>
    %cst_134 = arith.constant dense<0.000000e+00> : vector<16xf32>
    %339 = vector.multi_reduction <add>, %338, %cst_134 [1] : vector<16x32xf32> to vector<16xf32>
    %340 = vector.shape_cast %339 : vector<16xf32> to vector<16x1xf32>
    %cst_135 = arith.constant 3.200000e+01 : f32
    %341 = vector.broadcast %cst_135 : f32 to vector<16x1xf32>
    %342 = arith.divf %340, %341 : vector<16x1xf32>
    %343 = vector.broadcast %335 : vector<16x1xf32> to vector<16x32xf32>
    %344 = arith.subf %331, %343 : vector<16x32xf32>
    %cst_136 = arith.constant 9.99999974E-6 : f32
    %345 = vector.broadcast %cst_136 : f32 to vector<16x1xf32>
    %346 = arith.addf %342, %345 : vector<16x1xf32>
    %347 = math.rsqrt %346 : vector<16x1xf32>
    %348 = vector.broadcast %347 : vector<16x1xf32> to vector<16x32xf32>
    %349 = arith.mulf %344, %348 : vector<16x32xf32>
    %350 = vector.broadcast %319 : vector<1x32xf32> to vector<16x32xf32>
    %351 = arith.mulf %349, %350 : vector<16x32xf32>
    %352 = vector.broadcast %320 : vector<1x32xf32> to vector<16x32xf32>
    %353 = arith.addf %351, %352 : vector<16x32xf32>
    %354 = vector.broadcast %12 : vector<16x1xf32> to vector<16x32xf32>
    %355 = arith.mulf %353, %354 : vector<16x32xf32>
    %356 = vector.extract_strided_slice %355 {offsets = [0, 0], sizes = [8, 32], strides = [1, 1]} : vector<16x32xf32> to vector<8x32xf32>
    %357 = vector.extract_strided_slice %355 {offsets = [8, 0], sizes = [8, 32], strides = [1, 1]} : vector<16x32xf32> to vector<8x32xf32>
    %358 = arith.truncf %356 : vector<8x32xf32> to vector<8x32xbf16>
    %c0_137 = arith.constant 0 : index
    %c0_138 = arith.constant 0 : index
    %359 = vector.load %arg34[%c0_137, %c0_138] : memref<32x32xbf16, #tpu.memory_space<vmem>>, vector<32x32xbf16>
    %cst_139 = arith.constant dense<0.000000e+00> : vector<8x32xf32>
    %360 = tpu.matmul %358, %359, %cst_139 {dimension_numbers = #tpu.dot_dimension_numbers<[1], [0], [0], [1], [0, 0, 1, 1], [], []>} : vector<8x32xbf16>, vector<32x32xbf16>, vector<8x32xf32> -> vector<8x32xf32>
    %361 = arith.truncf %357 : vector<8x32xf32> to vector<8x32xbf16>
    %c0_140 = arith.constant 0 : index
    %c0_141 = arith.constant 0 : index
    %362 = vector.load %arg35[%c0_140, %c0_141] : memref<32x32xbf16, #tpu.memory_space<vmem>>, vector<32x32xbf16>
    %cst_142 = arith.constant dense<0.000000e+00> : vector<8x32xf32>
    %363 = tpu.matmul %361, %362, %cst_142 {dimension_numbers = #tpu.dot_dimension_numbers<[1], [0], [0], [1], [0, 0, 1, 1], [], []>} : vector<8x32xbf16>, vector<32x32xbf16>, vector<8x32xf32> -> vector<8x32xf32>
    %364 = arith.addf %360, %363 : vector<8x32xf32>
    %c0_143 = arith.constant 0 : index
    %c0_144 = arith.constant 0 : index
    %365 = vector.load %arg36[%c0_143, %c0_144] : memref<1x32xf32, #tpu.memory_space<vmem>>, vector<1x32xf32>
    %366 = vector.broadcast %365 : vector<1x32xf32> to vector<8x32xf32>
    %367 = arith.addf %364, %366 : vector<8x32xf32>
    %cst_145 = arith.constant 0.000000e+00 : f32
    %368 = vector.broadcast %cst_145 : f32 to vector<8x32xf32>
    %369 = arith.cmpf oge, %367, %368 : vector<8x32xf32>
    %cst_146 = arith.constant 1.250000e-01 : f32
    %370 = vector.broadcast %cst_146 : f32 to vector<8x32xf32>
    %371 = arith.mulf %370, %367 : vector<8x32xf32>
    %372 = arith.select %369, %367, %371 : vector<8x32xi1>, vector<8x32xf32>
    %373 = vector.shape_cast %372 : vector<8x32xf32> to vector<1x8x32xf32>
    %c0_147 = arith.constant 0 : index
    %c0_148 = arith.constant 0 : index
    %c0_149 = arith.constant 0 : index
    %374 = vector.load %arg37[%c0_147, %c0_148, %c0_149] : memref<1x8x32xf32, #tpu.memory_space<vmem>>, vector<1x8x32xf32>
    tpu.vector_store %arg37[%c0_147, %c0_148, %c0_149], %373 {strides = array<i32>} : memref<1x8x32xf32, #tpu.memory_space<vmem>>, vector<1x8x32xf32>,
    return
  }
  func.func @transform_0(%arg0: i32) -> (i32, i32, i32) {
    %c0_i32 = arith.constant 0 : i32
    %c0_i32_0 = arith.constant 0 : i32
    %c0_i32_1 = arith.constant 0 : i32
    return %arg0, %c0_i32, %c0_i32_0 : i32, i32, i32
  }
  func.func @transform_1(%arg0: i32) -> (i32, i32, i32) {
    %c0_i32 = arith.constant 0 : i32
    %c0_i32_0 = arith.constant 0 : i32
    %c0_i32_1 = arith.constant 0 : i32
    return %arg0, %c0_i32, %c0_i32_0 : i32, i32, i32
  }
  func.func @transform_2(%arg0: i32) -> (i32, i32, i32) {
    %c0_i32 = arith.constant 0 : i32
    %c0_i32_0 = arith.constant 0 : i32
    %c0_i32_1 = arith.constant 0 : i32
    return %arg0, %c0_i32, %c0_i32_0 : i32, i32, i32
  }
  func.func @transform_3(%arg0: i32) -> (i32, i32, i32) {
    %c0_i32 = arith.constant 0 : i32
    %c0_i32_0 = arith.constant 0 : i32
    %c0_i32_1 = arith.constant 0 : i32
    return %arg0, %c0_i32, %c0_i32_0 : i32, i32, i32
  }
  func.func @transform_4(%arg0: i32) -> (i32, i32, i32) {
    %c0_i32 = arith.constant 0 : i32
    %c0_i32_0 = arith.constant 0 : i32
    %c0_i32_1 = arith.constant 0 : i32
    return %arg0, %c0_i32, %c0_i32_0 : i32, i32, i32
  }
  func.func @transform_5(%arg0: i32) -> (i32, i32, i32) {
    %c0_i32 = arith.constant 0 : i32
    %c0_i32_0 = arith.constant 0 : i32
    %c0_i32_1 = arith.constant 0 : i32
    return %arg0, %c0_i32, %c0_i32_0 : i32, i32, i32
  }
  func.func @transform_6(%arg0: i32) -> (i32, i32, i32) {
    %c0_i32 = arith.constant 0 : i32
    %c0_i32_0 = arith.constant 0 : i32
    %c0_i32_1 = arith.constant 0 : i32
    return %arg0, %c0_i32, %c0_i32_0 : i32, i32, i32
  }
  func.func @transform_7(%arg0: i32) -> (i32, i32) {
    %c0_i32 = arith.constant 0 : i32
    %c0_i32_0 = arith.constant 0 : i32
    %c0_i32_1 = arith.constant 0 : i32
    return %c0_i32, %c0_i32_0 : i32, i32
  }
  func.func @transform_8(%arg0: i32) -> (i32, i32) {
    %c0_i32 = arith.constant 0 : i32
    %c0_i32_0 = arith.constant 0 : i32
    %c0_i32_1 = arith.constant 0 : i32
    return %c0_i32, %c0_i32_0 : i32, i32
  }
  func.func @transform_9(%arg0: i32) -> (i32, i32) {
    %c0_i32 = arith.constant 0 : i32
    %c0_i32_0 = arith.constant 0 : i32
    %c0_i32_1 = arith.constant 0 : i32
    return %c0_i32, %c0_i32_0 : i32, i32
  }
  func.func @transform_10(%arg0: i32) -> (i32, i32) {
    %c0_i32 = arith.constant 0 : i32
    %c0_i32_0 = arith.constant 0 : i32
    %c0_i32_1 = arith.constant 0 : i32
    return %c0_i32, %c0_i32_0 : i32, i32
  }
  func.func @transform_11(%arg0: i32) -> (i32, i32) {
    %c0_i32 = arith.constant 0 : i32
    %c0_i32_0 = arith.constant 0 : i32
    %c0_i32_1 = arith.constant 0 : i32
    return %c0_i32, %c0_i32_0 : i32, i32
  }
  func.func @transform_12(%arg0: i32) -> (i32, i32) {
    %c0_i32 = arith.constant 0 : i32
    %c0_i32_0 = arith.constant 0 : i32
    %c0_i32_1 = arith.constant 0 : i32
    return %c0_i32, %c0_i32_0 : i32, i32
  }
  func.func @transform_13(%arg0: i32) -> (i32, i32) {
    %c0_i32 = arith.constant 0 : i32
    %c0_i32_0 = arith.constant 0 : i32
    %c0_i32_1 = arith.constant 0 : i32
    return %c0_i32, %c0_i32_0 : i32, i32
  }
  func.func @transform_14(%arg0: i32) -> (i32, i32) {
    %c0_i32 = arith.constant 0 : i32
    %c0_i32_0 = arith.constant 0 : i32
    %c0_i32_1 = arith.constant 0 : i32
    return %c0_i32, %c0_i32_0 : i32, i32
  }
  func.func @transform_15(%arg0: i32) -> (i32, i32) {
    %c0_i32 = arith.constant 0 : i32
    %c0_i32_0 = arith.constant 0 : i32
    %c0_i32_1 = arith.constant 0 : i32
    return %c0_i32, %c0_i32_0 : i32, i32
  }
  func.func @transform_16(%arg0: i32) -> (i32, i32) {
    %c0_i32 = arith.constant 0 : i32
    %c0_i32_0 = arith.constant 0 : i32
    %c0_i32_1 = arith.constant 0 : i32
    return %c0_i32, %c0_i32_0 : i32, i32
  }
  func.func @transform_17(%arg0: i32) -> (i32, i32) {
    %c0_i32 = arith.constant 0 : i32
    %c0_i32_0 = arith.constant 0 : i32
    %c0_i32_1 = arith.constant 0 : i32
    return %c0_i32, %c0_i32_0 : i32, i32
  }
  func.func @transform_18(%arg0: i32) -> (i32, i32) {
    %c0_i32 = arith.constant 0 : i32
    %c0_i32_0 = arith.constant 0 : i32
    %c0_i32_1 = arith.constant 0 : i32
    return %c0_i32, %c0_i32_0 : i32, i32
  }
  func.func @transform_19(%arg0: i32) -> (i32, i32) {
    %c0_i32 = arith.constant 0 : i32
    %c0_i32_0 = arith.constant 0 : i32
    %c0_i32_1 = arith.constant 0 : i32
    return %c0_i32, %c0_i32_0 : i32, i32
  }
  func.func @transform_20(%arg0: i32) -> (i32, i32) {
    %c0_i32 = arith.constant 0 : i32
    %c0_i32_0 = arith.constant 0 : i32
    %c0_i32_1 = arith.constant 0 : i32
    return %c0_i32, %c0_i32_0 : i32, i32
  }
  func.func @transform_21(%arg0: i32) -> (i32, i32) {
    %c0_i32 = arith.constant 0 : i32
    %c0_i32_0 = arith.constant 0 : i32
    %c0_i32_1 = arith.constant 0 : i32
    return %c0_i32, %c0_i32_0 : i32, i32
  }
  func.func @transform_22(%arg0: i32) -> (i32, i32) {
    %c0_i32 = arith.constant 0 : i32
    %c0_i32_0 = arith.constant 0 : i32
    %c0_i32_1 = arith.constant 0 : i32
    return %c0_i32, %c0_i32_0 : i32, i32
  }
  func.func @transform_23(%arg0: i32) -> (i32, i32) {
    %c0_i32 = arith.constant 0 : i32
    %c0_i32_0 = arith.constant 0 : i32
    %c0_i32_1 = arith.constant 0 : i32
    return %c0_i32, %c0_i32_0 : i32, i32
  }
  func.func @transform_24(%arg0: i32) -> (i32, i32) {
    %c0_i32 = arith.constant 0 : i32
    %c0_i32_0 = arith.constant 0 : i32
    %c0_i32_1 = arith.constant 0 : i32
    return %c0_i32, %c0_i32_0 : i32, i32
  }
  func.func @transform_25(%arg0: i32) -> (i32, i32) {
    %c0_i32 = arith.constant 0 : i32
    %c0_i32_0 = arith.constant 0 : i32
    %c0_i32_1 = arith.constant 0 : i32
    return %c0_i32, %c0_i32_0 : i32, i32
  }
  func.func @transform_26(%arg0: i32) -> (i32, i32) {
    %c0_i32 = arith.constant 0 : i32
    %c0_i32_0 = arith.constant 0 : i32
    %c0_i32_1 = arith.constant 0 : i32
    return %c0_i32, %c0_i32_0 : i32, i32
  }
  func.func @transform_27(%arg0: i32) -> (i32, i32) {
    %c0_i32 = arith.constant 0 : i32
    %c0_i32_0 = arith.constant 0 : i32
    %c0_i32_1 = arith.constant 0 : i32
    return %c0_i32, %c0_i32_0 : i32, i32
  }
  func.func @transform_28(%arg0: i32) -> (i32, i32) {
    %c0_i32 = arith.constant 0 : i32
    %c0_i32_0 = arith.constant 0 : i32
    %c0_i32_1 = arith.constant 0 : i32
    return %c0_i32, %c0_i32_0 : i32, i32
  }
  func.func @transform_29(%arg0: i32) -> (i32, i32) {
    %c0_i32 = arith.constant 0 : i32
    %c0_i32_0 = arith.constant 0 : i32
    %c0_i32_1 = arith.constant 0 : i32
    return %c0_i32, %c0_i32_0 : i32, i32
  }
  func.func @transform_30(%arg0: i32) -> (i32, i32) {
    %c0_i32 = arith.constant 0 : i32
    %c0_i32_0 = arith.constant 0 : i32
    %c0_i32_1 = arith.constant 0 : i32
    return %c0_i32, %c0_i32_0 : i32, i32
  }
  func.func @transform_31(%arg0: i32) -> (i32, i32) {
    %c0_i32 = arith.constant 0 : i32
    %c0_i32_0 = arith.constant 0 : i32
    %c0_i32_1 = arith.constant 0 : i32
    return %c0_i32, %c0_i32_0 : i32, i32
  }
  func.func @transform_32(%arg0: i32) -> (i32, i32) {
    %c0_i32 = arith.constant 0 : i32
    %c0_i32_0 = arith.constant 0 : i32
    %c0_i32_1 = arith.constant 0 : i32
    return %c0_i32, %c0_i32_0 : i32, i32
  }
  func.func @transform_33(%arg0: i32) -> (i32, i32) {
    %c0_i32 = arith.constant 0 : i32
    %c0_i32_0 = arith.constant 0 : i32
    %c0_i32_1 = arith.constant 0 : i32
    return %c0_i32, %c0_i32_0 : i32, i32
  }
  func.func @transform_34(%arg0: i32) -> (i32, i32) {
    %c0_i32 = arith.constant 0 : i32
    %c0_i32_0 = arith.constant 0 : i32
    %c0_i32_1 = arith.constant 0 : i32
    return %c0_i32, %c0_i32_0 : i32, i32
  }
  func.func @transform_35(%arg0: i32) -> (i32, i32) {
    %c0_i32 = arith.constant 0 : i32
    %c0_i32_0 = arith.constant 0 : i32
    %c0_i32_1 = arith.constant 0 : i32
    return %c0_i32, %c0_i32_0 : i32, i32
  }
  func.func @transform_36(%arg0: i32) -> (i32, i32, i32) {
    %c0_i32 = arith.constant 0 : i32
    %c0_i32_0 = arith.constant 0 : i32
    %c0_i32_1 = arith.constant 0 : i32
    return %arg0, %c0_i32, %c0_i32_0 : i32, i32, i32
  }
}

</mosaic_0001>

<bundles_post_ra>
// kernel: tpu_custom_call.1
= control target key start
LH: loop header
LB: loop body
LE: loop exit
PB: predicated region body
PF: predicated region fallthrough
CT: control target
= control target key end

     0   :  { %s4727_s6 = smov 1   ;;  %s4728_s10 = smov 2   ;;  %s5636_s0 = inlined_call_operand.smem [shape: u32[37], index: -1, kind: input, shape index: {}] }
   0x1   :  { %s4804_s5 = sld [smem:[%s5636_s0]]   ;;  %s4729_s14 = smov 3  }
   0x2   :  { %s4809_s9 = sld [smem:[%s5636_s0 + %s4727_s6]]   ;;  %s4730_s18 = smov 4  }
   0x3   :  { %s4814_s13 = sld [smem:[%s5636_s0 + %s4728_s10]]   ;;  %s4731_s22 = smov 5  }
   0x4   :  { %s4819_s17 = sld [smem:[%s5636_s0 + %s4729_s14]]   ;;  %s4732_s26 = smov 6  }
   0x5   :  { %s4824_s21 = sld [smem:[%s5636_s0 + %s4730_s18]]   ;;  %s4733_s30 = smov 7  }
   0x6   :  { %s4829_s25 = sld [smem:[%s5636_s0 + %s4731_s22]]   ;;  %s4734_s4 = smov 8  }
   0x7   :  { %5683 = sst [smem:[#allocation64_spill]] %s4804_s5  ;;  %s4735_s10 = smov 9  }
   0x8   :  { %5684 = sst [smem:[#allocation65_spill]] %s4809_s9  ;;  %s4736_s15 = smov 10  }
   0x9   :  { %5685 = sst [smem:[#allocation66_spill]] %s4814_s13  ;;  %s4737_s20 = smov 11  }
   0xa   :  { %5686 = sst [smem:[#allocation67_spill]] %s4819_s17  ;;  %s4739_s1 = smov 13  }
   0xb   :  { %5687 = sst [smem:[#allocation68_spill]] %s4824_s21  ;;  %s4740_s7 = smov 14  }
   0xc   :  { %5688 = sst [smem:[#allocation69_spill]] %s4829_s25  ;;  %s4742_s22 = smov 16  }
   0xd   :  { %s4834_s29 = sld [smem:[%s5636_s0 + %s4732_s26]]   ;;  %s4738_s26 = smov 12  }
   0xe   :  { %s4839_s3 = sld [smem:[%s5636_s0 + %s4733_s30]]   ;;  %s4743_s28 = smov 17  }
   0xf   :  { %s4844_s8 = sld [smem:[%s5636_s0 + %s4734_s4]]  }
  0x10   :  { %s4849_s14 = sld [smem:[%s5636_s0 + %s4735_s10]]  }
  0x11   :  { %s4854_s19 = sld [smem:[%s5636_s0 + %s4736_s15]]   ;;  %s4741_s15 = smov 15  }
  0x12   :  { %s4859_s24 = sld [smem:[%s5636_s0 + %s4737_s20]]  }
  0x13   :  { %5689 = sst [smem:[#allocation70_spill]] %s4834_s29 }
  0x14   :  { %5690 = sst [smem:[#allocation71_spill]] %s4839_s3 }
  0x15   :  { %5691 = sst [smem:[#allocation72_spill]] %s4844_s8 }
  0x16   :  { %5692 = sst [smem:[#allocation73_spill]] %s4849_s14 }
  0x17   :  { %5693 = sst [smem:[#allocation74_spill]] %s4854_s19 }
  0x18   :  { %5694 = sst [smem:[#allocation75_spill]] %s4859_s24 }
  0x19   :  { %s4864_s30 = sld [smem:[%s5636_s0 + %s4738_s26]]  }
  0x1a   :  { %s4869_s6 = sld [smem:[%s5636_s0 + %s4739_s1]]  }
  0x1b   :  { %s4874_s12 = sld [smem:[%s5636_s0 + %s4740_s7]]   ;;  %s4744_s7 = smov 18  }
  0x1c   :  { %s4879_s20 = sld [smem:[%s5636_s0 + %s4741_s15]]   ;;  %s4745_s15 = smov 19  }
  0x1d   :  { %s4884_s27 = sld [smem:[%s5636_s0 + %s4742_s22]]   ;;  %s4746_s22 = smov 20  }
  0x1e   :  { %s4889_s4 = sld [smem:[%s5636_s0 + %s4743_s28]]   ;;  %s4747_s28 = smov 21  }
  0x1f   :  { %s4894_s17 = sld [smem:[%s5636_s0 + %s4744_s7]]   ;;  %s4748_s7 = smov 22  }
  0x20   :  { %5695 = sst [smem:[#allocation76_spill]] %s4869_s6 }
  0x21   :  { %5696 = sst [smem:[#allocation77_spill]] %s4874_s12 }
  0x22   :  { %5697 = sst [smem:[#allocation78_spill]] %s4879_s20 }
  0x23   :  { %s4899_s13 = sld [smem:[%s5636_s0 + %s4745_s15]]   ;;  %s4749_s15 = smov 23  }
  0x24   :  { %5698 = sst [smem:[#allocation79_spill]] %s4889_s4 }
  0x25   :  { %5699 = sst [smem:[#allocation80_spill]] %s4894_s17 }
  0x26   :  { %s4904_s21 = sld [smem:[%s5636_s0 + %s4746_s22]]   ;;  %s4750_s22 = smov 24  }
  0x27   :  { %s4909_s9 = sld [smem:[%s5636_s0 + %s4747_s28]]   ;;  %s4751_s28 = smov 25  }
  0x28   :  { %s4914_s5 = sld [smem:[%s5636_s0 + %s4748_s7]]   ;;  %s4752_s7 = smov 26  }
  0x29   :  { %5700 = sst [smem:[#allocation81_spill]] %s4899_s13 }
  0x2a   :  { %s4919_s29 = sld [smem:[%s5636_s0 + %s4749_s15]]   ;;  %s4753_s15 = smov 27  }
  0x2b   :  { %s4924_s25 = sld [smem:[%s5636_s0 + %s4750_s22]]   ;;  %s4754_s22 = smov 28  }
  0x2c   :  { %s4934_s13 = sld [smem:[%s5636_s0 + %s4752_s7]]   ;;  %s4756_s7 = smov 30  }
  0x2d   :  { %5701 = sst [smem:[#allocation82_spill]] %s4909_s9 }
  0x2e   :  { %5702 = sst [smem:[#allocation83_spill]] %s4914_s5 }
  0x2f   :  { %s4929_s9 = sld [smem:[%s5636_s0 + %s4751_s28]]   ;;  %s4755_s28 = smov 29  }
  0x30   :  { %5703 = sst [smem:[#allocation84_spill]] %s4919_s29 }
  0x31   :  { %s4939_s29 = sld [smem:[%s5636_s0 + %s4753_s15]]   ;;  %s4757_s15 = smov 31  }
  0x32   :  { %5705 = sst [smem:[#allocation86_spill]] %s4934_s13 }
  0x33   :  { %s4944_s4 = sld [smem:[%s5636_s0 + %s4754_s22]]   ;;  %s4758_s22 = smov 32  }
  0x34   :  { %s4954_s20 = sld [smem:[%s5636_s0 + %s4756_s7]]   ;;  %s4760_s7 = smov 34  }
  0x35   :  { %5704 = sst [smem:[#allocation85_spill]] %s4929_s9 }
  0x36   :  { %s4949_s9 = sld [smem:[%s5636_s0 + %s4755_s28]]   ;;  %s4759_s28 = smov 33  }
  0x37   :  { %5706 = sst [smem:[#allocation87_spill]] %s4939_s29 }
  0x38   :  { %s4959_s29 = sld [smem:[%s5636_s0 + %s4757_s15]]   ;;  %s4761_s15 = smov 35  }
  0x39   :  { %5707 = sst [smem:[#allocation88_spill]] %s4944_s4 }
  0x3a   :  { %5709 = sst [smem:[#allocation90_spill]] %s4954_s20 }
  0x3b   :  { %s4964_s6 = sld [smem:[%s5636_s0 + %s4758_s22]]   ;;  %s4762_s22 = smov 36  }
  0x3c   :  { %5708 = sst [smem:[#allocation89_spill]] %s4949_s9 }
  0x3d   :  { %s4969_s9 = sld [smem:[%s5636_s0 + %s4759_s28]]  }
  0x3e   :  { %s4974_s20 = sld [smem:[%s5636_s0 + %s4760_s7]]  }
  0x3f   :  { %s4979_s24 = sld [smem:[%s5636_s0 + %s4761_s15]]  }
  0x41   :  { %5710 = sst [smem:[#allocation91_spill]] %s4964_s6 }
  0x42   :  { %s4984_s6 = sld [smem:[%s5636_s0 + %s4762_s22]]  }
  0x43   :  { %5711 = sst [smem:[#allocation92_spill]] %s4969_s9 }
  0x45   :  { %5712 = sst [smem:[#allocation93_spill]] %s4979_s24 }
  0x48   :  { %5713 = sst [smem:[#allocation94_spill]] %s4984_s6 }
  0x49   :  { %78 = vsyncpa [#allocation3], 0 }
  0x4a   :  { %80 = vsyncpa [#allocation3 + $0x1], 0 }
  0x4b   :  { %81 = vsyncpa [#allocation6], 0 }
  0x4c   :  { %83 = vsyncpa [#allocation6 + $0x1], 0 }
  0x4d   :  { %84 = vsyncpa [#allocation9], 0 }
  0x4e   :  { %85 = vsyncpa [#allocation12], 0 }
  0x4f   :  { %86 = vsyncpa [#allocation15], 0 }
  0x50   :  { %87 = vsyncpa [#allocation18], 0 }
  0x51   :  { %88 = vsyncpa [#allocation21], 0 }
  0x52   :  { %89 = vsyncpa [#allocation24], 0 }
  0x53   :  { %90 = vsyncpa [#allocation27], 0 }
  0x54   :  { %91 = vsyncpa [#allocation30], 0 }
  0x55   :  { %92 = vsyncpa [#allocation33], 0 }
  0x56   :  { %93 = vsyncpa [#allocation36], 0 }
  0x57   :  { %94 = vsyncpa [#allocation39], 0 }
  0x58   :  { %95 = vsyncpa [#allocation42], 0 }
  0x59   :  { %96 = vsyncpa [#allocation45], 0 }
  0x5a   :  { %97 = vsyncpa [#allocation4], 0 }
  0x5b   :  { %99 = vsyncpa [#allocation4 + $0x1], 0  ;;  %s4986_s0 = smov 0   ;;  %s4988_s28 = smov 0  }
  0x5c   :  { %s4990_s1 = smov 0   ;;  %s4992_s2 = smov 0  }
  0x5d LB: > { %s5714_s19 = sld [smem:[#allocation74_spill]]  ;;  %s5007_s7 = sadd.s32 4294967295, %s4725_s2   ;;  %s4713_s0 = sphi %s4986_s0, %s5766_s0   ;;  %s4725_s2 = sphi %s4992_s2, %s5764_s2   ;;  %s4721_s1 = sphi %s4990_s1, %s5768_s1   ;;  %s4717_s28 = sphi %s4988_s28, %s5767_s28  }
  0x5e   : > { %s5715_s17 = sld [smem:[#allocation80_spill]]  ;;  %s3231_s10 = sadd.s32 4294967294, %s4725_s2  }
  0x5f   : > { %s5716_s14 = sld [smem:[#allocation73_spill]]  ;;  %s5011_s11 = sadd.s32 1, %s4725_s2  }
  0x60   : > { %s5717_s13 = sld [smem:[#allocation86_spill]]  ;;  %s242_s15 = sadd.s32 1, %s4721_s1 }
  0x61   : > { %s5718_s12 = sld [smem:[#allocation77_spill]]  ;;  %s239_s16 = ssub.s32 %s4725_s2, %s5011_s11 }
  0x62   : > { %s5719_s8 = sld [smem:[#allocation72_spill]]  ;;  %p249_p0 = scmp.ne.s32.totalorder %s4721_s1, %s4717_s28 }
  0x63   : > { %s5720_s5 = sld [smem:[#allocation83_spill]]  ;;  %p240_p1 = scmp.eq.s32.totalorder %s239_s16, 0 }
  0x64   : > { %s5721_s4 = sld [smem:[#allocation88_spill]]  ;;  %p250_p2 = scmp.eq.s32.totalorder %s4725_s2, 0 }
  0x65   : > { %s5722_s3 = sld [smem:[#allocation71_spill]]  ;;  %p255_p3 = scmp.ne.s32.totalorder %s4717_s28, %s4713_s0 }
  0x66   : > { %5723 = sst [smem:[#allocation95_spill]] %s4713_s0  ;;  %p256_p4 = scmp.eq.s32.totalorder %s5007_s7, 0 }
  0x67   : > { %5724 = sst [smem:[#allocation96_spill]] %s5011_s11  ;;  %p5025_p5 = por %p250_p2, %p249_p0 }
  0x68   : > { %s5023_s18 = scalar_select %p240_p1, %s4721_s1, %s242_s15  }
  0x69   : > { %p5031_p6 = por %p256_p4, %p255_p3  ;;  %p914_p7 = scmp.eq.s32.totalorder %s5007_s7, 1 }
  0x6a   : > { %5725 = sst [smem:[#allocation97_spill]] %s5023_s18  ;;  %p920_p8 = scmp.eq.s32.totalorder %s3231_s10, 1 }
  0x6b   : > { %s5727_s23 = scalar_select %p5031_p6, 1, 0 }
  0x6c   : > { %p3232_p9 = scmp.ge.s32.totalorder %s4725_s2, 1  ;;  %p927_p10 = scmp.lt.s32.totalorder %s4725_s2, 3 }
  0x6d   : > { %5728 = sst [smem:[#allocation98_spill]] %s5727_s23  ;;  %p5038_p11 = por %p914_p7, %p249_p0 }
  0x6e   : > { %p5042_p12 = por %p920_p8, %p255_p3  ;;  %p5046_p13 = pnand %p3232_p9, %p927_p10 }
  0x6f   : > { %s5729_s26 = scalar_select %p5038_p11, 1, 0 }
  0x70   : > { %s5731_s15 = scalar_select %p5042_p12, 1, 0 }
  0x71   : > { %5730 = sst [smem:[#allocation99_spill]] %s5729_s26  ;;  %931 = sbr.rel (%p5046_p13) target bundleno = 452 (0x1c4), region = 12 }
  0x72   : > { %5732 = sst [smem:[#allocation100_spill]] %s5731_s15  ;;  %s953_s10 = sshll.u32 (!%p5046_p13), %s5719_s8, 4  ;;  %s954_s10 = int_to_ptr.hbm [resolvable:$true] %s953_s10 }
  0x73   : > { %s4763_s18 = smov (!%p5046_p13), [#allocation8]   ;;  %s979_s0 = sshll.u32 (!%p5046_p13), %s5714_s19, 4  ;;  %s980_s0 = int_to_ptr.hbm [resolvable:$true] %s979_s0 }
  0x74   : > { %s955_s11 = sshll.u32 (!%p5046_p13), %s4763_s18, 4  ;;  %s3811_s26 = sshra.s32 (!%p5046_p13), %s954_s10, 4  ;;  %s956_s11 = int_to_ptr.vmem [resolvable:$true] %s955_s11  ;;  %s3812_s26 = int_to_ptr.hbm [resolvable:$true] %s3811_s26 }
  0x75   : > { %s3813_s15 = scalar_lea.hbm (!%p5046_p13), %s3812_s26, 1  ;;  %s3817_s6 = scalar_lea.hbm (!%p5046_p13), %s5719_s8, 1 }
  0x76   : > { %p3814_p0 = scmp.ne.s32.totalorder %s3812_s26, %s3813_s15  ;;  %p3818_p3 = scmp.lt.s32.totalorder %s3812_s26, %s5719_s8 }
  0x77   : > { %p3819_p7 = scmp.lt.s32.totalorder %s3817_s6, %s3813_s15 }
  0x78   : > { %p3815_p1 = pnand %p3814_p0, %p256_p4 }
  0x79   : > { %p3820_p8 = por %p3819_p7, %p3818_p3 }
  0x7a   : > { %p3816_p2 = pneg %p3815_p1 }
  0x7c   : > { %p3821_p9 = pnand %p3820_p8, %p3816_p2 }
  0x7e   : > { %3824 = shalt.err (!%p3821_p9)
}
  0x7f   : > { %3464 = dma.hbm_to_vmem [thread:$0]  (%p256_p4), %s954_s10, 16, %s956_s11, [#allocation9]  }
  0x80   : > { %s4764_s18 = smov [#allocation11]   ;;  %s1005_s9 = sshll.u32 %s4864_s30, 4  ;;  %s5061_s9 = int_to_ptr.hbm [resolvable:$true] %s1005_s9 }
  0x81   : > { %s981_s24 = sshll.u32 %s4764_s18, 4  ;;  %s3839_s23 = sshra.s32 %s980_s0, 4  ;;  %s982_s24 = int_to_ptr.vmem [resolvable:$true] %s981_s24  ;;  %s3840_s23 = int_to_ptr.hbm [resolvable:$true] %s3839_s23 }
  0x82   : > { %s3841_s6 = scalar_lea.hbm %s3840_s23, 1  ;;  %s3845_s26 = scalar_lea.hbm %s5714_s19, 1 }
  0x83   : > { %p3842_p10 = scmp.ne.s32.totalorder %s3840_s23, %s3841_s6  ;;  %p3846_p2 = scmp.lt.s32.totalorder %s3840_s23, %s5714_s19 }
  0x84   : > { %p3847_p3 = scmp.lt.s32.totalorder %s3845_s26, %s3841_s6 }
  0x85   : > { %p3843_p0 = pnand %p3842_p10, %p256_p4 }
  0x86   : > { %p3848_p7 = por %p3847_p3, %p3846_p2 }
  0x87   : > { %p3844_p1 = pneg %p3843_p0 }
  0x89   : > { %p3849_p8 = pnand %p3848_p7, %p3844_p1 }
  0x8b   : > { %3852 = shalt.err (!%p3849_p8)
}
  0x8c   : > { %3468 = dma.hbm_to_vmem [thread:$0]  (%p256_p4), %s980_s0, 16, %s982_s24, [#allocation12]  }
  0x8d   : > { %s1031_s11 = sshll.u32 %s5718_s12, 4  ;;  %s4765_s15 = smov [#allocation14]   ;;  %s5070_s11 = int_to_ptr.hbm [resolvable:$true] %s1031_s11 }
  0x8e   : > { %s1007_s10 = sshll.u32 %s4765_s15, 4  ;;  %s3867_s18 = sshra.s32 %s5061_s9, 4  ;;  %s1008_s10 = int_to_ptr.vmem [resolvable:$true] %s1007_s10  ;;  %s3868_s18 = int_to_ptr.hbm [resolvable:$true] %s3867_s18 }
  0x8f   : > { %s3869_s23 = scalar_lea.hbm %s3868_s18, 1  ;;  %s3873_s6 = scalar_lea.hbm %s4864_s30, 1 }
  0x90   : > { %p3870_p9 = scmp.ne.s32.totalorder %s3868_s18, %s3869_s23  ;;  %p3874_p1 = scmp.lt.s32.totalorder %s3868_s18, %s4864_s30 }
  0x91   : > { %p3875_p2 = scmp.lt.s32.totalorder %s3873_s6, %s3869_s23 }
  0x92   : > { %p3871_p10 = pnand %p3870_p9, %p256_p4 }
  0x93   : > { %p3876_p3 = por %p3875_p2, %p3874_p1 }
  0x94   : > { %p3872_p0 = pneg %p3871_p10 }
  0x96   : > { %p3877_p7 = pnand %p3876_p3, %p3872_p0 }
  0x98   : > { %3880 = shalt.err (!%p3877_p7)
}
  0x99   : > { %3472 = dma.hbm_to_vmem [thread:$0]  (%p256_p4), %s5061_s9, 16, %s1008_s10, [#allocation15]  }
  0x9a   : > { %s4766_s24 = smov [#allocation17]   ;;  %s1055_s26 = sshll.u32 %s4884_s27, 4  ;;  %s5081_s26 = int_to_ptr.hbm [resolvable:$true] %s1055_s26 }
  0x9b   : > { %s1033_s0 = sshll.u32 %s4766_s24, 4  ;;  %s3895_s15 = sshra.s32 %s5070_s11, 4  ;;  %s1034_s0 = int_to_ptr.vmem [resolvable:$true] %s1033_s0  ;;  %s3896_s15 = int_to_ptr.hbm [resolvable:$true] %s3895_s15 }
  0x9c   : > { %s3897_s18 = scalar_lea.hbm %s3896_s15, 1  ;;  %s3901_s23 = scalar_lea.hbm %s5718_s12, 1 }
  0x9d   : > { %p3898_p8 = scmp.ne.s32.totalorder %s3896_s15, %s3897_s18  ;;  %p3902_p0 = scmp.lt.s32.totalorder %s3896_s15, %s5718_s12 }
  0x9e   : > { %p3903_p1 = scmp.lt.s32.totalorder %s3901_s23, %s3897_s18 }
  0x9f   : > { %p3899_p9 = pnand %p3898_p8, %p256_p4 }
  0xa0   : > { %p3904_p2 = por %p3903_p1, %p3902_p0 }
  0xa1   : > { %p3900_p10 = pneg %p3899_p9 }
  0xa3   : > { %p3905_p3 = pnand %p3904_p2, %p3900_p10 }
  0xa5   : > { %3908 = shalt.err (!%p3905_p3)
}
  0xa6   : > { %3476 = dma.hbm_to_vmem [thread:$0]  (%p256_p4), %s5070_s11, 16, %s1034_s0, [#allocation18]  }
  0xa7   : > { %s1081_s9 = sshll.u32 %s5715_s17, 4  ;;  %s4767_s10 = smov [#allocation20]   ;;  %s5092_s9 = int_to_ptr.hbm [resolvable:$true] %s1081_s9 }
  0xa8   : > { %s1057_s6 = sshll.u32 %s4767_s10, 4  ;;  %s3923_s24 = sshra.s32 %s5081_s26, 4  ;;  %s1058_s6 = int_to_ptr.vmem [resolvable:$true] %s1057_s6  ;;  %s3924_s24 = int_to_ptr.hbm [resolvable:$true] %s3923_s24 }
  0xa9   : > { %s3925_s15 = scalar_lea.hbm %s3924_s24, 1  ;;  %s3929_s18 = scalar_lea.hbm %s4884_s27, 1 }
  0xaa   : > { %p3926_p7 = scmp.ne.s32.totalorder %s3924_s24, %s3925_s15  ;;  %p3930_p10 = scmp.lt.s32.totalorder %s3924_s24, %s4884_s27 }
  0xab   : > { %p3931_p0 = scmp.lt.s32.totalorder %s3929_s18, %s3925_s15 }
  0xac   : > { %p3927_p8 = pnand %p3926_p7, %p256_p4 }
  0xad   : > { %p3932_p1 = por %p3931_p0, %p3930_p10 }
  0xae   : > { %p3928_p9 = pneg %p3927_p8 }
  0xb0   : > { %p3933_p2 = pnand %p3932_p1, %p3928_p9 }
  0xb2   : > { %3936 = shalt.err (!%p3933_p2)
}
  0xb3   : > { %3480 = dma.hbm_to_vmem [thread:$0]  (%p256_p4), %s5081_s26, 16, %s1058_s6, [#allocation21]  }
  0xb4   : > { %s4768_s11 = smov [#allocation23]   ;;  %s1107_s23 = sshll.u32 %s4904_s21, 4  ;;  %s5103_s23 = int_to_ptr.hbm [resolvable:$true] %s1107_s23 }
  0xb5   : > { %s1083_s0 = sshll.u32 %s4768_s11, 4  ;;  %s3951_s10 = sshra.s32 %s5092_s9, 4  ;;  %s1084_s0 = int_to_ptr.vmem [resolvable:$true] %s1083_s0  ;;  %s3952_s10 = int_to_ptr.hbm [resolvable:$true] %s3951_s10 }
  0xb6   : > { %s3953_s24 = scalar_lea.hbm %s3952_s10, 1  ;;  %s3957_s15 = scalar_lea.hbm %s5715_s17, 1 }
  0xb7   : > { %p3954_p3 = scmp.ne.s32.totalorder %s3952_s10, %s3953_s24  ;;  %p3958_p9 = scmp.lt.s32.totalorder %s3952_s10, %s5715_s17 }
  0xb8   : > { %p3959_p10 = scmp.lt.s32.totalorder %s3957_s15, %s3953_s24 }
  0xb9   : > { %p3955_p7 = pnand %p3954_p3, %p256_p4 }
  0xba   : > { %p3960_p0 = por %p3959_p10, %p3958_p9 }
  0xbb   : > { %p3956_p8 = pneg %p3955_p7 }
  0xbd   : > { %p3961_p1 = pnand %p3960_p0, %p3956_p8 }
  0xbf   : > { %3964 = shalt.err (!%p3961_p1)
}
  0xc0   : > { %3484 = dma.hbm_to_vmem [thread:$0]  (%p256_p4), %s5092_s9, 16, %s1084_s0, [#allocation24]  }
  0xc1   : > { %s1133_s26 = sshll.u32 %s5720_s5, 4  ;;  %s4769_s6 = smov [#allocation26]   ;;  %s5114_s26 = int_to_ptr.hbm [resolvable:$true] %s1133_s26 }
  0xc2   : > { %s1109_s18 = sshll.u32 %s4769_s6, 4  ;;  %s3979_s11 = sshra.s32 %s5103_s23, 4  ;;  %s1110_s18 = int_to_ptr.vmem [resolvable:$true] %s1109_s18  ;;  %s3980_s11 = int_to_ptr.hbm [resolvable:$true] %s3979_s11 }
  0xc3   : > { %s3981_s10 = scalar_lea.hbm %s3980_s11, 1  ;;  %s3985_s24 = scalar_lea.hbm %s4904_s21, 1 }
  0xc4   : > { %p3982_p2 = scmp.ne.s32.totalorder %s3980_s11, %s3981_s10  ;;  %p3986_p8 = scmp.lt.s32.totalorder %s3980_s11, %s4904_s21 }
  0xc5   : > { %p3987_p9 = scmp.lt.s32.totalorder %s3985_s24, %s3981_s10 }
  0xc6   : > { %p3983_p3 = pnand %p3982_p2, %p256_p4 }
  0xc7   : > { %p3988_p10 = por %p3987_p9, %p3986_p8 }
  0xc8   : > { %p3984_p7 = pneg %p3983_p3 }
  0xca   : > { %p3989_p0 = pnand %p3988_p10, %p3984_p7 }
  0xcc   : > { %3992 = shalt.err (!%p3989_p0)
}
  0xcd   : > { %3488 = dma.hbm_to_vmem [thread:$0]  (%p256_p4), %s5103_s23, 16, %s1110_s18, [#allocation27]  }
  0xce   : > { %s4770_s9 = smov [#allocation29]   ;;  %s1159_s15 = sshll.u32 %s4924_s25, 4  ;;  %s5125_s15 = int_to_ptr.hbm [resolvable:$true] %s1159_s15 }
  0xcf   : > { %s1135_s0 = sshll.u32 %s4770_s9, 4  ;;  %s4007_s6 = sshra.s32 %s5114_s26, 4  ;;  %s1136_s0 = int_to_ptr.vmem [resolvable:$true] %s1135_s0  ;;  %s4008_s6 = int_to_ptr.hbm [resolvable:$true] %s4007_s6 }
  0xd0   : > { %s4009_s11 = scalar_lea.hbm %s4008_s6, 1  ;;  %s4013_s10 = scalar_lea.hbm %s5720_s5, 1 }
  0xd1   : > { %p4010_p1 = scmp.ne.s32.totalorder %s4008_s6, %s4009_s11  ;;  %p4014_p7 = scmp.lt.s32.totalorder %s4008_s6, %s5720_s5 }
  0xd2   : > { %p4015_p8 = scmp.lt.s32.totalorder %s4013_s10, %s4009_s11 }
  0xd3   : > { %p4011_p2 = pnand %p4010_p1, %p256_p4 }
  0xd4   : > { %p4016_p9 = por %p4015_p8, %p4014_p7 }
  0xd5   : > { %p4012_p3 = pneg %p4011_p2 }
  0xd7   : > { %p4017_p10 = pnand %p4016_p9, %p4012_p3 }
  0xd9   : > { %4020 = shalt.err (!%p4017_p10)
}
  0xda   : > { %3492 = dma.hbm_to_vmem [thread:$0]  (%p256_p4), %s5114_s26, 16, %s1136_s0, [#allocation30]  }
  0xdb   : > { %s1183_s23 = sshll.u32 %s5717_s13, 4  ;;  %s4771_s18 = smov [#allocation32]   ;;  %s5136_s23 = int_to_ptr.hbm [resolvable:$true] %s1183_s23 }
  0xdc   : > { %s1161_s24 = sshll.u32 %s4771_s18, 4  ;;  %s4035_s9 = sshra.s32 %s5125_s15, 4  ;;  %s1162_s24 = int_to_ptr.vmem [resolvable:$true] %s1161_s24  ;;  %s4036_s9 = int_to_ptr.hbm [resolvable:$true] %s4035_s9 }
  0xdd   : > { %s4037_s6 = scalar_lea.hbm %s4036_s9, 1  ;;  %s4041_s11 = scalar_lea.hbm %s4924_s25, 1 }
  0xde   : > { %p4038_p0 = scmp.ne.s32.totalorder %s4036_s9, %s4037_s6  ;;  %p4042_p3 = scmp.lt.s32.totalorder %s4036_s9, %s4924_s25 }
  0xdf   : > { %p4043_p7 = scmp.lt.s32.totalorder %s4041_s11, %s4037_s6 }
  0xe0   : > { %p4039_p1 = pnand %p4038_p0, %p256_p4 }
  0xe1   : > { %p4044_p8 = por %p4043_p7, %p4042_p3 }
  0xe2   : > { %p4040_p2 = pneg %p4039_p1 }
  0xe4   : > { %p4045_p9 = pnand %p4044_p8, %p4040_p2 }
  0xe6   : > { %4048 = shalt.err (!%p4045_p9)
}
  0xe7   : > { %3496 = dma.hbm_to_vmem [thread:$0]  (%p256_p4), %s5125_s15, 16, %s1162_s24, [#allocation33]  }
  0xe8   : > { %s4772_s26 = smov [#allocation35]   ;;  %s1209_s10 = sshll.u32 %s5721_s4, 4  ;;  %s5147_s10 = int_to_ptr.hbm [resolvable:$true] %s1209_s10 }
  0xe9   : > { %s1185_s0 = sshll.u32 %s4772_s26, 4  ;;  %s4063_s18 = sshra.s32 %s5136_s23, 4  ;;  %s1186_s0 = int_to_ptr.vmem [resolvable:$true] %s1185_s0  ;;  %s4064_s18 = int_to_ptr.hbm [resolvable:$true] %s4063_s18 }
  0xea   : > { %s4065_s9 = scalar_lea.hbm %s4064_s18, 1  ;;  %s4069_s6 = scalar_lea.hbm %s5717_s13, 1 }
  0xeb   : > { %p4066_p10 = scmp.ne.s32.totalorder %s4064_s18, %s4065_s9  ;;  %p4070_p2 = scmp.lt.s32.totalorder %s4064_s18, %s5717_s13 }
  0xec   : > { %p4071_p3 = scmp.lt.s32.totalorder %s4069_s6, %s4065_s9 }
  0xed   : > { %p4067_p0 = pnand %p4066_p10, %p256_p4 }
  0xee   : > { %p4072_p7 = por %p4071_p3, %p4070_p2 }
  0xef   : > { %p4068_p1 = pneg %p4067_p0 }
  0xf1   : > { %p4073_p8 = pnand %p4072_p7, %p4068_p1 }
  0xf3   : > { %4076 = shalt.err (!%p4073_p8)
}
  0xf4   : > { %3500 = dma.hbm_to_vmem [thread:$0]  (%p256_p4), %s5136_s23, 16, %s1186_s0, [#allocation36]  }
  0xf5   : > { %s1236_s15 = sshll.u32 %s4959_s29, 4  ;;  %s4773_s24 = smov [#allocation38]   ;;  %s5158_s15 = int_to_ptr.hbm [resolvable:$true] %s1236_s15 }
  0xf6   : > { %s1211_s11 = sshll.u32 %s4773_s24, 4  ;;  %s4091_s26 = sshra.s32 %s5147_s10, 4  ;;  %s1212_s11 = int_to_ptr.vmem [resolvable:$true] %s1211_s11  ;;  %s4092_s26 = int_to_ptr.hbm [resolvable:$true] %s4091_s26 }
  0xf7   : > { %s4093_s18 = scalar_lea.hbm %s4092_s26, 1  ;;  %s4097_s9 = scalar_lea.hbm %s5721_s4, 1 }
  0xf8   : > { %p4094_p9 = scmp.ne.s32.totalorder %s4092_s26, %s4093_s18  ;;  %p4098_p1 = scmp.lt.s32.totalorder %s4092_s26, %s5721_s4 }
  0xf9   : > { %p4099_p2 = scmp.lt.s32.totalorder %s4097_s9, %s4093_s18 }
  0xfa   : > { %p4095_p10 = pnand %p4094_p9, %p256_p4 }
  0xfb   : > { %p4100_p3 = por %p4099_p2, %p4098_p1 }
  0xfc   : > { %p4096_p0 = pneg %p4095_p10 }
  0xfe   : > { %p4101_p7 = pnand %p4100_p3, %p4096_p0 }
 0x100   : > { %4104 = shalt.err (!%p4101_p7)
}
 0x101   : > { %3504 = dma.hbm_to_vmem [thread:$0]  (%p256_p4), %s5147_s10, 16, %s1212_s11, [#allocation39]  }
 0x102   : > { %s4774_s23 = smov [#allocation41]   ;;  %s938_s6 = sshll.u32 %s5722_s3, 4  ;;  %s939_s6 = int_to_ptr.hbm [resolvable:$true] %s938_s6 }
 0x103   : > { %s1238_s0 = sshll.u32 %s4774_s23, 4  ;;  %s4119_s24 = sshra.s32 %s5158_s15, 4  ;;  %s1239_s0 = int_to_ptr.vmem [resolvable:$true] %s1238_s0  ;;  %s4120_s24 = int_to_ptr.hbm [resolvable:$true] %s4119_s24 }
 0x104   : > { %s4121_s26 = scalar_lea.hbm %s4120_s24, 1  ;;  %s4125_s18 = scalar_lea.hbm %s4959_s29, 1 }
 0x105   : > { %p4122_p8 = scmp.ne.s32.totalorder %s4120_s24, %s4121_s26  ;;  %p4126_p0 = scmp.lt.s32.totalorder %s4120_s24, %s4959_s29 }
 0x106   : > { %p4127_p1 = scmp.lt.s32.totalorder %s4125_s18, %s4121_s26 }
 0x107   : > { %p4123_p9 = pnand %p4122_p8, %p256_p4 }
 0x108   : > { %p4128_p2 = por %p4127_p1, %p4126_p0 }
 0x109   : > { %p4124_p10 = pneg %p4123_p9 }
 0x10b   : > { %p4129_p3 = pnand %p4128_p2, %p4124_p10 }
 0x10d   : > { %4132 = shalt.err (!%p4129_p3)
}
 0x10e   : > { %3508 = dma.hbm_to_vmem [thread:$0]  (%p256_p4), %s5158_s15, 16, %s1239_s0, [#allocation42]  }
 0x10f   : > { %s4775_s10 = smov [#allocation7]   ;;  %s4147_s9 = sshra.s32 %s939_s6, 4  ;;  %s4148_s9 = int_to_ptr.hbm [resolvable:$true] %s4147_s9 }
 0x110   : > { %s940_s11 = sshll.u32 %s4775_s10, 4  ;;  %s4149_s23 = scalar_lea.hbm %s4148_s9, 16  ;;  %s941_s11 = int_to_ptr.vmem [resolvable:$true] %s940_s11 }
 0x111   : > { %p4150_p7 = scmp.ne.s32.totalorder %s4148_s9, %s4149_s23  ;;  %s4153_s24 = scalar_lea.hbm %s5722_s3, 16 }
 0x112   : > { %p4154_p10 = scmp.lt.s32.totalorder %s4148_s9, %s5722_s3  ;;  %p4155_p0 = scmp.lt.s32.totalorder %s4153_s24, %s4149_s23 }
 0x113   : > { %p4151_p8 = pnand %p4150_p7, %p256_p4 }
 0x114   : > { %p4156_p1 = por %p4155_p0, %p4154_p10 }
 0x115   : > { %p4152_p9 = pneg %p4151_p8 }
 0x117   : > { %p4157_p2 = pnand %p4156_p1, %p4152_p9 }
 0x119   : > { %4160 = shalt.err (!%p4157_p2)
}
 0x11a   : > { %s5666_s26 = smov 64   ;;  %s5734_s15 = sld [smem:[#allocation75_spill]] }
 0x11b   : > { %s5673_s0 = smov 4   ;;  %s964_s18 = sshll.u32 %s5716_s14, 4  ;;  %s965_s18 = int_to_ptr.hbm [resolvable:$true] %s964_s18 }
 0x11c   : > { %3462 = dma.hbm_to_vmem [thread:$0]  (%p256_p4), %s939_s6, 256, %s941_s11, [#allocation6], %s5666_s26, %s5666_s26, %s5673_s0  }
 0x11d   : > { %s4778_s10 = smov [#allocation10]   ;;  %s4175_s24 = sshra.s32 %s965_s18, 4  ;;  %s4176_s24 = int_to_ptr.hbm [resolvable:$true] %s4175_s24 }
 0x11e   : > { %s966_s9 = sshll.u32 %s4778_s10, 4  ;;  %s4177_s3 = scalar_lea.hbm %s4176_s24, 16  ;;  %s967_s9 = int_to_ptr.vmem [resolvable:$true] %s966_s9 }
 0x11f   : > { %p4178_p3 = scmp.ne.s32.totalorder %s4176_s24, %s4177_s3  ;;  %s4181_s4 = scalar_lea.hbm %s5716_s14, 16 }
 0x120   : > { %s990_s23 = sshll.u32 %s5734_s15, 4  ;;  %p4182_p9 = scmp.lt.s32.totalorder %s4176_s24, %s5716_s14  ;;  %s991_s23 = int_to_ptr.hbm [resolvable:$true] %s990_s23 }
 0x121   : > { %p4179_p7 = pnand %p4178_p3, %p256_p4  ;;  %p4183_p10 = scmp.lt.s32.totalorder %s4181_s4, %s4177_s3 }
 0x123   : > { %p4180_p8 = pneg %p4179_p7  ;;  %p4184_p0 = por %p4183_p10, %p4182_p9 }
 0x125   : > { %p4185_p1 = pnand %p4184_p0, %p4180_p8 }
 0x127   : > { %4188 = shalt.err (!%p4185_p1)
}
 0x128   : > { %s5735_s6 = sld [smem:[#allocation76_spill]]  ;;  %s4779_s11 = smov [#allocation13]  }
 0x129   : > { %3466 = dma.hbm_to_vmem [thread:$0]  (%p256_p4), %s965_s18, 256, %s967_s9, [#allocation9], %s5666_s26, %s5666_s26, %s5673_s0  }
 0x12a   : > { %s992_s10 = sshll.u32 %s4779_s11, 4  ;;  %s4203_s3 = sshra.s32 %s991_s23, 4  ;;  %s993_s10 = int_to_ptr.vmem [resolvable:$true] %s992_s10  ;;  %s4204_s3 = int_to_ptr.hbm [resolvable:$true] %s4203_s3 }
 0x12b   : > { %s4205_s4 = scalar_lea.hbm %s4204_s3, 16  ;;  %s4209_s24 = scalar_lea.hbm %s5734_s15, 16 }
 0x12c   : > { %p4206_p2 = scmp.ne.s32.totalorder %s4204_s3, %s4205_s4  ;;  %p4210_p8 = scmp.lt.s32.totalorder %s4204_s3, %s5734_s15 }
 0x12d   : > { %p4211_p9 = scmp.lt.s32.totalorder %s4209_s24, %s4205_s4 }
 0x12e   : > { %s1016_s5 = sshll.u32 %s5735_s6, 4  ;;  %p4207_p3 = pnand %p4206_p2, %p256_p4  ;;  %s5198_s5 = int_to_ptr.hbm [resolvable:$true] %s1016_s5 }
 0x12f   : > { %p4212_p10 = por %p4211_p9, %p4210_p8 }
 0x130   : > { %p4208_p7 = pneg %p4207_p3 }
 0x132   : > { %p4213_p0 = pnand %p4212_p10, %p4208_p7 }
 0x134   : > { %4216 = shalt.err (!%p4213_p0)
}
 0x135   : > { %s5736_s18 = sld [smem:[#allocation78_spill]]  ;;  %s4780_s11 = smov [#allocation16]  }
 0x136   : > { %3470 = dma.hbm_to_vmem [thread:$0]  (%p256_p4), %s991_s23, 256, %s993_s10, [#allocation12], %s5666_s26, %s5666_s26, %s5673_s0  }
 0x137   : > { %s1018_s8 = sshll.u32 %s4780_s11, 4  ;;  %s4231_s3 = sshra.s32 %s5198_s5, 4  ;;  %s1019_s8 = int_to_ptr.vmem [resolvable:$true] %s1018_s8  ;;  %s4232_s3 = int_to_ptr.hbm [resolvable:$true] %s4231_s3 }
 0x138   : > { %s4233_s4 = scalar_lea.hbm %s4232_s3, 16  ;;  %s4237_s24 = scalar_lea.hbm %s5735_s6, 16 }
 0x139   : > { %p4234_p1 = scmp.ne.s32.totalorder %s4232_s3, %s4233_s4  ;;  %p4238_p7 = scmp.lt.s32.totalorder %s4232_s3, %s5735_s6 }
 0x13a   : > { %p4239_p8 = scmp.lt.s32.totalorder %s4237_s24, %s4233_s4 }
 0x13b   : > { %s1043_s9 = sshll.u32 %s5736_s18, 4  ;;  %p4235_p2 = pnand %p4234_p1, %p256_p4  ;;  %s5210_s9 = int_to_ptr.hbm [resolvable:$true] %s1043_s9 }
 0x13c   : > { %p4240_p9 = por %p4239_p8, %p4238_p7 }
 0x13d   : > { %p4236_p3 = pneg %p4235_p2 }
 0x13f   : > { %p4241_p10 = pnand %p4240_p9, %p4236_p3 }
 0x141   : > { %4244 = shalt.err (!%p4241_p10)
}
 0x142   : > { %s5737_s23 = sld [smem:[#allocation79_spill]]  ;;  %s4781_s10 = smov [#allocation19]  }
 0x143   : > { %3474 = dma.hbm_to_vmem [thread:$0]  (%p256_p4), %s5198_s5, 256, %s1019_s8, [#allocation15], %s5666_s26, %s5666_s26, %s5673_s0  }
 0x144   : > { %s1045_s11 = sshll.u32 %s4781_s10, 4  ;;  %s4259_s3 = sshra.s32 %s5210_s9, 4  ;;  %s1046_s11 = int_to_ptr.vmem [resolvable:$true] %s1045_s11  ;;  %s4260_s3 = int_to_ptr.hbm [resolvable:$true] %s4259_s3 }
 0x145   : > { %s4261_s4 = scalar_lea.hbm %s4260_s3, 1  ;;  %s4265_s24 = scalar_lea.hbm %s5736_s18, 1 }
 0x146   : > { %p4262_p0 = scmp.ne.s32.totalorder %s4260_s3, %s4261_s4  ;;  %p4266_p3 = scmp.lt.s32.totalorder %s4260_s3, %s5736_s18 }
 0x147   : > { %p4267_p7 = scmp.lt.s32.totalorder %s4265_s24, %s4261_s4 }
 0x148   : > { %s1066_s12 = sshll.u32 %s5737_s23, 4  ;;  %p4263_p1 = pnand %p4262_p0, %p256_p4  ;;  %s5224_s12 = int_to_ptr.hbm [resolvable:$true] %s1066_s12 }
 0x149   : > { %p4268_p8 = por %p4267_p7, %p4266_p3 }
 0x14a   : > { %p4264_p2 = pneg %p4263_p1 }
 0x14c   : > { %p4269_p9 = pnand %p4268_p8, %p4264_p2 }
 0x14e   : > { %4272 = shalt.err (!%p4269_p9)
}
 0x14f   : > { %s5738_s5 = sld [smem:[#allocation81_spill]]  ;;  %s4782_s10 = smov [#allocation22]  }
 0x150   : > { %3478 = dma.hbm_to_vmem [thread:$0]  (%p256_p4), %s5210_s9, 16, %s1046_s11, [#allocation18]  }
 0x151   : > { %s1068_s26 = sshll.u32 %s4782_s10, 4  ;;  %s4287_s3 = sshra.s32 %s5224_s12, 4  ;;  %s1069_s26 = int_to_ptr.vmem [resolvable:$true] %s1068_s26  ;;  %s4288_s3 = int_to_ptr.hbm [resolvable:$true] %s4287_s3 }
 0x152   : > { %s4289_s4 = scalar_lea.hbm %s4288_s3, 16  ;;  %s4293_s24 = scalar_lea.hbm %s5737_s23, 16 }
 0x153   : > { %p4290_p10 = scmp.ne.s32.totalorder %s4288_s3, %s4289_s4  ;;  %p4294_p2 = scmp.lt.s32.totalorder %s4288_s3, %s5737_s23 }
 0x154   : > { %p4295_p3 = scmp.lt.s32.totalorder %s4293_s24, %s4289_s4 }
 0x155   : > { %s1092_s8 = sshll.u32 %s5738_s5, 4  ;;  %p4291_p0 = pnand %p4290_p10, %p256_p4  ;;  %s5235_s8 = int_to_ptr.hbm [resolvable:$true] %s1092_s8 }
 0x156   : > { %p4296_p7 = por %p4295_p3, %p4294_p2 }
 0x157   : > { %p4292_p1 = pneg %p4291_p0 }
 0x159   : > { %p4297_p8 = pnand %p4296_p7, %p4292_p1 }
 0x15b   : > { %4300 = shalt.err (!%p4297_p8)
}
 0x15c   : > { %s5739_s9 = smov 64   ;;  %s5740_s11 = sld [smem:[#allocation82_spill]] }
 0x15d   : > { %3482 = dma.hbm_to_vmem [thread:$0]  (%p256_p4), %s5224_s12, 256, %s1069_s26, [#allocation21], %s5739_s9, %s5739_s9, %s5673_s0  }
 0x15e   : > { %s4783_s10 = smov [#allocation25]   ;;  %s4315_s3 = sshra.s32 %s5235_s8, 4  ;;  %s4316_s3 = int_to_ptr.hbm [resolvable:$true] %s4315_s3 }
 0x15f   : > { %s1094_s6 = sshll.u32 %s4783_s10, 4  ;;  %s4317_s4 = scalar_lea.hbm %s4316_s3, 16  ;;  %s1095_s6 = int_to_ptr.vmem [resolvable:$true] %s1094_s6 }
 0x160   : > { %p4318_p9 = scmp.ne.s32.totalorder %s4316_s3, %s4317_s4  ;;  %s4321_s24 = scalar_lea.hbm %s5738_s5, 16 }
 0x161   : > { %p4322_p1 = scmp.lt.s32.totalorder %s4316_s3, %s5738_s5  ;;  %p4323_p2 = scmp.lt.s32.totalorder %s4321_s24, %s4317_s4 }
 0x162   : > { %s1118_s13 = sshll.u32 %s5740_s11, 4  ;;  %p4319_p10 = pnand %p4318_p9, %p256_p4  ;;  %s5249_s13 = int_to_ptr.hbm [resolvable:$true] %s1118_s13 }
 0x163   : > { %p4324_p3 = por %p4323_p2, %p4322_p1 }
 0x164   : > { %p4320_p0 = pneg %p4319_p10 }
 0x166   : > { %p4325_p7 = pnand %p4324_p3, %p4320_p0 }
 0x168   : > { %4328 = shalt.err (!%p4325_p7)
}
 0x169   : > { %s5741_s12 = sld [smem:[#allocation84_spill]]  ;;  %s4784_s10 = smov [#allocation28]  }
 0x16a   : > { %3486 = dma.hbm_to_vmem [thread:$0]  (%p256_p4), %s5235_s8, 256, %s1095_s6, [#allocation24], %s5739_s9, %s5739_s9, %s5673_s0  }
 0x16b   : > { %s1120_s14 = sshll.u32 %s4784_s10, 4  ;;  %s4343_s3 = sshra.s32 %s5249_s13, 4  ;;  %s1121_s14 = int_to_ptr.vmem [resolvable:$true] %s1120_s14  ;;  %s4344_s3 = int_to_ptr.hbm [resolvable:$true] %s4343_s3 }
 0x16c   : > { %s4345_s4 = scalar_lea.hbm %s4344_s3, 16  ;;  %s4349_s24 = scalar_lea.hbm %s5740_s11, 16 }
 0x16d   : > { %p4346_p8 = scmp.ne.s32.totalorder %s4344_s3, %s4345_s4  ;;  %p4350_p0 = scmp.lt.s32.totalorder %s4344_s3, %s5740_s11 }
 0x16e   : > { %p4351_p1 = scmp.lt.s32.totalorder %s4349_s24, %s4345_s4 }
 0x16f   : > { %s1144_s26 = sshll.u32 %s5741_s12, 4  ;;  %p4347_p9 = pnand %p4346_p8, %p256_p4  ;;  %s5263_s26 = int_to_ptr.hbm [resolvable:$true] %s1144_s26 }
 0x170   : > { %p4352_p2 = por %p4351_p1, %p4350_p0 }
 0x171   : > { %p4348_p10 = pneg %p4347_p9 }
 0x173   : > { %p4353_p3 = pnand %p4352_p2, %p4348_p10 }
 0x175   : > { %4356 = shalt.err (!%p4353_p3)
}
 0x176   : > { %s5742_s6 = sld [smem:[#allocation85_spill]]  ;;  %s4785_s8 = smov [#allocation31]  }
 0x177   : > { %3490 = dma.hbm_to_vmem [thread:$0]  (%p256_p4), %s5249_s13, 256, %s1121_s14, [#allocation27], %s5739_s9, %s5739_s9, %s5673_s0  }
 0x178   : > { %s1146_s10 = sshll.u32 %s4785_s8, 4  ;;  %s4371_s3 = sshra.s32 %s5263_s26, 4  ;;  %s1147_s10 = int_to_ptr.vmem [resolvable:$true] %s1146_s10  ;;  %s4372_s3 = int_to_ptr.hbm [resolvable:$true] %s4371_s3 }
 0x179   : > { %s4373_s4 = scalar_lea.hbm %s4372_s3, 16  ;;  %s4377_s24 = scalar_lea.hbm %s5741_s12, 16 }
 0x17a   : > { %p4374_p7 = scmp.ne.s32.totalorder %s4372_s3, %s4373_s4  ;;  %p4378_p10 = scmp.lt.s32.totalorder %s4372_s3, %s5741_s12 }
 0x17b   : > { %p4379_p0 = scmp.lt.s32.totalorder %s4377_s24, %s4373_s4 }
 0x17c   : > { %s1171_s5 = sshll.u32 %s5742_s6, 4  ;;  %p4375_p8 = pnand %p4374_p7, %p256_p4  ;;  %s5277_s5 = int_to_ptr.hbm [resolvable:$true] %s1171_s5 }
 0x17d   : > { %p4380_p1 = por %p4379_p0, %p4378_p10 }
 0x17e   : > { %p4376_p9 = pneg %p4375_p8 }
 0x180   : > { %p4381_p2 = pnand %p4380_p1, %p4376_p9 }
 0x182   : > { %4384 = shalt.err (!%p4381_p2)
}
 0x183   : > { %s5743_s13 = sld [smem:[#allocation87_spill]]  ;;  %s4786_s8 = smov [#allocation34]  }
 0x184   : > { %3494 = dma.hbm_to_vmem [thread:$0]  (%p256_p4), %s5263_s26, 256, %s1147_s10, [#allocation30], %s5739_s9, %s5739_s9, %s5673_s0  }
 0x185   : > { %s1173_s11 = sshll.u32 %s4786_s8, 4  ;;  %s4399_s3 = sshra.s32 %s5277_s5, 4  ;;  %s1174_s11 = int_to_ptr.vmem [resolvable:$true] %s1173_s11  ;;  %s4400_s3 = int_to_ptr.hbm [resolvable:$true] %s4399_s3 }
 0x186   : > { %s4401_s4 = scalar_lea.hbm %s4400_s3, 1  ;;  %s4405_s24 = scalar_lea.hbm %s5742_s6, 1 }
 0x187   : > { %p4402_p3 = scmp.ne.s32.totalorder %s4400_s3, %s4401_s4  ;;  %p4406_p9 = scmp.lt.s32.totalorder %s4400_s3, %s5742_s6 }
 0x188   : > { %p4407_p10 = scmp.lt.s32.totalorder %s4405_s24, %s4401_s4 }
 0x189   : > { %s1194_s14 = sshll.u32 %s5743_s13, 4  ;;  %p4403_p7 = pnand %p4402_p3, %p256_p4  ;;  %s5291_s14 = int_to_ptr.hbm [resolvable:$true] %s1194_s14 }
 0x18a   : > { %p4408_p0 = por %p4407_p10, %p4406_p9 }
 0x18b   : > { %p4404_p8 = pneg %p4403_p7 }
 0x18d   : > { %p4409_p1 = pnand %p4408_p0, %p4404_p8 }
 0x18f   : > { %4412 = shalt.err (!%p4409_p1)
}
 0x190   : > { %s5744_s26 = sld [smem:[#allocation90_spill]]  ;;  %s4787_s10 = smov [#allocation37]  }
 0x191   : > { %3498 = dma.hbm_to_vmem [thread:$0]  (%p256_p4), %s5277_s5, 16, %s1174_s11, [#allocation33]  }
 0x192   : > { %s1196_s8 = sshll.u32 %s4787_s10, 4  ;;  %s4427_s3 = sshra.s32 %s5291_s14, 4  ;;  %s1197_s8 = int_to_ptr.vmem [resolvable:$true] %s1196_s8  ;;  %s4428_s3 = int_to_ptr.hbm [resolvable:$true] %s4427_s3 }
 0x193   : > { %s4429_s4 = scalar_lea.hbm %s4428_s3, 16  ;;  %s4433_s24 = scalar_lea.hbm %s5743_s13, 16 }
 0x194   : > { %p4430_p2 = scmp.ne.s32.totalorder %s4428_s3, %s4429_s4  ;;  %p4434_p8 = scmp.lt.s32.totalorder %s4428_s3, %s5743_s13 }
 0x195   : > { %p4435_p9 = scmp.lt.s32.totalorder %s4433_s24, %s4429_s4 }
 0x196   : > { %s1224_s0 = sshll.u32 %s5744_s26, 4  ;;  %p4431_p3 = pnand %p4430_p2, %p256_p4  ;;  %s5302_s0 = int_to_ptr.hbm [resolvable:$true] %s1224_s0 }
 0x197   : > { %p4436_p10 = por %p4435_p9, %p4434_p8 }
 0x198   : > { %p4432_p7 = pneg %p4431_p3 }
 0x19a   : > { %p4437_p0 = pnand %p4436_p10, %p4432_p7 }
 0x19c   : > { %4440 = shalt.err (!%p4437_p0)
}
 0x19d   : > { %s5745_s5 = smov 4   ;;  %s5746_s11 = sld [smem:[#allocation91_spill]] }
 0x19e   : > { %3502 = dma.hbm_to_vmem [thread:$0]  (%p256_p4), %s5291_s14, 256, %s1197_s8, [#allocation36], %s5739_s9, %s5739_s9, %s5745_s5  }
 0x19f   : > { %s4788_s6 = smov [#allocation40]   ;;  %s4455_s3 = sshra.s32 %s5302_s0, 4  ;;  %s4456_s3 = int_to_ptr.hbm [resolvable:$true] %s4455_s3 }
 0x1a0   : > { %s1226_s12 = sshll.u32 %s4788_s6, 4  ;;  %s4457_s4 = scalar_lea.hbm %s4456_s3, 1  ;;  %s1227_s12 = int_to_ptr.vmem [resolvable:$true] %s1226_s12 }
 0x1a1   : > { %p4458_p1 = scmp.ne.s32.totalorder %s4456_s3, %s4457_s4  ;;  %s4461_s24 = scalar_lea.hbm %s5744_s26, 1 }
 0x1a2   : > { %p4462_p7 = scmp.lt.s32.totalorder %s4456_s3, %s5744_s26  ;;  %p4463_p8 = scmp.lt.s32.totalorder %s4461_s24, %s4457_s4 }
 0x1a3   : > { %s1248_s10 = sshll.u32 %s5746_s11, 4  ;;  %p4459_p2 = pnand %p4458_p1, %p256_p4  ;;  %s5316_s10 = int_to_ptr.hbm [resolvable:$true] %s1248_s10 }
 0x1a4   : > { %p4464_p9 = por %p4463_p8, %p4462_p7 }
 0x1a5   : > { %p4460_p3 = pneg %p4459_p2 }
 0x1a7   : > { %p4465_p10 = pnand %p4464_p9, %p4460_p3 }
 0x1a9   : > { %4468 = shalt.err (!%p4465_p10)
}
 0x1aa   : > { %3506 = dma.hbm_to_vmem [thread:$0]  (%p256_p4), %s5302_s0, 16, %s1227_s12, [#allocation39]  }
 0x1ab   : > { %s4789_s6 = smov [#allocation43]   ;;  %s1262_s8 = sshll.u32 %s4974_s20, 4  ;;  %s1263_s8 = int_to_ptr.hbm [resolvable:$true] %s1262_s8 }
 0x1ac   : > { %s1250_s14 = sshll.u32 %s4789_s6, 4  ;;  %s4483_s13 = sshra.s32 %s5316_s10, 4  ;;  %s1251_s14 = int_to_ptr.vmem [resolvable:$true] %s1250_s14  ;;  %s4484_s13 = int_to_ptr.hbm [resolvable:$true] %s4483_s13 }
 0x1ad   : > { %s4485_s3 = scalar_lea.hbm %s4484_s13, 1  ;;  %s4489_s4 = scalar_lea.hbm %s5746_s11, 1 }
 0x1ae   : > { %p4486_p0 = scmp.ne.s32.totalorder %s4484_s13, %s4485_s3  ;;  %p4490_p3 = scmp.lt.s32.totalorder %s4484_s13, %s5746_s11 }
 0x1af   : > { %p4491_p7 = scmp.lt.s32.totalorder %s4489_s4, %s4485_s3 }
 0x1b0   : > { %p4487_p1 = pnand %p4486_p0, %p256_p4 }
 0x1b1   : > { %p4492_p8 = por %p4491_p7, %p4490_p3 }
 0x1b2   : > { %p4488_p2 = pneg %p4487_p1 }
 0x1b4   : > { %p4493_p9 = pnand %p4492_p8, %p4488_p2 }
 0x1b6   : > { %4496 = shalt.err (!%p4493_p9)
}
 0x1b7   : > { %3510 = dma.hbm_to_vmem [thread:$0]  (%p256_p4), %s5316_s10, 16, %s1251_s14, [#allocation42]  }
 0x1b8   : > { %s4790_s0 = smov [#allocation44]   ;;  %s4511_s24 = sshra.s32 %s1263_s8, 4  ;;  %s4512_s24 = int_to_ptr.hbm [resolvable:$true] %s4511_s24 }
 0x1b9   : > { %s1264_s12 = sshll.u32 %s4790_s0, 4  ;;  %s4513_s6 = scalar_lea.hbm %s4512_s24, 16  ;;  %s1265_s12 = int_to_ptr.vmem [resolvable:$true] %s1264_s12 }
 0x1ba   : > { %p4514_p10 = scmp.ne.s32.totalorder %s4512_s24, %s4513_s6  ;;  %s4517_s13 = scalar_lea.hbm %s4974_s20, 16 }
 0x1bb   : > { %p4518_p2 = scmp.lt.s32.totalorder %s4512_s24, %s4974_s20  ;;  %p4519_p3 = scmp.lt.s32.totalorder %s4517_s13, %s4513_s6 }
 0x1bc   : > { %p4515_p0 = pnand %p4514_p10, %p256_p4 }
 0x1bd   : > { %p4520_p7 = por %p4519_p3, %p4518_p2 }
 0x1be   : > { %p4516_p1 = pneg %p4515_p0 }
 0x1c0   : > { %p4521_p8 = pnand %p4520_p7, %p4516_p1 }
 0x1c2   : > { %4524 = shalt.err (!%p4521_p8)
}
 0x1c3   : > { %3512 = dma.hbm_to_vmem [thread:$0]  (%p256_p4), %s1263_s8, 256, %s1265_s12, [#allocation45], %s5739_s9, %s5739_s9, %s5745_s5  }
 0x1c4 PF: > { %s5747_s10 = sld [smem:[#allocation69_spill]]  ;;  %p3608_p10 = scmp.lt.s32.totalorder %s4725_s2, 2 }
 0x1c5   : > { %s5748_s14 = sld [smem:[#allocation70_spill]]  ;;  %s1316_s3 = sand.u32 1, %s4721_s1  }
 0x1c6   : > { %s3261_s4 = sshll.u32 %s4725_s2, 3  ;;  %s3260_s0 = sshll.u32 %s1316_s3, 3 }
 0x1c7   : > { %s1320_s13 = scalar_lea.vmem [#allocation2], %s3260_s0  ;;  %p5351_p0 = pnand %p3608_p10, %p5025_p5 }
 0x1c8   : > { %s1328_s9 = sshll.u32 %s1320_s13, 4  ;;  %s1335_s8 = sand.u32 1, %s4725_s2   ;;  %s1329_s9 = int_to_ptr.vmem [resolvable:$true] %s1328_s9 }
 0x1c9   : > { %s1317_s11 = scalar_lea.sflag [#allocation3], %s1316_s3  ;;  %p4543_p2 = pneg %p5351_p0 }
 0x1ca   : > { %s1324_s24 = scalar_lea.hbm %s5747_s10, %s3261_s4  ;;  %s4546_s22 = scalar_lea.hbm %s5747_s10, 16 }
 0x1cb   : > { %s1326_s6 = sshll.u32 %s1324_s24, 4  ;;  %s1343_s12 = scalar_lea.hbm %s5748_s14, %s3261_s4  ;;  %s1327_s6 = int_to_ptr.hbm [resolvable:$true] %s1326_s6 }
 0x1cc   : > { %s4539_s15 = sshra.s32 %s1327_s6, 4  ;;  %s4540_s15 = int_to_ptr.hbm [resolvable:$true] %s4539_s15 }
 0x1cd   : > { %s4541_s17 = scalar_lea.hbm %s4540_s15, 8  ;;  %p4547_p5 = scmp.lt.s32.totalorder %s4540_s15, %s5747_s10 }
 0x1ce   : > { %p4542_p1 = scmp.ne.s32.totalorder %s4540_s15, %s4541_s17  ;;  %p4548_p8 = scmp.lt.s32.totalorder %s4546_s22, %s4541_s17 }
 0x1d0   : > { %p4544_p3 = pnand %p4543_p2, %p4542_p1  ;;  %p4549_p10 = por %p4548_p8, %p4547_p5 }
 0x1d2   : > { %p4545_p7 = pneg %p4544_p3 }
 0x1d4   : > { %p4550_p9 = pnand %p4549_p10, %p4545_p7 }
 0x1d6   : > { %4553 = shalt.err (!%p4550_p9)
}
 0x1d7   : > { %3574 = dma.hbm_to_vmem [thread:$0]  (!%p5351_p0), %s1327_s6, 128, %s1329_s9, %s1317_s11  }
 0x1d8   : > { %s1345_s3 = sshll.u32 %s1343_s12, 4  ;;  %s1339_s4 = scalar_lea.vmem [#allocation5], %s3260_s0  ;;  %s1346_s3 = int_to_ptr.hbm [resolvable:$true] %s1345_s3 }
 0x1d9   : > { %s1347_s24 = sshll.u32 %s1339_s4, 4  ;;  %s1336_s13 = scalar_lea.sflag [#allocation6], %s1335_s8  ;;  %s1348_s24 = int_to_ptr.vmem [resolvable:$true] %s1347_s24 }
 0x1da   : > { %s4569_s18 = sshra.s32 %s1346_s3, 4  ;;  %s4576_s17 = scalar_lea.hbm %s5748_s14, 16  ;;  %s4570_s18 = int_to_ptr.hbm [resolvable:$true] %s4569_s18 }
 0x1db   : > { %s4571_s19 = scalar_lea.hbm %s4570_s18, 8  ;;  %p4577_p7 = scmp.lt.s32.totalorder %s4570_s18, %s5748_s14 }
 0x1dc   : > { %p4572_p1 = scmp.ne.s32.totalorder %s4570_s18, %s4571_s19  ;;  %p4578_p5 = scmp.lt.s32.totalorder %s4576_s17, %s4571_s19 }
 0x1de   : > { %p4574_p3 = pnand %p4572_p1, %p4543_p2  ;;  %p4579_p8 = por %p4578_p5, %p4577_p7 }
 0x1e0   : > { %p4575_p9 = pneg %p4574_p3 }
 0x1e2   : > { %p4580_p10 = pnand %p4579_p8, %p4575_p9 }
 0x1e4   : > { %4583 = shalt.err (!%p4580_p10)
}
 0x1e5   : > { %3577 = dma.hbm_to_vmem [thread:$0]  (!%p5351_p0), %s1346_s3, 128, %s1348_s24, %s1336_s13  }
 0x1e6   : > { %1356 = sbr.rel (%p5046_p13) target bundleno = 3857 (0xf11), region = 164  ;;  %s5376_s11 = sand.u32 (!%p5046_p13), 1, %s4717_s28  }
 0x1e7   : > { %s5379_s0 = sshll.u32 (!%p5046_p13), %s5376_s11, 3  ;;  %s1359_s18 = scalar_lea.sflag (!%p5046_p13), [#allocation3], %s5376_s11 }
 0x1e8   : > { %s1362_s19 = scalar_lea.vmem (!%p5046_p13), [#allocation2], %s5379_s0 }
 0x1eb   : > { %4644 = dma.done.wait (%p5031_p6), %s1359_s18, 128  }
 0x1ec   : > { %4646 = vsyncadd (%p5031_p6), %s1359_s18, 4294967168  ;;  %s1368_s16 = sand.u32 1, %s5007_s7   ;;  %s1372_s9 = scalar_lea.vmem [#allocation5], %s5379_s0 }
 0x1ed   : > { %s1369_s6 = scalar_lea.sflag [#allocation6], %s1368_s16 }
 0x1ee   : > { %4648 = dma.done.wait (%p5031_p6), %s1369_s6, 128  }
 0x1ef   : > { %4650 = vsyncadd (%p5031_p6), %s1369_s6, 4294967168 }
 0x1f0   : > { %4652 = dma.done.wait (%p256_p4), [#allocation6], 256  }
 0x1f1   : > { %4654 = vsyncadd (%p256_p4), [#allocation6], 4294967040 }
 0x1f2   : > { %4656 = dma.done.wait (%p256_p4), [#allocation9], 272  }
 0x1f3   : > { %4658 = vsyncadd (%p256_p4), [#allocation9], 4294967024 }
 0x1f4   : > { %4660 = dma.done.wait (%p256_p4), [#allocation12], 272  }
 0x1f5   : > { %4662 = vsyncadd (%p256_p4), [#allocation12], 4294967024 }
 0x1f6   : > { %4664 = dma.done.wait (%p256_p4), [#allocation15], 272  }
 0x1f7   : > { %4666 = vsyncadd (%p256_p4), [#allocation15], 4294967024 }
 0x1f8   : > { %4668 = dma.done.wait (%p256_p4), [#allocation18], 32  }
 0x1f9   : > { %4670 = vsyncadd (%p256_p4), [#allocation18], 4294967264 }
 0x1fa   : > { %4672 = dma.done.wait (%p256_p4), [#allocation21], 272  }
 0x1fb   : > { %4674 = vsyncadd (%p256_p4), [#allocation21], 4294967024 }
 0x1fc   : > { %4676 = dma.done.wait (%p256_p4), [#allocation24], 272  }
 0x1fd   : > { %4678 = vsyncadd (%p256_p4), [#allocation24], 4294967024 }
 0x1fe   : > { %4680 = dma.done.wait (%p256_p4), [#allocation27], 272  }
 0x1ff   : > { %4682 = vsyncadd (%p256_p4), [#allocation27], 4294967024 }
 0x200   : > { %4684 = dma.done.wait (%p256_p4), [#allocation30], 272  }
 0x201   : > { %4686 = vsyncadd (%p256_p4), [#allocation30], 4294967024 }
 0x202   : > { %4688 = dma.done.wait (%p256_p4), [#allocation33], 32  }
 0x203   : > { %4690 = vsyncadd (%p256_p4), [#allocation33], 4294967264 }
 0x204   : > { %4692 = dma.done.wait (%p256_p4), [#allocation36], 272  }
 0x205   : > { %4694 = vsyncadd (%p256_p4), [#allocation36], 4294967024 }
 0x206   : > { %4696 = dma.done.wait (%p256_p4), [#allocation39], 32  }
 0x207   : > { %4698 = vsyncadd (%p256_p4), [#allocation39], 4294967264 }
 0x208   : > { %4700 = dma.done.wait (%p256_p4), [#allocation42], 32  }
 0x209   : > { %4702 = vsyncadd (%p256_p4), [#allocation42], 4294967264 }
 0x20a   : > { %4704 = dma.done.wait (%p256_p4), [#allocation45], 256  }
 0x20b   : > { %4706 = vsyncadd (%p256_p4), [#allocation45], 4294967040  ;;  %s5751_s5 = sld [smem:[#allocation64_spill]]  ;;  %p1617_p6 = scmp.lt.s32.totalorder %s5007_s7, 1  ;;  %v3436_v0 = vld [vmem:[#allocation7 + $0x8] sm:$0xff]  ;;  %v3438_v1 = vld [vmem:[#allocation10 + $0x8] sm:$0xff] }
 0x20c   : > { %s5752_s8 = sld [smem:[#allocation65_spill]]  ;;  %v3435_v2 = vld [vmem:[#allocation7] sm:$0xff]  ;;  %v3437_v3 = vld [vmem:[#allocation10] sm:$0xff]  ;;  %1697 = vmatpush.bf16.msra.mxu0 %v3436_v0  ;;  %1728 = vmatpush.bf16.msra.mxu1 %v3438_v1  ;;  %vm1687_vm0 = vcmask 261120   ;;  %v3748_v7 = vld [vmem:[#allocation8] ss:$0 sm:$0xff] }
 0x20d   : > { %s1618_s12 = scalar_select %p1617_p6, %s5007_s7, 1  ;;  %v3749_v8 = vld [vmem:[#allocation11] ss:$0 sm:$0xff]  ;;  %vm1768_vm1 = vcmask 130048   ;;  %v3440_v28 = vld [vmem:[#allocation13 + $0x8] sm:$0xff]  ;;  %v4792_v34 = vmov 0.0  }
 0x20e   : > { %s4791_s24 = smov 112   ;;  %1757 = vmatpush.bf16.msra.mxu2 %v3440_v28  ;;  %v1643_v32 = vld [vmem:[%s1362_s19] sm:$0xff]  ;;  %vm1788_vm3 = vcmask 64512   ;;  %v3750_v62 = vld [vmem:[#allocation14] ss:$0 sm:$0xff]  ;;  %vm1804_vm4 = vcmask 1043456  }
 0x20f   : > { %s5451_s22 = sshll.u32 %s1618_s12, 3  ;;  %vm1644_vm2 = vcmp.gt.f32.partialorder %v1643_v32, 0.0  ;;  %v3439_v43 = vld [vmem:[#allocation13] sm:$0xff]  ;;  %s4793_s13 = smov 16  }
 0x210   : > { %1698 = vmatpush.bf16.msra.mxu0 %v3435_v2  ;;  %1729 = vmatpush.bf16.msra.mxu1 %v3437_v3  ;;  %v1645_v35 = vsel %vm1644_vm2, -1e+30, %v4792_v34  ;;  %s5753_s17 = sld [smem:[#allocation68_spill]] }
 0x211   : > { %s1620_s3 = scalar_lea.vmem %s5751_s5, %s5451_s22  ;;  %s5754_s18 = sld [smem:[#allocation66_spill]] }
 0x212   : > { %s1624_s4 = scalar_lea.vmem %s5752_s8, %s5451_s22  ;;  %v5457_v4 = vld [vmem:[%s1620_s3] sm:$0xff]  ;;  %1758 = vmatpush.bf16.msra.mxu2 %v3439_v43  ;;  %s5755_s19 = sld [smem:[#allocation67_spill]] }
 0x213   : > { %v5459_v5 = vld [vmem:[%s1624_s4] sm:$0xff]  ;;  %s5757_s5 = sld [smem:[#allocation92_spill]] }
 0x214   : > { %v1671_v6 = vpack.c.bf16 %v5459_v5, %v5457_v4  ;;  %s5758_s8 = sld [smem:[#allocation93_spill]] }
 0x215   : > { %s5759_s12 = sld [smem:[#allocation94_spill]] }
 0x216   : > { %3307 = vmatmul.msk.bf16.vlgmr.msra.gmra.mxu0 %vm1687_vm0, %v1671_v6  ;;  %3316 = vmatmul.msk.bf16.vlgmr.msra.gmra.mxu1 %vm1687_vm0, %v1671_v6  ;;  %s1636_s15 = scalar_lea.vmem %s5753_s17, %s5451_s22 }
 0x217   : > { %3325 = vmatmul.msk.bf16.vlgmr.msra.gmra.mxu2 %vm1687_vm0, %v1671_v6  ;;  %s1628_s16 = scalar_lea.vmem %s5754_s18, %s5451_s22 }
 0x218   : > { %s1632_s6 = scalar_lea.vmem %s5755_s19, %s5451_s22  ;;  %s3432_s22 = sshll.u32 %s5007_s7, 3 }
 0x219   : > { %s2780_s7 = scalar_lea.sflag [#allocation4], %s5376_s11 }
 0x21b   : > { %s2790_s3 = scalar_lea.hbm %s5759_s12, %s3432_s22 }
 0x21c   : > { %s2794_s17 = sshll.u32 %s2790_s3, 4  ;;  %s2795_s17 = int_to_ptr.hbm [resolvable:$true] %s2794_s17 }
 0x293   : > { %v1700_v9 = vpop.f32.mrf.mxu0  ;;  %v1731_v10 = vpop.f32.mrf.mxu1 }
 0x294   : > { %v1701_v11 = vadd.f32 %v3748_v7, %v1700_v9  ;;  %v1732_v12 = vadd.f32 %v3749_v8, %v1731_v10 }
 0x296   : > { %v1705_v13 = vmul.f32 0.25, %v1701_v11  ;;  %v1766_v14 = vpack.c.bf16 %v1732_v12, %v1732_v12 }
 0x298   : > { %1878 = vrot.lane.b32.xlu0 %v1766_v14, %s4791_s24  ;;  %v1773_v15 = vsel %vm1768_vm1, %v1766_v14, 0  ;;  %v1765_v16 = vpack.c.bf16 %v1705_v13, %v1705_v13 }
 0x299   : > { %1782 = vmatpush.bf16.xpose.msra.mxu3 %v1773_v15 }
 0x29a   : > { %1875 = vrot.lane.b32.xlu1 %v1765_v16, %s4791_s24  ;;  %v1760_v63 = vpop.f32.mrf.mxu2 }
 0x29b   : > { %v1702_v17 = vpop.f32.mrf.mxu0  ;;  %v1733_v18 = vpop.f32.mrf.mxu1  ;;  %v1761_v0 = vadd.f32 %v3750_v62, %v1760_v63 }
 0x29c   : > { %v1703_v19 = vadd.f32 %v3748_v7, %v1702_v17  ;;  %v1734_v20 = vadd.f32 %v3749_v8, %v1733_v18 }
 0x29d   : > { %v1767_v1 = vpack.c.bf16 %v1761_v0, %v1761_v0 }
 0x29e   : > { %v1706_v21 = vmul.f32 0.25, %v1703_v19  ;;  %v1822_v22 = vpack.c.bf16 %v1734_v20, %v1734_v20 }
 0x29f   : > { %v1806_v3 = vsel %vm1804_vm4, %v1767_v1, 0 }
 0x2a0   : > { %v1821_v23 = vpack.c.bf16 %v1706_v21, %v1706_v21  ;;  %1937 = vrot.lane.b32.xlu0 %v1822_v22, %s4791_s24  ;;  %3326 = vmatmul.msk.bf16.vlgmr.msra.gmra.mxu3 %vm1768_vm1, %v1765_v16  ;;  %v1828_v24 = vsel %vm1768_vm1, %v1822_v22, 0 }
 0x2a1   : > { %1837 = vmatpush.bf16.xpose.msrb.mxu1 %v1828_v24  ;;  %1815 = vmatpush.bf16.msrb.mxu0 %v1806_v3 }
 0x2a2   : > { %1934 = vrot.lane.b32.xlu1 %v1821_v23, %s4791_s24  ;;  %v1762_v2 = vpop.f32.mrf.mxu2 }
 0x2a3   : > { %v1763_v7 = vadd.f32 %v3750_v62, %v1762_v2  ;;  %v4794_v2 = vmov 32.0  }
 0x2a5   : > { %v1823_v10 = vpack.c.bf16 %v1763_v7, %v1763_v7  ;;  %v1642_v7 = vld [vmem:[%s1636_s15] sm:$0xff]  ;;  %s4613_s15 = sshra.s32 %s2795_s17, 4  ;;  %s4614_s15 = int_to_ptr.hbm [resolvable:$true] %s4613_s15 }
 0x2a6   : > { %s4615_s18 = scalar_lea.hbm %s4614_s15, 8  ;;  %p4620_p2 = scmp.lt.s32.totalorder %s4614_s15, %s5759_s12 }
 0x2a7   : > { %v1859_v13 = vsel %vm1804_vm4, %v1823_v10, 0  ;;  %p4616_p4 = scmp.ne.s32.totalorder %s4614_s15, %s4615_s18 }
 0x2a8   : > { %3328 = vmatmul.msk.bf16.vlgmr.msrb.gmra.mxu1 %vm1768_vm1, %v1821_v23  ;;  %1868 = vmatpush.bf16.msrb.mxu2 %v1859_v13 }
 0x2a9   : > { %p4617_p13 = pnand %p4616_p4, %p5038_p11 }
 0x2ab   : > { %p4618_p0 = pneg %p4617_p13 }
 0x30a   : > { %v1879_v25 = vpop.permute.xlu0 %1878 }
 0x30b   : > { %v1884_v26 = vsel %vm1768_vm1, %v1879_v25, 0 }
 0x30c   : > { %1893 = vmatpush.bf16.xpose.msrb.mxu3 %v1884_v26  ;;  %v1876_v27 = vpop.permute.xlu1 %1875 }
 0x312   : > { %v1938_v29 = vpop.permute.xlu0 %1937 }
 0x313   : > { %v1943_v30 = vsel %vm1768_vm1, %v1938_v29, 0  ;;  %3330 = vmatmul.msk.bf16.vlgmr.msrb.gmra.mxu3 %vm1768_vm1, %v1876_v27 }
 0x314   : > { %1952 = vmatpush.bf16.xpose.msra.mxu1 %v1943_v30  ;;  %v1935_v31 = vpop.permute.xlu1 %1934 }
 0x31b   : > { %3332 = vmatmul.msk.bf16.vlgmr.msra.gmra.mxu1 %vm1768_vm1, %v1935_v31 }
 0x323   : > { %v1784_v33 = vpop.f32.mrf.mxu3 }
 0x324   : > { %v1785_v40 = vadd.f32 %v1784_v33, %v1645_v35 }
 0x325   : > { %v1839_v36 = vpop.f32.mrf.mxu1 }
 0x326   : > { %v1840_v37 = vadd.f32 %v1839_v36, %v1645_v35  ;;  %v1789_v42 = vsel %vm1788_vm3, %v1785_v40, -inf }
 0x328   : > { %v1843_v38 = vsel %vm1788_vm3, %v1840_v37, -inf }
 0x329   : > { %1844 = vmax.xlane.f32.xlu2 %v1843_v38 }
 0x32b   : > { %v1786_v39 = vpop.f32.mrf.mxu3 }
 0x32d   : > { %v1841_v41 = vpop.f32.mrf.mxu1 }
 0x331   : > { %1790 = vmax.xlane.f32.xlu2 %v1789_v42 }
 0x396   : > { %v1895_v44 = vpop.f32.mrf.mxu3 }
 0x397   : > { %v1896_v45 = vadd.f32 %v1895_v44, %v1645_v35  ;;  %v3442_v44 = vld [vmem:[#allocation16 + $0x8] sm:$0xff] }
 0x398   : > { %v1954_v46 = vpop.f32.mrf.mxu1  ;;  %2027 = vmatpush.bf16.msra.mxu3 %v3442_v44 }
 0x399   : > { %v1955_v47 = vadd.f32 %v1954_v46, %v1645_v35  ;;  %v1899_v48 = vsel %vm1788_vm3, %v1896_v45, -inf }
 0x39a   : > { %1900 = vmax.xlane.f32.xlu1 %v1899_v48 }
 0x39b   : > { %v1958_v49 = vsel %vm1788_vm3, %v1955_v47, -inf }
 0x39c   : > { %v1845_v50 = vpop.xlane.xlu2 %1844  ;;  %1959 = vmax.xlane.f32.xlu0 %v1958_v49 }
 0x39d   : > { %v1846_v55 = vsub.f32 %v1840_v37, %v1845_v50  ;;  %v3441_v50 = vld [vmem:[#allocation16] sm:$0xff] }
 0x39e   : > { %v1897_v51 = vpop.f32.mrf.mxu3  ;;  %2028 = vmatpush.bf16.msra.mxu3 %v3441_v50 }
 0x39f   : > { %v1847_v57 = vmul.f32 1.442695, %v1846_v55 }
 0x3a0   : > { %v1956_v52 = vpop.f32.mrf.mxu1 }
 0x3a4   : > { %v1791_v53 = vpop.xlane.xlu2 %1790 }
 0x3a5   : > { %v1792_v54 = vsub.f32 %v1785_v40, %v1791_v53 }
 0x3a7   : > { %v1793_v56 = vmul.f32 1.442695, %v1792_v54 }
 0x3a9   : > { %3765 = vpow2.f32 %v1793_v56 }
 0x3aa   : > { %3767 = vpow2.f32 %v1847_v57  ;;  %v3751_v57 = vld [vmem:[#allocation17] ss:$0 sm:$0xff] }
 0x3af   : > { %v3766_v58 = vpop.eup %3765 }
 0x3b0   : > { %v1795_v59 = vsel %vm1788_vm3, %v3766_v58, 0.0  ;;  %v3768_v60 = vpop.eup %3767  ;;  %1912 = vrot.lane.b32.xlu0 %v1767_v1, %s4791_s24 }
 0x3b1   : > { %1796 = vadd.xlane.f32.xlu2 %v1795_v59  ;;  %v1849_v61 = vsel %vm1788_vm3, %v3768_v60, 0.0 }
 0x3b9   : > { %1850 = vadd.xlane.f32.xlu2 %v1849_v61 }
 0x40d   : > { %v1901_v6 = vpop.xlane.xlu1 %1900 }
 0x40e   : > { %v1902_v8 = vsub.f32 %v1896_v45, %v1901_v6 }
 0x40f   : > { %v1960_v9 = vpop.xlane.xlu0 %1959 }
 0x410   : > { %v1903_v11 = vmul.f32 1.442695, %v1902_v8  ;;  %v1961_v12 = vsub.f32 %v1955_v47, %v1960_v9  ;;  %v4795_v8 = vmov 0  }
 0x411   : > { %3742 = vset.pattern.permute.xlu0 %v4795_v8  ;;  %v3755_v8 = vld [vmem:[#allocation23] ss:$0 sm:$0xff] }
 0x412   : > { %3769 = vpow2.f32 %v1903_v11  ;;  %v1962_v14 = vmul.f32 1.442695, %v1961_v12 }
 0x414   : > { %3771 = vpow2.f32 %v1962_v14 }
 0x418   : > { %v3770_v15 = vpop.eup %3769 }
 0x419   : > { %v1905_v16 = vsel %vm1788_vm3, %v3770_v15, 0.0 }
 0x41a   : > { %1906 = vadd.xlane.f32.xlu2 %v1905_v16  ;;  %v3772_v17 = vpop.eup %3771 }
 0x41b   : > { %v1964_v18 = vsel %vm1788_vm3, %v3772_v17, 0.0 }
 0x422   : > { %1965 = vadd.xlane.f32.xlu2 %v1964_v18  ;;  %v1913_v27 = vpop.permute.xlu0 %1912 }
 0x423   : > { %v1918_v28 = vsel %vm1804_vm4, %v1913_v27, 0  ;;  %v3444_v27 = vld [vmem:[#allocation22 + $0x8] sm:$0xff] }
 0x424   : > { %v1797_v19 = vpop.xlane.xlu2 %1796  ;;  %1927 = vmatpush.bf16.msra.mxu0 %v1918_v28 }
 0x425   : > { %3773 = vrcp.f32 %v1797_v19 }
 0x42b   : > { %v3774_v20 = vpop.eup %3773 }
 0x42c   : > { %v1799_v21 = vmul.f32 %v3774_v20, %v3766_v58  ;;  %v1851_v22 = vpop.xlane.xlu2 %1850 }
 0x42d   : > { %3775 = vrcp.f32 %v1851_v22  ;;  %v3445_v22 = vld [vmem:[#allocation25] sm:$0xff] }
 0x42e   : > { %v1800_v23 = vpack.c.bf16 %v1799_v21, %v1799_v21  ;;  %v3446_v21 = vld [vmem:[#allocation25 + $0x8] sm:$0xff] }
 0x42f   : > { %2187 = vmatpush.bf16.msrb.mxu1 %v3446_v21 }
 0x430   : > { %3327 = vmatmul.msk.bf16.vlgmr.msrb.gmra.mxu0 %vm1788_vm3, %v1800_v23  ;;  %v1640_v23 = vld [vmem:[%s1628_s16] sm:$0xff] }
 0x431   : > { %2153 = vmatpush.bf16.msrb.mxu0 %v3444_v27 }
 0x433   : > { %v3776_v24 = vpop.eup %3775  ;;  %2188 = vmatpush.bf16.msrb.mxu1 %v3445_v22  ;;  %v1646_v22 = vld [vmem:[%s1372_s9] sm:$0xff]  ;;  %s5756_s9 = sld [smem:[#allocation89_spill]] }
 0x434   : > { %v1853_v25 = vmul.f32 %v3776_v24, %v3768_v60  ;;  %v1641_v24 = vld [vmem:[%s1632_s6] sm:$0xff]  ;;  %vm1647_vm12 = vcmp.gt.f32.partialorder %v1646_v22, 0.0 }
 0x436   : > { %v1854_v26 = vpack.c.bf16 %v1853_v25, %v1853_v25  ;;  %v5519_v25 = vpack.c.bf16 %v1641_v24, %v1640_v23  ;;  %v1648_v23 = vsel %vm1647_vm12, -1e+30, %v4792_v34 }
 0x438   : > { %3329 = vmatmul.msk.bf16.vlgmr.msrb.gmra.mxu2 %vm1788_vm3, %v1854_v26  ;;  %3360 = vmatmul.msk.bf16.vlgmr.msrb.gmra.mxu1 %vm1687_vm0, %v5519_v25 }
 0x43a   : > { %1971 = vrot.lane.b32.xlu2 %v1823_v10, %s4791_s24 }
 0x48d   : > { %v1907_v29 = vpop.xlane.xlu2 %1906 }
 0x48e   : > { %3777 = vrcp.f32 %v1907_v29 }
 0x494   : > { %v3778_v30 = vpop.eup %3777 }
 0x495   : > { %v1909_v31 = vmul.f32 %v3778_v30, %v3770_v15  ;;  %v1966_v32 = vpop.xlane.xlu2 %1965  ;;  %v3443_v30 = vld [vmem:[#allocation22] sm:$0xff] }
 0x496   : > { %3779 = vrcp.f32 %v1966_v32  ;;  %2154 = vmatpush.bf16.msrb.mxu0 %v3443_v30 }
 0x497   : > { %v1910_v33 = vpack.c.bf16 %v1909_v31, %v1909_v31  ;;  %3781 = vrcp.f32 %v4794_v2 }
 0x499   : > { %3331 = vmatmul.msk.bf16.vlgmr.msra.gmra.mxu0 %vm1788_vm3, %v1910_v33 }
 0x49c   : > { %v3780_v35 = vpop.eup %3779 }
 0x49d   : > { %v1968_v36 = vmul.f32 %v3780_v35, %v3772_v17  ;;  %v1972_v37 = vpop.permute.xlu2 %1971  ;;  %v3782_v3 = vpop.eup %3781 }
 0x49e   : > { %v1977_v38 = vsel %vm1804_vm4, %v1972_v37, 0  ;;  %v2044_v6 = vmul.f32 32.0, %v3782_v3  ;;  %vm2048_vm5 = vweird.f32 %v3782_v3 }
 0x49f   : > { %v1969_v39 = vpack.c.bf16 %v1968_v36, %v1968_v36  ;;  %1986 = vmatpush.bf16.msra.mxu2 %v1977_v38 }
 0x4a0   : > { %v2045_v9 = vsub.f32 1.0, %v2044_v6 }
 0x4a2   : > { %3333 = vmatmul.msk.bf16.vlgmr.msra.gmra.mxu2 %vm1788_vm3, %v1969_v39 }
 0x4ad   : > { %v1817_v40 = vpop.f32.mrf.mxu0 }
 0x4b5   : > { %v1819_v41 = vpop.f32.mrf.mxu0 }
 0x4bb   : > { %v1870_v42 = vpop.f32.mrf.mxu2 }
 0x4c3   : > { %v1872_v43 = vpop.f32.mrf.mxu2 }
 0x516   : > { %v1929_v45 = vpop.f32.mrf.mxu0 }
 0x51e   : > { %v1931_v46 = vpop.f32.mrf.mxu0 }
 0x51f   : > { %v3752_v46 = vld [vmem:[#allocation19] ss:$0 sm:$0xff] }
 0x525   : > { %v1988_v47 = vpop.f32.mrf.mxu2 }
 0x526   : > { %v3737_v48 = vpack.i.bf16 %v1988_v47, %v1929_v45 }
 0x528   : > { %3738 = vrot.lane.b32.xlu1 %v3737_v48, %s4793_s13 }
 0x52d   : > { %v1990_v49 = vpop.f32.mrf.mxu2 }
 0x59a   : > { %v3739_v51 = vpop.permute.xlu1 %3738 }
 0x59b   : > { %v3741_v52 = vunpack.i.h.bf16 %v3739_v51  ;;  %v3740_v53 = vunpack.i.l.bf16 %v3739_v51  ;;  %v3753_v51 = vld [vmem:[#allocation20] ss:$0 sm:$0xff] }
 0x59d   : > { %v2001_v54 = vsel %vm1768_vm1, %v1870_v42, %v3741_v52  ;;  %v2000_v55 = vsel %vm1768_vm1, %v1817_v40, %v3740_v53 }
 0x59e   : > { %v2002_v56 = vpack.c.bf16 %v2001_v54, %v2000_v55 }
 0x5a0   : > { %3342 = vmatmul.msk.bf16.vlgmr.msra.gmra.mxu3 %vm1687_vm0, %v2002_v56 }
 0x623   : > { %v2030_v58 = vpop.f32.mrf.mxu3 }
 0x624   : > { %v2031_v59 = vadd.f32 %v3751_v57, %v2030_v58 }
 0x626   : > { %v2035_v60 = vadd.f32 %v2031_v59, %v5457_v4  ;;  %v2046_v4 = vmul.f32 %v3782_v3, %v2045_v9 }
 0x628   : > { %v2037_v61 = vsel %vm1687_vm0, %v2035_v60, 0.0  ;;  %v2047_v10 = vadd.f32 %v3782_v3, %v2046_v4 }
 0x629   : > { %2038 = vadd.xlane.f32.xlu2 %v2037_v61  ;;  %v3754_v61 = vld [vmem:[#allocation26] ss:$0 sm:$0xff] }
 0x62a   : > { %v5509_v11 = vsel %vm2048_vm5, %v3782_v3, %v2047_v10 }
 0x62b   : > { %v2032_v62 = vpop.f32.mrf.mxu3 }
 0x62c   : > { %v2033_v63 = vadd.f32 %v3751_v57, %v2032_v62  ;;  %v2190_v62 = vpop.f32.mrf.mxu1 }
 0x62e   : > { %v2036_v0 = vadd.f32 %v2033_v63, %v5459_v5  ;;  %v2191_v63 = vadd.f32 %v3754_v61, %v2190_v62 }
 0x630   : > { %v2040_v1 = vsel %vm1687_vm0, %v2036_v0, 0.0 }
 0x631   : > { %2041 = vadd.xlane.f32.xlu0 %v2040_v1 }
 0x634   : > { %v2192_v2 = vpop.f32.mrf.mxu1 }
 0x635   : > { %v2193_v3 = vadd.f32 %v3754_v61, %v2192_v2 }
 0x637   : > { %v2278_v6 = vpack.c.bf16 %v2193_v3, %v2193_v3 }
 0x645   : > { %2100 = vperm.xlu0 %3742, %v1642_v7   ;;  %v2284_v7 = vsel %vm1768_vm1, %v2278_v6, 0 }
 0x646   : > { %2293 = vmatpush.bf16.xpose.msra.mxu1 %v2284_v7 }
 0x69c   : > { %v2039_v5 = vpop.xlane.xlu2 %2038 }
 0x69d   : > { %v2050_v12 = vmul.f32 %v5509_v11, %v2039_v5 }
 0x69f   : > { %v2052_v13 = vsub.f32 %v2035_v60, %v2050_v12 }
 0x6a1   : > { %v2054_v14 = vmul.f32 %v2052_v13, %v2052_v13 }
 0x6a3   : > { %v2056_v15 = vsel %vm1687_vm0, %v2054_v14, 0.0 }
 0x6a4   : > { %v2042_v16 = vpop.xlane.xlu0 %2041  ;;  %2057 = vadd.xlane.f32.xlu1 %v2056_v15 }
 0x6a5   : > { %v2051_v17 = vmul.f32 %v5509_v11, %v2042_v16 }
 0x6a7   : > { %v2053_v18 = vsub.f32 %v2036_v0, %v2051_v17  ;;  %v2225_v0 = vpack.c.bf16 %v2191_v63, %v2191_v63 }
 0x6a9   : > { %v2055_v19 = vmul.f32 %v2053_v18, %v2053_v18  ;;  %v2231_v1 = vsel %vm1768_vm1, %v2225_v0, 0 }
 0x6aa   : > { %2240 = vmatpush.bf16.xpose.msrb.mxu3 %v2231_v1 }
 0x6ab   : > { %v2059_v20 = vsel %vm1687_vm0, %v2055_v19, 0.0 }
 0x6ac   : > { %2060 = vadd.xlane.f32.xlu2 %v2059_v20 }
 0x6b7   : > { %v5525_v56 = vpop.permute.xlu0 %2100 }
 0x6bd   : > { %2393 = vrot.lane.b32.xlu1 %v2278_v6, %s4791_s24 }
 0x6c4   : > { %2334 = vrot.lane.b32.xlu2 %v2225_v0, %s4791_s24 }
 0x717   : > { %v2058_v26 = vpop.xlane.xlu1 %2057 }
 0x718   : > { %v2062_v28 = vmul.f32 %v2058_v26, %v5509_v11 }
 0x71a   : > { %v2064_v29 = vadd.f32 1e-05, %v2062_v28 }
 0x71c   : > { %3783 = vrsqrt.f32 %v2064_v29  ;;  %vm2072_vm7 = vweird.f32 %v2064_v29 }
 0x71f   : > { %v2061_v31 = vpop.xlane.xlu2 %2060 }
 0x720   : > { %v2063_v32 = vmul.f32 %v2061_v31, %v5509_v11 }
 0x722   : > { %v3784_v33 = vpop.eup %3783  ;;  %v2065_v35 = vadd.f32 1e-05, %v2063_v32 }
 0x723   : > { %v2067_v36 = vmul.f32 %v3784_v33, %v2064_v29  ;;  %vm2073_vm6 = vweird.f32 %v3784_v33 }
 0x724   : > { %3785 = vrsqrt.f32 %v2065_v35  ;;  %vm2074_vm8 = vmor %vm2072_vm7, %vm2073_vm6  ;;  %vm2082_vm10 = vweird.f32 %v2065_v35 }
 0x725   : > { %v2068_v37 = vmul.f32 %v3784_v33, %v2067_v36 }
 0x727   : > { %v2069_v38 = vmul.f32 0.5, %v2068_v37  ;;  %v2335_v16 = vpop.permute.xlu2 %2334 }
 0x728   : > { %v2340_v17 = vsel %vm1768_vm1, %v2335_v16, 0 }
 0x729   : > { %v2070_v39 = vsub.f32 1.5, %v2069_v38  ;;  %2349 = vmatpush.bf16.xpose.msra.mxu3 %v2340_v17 }
 0x72a   : > { %v3786_v40 = vpop.eup %3785 }
 0x72b   : > { %v2071_v41 = vmul.f32 %v3784_v33, %v2070_v39  ;;  %v2077_v42 = vmul.f32 %v3786_v40, %v2065_v35  ;;  %vm2083_vm9 = vweird.f32 %v3786_v40  ;;  %v3447_v35 = vld [vmem:[#allocation28] sm:$0xff] }
 0x72c   : > { %vm2084_vm11 = vmor %vm2082_vm10, %vm2083_vm9 }
 0x72d   : > { %v2075_v43 = vsel %vm2074_vm8, %v3784_v33, %v2071_v41  ;;  %v2078_v44 = vmul.f32 %v3786_v40, %v2077_v42  ;;  %v3448_v33 = vld [vmem:[#allocation28 + $0x8] sm:$0xff] }
 0x72e   : > { %v2086_v47 = vmul.f32 %v2075_v43, %v2052_v13  ;;  %2216 = vmatpush.bf16.msrb.mxu2 %v3448_v33 }
 0x72f   : > { %v2079_v45 = vmul.f32 0.5, %v2078_v44 }
 0x730   : > { %v2091_v50 = vmul.f32 %v3752_v46, %v2086_v47 }
 0x731   : > { %v2080_v48 = vsub.f32 1.5, %v2079_v45 }
 0x732   : > { %v2096_v55 = vadd.f32 %v3753_v51, %v2091_v50  ;;  %2217 = vmatpush.bf16.msrb.mxu2 %v3447_v35 }
 0x733   : > { %v2081_v49 = vmul.f32 %v3786_v40, %v2080_v48 }
 0x734   : > { %v5528_v58 = vmul.f32 %v5525_v56, %v2096_v55 }
 0x735   : > { %v2085_v52 = vsel %vm2084_vm11, %v3786_v40, %v2081_v49  ;;  %3369 = vmatmul.msk.bf16.vlgmr.msrb.gmra.mxu2 %vm1687_vm0, %v5519_v25 }
 0x736   : > { %v2087_v53 = vmul.f32 %v2085_v52, %v2053_v18  ;;  %v2394_v18 = vpop.permute.xlu1 %2393 }
 0x737   : > { %v2399_v19 = vsel %vm1768_vm1, %v2394_v18, 0 }
 0x738   : > { %v2092_v54 = vmul.f32 %v3752_v46, %v2087_v53  ;;  %2408 = vmatpush.bf16.xpose.msrb.mxu1 %v2399_v19  ;;  %v3756_v53 = vld [vmem:[#allocation29] ss:$0 sm:$0xff] }
 0x73a   : > { %v2097_v57 = vadd.f32 %v3753_v51, %v2092_v54 }
 0x73c   : > { %v5531_v59 = vmul.f32 %v5525_v56, %v2097_v57 }
 0x73e   : > { %v2127_v60 = vpack.c.bf16 %v5531_v59, %v5528_v58 }
 0x740   : > { %3351 = vmatmul.msk.bf16.vlgmr.msrb.gmra.mxu0 %vm1687_vm0, %v2127_v60 }
 0x7b8   : > { %v2219_v52 = vpop.f32.mrf.mxu2 }
 0x7b9   : > { %v2220_v57 = vadd.f32 %v3756_v53, %v2219_v52 }
 0x7bb   : > { %v2226_v62 = vpack.c.bf16 %v2220_v57, %v2220_v57 }
 0x7bd   : > { %v2156_v9 = vpop.f32.mrf.mxu0  ;;  %v2262_v0 = vsel %vm1804_vm4, %v2226_v62, 0 }
 0x7be   : > { %v2157_v4 = vadd.f32 %v3755_v8, %v2156_v9  ;;  %2271 = vmatpush.bf16.msra.mxu0 %v2262_v0 }
 0x7c0   : > { %v2161_v10 = vmul.f32 0.25, %v2157_v4  ;;  %v2221_v60 = vpop.f32.mrf.mxu2 }
 0x7c1   : > { %v2222_v63 = vadd.f32 %v3756_v53, %v2221_v60 }
 0x7c2   : > { %v2224_v5 = vpack.c.bf16 %v2161_v10, %v2161_v10 }
 0x7c3   : > { %v2279_v1 = vpack.c.bf16 %v2222_v63, %v2222_v63 }
 0x7c4   : > { %2331 = vrot.lane.b32.xlu2 %v2224_v5, %s4791_s24  ;;  %3370 = vmatmul.msk.bf16.vlgmr.msrb.gmra.mxu3 %vm1768_vm1, %v2224_v5 }
 0x7c5   : > { %v2158_v12 = vpop.f32.mrf.mxu0  ;;  %v2315_v2 = vsel %vm1804_vm4, %v2279_v1, 0 }
 0x7c6   : > { %v2159_v13 = vadd.f32 %v3755_v8, %v2158_v12  ;;  %2324 = vmatpush.bf16.msra.mxu2 %v2315_v2 }
 0x7c8   : > { %v2162_v14 = vmul.f32 0.25, %v2159_v13 }
 0x7ca   : > { %v2277_v15 = vpack.c.bf16 %v2162_v14, %v2162_v14 }
 0x7cc   : > { %2390 = vrot.lane.b32.xlu1 %v2277_v15, %s4791_s24  ;;  %3372 = vmatmul.msk.bf16.vlgmr.msra.gmra.mxu1 %vm1768_vm1, %v2277_v15 }
 0x81e   : > { %v2332_v20 = vpop.permute.xlu2 %2331 }
 0x81f   : > { %3374 = vmatmul.msk.bf16.vlgmr.msra.gmra.mxu3 %vm1768_vm1, %v2332_v20 }
 0x83e   : > { %v2391_v21 = vpop.permute.xlu1 %2390 }
 0x83f   : > { %3376 = vmatmul.msk.bf16.vlgmr.msrb.gmra.mxu1 %vm1768_vm1, %v2391_v21 }
 0x847   : > { %v2242_v24 = vpop.f32.mrf.mxu3 }
 0x848   : > { %v2243_v26 = vadd.f32 %v2242_v24, %v1648_v23 }
 0x849   : > { %v2295_v27 = vpop.f32.mrf.mxu1 }
 0x84a   : > { %v2296_v28 = vadd.f32 %v2295_v27, %v1648_v23  ;;  %v2246_v29 = vsel %vm1788_vm3, %v2243_v26, -inf }
 0x84b   : > { %2247 = vmax.xlane.f32.xlu1 %v2246_v29 }
 0x84c   : > { %v2299_v30 = vsel %vm1788_vm3, %v2296_v28, -inf }
 0x84d   : > { %2300 = vmax.xlane.f32.xlu2 %v2299_v30 }
 0x84f   : > { %v2244_v31 = vpop.f32.mrf.mxu3 }
 0x851   : > { %v2297_v32 = vpop.f32.mrf.mxu1 }
 0x8a2   : > { %v2351_v34 = vpop.f32.mrf.mxu3 }
 0x8a3   : > { %v2352_v36 = vadd.f32 %v2351_v34, %v1648_v23 }
 0x8a5   : > { %v2355_v37 = vsel %vm1788_vm3, %v2352_v36, -inf }
 0x8a6   : > { %2356 = vmax.xlane.f32.xlu2 %v2355_v37 }
 0x8aa   : > { %v2353_v38 = vpop.f32.mrf.mxu3 }
 0x8bc   : > { %v2410_v39 = vpop.f32.mrf.mxu1 }
 0x8bd   : > { %v2411_v40 = vadd.f32 %v2410_v39, %v1648_v23 }
 0x8be   : > { %v2248_v41 = vpop.xlane.xlu1 %2247 }
 0x8bf   : > { %v2249_v42 = vsub.f32 %v2243_v26, %v2248_v41  ;;  %v2414_v43 = vsel %vm1788_vm3, %v2411_v40, -inf }
 0x8c0   : > { %2415 = vmax.xlane.f32.xlu0 %v2414_v43  ;;  %v2301_v44 = vpop.xlane.xlu2 %2300 }
 0x8c1   : > { %v2250_v45 = vmul.f32 1.442695, %v2249_v42  ;;  %v2302_v46 = vsub.f32 %v2296_v28, %v2301_v44  ;;  %v3449_v42 = vld [vmem:[#allocation31] sm:$0xff] }
 0x8c3   : > { %3787 = vpow2.f32 %v2250_v45  ;;  %v2303_v47 = vmul.f32 1.442695, %v2302_v46 }
 0x8c4   : > { %v2412_v48 = vpop.f32.mrf.mxu1 }
 0x8c5   : > { %3789 = vpow2.f32 %v2303_v47 }
 0x8c9   : > { %v3788_v25 = vpop.eup %3787 }
 0x8ca   : > { %v2252_v49 = vsel %vm1788_vm3, %v3788_v25, 0.0 }
 0x8cb   : > { %v3790_v50 = vpop.eup %3789  ;;  %2253 = vadd.xlane.f32.xlu0 %v2252_v49 }
 0x8cc   : > { %v2305_v51 = vsel %vm1788_vm3, %v3790_v50, 0.0 }
 0x8cd   : > { %2306 = vadd.xlane.f32.xlu1 %v2305_v51 }
 0x8df   : > { %2427 = vrot.lane.b32.xlu0 %v2279_v1, %s4791_s24 }
 0x919   : > { %v2357_v54 = vpop.xlane.xlu2 %2356 }
 0x91a   : > { %v2358_v55 = vsub.f32 %v2352_v36, %v2357_v54  ;;  %v3450_v36 = vld [vmem:[#allocation31 + $0x8] sm:$0xff] }
 0x91b   : > { %2483 = vmatpush.bf16.msrb.mxu3 %v3450_v36 }
 0x91c   : > { %v2359_v61 = vmul.f32 1.442695, %v2358_v55 }
 0x91e   : > { %3791 = vpow2.f32 %v2359_v61 }
 0x91f   : > { %2484 = vmatpush.bf16.msrb.mxu3 %v3449_v42  ;;  %v3453_v42 = vld [vmem:[%s5756_s9] sm:$0xff] }
 0x924   : > { %v3792_v3 = vpop.eup %3791 }
 0x925   : > { %v2361_v6 = vsel %vm1788_vm3, %v3792_v3, 0.0 }
 0x926   : > { %2362 = vadd.xlane.f32.xlu1 %v2361_v6 }
 0x933   : > { %v2416_v7 = vpop.xlane.xlu0 %2415 }
 0x934   : > { %v2417_v8 = vsub.f32 %v2411_v40, %v2416_v7  ;;  %v3452_v7 = vld [vmem:[#allocation37 + $0x8] sm:$0xff] }
 0x936   : > { %v2418_v9 = vmul.f32 1.442695, %v2417_v8 }
 0x938   : > { %3793 = vpow2.f32 %v2418_v9 }
 0x93e   : > { %v3794_v4 = vpop.eup %3793  ;;  %v2254_v10 = vpop.xlane.xlu0 %2253 }
 0x93f   : > { %3795 = vrcp.f32 %v2254_v10  ;;  %v2420_v5 = vsel %vm1788_vm3, %v3794_v4, 0.0 }
 0x940   : > { %2421 = vadd.xlane.f32.xlu2 %v2420_v5  ;;  %v2307_v12 = vpop.xlane.xlu1 %2306 }
 0x941   : > { %3797 = vrcp.f32 %v2307_v12 }
 0x945   : > { %v3796_v13 = vpop.eup %3795 }
 0x946   : > { %v2256_v14 = vmul.f32 %v3796_v13, %v3788_v25  ;;  %v3757_v25 = vld [vmem:[#allocation32] ss:$0 sm:$0xff] }
 0x947   : > { %v3798_v15 = vpop.eup %3797 }
 0x948   : > { %v2257_v16 = vpack.c.bf16 %v2256_v14, %v2256_v14  ;;  %v2309_v17 = vmul.f32 %v3798_v15, %v3790_v50 }
 0x94a   : > { %v2310_v18 = vpack.c.bf16 %v2309_v17, %v2309_v17  ;;  %3371 = vmatmul.msk.bf16.vlgmr.msra.gmra.mxu0 %vm1788_vm3, %v2257_v16 }
 0x94c   : > { %3373 = vmatmul.msk.bf16.vlgmr.msra.gmra.mxu2 %vm1788_vm3, %v2310_v18 }
 0x951   : > { %v2428_v19 = vpop.permute.xlu0 %2427 }
 0x952   : > { %v2433_v20 = vsel %vm1804_vm4, %v2428_v19, 0 }
 0x953   : > { %2442 = vmatpush.bf16.msrb.mxu2 %v2433_v20 }
 0x958   : > { %2368 = vrot.lane.b32.xlu2 %v2226_v62, %s4791_s24  ;;  %s1616_s24 = scalar_lea.vmem [#allocation46], %s5379_s0  ;;  %s4619_s0 = scalar_lea.hbm %s5759_s12, 16 }
 0x959   : > { %p4621_p1 = scmp.lt.s32.totalorder %s4619_s0, %s4615_s18 }
 0x95b   : > { %p4622_p3 = por %p4621_p1, %p4620_p2 }
 0x95d   : > { %p4623_p9 = pnand %p4622_p3, %p4618_p0 }
 0x999   : > { %v2363_v21 = vpop.xlane.xlu1 %2362 }
 0x99a   : > { %3799 = vrcp.f32 %v2363_v21 }
 0x9a0   : > { %v3800_v23 = vpop.eup %3799 }
 0x9a1   : > { %v2365_v26 = vmul.f32 %v3800_v23, %v3792_v3 }
 0x9a3   : > { %v2366_v31 = vpack.c.bf16 %v2365_v26, %v2365_v26 }
 0x9b3   : > { %v2422_v22 = vpop.xlane.xlu2 %2421 }
 0x9b4   : > { %3801 = vrcp.f32 %v2422_v22 }
 0x9ba   : > { %v3802_v24 = vpop.eup %3801 }
 0x9bb   : > { %v2424_v27 = vmul.f32 %v3802_v24, %v3794_v4  ;;  %v2369_v28 = vpop.permute.xlu2 %2368  ;;  %v3451_v4 = vld [vmem:[#allocation37] sm:$0xff]  ;;  %v3758_v24 = vld [vmem:[#allocation34] ss:$0 sm:$0xff] }
 0x9bc   : > { %v2374_v29 = vsel %vm1804_vm4, %v2369_v28, 0  ;;  %vm2628_vm4 = vcmask 523264  }
 0x9bd   : > { %v2425_v30 = vpack.c.bf16 %v2424_v27, %v2424_v27  ;;  %2383 = vmatpush.bf16.msrb.mxu0 %v2374_v29  ;;  %v3759_v29 = vld [vmem:[#allocation35] ss:$0 sm:$0xff] }
 0x9bf   : > { %3377 = vmatmul.msk.bf16.vlgmr.msrb.gmra.mxu2 %vm1788_vm3, %v2425_v30 }
 0x9c0   : > { %3375 = vmatmul.msk.bf16.vlgmr.msrb.gmra.mxu0 %vm1788_vm3, %v2366_v31 }
 0x9c1   : > { %2590 = vmatpush.bf16.msra.mxu0 %v3452_v7 }
 0x9c5   : > { %2591 = vmatpush.bf16.msra.mxu0 %v3451_v4 }
 0x9c7   : > { %v2273_v32 = vpop.f32.mrf.mxu0 }
 0x9cf   : > { %v2275_v33 = vpop.f32.mrf.mxu0  ;;  %v2326_v35 = vpop.f32.mrf.mxu2 }
 0x9d7   : > { %v2328_v34 = vpop.f32.mrf.mxu2 }
 0xa3d   : > { %v2385_v37 = vpop.f32.mrf.mxu0 }
 0xa42   : > { %v2444_v38 = vpop.f32.mrf.mxu2 }
 0xa43   : > { %v3743_v39 = vpack.i.bf16 %v2444_v38, %v2385_v37 }
 0xa45   : > { %3744 = vrot.lane.b32.xlu1 %v3743_v39, %s4793_s13  ;;  %v2387_v40 = vpop.f32.mrf.mxu0  ;;  %v3456_v39 = vld [vmem:[%s5756_s9 + $0x18] sm:$0xff]  ;;  %s2792_s13 = sshll.u32 %s1616_s24, 4  ;;  %s2793_s13 = int_to_ptr.vmem [resolvable:$true] %s2792_s13 }
 0xa46   : > { %2636 = vmatpush.bf16.msra.mxu1 %v3456_v39  ;;  %v3455_v40 = vld [vmem:[%s5756_s9 + $0x10] sm:$0xff] }
 0xa4a   : > { %v2446_v41 = vpop.f32.mrf.mxu2  ;;  %2637 = vmatpush.bf16.msra.mxu1 %v3455_v40 }
 0xa4b   : > { %v3454_v41 = vld [vmem:[%s5756_s9 + $0x8] sm:$0xff] }
 0xa4e   : > { %2638 = vmatpush.bf16.msra.mxu1 %v3454_v41 }
 0xa52   : > { %2639 = vmatpush.bf16.msra.mxu1 %v3453_v42 }
 0xab7   : > { %v3745_v43 = vpop.permute.xlu1 %3744 }
 0xab8   : > { %v3747_v44 = vunpack.i.h.bf16 %v3745_v43  ;;  %v3746_v45 = vunpack.i.l.bf16 %v3745_v43 }
 0xaba   : > { %v2457_v46 = vsel %vm1768_vm1, %v2326_v35, %v3747_v44  ;;  %v2456_v47 = vsel %vm1768_vm1, %v2273_v32, %v3746_v45  ;;  %v3760_v44 = vld [vmem:[#allocation38] ss:$0 sm:$0xff] }
 0xabb   : > { %v2458_v48 = vpack.c.bf16 %v2457_v46, %v2456_v47 }
 0xabd   : > { %3386 = vmatmul.msk.bf16.vlgmr.msrb.gmra.mxu3 %vm1687_vm0, %v2458_v48 }
 0xb40   : > { %v2486_v49 = vpop.f32.mrf.mxu3 }
 0xb41   : > { %v2487_v50 = vadd.f32 %v3757_v25, %v2486_v49 }
 0xb43   : > { %v2491_v51 = vadd.f32 %v2487_v50, %v5528_v58  ;;  %v3761_v50 = vld [vmem:[#allocation40] ss:$0 sm:$0xff] }
 0xb45   : > { %v2493_v52 = vsel %vm1687_vm0, %v2491_v51, 0.0 }
 0xb46   : > { %2494 = vadd.xlane.f32.xlu0 %v2493_v52 }
 0xb48   : > { %v2488_v53 = vpop.f32.mrf.mxu3 }
 0xb49   : > { %v2489_v54 = vadd.f32 %v3757_v25, %v2488_v53 }
 0xb4b   : > { %v2492_v55 = vadd.f32 %v2489_v54, %v5531_v59 }
 0xb4d   : > { %v2496_v57 = vsel %vm1687_vm0, %v2492_v55, 0.0 }
 0xb4e   : > { %2497 = vadd.xlane.f32.xlu2 %v2496_v57 }
 0xbb9   : > { %v2495_v60 = vpop.xlane.xlu0 %2494 }
 0xbba   : > { %v2499_v61 = vmul.f32 %v2495_v60, %v5509_v11 }
 0xbbc   : > { %v2501_v62 = vsub.f32 %v2491_v51, %v2499_v61 }
 0xbbe   : > { %v2503_v63 = vmul.f32 %v2501_v62, %v2501_v62 }
 0xbc0   : > { %v2505_v0 = vsel %vm1687_vm0, %v2503_v63, 0.0 }
 0xbc1   : > { %v2498_v1 = vpop.xlane.xlu2 %2497  ;;  %2506 = vadd.xlane.f32.xlu1 %v2505_v0 }
 0xbc2   : > { %v2500_v58 = vmul.f32 %v2498_v1, %v5509_v11 }
 0xbc4   : > { %v2502_v2 = vsub.f32 %v2492_v55, %v2500_v58 }
 0xbc6   : > { %v2504_v3 = vmul.f32 %v2502_v2, %v2502_v2 }
 0xbc8   : > { %v2508_v6 = vsel %vm1687_vm0, %v2504_v3, 0.0 }
 0xbc9   : > { %2509 = vadd.xlane.f32.xlu0 %v2508_v6 }
 0xc34   : > { %v2507_v59 = vpop.xlane.xlu1 %2506 }
 0xc35   : > { %v2511_v8 = vmul.f32 %v2507_v59, %v5509_v11 }
 0xc37   : > { %v2513_v9 = vadd.f32 1e-05, %v2511_v8  ;;  %v3458_v8 = vld [vmem:[%s5757_s5 + $0x8] sm:$0xff] }
 0xc38   : > { %2763 = vmatpush.bf16.msra.mxu3 %v3458_v8 }
 0xc39   : > { %3803 = vrsqrt.f32 %v2513_v9  ;;  %vm2521_vm14 = vweird.f32 %v2513_v9 }
 0xc3c   : > { %v2510_v10 = vpop.xlane.xlu0 %2509 }
 0xc3d   : > { %v2512_v5 = vmul.f32 %v2510_v10, %v5509_v11  ;;  %v3460_v10 = vld [vmem:[#allocation44 + $0x8] sm:$0xff] }
 0xc3e   : > { %2735 = vmatpush.bf16.msra.mxu2 %v3460_v10 }
 0xc3f   : > { %v3804_v12 = vpop.eup %3803  ;;  %v2514_v13 = vadd.f32 1e-05, %v2512_v5 }
 0xc40   : > { %v2516_v14 = vmul.f32 %v3804_v12, %v2513_v9  ;;  %vm2522_vm13 = vweird.f32 %v3804_v12  ;;  %v3457_v9 = vld [vmem:[%s5757_s5] sm:$0xff] }
 0xc41   : > { %3805 = vrsqrt.f32 %v2514_v13  ;;  %vm2523_vm15 = vmor %vm2521_vm14, %vm2522_vm13  ;;  %vm2531_vm2 = vweird.f32 %v2514_v13  ;;  %2764 = vmatpush.bf16.msra.mxu3 %v3457_v9 }
 0xc42   : > { %v2517_v15 = vmul.f32 %v3804_v12, %v2516_v14 }
 0xc44   : > { %v2518_v16 = vmul.f32 0.5, %v2517_v15 }
 0xc46   : > { %v2519_v17 = vsub.f32 1.5, %v2518_v16 }
 0xc47   : > { %v3806_v18 = vpop.eup %3805 }
 0xc48   : > { %v2520_v19 = vmul.f32 %v3804_v12, %v2519_v17  ;;  %v2526_v20 = vmul.f32 %v3806_v18, %v2514_v13  ;;  %vm2532_vm1 = vweird.f32 %v3806_v18  ;;  %v3459_v13 = vld [vmem:[#allocation44] sm:$0xff] }
 0xc49   : > { %vm2533_vm3 = vmor %vm2531_vm2, %vm2532_vm1  ;;  %2736 = vmatpush.bf16.msra.mxu2 %v3459_v13 }
 0xc4a   : > { %v2524_v21 = vsel %vm2523_vm15, %v3804_v12, %v2520_v19  ;;  %v2527_v22 = vmul.f32 %v3806_v18, %v2526_v20 }
 0xc4b   : > { %v2535_v26 = vmul.f32 %v2524_v21, %v2501_v62 }
 0xc4c   : > { %v2528_v23 = vmul.f32 0.5, %v2527_v22 }
 0xc4d   : > { %v2540_v30 = vmul.f32 %v3758_v24, %v2535_v26  ;;  %v3762_v26 = vld [vmem:[#allocation41] ss:$0 sm:$0xff] }
 0xc4e   : > { %v2529_v27 = vsub.f32 1.5, %v2528_v23 }
 0xc4f   : > { %v2545_v33 = vadd.f32 %v3759_v29, %v2540_v30 }
 0xc50   : > { %v2530_v28 = vmul.f32 %v3806_v18, %v2529_v27 }
 0xc51   : > { %v2547_v36 = vmul.f32 %v2545_v33, %v5525_v56 }
 0xc52   : > { %v2534_v31 = vsel %vm2533_vm3, %v3806_v18, %v2530_v28 }
 0xc53   : > { %v2536_v32 = vmul.f32 %v2534_v31, %v2502_v2 }
 0xc55   : > { %v2541_v35 = vmul.f32 %v3758_v24, %v2536_v32 }
 0xc57   : > { %v2546_v34 = vadd.f32 %v3759_v29, %v2541_v35  ;;  %v3763_v29 = vld [vmem:[#allocation43] ss:$0 sm:$0xff] }
 0xc59   : > { %v2548_v37 = vmul.f32 %v2546_v34, %v5525_v56 }
 0xc5b   : > { %v2565_v38 = vpack.c.bf16 %v2548_v37, %v2547_v36 }
 0xc5d   : > { %3395 = vmatmul.msk.bf16.vlgmr.msra.gmra.mxu0 %vm1687_vm0, %v2565_v38 }
 0xcda   : > { %v2593_v43 = vpop.f32.mrf.mxu0 }
 0xcdb   : > { %v2594_v45 = vadd.f32 %v3760_v44, %v2593_v43 }
 0xcdd   : > { %v2598_v48 = vmax.f32 %v2594_v45, 0.0 }
 0xce2   : > { %v2595_v46 = vpop.f32.mrf.mxu0 }
 0xce3   : > { %v2596_v47 = vadd.f32 %v3760_v44, %v2595_v46  ;;  %v3764_v44 = vld [vmem:[%s5758_s8] ss:$0 sm:$0xff] }
 0xce5   : > { %v2599_v25 = vmax.f32 %v2596_v47, 0.0 }
 0xce7   : > { %v2600_v49 = vpack.c.bf16 %v2599_v25, %v2598_v48 }
 0xce9   : > { %3412 = vmatmul.msk.bf16.vlgmr.msra.gmra.mxu1 %vm2628_vm4, %v2600_v49 }
 0xd66   : > { %v2641_v51 = vpop.f32.mrf.mxu1 }
 0xd67   : > { %v2642_v52 = vadd.f32 %v3761_v50, %v2641_v51 }
 0xd69   : > { %v2646_v53 = vadd.f32 %v2642_v52, %v2547_v36 }
 0xd6b   : > { %v2648_v54 = vsel %vm1687_vm0, %v2646_v53, 0.0 }
 0xd6c   : > { %2649 = vadd.xlane.f32.xlu2 %v2648_v54 }
 0xd6e   : > { %v2643_v55 = vpop.f32.mrf.mxu1 }
 0xd6f   : > { %v2644_v57 = vadd.f32 %v3761_v50, %v2643_v55 }
 0xd71   : > { %v2647_v60 = vadd.f32 %v2644_v57, %v2548_v37 }
 0xd73   : > { %v2651_v61 = vsel %vm1687_vm0, %v2647_v60, 0.0 }
 0xd74   : > { %2652 = vadd.xlane.f32.xlu0 %v2651_v61 }
 0xddf   : > { %v2650_v62 = vpop.xlane.xlu2 %2649 }
 0xde0   : > { %v2654_v63 = vmul.f32 %v2650_v62, %v5509_v11 }
 0xde2   : > { %v2656_v0 = vsub.f32 %v2646_v53, %v2654_v63 }
 0xde4   : > { %v2658_v1 = vmul.f32 %v2656_v0, %v2656_v0 }
 0xde6   : > { %v2660_v58 = vsel %vm1687_vm0, %v2658_v1, 0.0 }
 0xde7   : > { %v2653_v2 = vpop.xlane.xlu0 %2652  ;;  %2661 = vadd.xlane.f32.xlu1 %v2660_v58 }
 0xde8   : > { %v2655_v3 = vmul.f32 %v2653_v2, %v5509_v11 }
 0xdea   : > { %v2657_v6 = vsub.f32 %v2647_v60, %v2655_v3 }
 0xdec   : > { %v2659_v59 = vmul.f32 %v2657_v6, %v2657_v6 }
 0xdee   : > { %v2663_v7 = vsel %vm1687_vm0, %v2659_v59, 0.0 }
 0xdef   : > { %2664 = vadd.xlane.f32.xlu2 %v2663_v7 }
 0xe5a   : > { %v2662_v4 = vpop.xlane.xlu1 %2661 }
 0xe5b   : > { %v2666_v5 = vmul.f32 %v2662_v4, %v5509_v11 }
 0xe5d   : > { %v2668_v12 = vadd.f32 1e-05, %v2666_v5 }
 0xe5f   : > { %3807 = vrsqrt.f32 %v2668_v12  ;;  %vm2676_vm6 = vweird.f32 %v2668_v12 }
 0xe62   : > { %v2665_v14 = vpop.xlane.xlu2 %2664 }
 0xe63   : > { %v2667_v15 = vmul.f32 %v2665_v14, %v5509_v11 }
 0xe65   : > { %v3808_v16 = vpop.eup %3807  ;;  %v2669_v17 = vadd.f32 1e-05, %v2667_v15 }
 0xe66   : > { %v2671_v18 = vmul.f32 %v3808_v16, %v2668_v12  ;;  %vm2677_vm5 = vweird.f32 %v3808_v16 }
 0xe67   : > { %3809 = vrsqrt.f32 %v2669_v17  ;;  %vm2678_vm7 = vmor %vm2676_vm6, %vm2677_vm5  ;;  %vm2686_vm9 = vweird.f32 %v2669_v17 }
 0xe68   : > { %v2672_v19 = vmul.f32 %v3808_v16, %v2671_v18 }
 0xe6a   : > { %v2673_v20 = vmul.f32 0.5, %v2672_v19 }
 0xe6c   : > { %v2674_v21 = vsub.f32 1.5, %v2673_v20 }
 0xe6d   : > { %v3810_v22 = vpop.eup %3809 }
 0xe6e   : > { %v2675_v23 = vmul.f32 %v3808_v16, %v2674_v21  ;;  %v2681_v24 = vmul.f32 %v3810_v22, %v2669_v17  ;;  %vm2687_vm8 = vweird.f32 %v3810_v22 }
 0xe6f   : > { %vm2688_vm10 = vmor %vm2686_vm9, %vm2687_vm8 }
 0xe70   : > { %v2679_v27 = vsel %vm2678_vm7, %v3808_v16, %v2675_v23  ;;  %v2682_v28 = vmul.f32 %v3810_v22, %v2681_v24 }
 0xe71   : > { %v2690_v30 = vmul.f32 %v2679_v27, %v2656_v0 }
 0xe72   : > { %v2683_v31 = vmul.f32 0.5, %v2682_v28 }
 0xe73   : > { %v2695_v11 = vmul.f32 %v3762_v26, %v2690_v30 }
 0xe74   : > { %v2684_v32 = vsub.f32 1.5, %v2683_v31 }
 0xe75   : > { %v2700_v33 = vadd.f32 %v3763_v29, %v2695_v11 }
 0xe76   : > { %v2685_v35 = vmul.f32 %v3810_v22, %v2684_v32 }
 0xe77   : > { %v2702_v34 = vmul.f32 %v2700_v33, %v5525_v56 }
 0xe78   : > { %v2689_v36 = vsel %vm2688_vm10, %v3810_v22, %v2685_v35 }
 0xe79   : > { %v2691_v37 = vmul.f32 %v2689_v36, %v2657_v6  ;;  %v2704_v38 = vpack.c.bf16 %v2702_v34, %v2702_v34 }
 0xe7b   : > { %v2696_v39 = vmul.f32 %v3762_v26, %v2691_v37  ;;  %3430 = vmatmul.msk.bf16.vlgmr.msra.gmra.mxu3 %vm1687_vm0, %v2704_v38 }
 0xe7d   : > { %v2701_v40 = vadd.f32 %v3763_v29, %v2696_v39 }
 0xe7f   : > { %v2703_v41 = vmul.f32 %v2701_v40, %v5525_v56 }
 0xe81   : > { %v2709_v42 = vpack.c.bf16 %v2703_v41, %v2703_v41 }
 0xe83   : > { %3421 = vmatmul.msk.bf16.vlgmr.msra.gmra.mxu2 %vm1687_vm0, %v2709_v42 }
 0xefe   : > { %v2766_v43 = vpop.f32.mrf.mxu3 }
 0xf06   : > { %v2738_v45 = vpop.f32.mrf.mxu2  ;;  %v2768_v46 = vpop.f32.mrf.mxu3 }
 0xf07   : > { %v2767_v47 = vadd.f32 %v2766_v43, %v2738_v45 }
 0xf09   : > { %v2774_v48 = vadd.f32 %v3764_v44, %v2767_v47 }
 0xf0b   : > { %vm2775_vm11 = vcmp.ge.f32.partialorder %v2774_v48, 0.0  ;;  %v2776_v56 = vmul.f32 0.125, %v2774_v48 }
 0xf0d   : > { %v2777_v25 = vsel %vm2775_vm11, %v2774_v48, %v2776_v56 }
 0xf0e   : > { %v2740_v49 = vpop.f32.mrf.mxu2  ;;  %2778 = vst.msk [vmem:[%s1616_s24] sm:$0xff] %vm1687_vm0, %v2777_v25 }
 0xf0f   : > { %4626 = shalt.err (!%p4623_p9)
}
 0xf10   : > { %3569 = dma.vmem_to_hbm [thread:$0]  (%p5038_p11), %s2793_s13, 128, %s2795_s17, %s2780_s7  }
 0xf11 PF: > { %s5761_s19 = sld [smem:[#allocation95_spill]]  ;;  %p5763_p7 = scmp.ge.s32.totalorder %s4725_s2, 2 }
 0xf13   : > { %p3579_p5 = pnand %p5763_p7, %p5042_p12 }
 0xf15   : > { %p3580_p8 = pneg %p3579_p5 }
 0xf17   : > { %s2806_s11 = sand.u32 1, %s5761_s19  }
 0xf18   : > { %s2807_s6 = scalar_lea.sflag [#allocation4], %s2806_s11 }
 0xf19   : > { %4708 = dma.done.wait (%p3580_p8), %s2807_s6, 128  }
 0xf1a   : > { %4710 = vsyncadd (%p3580_p8), %s2807_s6, 4294967168  ;;  %s5764_s2 = sld [smem:[#allocation96_spill]]  ;;  %s5766_s0 = smov %s4717_s28 }
 0xf1b   : > { %s5765_s8 = sld [smem:[#allocation97_spill]]  ;;  %s5767_s28 = smov %s4721_s1 }
 0xf20   : > { %p102_p10 = scmp.ge.s32.totalorder %s5764_s2, 4  }
 0xf21   : > { %s5768_s1 = smov %s5765_s8 }
 0xf22   :  { %104 = sbr.rel (!%p102_p10) target bundleno = 93 (0x5d), region = 377 }
 0xf27   :  { %2813 = vsyncpa [#allocation3], 1 }
 0xf28   :  { %2815 = vsyncpa [#allocation3 + $0x1], 1 }
 0xf29   :  { %2816 = vsyncpa [#allocation6], 1 }
 0xf2a   :  { %2818 = vsyncpa [#allocation6 + $0x1], 1 }
 0xf2b   :  { %2819 = vsyncpa [#allocation9], 1 }
 0xf2c   :  { %2820 = vsyncpa [#allocation12], 1 }
 0xf2d   :  { %2821 = vsyncpa [#allocation15], 1 }
 0xf2e   :  { %2822 = vsyncpa [#allocation18], 1 }
 0xf2f   :  { %2823 = vsyncpa [#allocation21], 1 }
 0xf30   :  { %2824 = vsyncpa [#allocation24], 1 }
 0xf31   :  { %2825 = vsyncpa [#allocation27], 1 }
 0xf32   :  { %2826 = vsyncpa [#allocation30], 1 }
 0xf33   :  { %2827 = vsyncpa [#allocation33], 1 }
 0xf34   :  { %2828 = vsyncpa [#allocation36], 1 }
 0xf35   :  { %2829 = vsyncpa [#allocation39], 1 }
 0xf36   :  { %2830 = vsyncpa [#allocation42], 1 }
 0xf37   :  { %2831 = vsyncpa [#allocation45], 1 }
 0xf38   :  { %2832 = vsyncpa [#allocation4], 1 }
 0xf39   :  { %2834 = vsyncpa [#allocation4 + $0x1], 1 }

// kernel: tpu_custom_call.1
= control target key start
LH: loop header
LB: loop body
LE: loop exit
PB: predicated region body
PF: predicated region fallthrough
CT: control target
= control target key end

     0   :  { %s4727_s6 = smov 1   ;;  %s4728_s10 = smov 2   ;;  %s5636_s0 = inlined_call_operand.smem [shape: u32[37], index: -1, kind: input, shape index: {}] }
   0x1   :  { %s4804_s5 = sld [smem:[%s5636_s0]]   ;;  %s4729_s14 = smov 3  }
   0x2   :  { %s4809_s9 = sld [smem:[%s5636_s0 + %s4727_s6]]   ;;  %s4730_s18 = smov 4  }
   0x3   :  { %s4814_s13 = sld [smem:[%s5636_s0 + %s4728_s10]]   ;;  %s4731_s22 = smov 5  }
   0x4   :  { %s4819_s17 = sld [smem:[%s5636_s0 + %s4729_s14]]   ;;  %s4732_s26 = smov 6  }
   0x5   :  { %s4824_s21 = sld [smem:[%s5636_s0 + %s4730_s18]]   ;;  %s4733_s30 = smov 7  }
   0x6   :  { %s4829_s25 = sld [smem:[%s5636_s0 + %s4731_s22]]   ;;  %s4734_s4 = smov 8  }
   0x7   :  { %5683 = sst [smem:[#allocation64_spill]] %s4804_s5  ;;  %s4735_s10 = smov 9  }
   0x8   :  { %5684 = sst [smem:[#allocation65_spill]] %s4809_s9  ;;  %s4736_s15 = smov 10  }
   0x9   :  { %5685 = sst [smem:[#allocation66_spill]] %s4814_s13  ;;  %s4737_s20 = smov 11  }
   0xa   :  { %5686 = sst [smem:[#allocation67_spill]] %s4819_s17  ;;  %s4739_s1 = smov 13  }
   0xb   :  { %5687 = sst [smem:[#allocation68_spill]] %s4824_s21  ;;  %s4740_s7 = smov 14  }
   0xc   :  { %5688 = sst [smem:[#allocation69_spill]] %s4829_s25  ;;  %s4742_s22 = smov 16  }
   0xd   :  { %s4834_s29 = sld [smem:[%s5636_s0 + %s4732_s26]]   ;;  %s4738_s26 = smov 12  }
   0xe   :  { %s4839_s3 = sld [smem:[%s5636_s0 + %s4733_s30]]   ;;  %s4743_s28 = smov 17  }
   0xf   :  { %s4844_s8 = sld [smem:[%s5636_s0 + %s4734_s4]]  }
  0x10   :  { %s4849_s14 = sld [smem:[%s5636_s0 + %s4735_s10]]  }
  0x11   :  { %s4854_s19 = sld [smem:[%s5636_s0 + %s4736_s15]]   ;;  %s4741_s15 = smov 15  }
  0x12   :  { %s4859_s24 = sld [smem:[%s5636_s0 + %s4737_s20]]  }
  0x13   :  { %5689 = sst [smem:[#allocation70_spill]] %s4834_s29 }
  0x14   :  { %5690 = sst [smem:[#allocation71_spill]] %s4839_s3 }
  0x15   :  { %5691 = sst [smem:[#allocation72_spill]] %s4844_s8 }
  0x16   :  { %5692 = sst [smem:[#allocation73_spill]] %s4849_s14 }
  0x17   :  { %5693 = sst [smem:[#allocation74_spill]] %s4854_s19 }
  0x18   :  { %5694 = sst [smem:[#allocation75_spill]] %s4859_s24 }
  0x19   :  { %s4864_s30 = sld [smem:[%s5636_s0 + %s4738_s26]]  }
  0x1a   :  { %s4869_s6 = sld [smem:[%s5636_s0 + %s4739_s1]]  }
  0x1b   :  { %s4874_s12 = sld [smem:[%s5636_s0 + %s4740_s7]]   ;;  %s4744_s7 = smov 18  }
  0x1c   :  { %s4879_s20 = sld [smem:[%s5636_s0 + %s4741_s15]]   ;;  %s4745_s15 = smov 19  }
  0x1d   :  { %s4884_s27 = sld [smem:[%s5636_s0 + %s4742_s22]]   ;;  %s4746_s22 = smov 20  }
  0x1e   :  { %s4889_s4 = sld [smem:[%s5636_s0 + %s4743_s28]]   ;;  %s4747_s28 = smov 21  }
  0x1f   :  { %s4894_s17 = sld [smem:[%s5636_s0 + %s4744_s7]]   ;;  %s4748_s7 = smov 22  }
  0x20   :  { %5695 = sst [smem:[#allocation76_spill]] %s4869_s6 }
  0x21   :  { %5696 = sst [smem:[#allocation77_spill]] %s4874_s12 }
  0x22   :  { %5697 = sst [smem:[#allocation78_spill]] %s4879_s20 }
  0x23   :  { %s4899_s13 = sld [smem:[%s5636_s0 + %s4745_s15]]   ;;  %s4749_s15 = smov 23  }
  0x24   :  { %5698 = sst [smem:[#allocation79_spill]] %s4889_s4 }
  0x25   :  { %5699 = sst [smem:[#allocation80_spill]] %s4894_s17 }
  0x26   :  { %s4904_s21 = sld [smem:[%s5636_s0 + %s4746_s22]]   ;;  %s4750_s22 = smov 24  }
  0x27   :  { %s4909_s9 = sld [smem:[%s5636_s0 + %s4747_s28]]   ;;  %s4751_s28 = smov 25  }
  0x28   :  { %s4914_s5 = sld [smem:[%s5636_s0 + %s4748_s7]]   ;;  %s4752_s7 = smov 26  }
  0x29   :  { %5700 = sst [smem:[#allocation81_spill]] %s4899_s13 }
  0x2a   :  { %s4919_s29 = sld [smem:[%s5636_s0 + %s4749_s15]]   ;;  %s4753_s15 = smov 27  }
  0x2b   :  { %s4924_s25 = sld [smem:[%s5636_s0 + %s4750_s22]]   ;;  %s4754_s22 = smov 28  }
  0x2c   :  { %s4934_s13 = sld [smem:[%s5636_s0 + %s4752_s7]]   ;;  %s4756_s7 = smov 30  }
  0x2d   :  { %5701 = sst [smem:[#allocation82_spill]] %s4909_s9 }
  0x2e   :  { %5702 = sst [smem:[#allocation83_spill]] %s4914_s5 }
  0x2f   :  { %s4929_s9 = sld [smem:[%s5636_s0 + %s4751_s28]]   ;;  %s4755_s28 = smov 29  }
  0x30   :  { %5703 = sst [smem:[#allocation84_spill]] %s4919_s29 }
  0x31   :  { %s4939_s29 = sld [smem:[%s5636_s0 + %s4753_s15]]   ;;  %s4757_s15 = smov 31  }
  0x32   :  { %5705 = sst [smem:[#allocation86_spill]] %s4934_s13 }
  0x33   :  { %s4944_s4 = sld [smem:[%s5636_s0 + %s4754_s22]]   ;;  %s4758_s22 = smov 32  }
  0x34   :  { %s4954_s20 = sld [smem:[%s5636_s0 + %s4756_s7]]   ;;  %s4760_s7 = smov 34  }
  0x35   :  { %5704 = sst [smem:[#allocation85_spill]] %s4929_s9 }
  0x36   :  { %s4949_s9 = sld [smem:[%s5636_s0 + %s4755_s28]]   ;;  %s4759_s28 = smov 33  }
  0x37   :  { %5706 = sst [smem:[#allocation87_spill]] %s4939_s29 }
  0x38   :  { %s4959_s29 = sld [smem:[%s5636_s0 + %s4757_s15]]   ;;  %s4761_s15 = smov 35  }
  0x39   :  { %5707 = sst [smem:[#allocation88_spill]] %s4944_s4 }
  0x3a   :  { %5709 = sst [smem:[#allocation90_spill]] %s4954_s20 }
  0x3b   :  { %s4964_s6 = sld [smem:[%s5636_s0 + %s4758_s22]]   ;;  %s4762_s22 = smov 36  }
  0x3c   :  { %5708 = sst [smem:[#allocation89_spill]] %s4949_s9 }
  0x3d   :  { %s4969_s9 = sld [smem:[%s5636_s0 + %s4759_s28]]  }
  0x3e   :  { %s4974_s20 = sld [smem:[%s5636_s0 + %s4760_s7]]  }
  0x3f   :  { %s4979_s24 = sld [smem:[%s5636_s0 + %s4761_s15]]  }
  0x41   :  { %5710 = sst [smem:[#allocation91_spill]] %s4964_s6 }
  0x42   :  { %s4984_s6 = sld [smem:[%s5636_s0 + %s4762_s22]]  }
  0x43   :  { %5711 = sst [smem:[#allocation92_spill]] %s4969_s9 }
  0x45   :  { %5712 = sst [smem:[#allocation93_spill]] %s4979_s24 }
  0x48   :  { %5713 = sst [smem:[#allocation94_spill]] %s4984_s6 }
  0x49   :  { %78 = vsyncpa [#allocation3], 0 }
  0x4a   :  { %80 = vsyncpa [#allocation3 + $0x1], 0 }
  0x4b   :  { %81 = vsyncpa [#allocation6], 0 }
  0x4c   :  { %83 = vsyncpa [#allocation6 + $0x1], 0 }
  0x4d   :  { %84 = vsyncpa [#allocation9], 0 }
  0x4e   :  { %85 = vsyncpa [#allocation12], 0 }
  0x4f   :  { %86 = vsyncpa [#allocation15], 0 }
  0x50   :  { %87 = vsyncpa [#allocation18], 0 }
  0x51   :  { %88 = vsyncpa [#allocation21], 0 }
  0x52   :  { %89 = vsyncpa [#allocation24], 0 }
  0x53   :  { %90 = vsyncpa [#allocation27], 0 }
  0x54   :  { %91 = vsyncpa [#allocation30], 0 }
  0x55   :  { %92 = vsyncpa [#allocation33], 0 }
  0x56   :  { %93 = vsyncpa [#allocation36], 0 }
  0x57   :  { %94 = vsyncpa [#allocation39], 0 }
  0x58   :  { %95 = vsyncpa [#allocation42], 0 }
  0x59   :  { %96 = vsyncpa [#allocation45], 0 }
  0x5a   :  { %97 = vsyncpa [#allocation4], 0 }
  0x5b   :  { %99 = vsyncpa [#allocation4 + $0x1], 0  ;;  %s4986_s0 = smov 0   ;;  %s4988_s28 = smov 0  }
  0x5c   :  { %s4990_s1 = smov 0   ;;  %s4992_s2 = smov 0  }
  0x5d LB: > { %s5714_s19 = sld [smem:[#allocation74_spill]]  ;;  %s5007_s7 = sadd.s32 4294967295, %s4725_s2   ;;  %s4713_s0 = sphi %s4986_s0, %s5766_s0   ;;  %s4725_s2 = sphi %s4992_s2, %s5764_s2   ;;  %s4721_s1 = sphi %s4990_s1, %s5768_s1   ;;  %s4717_s28 = sphi %s4988_s28, %s5767_s28  }
  0x5e   : > { %s5715_s17 = sld [smem:[#allocation80_spill]]  ;;  %s3231_s10 = sadd.s32 4294967294, %s4725_s2  }
  0x5f   : > { %s5716_s14 = sld [smem:[#allocation73_spill]]  ;;  %s5011_s11 = sadd.s32 1, %s4725_s2  }
  0x60   : > { %s5717_s13 = sld [smem:[#allocation86_spill]]  ;;  %s242_s15 = sadd.s32 1, %s4721_s1 }
  0x61   : > { %s5718_s12 = sld [smem:[#allocation77_spill]]  ;;  %s239_s16 = ssub.s32 %s4725_s2, %s5011_s11 }
  0x62   : > { %s5719_s8 = sld [smem:[#allocation72_spill]]  ;;  %p249_p0 = scmp.ne.s32.totalorder %s4721_s1, %s4717_s28 }
  0x63   : > { %s5720_s5 = sld [smem:[#allocation83_spill]]  ;;  %p240_p1 = scmp.eq.s32.totalorder %s239_s16, 0 }
  0x64   : > { %s5721_s4 = sld [smem:[#allocation88_spill]]  ;;  %p250_p2 = scmp.eq.s32.totalorder %s4725_s2, 0 }
  0x65   : > { %s5722_s3 = sld [smem:[#allocation71_spill]]  ;;  %p255_p3 = scmp.ne.s32.totalorder %s4717_s28, %s4713_s0 }
  0x66   : > { %5723 = sst [smem:[#allocation95_spill]] %s4713_s0  ;;  %p256_p4 = scmp.eq.s32.totalorder %s5007_s7, 0 }
  0x67   : > { %5724 = sst [smem:[#allocation96_spill]] %s5011_s11  ;;  %p5025_p5 = por %p250_p2, %p249_p0 }
  0x68   : > { %s5023_s18 = scalar_select %p240_p1, %s4721_s1, %s242_s15  }
  0x69   : > { %p5031_p6 = por %p256_p4, %p255_p3  ;;  %p914_p7 = scmp.eq.s32.totalorder %s5007_s7, 1 }
  0x6a   : > { %5725 = sst [smem:[#allocation97_spill]] %s5023_s18  ;;  %p920_p8 = scmp.eq.s32.totalorder %s3231_s10, 1 }
  0x6b   : > { %s5727_s23 = scalar_select %p5031_p6, 1, 0 }
  0x6c   : > { %p3232_p9 = scmp.ge.s32.totalorder %s4725_s2, 1  ;;  %p927_p10 = scmp.lt.s32.totalorder %s4725_s2, 3 }
  0x6d   : > { %5728 = sst [smem:[#allocation98_spill]] %s5727_s23  ;;  %p5038_p11 = por %p914_p7, %p249_p0 }
  0x6e   : > { %p5042_p12 = por %p920_p8, %p255_p3  ;;  %p5046_p13 = pnand %p3232_p9, %p927_p10 }
  0x6f   : > { %s5729_s26 = scalar_select %p5038_p11, 1, 0 }
  0x70   : > { %s5731_s15 = scalar_select %p5042_p12, 1, 0 }
  0x71   : > { %5730 = sst [smem:[#allocation99_spill]] %s5729_s26  ;;  %931 = sbr.rel (%p5046_p13) target bundleno = 452 (0x1c4), region = 12 }
  0x72   : > { %5732 = sst [smem:[#allocation100_spill]] %s5731_s15  ;;  %s953_s10 = sshll.u32 (!%p5046_p13), %s5719_s8, 4  ;;  %s954_s10 = int_to_ptr.hbm [resolvable:$true] %s953_s10 }
  0x73   : > { %s4763_s18 = smov (!%p5046_p13), [#allocation8]   ;;  %s979_s0 = sshll.u32 (!%p5046_p13), %s5714_s19, 4  ;;  %s980_s0 = int_to_ptr.hbm [resolvable:$true] %s979_s0 }
  0x74   : > { %s955_s11 = sshll.u32 (!%p5046_p13), %s4763_s18, 4  ;;  %s3811_s26 = sshra.s32 (!%p5046_p13), %s954_s10, 4  ;;  %s956_s11 = int_to_ptr.vmem [resolvable:$true] %s955_s11  ;;  %s3812_s26 = int_to_ptr.hbm [resolvable:$true] %s3811_s26 }
  0x75   : > { %s3813_s15 = scalar_lea.hbm (!%p5046_p13), %s3812_s26, 1  ;;  %s3817_s6 = scalar_lea.hbm (!%p5046_p13), %s5719_s8, 1 }
  0x76   : > { %p3814_p0 = scmp.ne.s32.totalorder %s3812_s26, %s3813_s15  ;;  %p3818_p3 = scmp.lt.s32.totalorder %s3812_s26, %s5719_s8 }
  0x77   : > { %p3819_p7 = scmp.lt.s32.totalorder %s3817_s6, %s3813_s15 }
  0x78   : > { %p3815_p1 = pnand %p3814_p0, %p256_p4 }
  0x79   : > { %p3820_p8 = por %p3819_p7, %p3818_p3 }
  0x7a   : > { %p3816_p2 = pneg %p3815_p1 }
  0x7c   : > { %p3821_p9 = pnand %p3820_p8, %p3816_p2 }
  0x7e   : > { %3824 = shalt.err (!%p3821_p9)
}
  0x7f   : > { %3464 = dma.hbm_to_vmem [thread:$0]  (%p256_p4), %s954_s10, 16, %s956_s11, [#allocation9]  }
  0x80   : > { %s4764_s18 = smov [#allocation11]   ;;  %s1005_s9 = sshll.u32 %s4864_s30, 4  ;;  %s5061_s9 = int_to_ptr.hbm [resolvable:$true] %s1005_s9 }
  0x81   : > { %s981_s24 = sshll.u32 %s4764_s18, 4  ;;  %s3839_s23 = sshra.s32 %s980_s0, 4  ;;  %s982_s24 = int_to_ptr.vmem [resolvable:$true] %s981_s24  ;;  %s3840_s23 = int_to_ptr.hbm [resolvable:$true] %s3839_s23 }
  0x82   : > { %s3841_s6 = scalar_lea.hbm %s3840_s23, 1  ;;  %s3845_s26 = scalar_lea.hbm %s5714_s19, 1 }
  0x83   : > { %p3842_p10 = scmp.ne.s32.totalorder %s3840_s23, %s3841_s6  ;;  %p3846_p2 = scmp.lt.s32.totalorder %s3840_s23, %s5714_s19 }
  0x84   : > { %p3847_p3 = scmp.lt.s32.totalorder %s3845_s26, %s3841_s6 }
  0x85   : > { %p3843_p0 = pnand %p3842_p10, %p256_p4 }
  0x86   : > { %p3848_p7 = por %p3847_p3, %p3846_p2 }
  0x87   : > { %p3844_p1 = pneg %p3843_p0 }
  0x89   : > { %p3849_p8 = pnand %p3848_p7, %p3844_p1 }
  0x8b   : > { %3852 = shalt.err (!%p3849_p8)
}
  0x8c   : > { %3468 = dma.hbm_to_vmem [thread:$0]  (%p256_p4), %s980_s0, 16, %s982_s24, [#allocation12]  }
  0x8d   : > { %s1031_s11 = sshll.u32 %s5718_s12, 4  ;;  %s4765_s15 = smov [#allocation14]   ;;  %s5070_s11 = int_to_ptr.hbm [resolvable:$true] %s1031_s11 }
  0x8e   : > { %s1007_s10 = sshll.u32 %s4765_s15, 4  ;;  %s3867_s18 = sshra.s32 %s5061_s9, 4  ;;  %s1008_s10 = int_to_ptr.vmem [resolvable:$true] %s1007_s10  ;;  %s3868_s18 = int_to_ptr.hbm [resolvable:$true] %s3867_s18 }
  0x8f   : > { %s3869_s23 = scalar_lea.hbm %s3868_s18, 1  ;;  %s3873_s6 = scalar_lea.hbm %s4864_s30, 1 }
  0x90   : > { %p3870_p9 = scmp.ne.s32.totalorder %s3868_s18, %s3869_s23  ;;  %p3874_p1 = scmp.lt.s32.totalorder %s3868_s18, %s4864_s30 }
  0x91   : > { %p3875_p2 = scmp.lt.s32.totalorder %s3873_s6, %s3869_s23 }
  0x92   : > { %p3871_p10 = pnand %p3870_p9, %p256_p4 }
  0x93   : > { %p3876_p3 = por %p3875_p2, %p3874_p1 }
  0x94   : > { %p3872_p0 = pneg %p3871_p10 }
  0x96   : > { %p3877_p7 = pnand %p3876_p3, %p3872_p0 }
  0x98   : > { %3880 = shalt.err (!%p3877_p7)
}
  0x99   : > { %3472 = dma.hbm_to_vmem [thread:$0]  (%p256_p4), %s5061_s9, 16, %s1008_s10, [#allocation15]  }
  0x9a   : > { %s4766_s24 = smov [#allocation17]   ;;  %s1055_s26 = sshll.u32 %s4884_s27, 4  ;;  %s5081_s26 = int_to_ptr.hbm [resolvable:$true] %s1055_s26 }
  0x9b   : > { %s1033_s0 = sshll.u32 %s4766_s24, 4  ;;  %s3895_s15 = sshra.s32 %s5070_s11, 4  ;;  %s1034_s0 = int_to_ptr.vmem [resolvable:$true] %s1033_s0  ;;  %s3896_s15 = int_to_ptr.hbm [resolvable:$true] %s3895_s15 }
  0x9c   : > { %s3897_s18 = scalar_lea.hbm %s3896_s15, 1  ;;  %s3901_s23 = scalar_lea.hbm %s5718_s12, 1 }
  0x9d   : > { %p3898_p8 = scmp.ne.s32.totalorder %s3896_s15, %s3897_s18  ;;  %p3902_p0 = scmp.lt.s32.totalorder %s3896_s15, %s5718_s12 }
  0x9e   : > { %p3903_p1 = scmp.lt.s32.totalorder %s3901_s23, %s3897_s18 }
  0x9f   : > { %p3899_p9 = pnand %p3898_p8, %p256_p4 }
  0xa0   : > { %p3904_p2 = por %p3903_p1, %p3902_p0 }
  0xa1   : > { %p3900_p10 = pneg %p3899_p9 }
  0xa3   : > { %p3905_p3 = pnand %p3904_p2, %p3900_p10 }
  0xa5   : > { %3908 = shalt.err (!%p3905_p3)
}
  0xa6   : > { %3476 = dma.hbm_to_vmem [thread:$0]  (%p256_p4), %s5070_s11, 16, %s1034_s0, [#allocation18]  }
  0xa7   : > { %s1081_s9 = sshll.u32 %s5715_s17, 4  ;;  %s4767_s10 = smov [#allocation20]   ;;  %s5092_s9 = int_to_ptr.hbm [resolvable:$true] %s1081_s9 }
  0xa8   : > { %s1057_s6 = sshll.u32 %s4767_s10, 4  ;;  %s3923_s24 = sshra.s32 %s5081_s26, 4  ;;  %s1058_s6 = int_to_ptr.vmem [resolvable:$true] %s1057_s6  ;;  %s3924_s24 = int_to_ptr.hbm [resolvable:$true] %s3923_s24 }
  0xa9   : > { %s3925_s15 = scalar_lea.hbm %s3924_s24, 1  ;;  %s3929_s18 = scalar_lea.hbm %s4884_s27, 1 }
  0xaa   : > { %p3926_p7 = scmp.ne.s32.totalorder %s3924_s24, %s3925_s15  ;;  %p3930_p10 = scmp.lt.s32.totalorder %s3924_s24, %s4884_s27 }
  0xab   : > { %p3931_p0 = scmp.lt.s32.totalorder %s3929_s18, %s3925_s15 }
  0xac   : > { %p3927_p8 = pnand %p3926_p7, %p256_p4 }
  0xad   : > { %p3932_p1 = por %p3931_p0, %p3930_p10 }
  0xae   : > { %p3928_p9 = pneg %p3927_p8 }
  0xb0   : > { %p3933_p2 = pnand %p3932_p1, %p3928_p9 }
  0xb2   : > { %3936 = shalt.err (!%p3933_p2)
}
  0xb3   : > { %3480 = dma.hbm_to_vmem [thread:$0]  (%p256_p4), %s5081_s26, 16, %s1058_s6, [#allocation21]  }
  0xb4   : > { %s4768_s11 = smov [#allocation23]   ;;  %s1107_s23 = sshll.u32 %s4904_s21, 4  ;;  %s5103_s23 = int_to_ptr.hbm [resolvable:$true] %s1107_s23 }
  0xb5   : > { %s1083_s0 = sshll.u32 %s4768_s11, 4  ;;  %s3951_s10 = sshra.s32 %s5092_s9, 4  ;;  %s1084_s0 = int_to_ptr.vmem [resolvable:$true] %s1083_s0  ;;  %s3952_s10 = int_to_ptr.hbm [resolvable:$true] %s3951_s10 }
  0xb6   : > { %s3953_s24 = scalar_lea.hbm %s3952_s10, 1  ;;  %s3957_s15 = scalar_lea.hbm %s5715_s17, 1 }
  0xb7   : > { %p3954_p3 = scmp.ne.s32.totalorder %s3952_s10, %s3953_s24  ;;  %p3958_p9 = scmp.lt.s32.totalorder %s3952_s10, %s5715_s17 }
  0xb8   : > { %p3959_p10 = scmp.lt.s32.totalorder %s3957_s15, %s3953_s24 }
  0xb9   : > { %p3955_p7 = pnand %p3954_p3, %p256_p4 }
  0xba   : > { %p3960_p0 = por %p3959_p10, %p3958_p9 }
  0xbb   : > { %p3956_p8 = pneg %p3955_p7 }
  0xbd   : > { %p3961_p1 = pnand %p3960_p0, %p3956_p8 }
  0xbf   : > { %3964 = shalt.err (!%p3961_p1)
}
  0xc0   : > { %3484 = dma.hbm_to_vmem [thread:$0]  (%p256_p4), %s5092_s9, 16, %s1084_s0, [#allocation24]  }
  0xc1   : > { %s1133_s26 = sshll.u32 %s5720_s5, 4  ;;  %s4769_s6 = smov [#allocation26]   ;;  %s5114_s26 = int_to_ptr.hbm [resolvable:$true] %s1133_s26 }
  0xc2   : > { %s1109_s18 = sshll.u32 %s4769_s6, 4  ;;  %s3979_s11 = sshra.s32 %s5103_s23, 4  ;;  %s1110_s18 = int_to_ptr.vmem [resolvable:$true] %s1109_s18  ;;  %s3980_s11 = int_to_ptr.hbm [resolvable:$true] %s3979_s11 }
  0xc3   : > { %s3981_s10 = scalar_lea.hbm %s3980_s11, 1  ;;  %s3985_s24 = scalar_lea.hbm %s4904_s21, 1 }
  0xc4   : > { %p3982_p2 = scmp.ne.s32.totalorder %s3980_s11, %s3981_s10  ;;  %p3986_p8 = scmp.lt.s32.totalorder %s3980_s11, %s4904_s21 }
  0xc5   : > { %p3987_p9 = scmp.lt.s32.totalorder %s3985_s24, %s3981_s10 }
  0xc6   : > { %p3983_p3 = pnand %p3982_p2, %p256_p4 }
  0xc7   : > { %p3988_p10 = por %p3987_p9, %p3986_p8 }
  0xc8   : > { %p3984_p7 = pneg %p3983_p3 }
  0xca   : > { %p3989_p0 = pnand %p3988_p10, %p3984_p7 }
  0xcc   : > { %3992 = shalt.err (!%p3989_p0)
}
  0xcd   : > { %3488 = dma.hbm_to_vmem [thread:$0]  (%p256_p4), %s5103_s23, 16, %s1110_s18, [#allocation27]  }
  0xce   : > { %s4770_s9 = smov [#allocation29]   ;;  %s1159_s15 = sshll.u32 %s4924_s25, 4  ;;  %s5125_s15 = int_to_ptr.hbm [resolvable:$true] %s1159_s15 }
  0xcf   : > { %s1135_s0 = sshll.u32 %s4770_s9, 4  ;;  %s4007_s6 = sshra.s32 %s5114_s26, 4  ;;  %s1136_s0 = int_to_ptr.vmem [resolvable:$true] %s1135_s0  ;;  %s4008_s6 = int_to_ptr.hbm [resolvable:$true] %s4007_s6 }
  0xd0   : > { %s4009_s11 = scalar_lea.hbm %s4008_s6, 1  ;;  %s4013_s10 = scalar_lea.hbm %s5720_s5, 1 }
  0xd1   : > { %p4010_p1 = scmp.ne.s32.totalorder %s4008_s6, %s4009_s11  ;;  %p4014_p7 = scmp.lt.s32.totalorder %s4008_s6, %s5720_s5 }
  0xd2   : > { %p4015_p8 = scmp.lt.s32.totalorder %s4013_s10, %s4009_s11 }
  0xd3   : > { %p4011_p2 = pnand %p4010_p1, %p256_p4 }
  0xd4   : > { %p4016_p9 = por %p4015_p8, %p4014_p7 }
  0xd5   : > { %p4012_p3 = pneg %p4011_p2 }
  0xd7   : > { %p4017_p10 = pnand %p4016_p9, %p4012_p3 }
  0xd9   : > { %4020 = shalt.err (!%p4017_p10)
}
  0xda   : > { %3492 = dma.hbm_to_vmem [thread:$0]  (%p256_p4), %s5114_s26, 16, %s1136_s0, [#allocation30]  }
  0xdb   : > { %s1183_s23 = sshll.u32 %s5717_s13, 4  ;;  %s4771_s18 = smov [#allocation32]   ;;  %s5136_s23 = int_to_ptr.hbm [resolvable:$true] %s1183_s23 }
  0xdc   : > { %s1161_s24 = sshll.u32 %s4771_s18, 4  ;;  %s4035_s9 = sshra.s32 %s5125_s15, 4  ;;  %s1162_s24 = int_to_ptr.vmem [resolvable:$true] %s1161_s24  ;;  %s4036_s9 = int_to_ptr.hbm [resolvable:$true] %s4035_s9 }
  0xdd   : > { %s4037_s6 = scalar_lea.hbm %s4036_s9, 1  ;;  %s4041_s11 = scalar_lea.hbm %s4924_s25, 1 }
  0xde   : > { %p4038_p0 = scmp.ne.s32.totalorder %s4036_s9, %s4037_s6  ;;  %p4042_p3 = scmp.lt.s32.totalorder %s4036_s9, %s4924_s25 }
  0xdf   : > { %p4043_p7 = scmp.lt.s32.totalorder %s4041_s11, %s4037_s6 }
  0xe0   : > { %p4039_p1 = pnand %p4038_p0, %p256_p4 }
  0xe1   : > { %p4044_p8 = por %p4043_p7, %p4042_p3 }
  0xe2   : > { %p4040_p2 = pneg %p4039_p1 }
  0xe4   : > { %p4045_p9 = pnand %p4044_p8, %p4040_p2 }
  0xe6   : > { %4048 = shalt.err (!%p4045_p9)
}
  0xe7   : > { %3496 = dma.hbm_to_vmem [thread:$0]  (%p256_p4), %s5125_s15, 16, %s1162_s24, [#allocation33]  }
  0xe8   : > { %s4772_s26 = smov [#allocation35]   ;;  %s1209_s10 = sshll.u32 %s5721_s4, 4  ;;  %s5147_s10 = int_to_ptr.hbm [resolvable:$true] %s1209_s10 }
  0xe9   : > { %s1185_s0 = sshll.u32 %s4772_s26, 4  ;;  %s4063_s18 = sshra.s32 %s5136_s23, 4  ;;  %s1186_s0 = int_to_ptr.vmem [resolvable:$true] %s1185_s0  ;;  %s4064_s18 = int_to_ptr.hbm [resolvable:$true] %s4063_s18 }
  0xea   : > { %s4065_s9 = scalar_lea.hbm %s4064_s18, 1  ;;  %s4069_s6 = scalar_lea.hbm %s5717_s13, 1 }
  0xeb   : > { %p4066_p10 = scmp.ne.s32.totalorder %s4064_s18, %s4065_s9  ;;  %p4070_p2 = scmp.lt.s32.totalorder %s4064_s18, %s5717_s13 }
  0xec   : > { %p4071_p3 = scmp.lt.s32.totalorder %s4069_s6, %s4065_s9 }
  0xed   : > { %p4067_p0 = pnand %p4066_p10, %p256_p4 }
  0xee   : > { %p4072_p7 = por %p4071_p3, %p4070_p2 }
  0xef   : > { %p4068_p1 = pneg %p4067_p0 }
  0xf1   : > { %p4073_p8 = pnand %p4072_p7, %p4068_p1 }
  0xf3   : > { %4076 = shalt.err (!%p4073_p8)
}
  0xf4   : > { %3500 = dma.hbm_to_vmem [thread:$0]  (%p256_p4), %s5136_s23, 16, %s1186_s0, [#allocation36]  }
  0xf5   : > { %s1236_s15 = sshll.u32 %s4959_s29, 4  ;;  %s4773_s24 = smov [#allocation38]   ;;  %s5158_s15 = int_to_ptr.hbm [resolvable:$true] %s1236_s15 }
  0xf6   : > { %s1211_s11 = sshll.u32 %s4773_s24, 4  ;;  %s4091_s26 = sshra.s32 %s5147_s10, 4  ;;  %s1212_s11 = int_to_ptr.vmem [resolvable:$true] %s1211_s11  ;;  %s4092_s26 = int_to_ptr.hbm [resolvable:$true] %s4091_s26 }
  0xf7   : > { %s4093_s18 = scalar_lea.hbm %s4092_s26, 1  ;;  %s4097_s9 = scalar_lea.hbm %s5721_s4, 1 }
  0xf8   : > { %p4094_p9 = scmp.ne.s32.totalorder %s4092_s26, %s4093_s18  ;;  %p4098_p1 = scmp.lt.s32.totalorder %s4092_s26, %s5721_s4 }
  0xf9   : > { %p4099_p2 = scmp.lt.s32.totalorder %s4097_s9, %s4093_s18 }
  0xfa   : > { %p4095_p10 = pnand %p4094_p9, %p256_p4 }
  0xfb   : > { %p4100_p3 = por %p4099_p2, %p4098_p1 }
  0xfc   : > { %p4096_p0 = pneg %p4095_p10 }
  0xfe   : > { %p4101_p7 = pnand %p4100_p3, %p4096_p0 }
 0x100   : > { %4104 = shalt.err (!%p4101_p7)
}
 0x101   : > { %3504 = dma.hbm_to_vmem [thread:$0]  (%p256_p4), %s5147_s10, 16, %s1212_s11, [#allocation39]  }
 0x102   : > { %s4774_s23 = smov [#allocation41]   ;;  %s938_s6 = sshll.u32 %s5722_s3, 4  ;;  %s939_s6 = int_to_ptr.hbm [resolvable:$true] %s938_s6 }
 0x103   : > { %s1238_s0 = sshll.u32 %s4774_s23, 4  ;;  %s4119_s24 = sshra.s32 %s5158_s15, 4  ;;  %s1239_s0 = int_to_ptr.vmem [resolvable:$true] %s1238_s0  ;;  %s4120_s24 = int_to_ptr.hbm [resolvable:$true] %s4119_s24 }
 0x104   : > { %s4121_s26 = scalar_lea.hbm %s4120_s24, 1  ;;  %s4125_s18 = scalar_lea.hbm %s4959_s29, 1 }
 0x105   : > { %p4122_p8 = scmp.ne.s32.totalorder %s4120_s24, %s4121_s26  ;;  %p4126_p0 = scmp.lt.s32.totalorder %s4120_s24, %s4959_s29 }
 0x106   : > { %p4127_p1 = scmp.lt.s32.totalorder %s4125_s18, %s4121_s26 }
 0x107   : > { %p4123_p9 = pnand %p4122_p8, %p256_p4 }
 0x108   : > { %p4128_p2 = por %p4127_p1, %p4126_p0 }
 0x109   : > { %p4124_p10 = pneg %p4123_p9 }
 0x10b   : > { %p4129_p3 = pnand %p4128_p2, %p4124_p10 }
 0x10d   : > { %4132 = shalt.err (!%p4129_p3)
}
 0x10e   : > { %3508 = dma.hbm_to_vmem [thread:$0]  (%p256_p4), %s5158_s15, 16, %s1239_s0, [#allocation42]  }
 0x10f   : > { %s4775_s10 = smov [#allocation7]   ;;  %s4147_s9 = sshra.s32 %s939_s6, 4  ;;  %s4148_s9 = int_to_ptr.hbm [resolvable:$true] %s4147_s9 }
 0x110   : > { %s940_s11 = sshll.u32 %s4775_s10, 4  ;;  %s4149_s23 = scalar_lea.hbm %s4148_s9, 16  ;;  %s941_s11 = int_to_ptr.vmem [resolvable:$true] %s940_s11 }
 0x111   : > { %p4150_p7 = scmp.ne.s32.totalorder %s4148_s9, %s4149_s23  ;;  %s4153_s24 = scalar_lea.hbm %s5722_s3, 16 }
 0x112   : > { %p4154_p10 = scmp.lt.s32.totalorder %s4148_s9, %s5722_s3  ;;  %p4155_p0 = scmp.lt.s32.totalorder %s4153_s24, %s4149_s23 }
 0x113   : > { %p4151_p8 = pnand %p4150_p7, %p256_p4 }
 0x114   : > { %p4156_p1 = por %p4155_p0, %p4154_p10 }
 0x115   : > { %p4152_p9 = pneg %p4151_p8 }
 0x117   : > { %p4157_p2 = pnand %p4156_p1, %p4152_p9 }
 0x119   : > { %4160 = shalt.err (!%p4157_p2)
}
 0x11a   : > { %s5666_s26 = smov 64   ;;  %s5734_s15 = sld [smem:[#allocation75_spill]] }
 0x11b   : > { %s5673_s0 = smov 4   ;;  %s964_s18 = sshll.u32 %s5716_s14, 4  ;;  %s965_s18 = int_to_ptr.hbm [resolvable:$true] %s964_s18 }
 0x11c   : > { %3462 = dma.hbm_to_vmem [thread:$0]  (%p256_p4), %s939_s6, 256, %s941_s11, [#allocation6], %s5666_s26, %s5666_s26, %s5673_s0  }
 0x11d   : > { %s4778_s10 = smov [#allocation10]   ;;  %s4175_s24 = sshra.s32 %s965_s18, 4  ;;  %s4176_s24 = int_to_ptr.hbm [resolvable:$true] %s4175_s24 }
 0x11e   : > { %s966_s9 = sshll.u32 %s4778_s10, 4  ;;  %s4177_s3 = scalar_lea.hbm %s4176_s24, 16  ;;  %s967_s9 = int_to_ptr.vmem [resolvable:$true] %s966_s9 }
 0x11f   : > { %p4178_p3 = scmp.ne.s32.totalorder %s4176_s24, %s4177_s3  ;;  %s4181_s4 = scalar_lea.hbm %s5716_s14, 16 }
 0x120   : > { %s990_s23 = sshll.u32 %s5734_s15, 4  ;;  %p4182_p9 = scmp.lt.s32.totalorder %s4176_s24, %s5716_s14  ;;  %s991_s23 = int_to_ptr.hbm [resolvable:$true] %s990_s23 }
 0x121   : > { %p4179_p7 = pnand %p4178_p3, %p256_p4  ;;  %p4183_p10 = scmp.lt.s32.totalorder %s4181_s4, %s4177_s3 }
 0x123   : > { %p4180_p8 = pneg %p4179_p7  ;;  %p4184_p0 = por %p4183_p10, %p4182_p9 }
 0x125   : > { %p4185_p1 = pnand %p4184_p0, %p4180_p8 }
 0x127   : > { %4188 = shalt.err (!%p4185_p1)
}
 0x128   : > { %s5735_s6 = sld [smem:[#allocation76_spill]]  ;;  %s4779_s11 = smov [#allocation13]  }
 0x129   : > { %3466 = dma.hbm_to_vmem [thread:$0]  (%p256_p4), %s965_s18, 256, %s967_s9, [#allocation9], %s5666_s26, %s5666_s26, %s5673_s0  }
 0x12a   : > { %s992_s10 = sshll.u32 %s4779_s11, 4  ;;  %s4203_s3 = sshra.s32 %s991_s23, 4  ;;  %s993_s10 = int_to_ptr.vmem [resolvable:$true] %s992_s10  ;;  %s4204_s3 = int_to_ptr.hbm [resolvable:$true] %s4203_s3 }
 0x12b   : > { %s4205_s4 = scalar_lea.hbm %s4204_s3, 16  ;;  %s4209_s24 = scalar_lea.hbm %s5734_s15, 16 }
 0x12c   : > { %p4206_p2 = scmp.ne.s32.totalorder %s4204_s3, %s4205_s4  ;;  %p4210_p8 = scmp.lt.s32.totalorder %s4204_s3, %s5734_s15 }
 0x12d   : > { %p4211_p9 = scmp.lt.s32.totalorder %s4209_s24, %s4205_s4 }
 0x12e   : > { %s1016_s5 = sshll.u32 %s5735_s6, 4  ;;  %p4207_p3 = pnand %p4206_p2, %p256_p4  ;;  %s5198_s5 = int_to_ptr.hbm [resolvable:$true] %s1016_s5 }
 0x12f   : > { %p4212_p10 = por %p4211_p9, %p4210_p8 }
 0x130   : > { %p4208_p7 = pneg %p4207_p3 }
 0x132   : > { %p4213_p0 = pnand %p4212_p10, %p4208_p7 }
 0x134   : > { %4216 = shalt.err (!%p4213_p0)
}
 0x135   : > { %s5736_s18 = sld [smem:[#allocation78_spill]]  ;;  %s4780_s11 = smov [#allocation16]  }
 0x136   : > { %3470 = dma.hbm_to_vmem [thread:$0]  (%p256_p4), %s991_s23, 256, %s993_s10, [#allocation12], %s5666_s26, %s5666_s26, %s5673_s0  }
 0x137   : > { %s1018_s8 = sshll.u32 %s4780_s11, 4  ;;  %s4231_s3 = sshra.s32 %s5198_s5, 4  ;;  %s1019_s8 = int_to_ptr.vmem [resolvable:$true] %s1018_s8  ;;  %s4232_s3 = int_to_ptr.hbm [resolvable:$true] %s4231_s3 }
 0x138   : > { %s4233_s4 = scalar_lea.hbm %s4232_s3, 16  ;;  %s4237_s24 = scalar_lea.hbm %s5735_s6, 16 }
 0x139   : > { %p4234_p1 = scmp.ne.s32.totalorder %s4232_s3, %s4233_s4  ;;  %p4238_p7 = scmp.lt.s32.totalorder %s4232_s3, %s5735_s6 }
 0x13a   : > { %p4239_p8 = scmp.lt.s32.totalorder %s4237_s24, %s4233_s4 }
 0x13b   : > { %s1043_s9 = sshll.u32 %s5736_s18, 4  ;;  %p4235_p2 = pnand %p4234_p1, %p256_p4  ;;  %s5210_s9 = int_to_ptr.hbm [resolvable:$true] %s1043_s9 }
 0x13c   : > { %p4240_p9 = por %p4239_p8, %p4238_p7 }
 0x13d   : > { %p4236_p3 = pneg %p4235_p2 }
 0x13f   : > { %p4241_p10 = pnand %p4240_p9, %p4236_p3 }
 0x141   : > { %4244 = shalt.err (!%p4241_p10)
}
 0x142   : > { %s5737_s23 = sld [smem:[#allocation79_spill]]  ;;  %s4781_s10 = smov [#allocation19]  }
 0x143   : > { %3474 = dma.hbm_to_vmem [thread:$0]  (%p256_p4), %s5198_s5, 256, %s1019_s8, [#allocation15], %s5666_s26, %s5666_s26, %s5673_s0  }
 0x144   : > { %s1045_s11 = sshll.u32 %s4781_s10, 4  ;;  %s4259_s3 = sshra.s32 %s5210_s9, 4  ;;  %s1046_s11 = int_to_ptr.vmem [resolvable:$true] %s1045_s11  ;;  %s4260_s3 = int_to_ptr.hbm [resolvable:$true] %s4259_s3 }
 0x145   : > { %s4261_s4 = scalar_lea.hbm %s4260_s3, 1  ;;  %s4265_s24 = scalar_lea.hbm %s5736_s18, 1 }
 0x146   : > { %p4262_p0 = scmp.ne.s32.totalorder %s4260_s3, %s4261_s4  ;;  %p4266_p3 = scmp.lt.s32.totalorder %s4260_s3, %s5736_s18 }
 0x147   : > { %p4267_p7 = scmp.lt.s32.totalorder %s4265_s24, %s4261_s4 }
 0x148   : > { %s1066_s12 = sshll.u32 %s5737_s23, 4  ;;  %p4263_p1 = pnand %p4262_p0, %p256_p4  ;;  %s5224_s12 = int_to_ptr.hbm [resolvable:$true] %s1066_s12 }
 0x149   : > { %p4268_p8 = por %p4267_p7, %p4266_p3 }
 0x14a   : > { %p4264_p2 = pneg %p4263_p1 }
 0x14c   : > { %p4269_p9 = pnand %p4268_p8, %p4264_p2 }
 0x14e   : > { %4272 = shalt.err (!%p4269_p9)
}
 0x14f   : > { %s5738_s5 = sld [smem:[#allocation81_spill]]  ;;  %s4782_s10 = smov [#allocation22]  }
 0x150   : > { %3478 = dma.hbm_to_vmem [thread:$0]  (%p256_p4), %s5210_s9, 16, %s1046_s11, [#allocation18]  }
 0x151   : > { %s1068_s26 = sshll.u32 %s4782_s10, 4  ;;  %s4287_s3 = sshra.s32 %s5224_s12, 4  ;;  %s1069_s26 = int_to_ptr.vmem [resolvable:$true] %s1068_s26  ;;  %s4288_s3 = int_to_ptr.hbm [resolvable:$true] %s4287_s3 }
 0x152   : > { %s4289_s4 = scalar_lea.hbm %s4288_s3, 16  ;;  %s4293_s24 = scalar_lea.hbm %s5737_s23, 16 }
 0x153   : > { %p4290_p10 = scmp.ne.s32.totalorder %s4288_s3, %s4289_s4  ;;  %p4294_p2 = scmp.lt.s32.totalorder %s4288_s3, %s5737_s23 }
 0x154   : > { %p4295_p3 = scmp.lt.s32.totalorder %s4293_s24, %s4289_s4 }
 0x155   : > { %s1092_s8 = sshll.u32 %s5738_s5, 4  ;;  %p4291_p0 = pnand %p4290_p10, %p256_p4  ;;  %s5235_s8 = int_to_ptr.hbm [resolvable:$true] %s1092_s8 }
 0x156   : > { %p4296_p7 = por %p4295_p3, %p4294_p2 }
 0x157   : > { %p4292_p1 = pneg %p4291_p0 }
 0x159   : > { %p4297_p8 = pnand %p4296_p7, %p4292_p1 }
 0x15b   : > { %4300 = shalt.err (!%p4297_p8)
}
 0x15c   : > { %s5739_s9 = smov 64   ;;  %s5740_s11 = sld [smem:[#allocation82_spill]] }
 0x15d   : > { %3482 = dma.hbm_to_vmem [thread:$0]  (%p256_p4), %s5224_s12, 256, %s1069_s26, [#allocation21], %s5739_s9, %s5739_s9, %s5673_s0  }
 0x15e   : > { %s4783_s10 = smov [#allocation25]   ;;  %s4315_s3 = sshra.s32 %s5235_s8, 4  ;;  %s4316_s3 = int_to_ptr.hbm [resolvable:$true] %s4315_s3 }
 0x15f   : > { %s1094_s6 = sshll.u32 %s4783_s10, 4  ;;  %s4317_s4 = scalar_lea.hbm %s4316_s3, 16  ;;  %s1095_s6 = int_to_ptr.vmem [resolvable:$true] %s1094_s6 }
 0x160   : > { %p4318_p9 = scmp.ne.s32.totalorder %s4316_s3, %s4317_s4  ;;  %s4321_s24 = scalar_lea.hbm %s5738_s5, 16 }
 0x161   : > { %p4322_p1 = scmp.lt.s32.totalorder %s4316_s3, %s5738_s5  ;;  %p4323_p2 = scmp.lt.s32.totalorder %s4321_s24, %s4317_s4 }
 0x162   : > { %s1118_s13 = sshll.u32 %s5740_s11, 4  ;;  %p4319_p10 = pnand %p4318_p9, %p256_p4  ;;  %s5249_s13 = int_to_ptr.hbm [resolvable:$true] %s1118_s13 }
 0x163   : > { %p4324_p3 = por %p4323_p2, %p4322_p1 }
 0x164   : > { %p4320_p0 = pneg %p4319_p10 }
 0x166   : > { %p4325_p7 = pnand %p4324_p3, %p4320_p0 }
 0x168   : > { %4328 = shalt.err (!%p4325_p7)
}
 0x169   : > { %s5741_s12 = sld [smem:[#allocation84_spill]]  ;;  %s4784_s10 = smov [#allocation28]  }
 0x16a   : > { %3486 = dma.hbm_to_vmem [thread:$0]  (%p256_p4), %s5235_s8, 256, %s1095_s6, [#allocation24], %s5739_s9, %s5739_s9, %s5673_s0  }
 0x16b   : > { %s1120_s14 = sshll.u32 %s4784_s10, 4  ;;  %s4343_s3 = sshra.s32 %s5249_s13, 4  ;;  %s1121_s14 = int_to_ptr.vmem [resolvable:$true] %s1120_s14  ;;  %s4344_s3 = int_to_ptr.hbm [resolvable:$true] %s4343_s3 }
 0x16c   : > { %s4345_s4 = scalar_lea.hbm %s4344_s3, 16  ;;  %s4349_s24 = scalar_lea.hbm %s5740_s11, 16 }
 0x16d   : > { %p4346_p8 = scmp.ne.s32.totalorder %s4344_s3, %s4345_s4  ;;  %p4350_p0 = scmp.lt.s32.totalorder %s4344_s3, %s5740_s11 }
 0x16e   : > { %p4351_p1 = scmp.lt.s32.totalorder %s4349_s24, %s4345_s4 }
 0x16f   : > { %s1144_s26 = sshll.u32 %s5741_s12, 4  ;;  %p4347_p9 = pnand %p4346_p8, %p256_p4  ;;  %s5263_s26 = int_to_ptr.hbm [resolvable:$true] %s1144_s26 }
 0x170   : > { %p4352_p2 = por %p4351_p1, %p4350_p0 }
 0x171   : > { %p4348_p10 = pneg %p4347_p9 }
 0x173   : > { %p4353_p3 = pnand %p4352_p2, %p4348_p10 }
 0x175   : > { %4356 = shalt.err (!%p4353_p3)
}
 0x176   : > { %s5742_s6 = sld [smem:[#allocation85_spill]]  ;;  %s4785_s8 = smov [#allocation31]  }
 0x177   : > { %3490 = dma.hbm_to_vmem [thread:$0]  (%p256_p4), %s5249_s13, 256, %s1121_s14, [#allocation27], %s5739_s9, %s5739_s9, %s5673_s0  }
 0x178   : > { %s1146_s10 = sshll.u32 %s4785_s8, 4  ;;  %s4371_s3 = sshra.s32 %s5263_s26, 4  ;;  %s1147_s10 = int_to_ptr.vmem [resolvable:$true] %s1146_s10  ;;  %s4372_s3 = int_to_ptr.hbm [resolvable:$true] %s4371_s3 }
 0x179   : > { %s4373_s4 = scalar_lea.hbm %s4372_s3, 16  ;;  %s4377_s24 = scalar_lea.hbm %s5741_s12, 16 }
 0x17a   : > { %p4374_p7 = scmp.ne.s32.totalorder %s4372_s3, %s4373_s4  ;;  %p4378_p10 = scmp.lt.s32.totalorder %s4372_s3, %s5741_s12 }
 0x17b   : > { %p4379_p0 = scmp.lt.s32.totalorder %s4377_s24, %s4373_s4 }
 0x17c   : > { %s1171_s5 = sshll.u32 %s5742_s6, 4  ;;  %p4375_p8 = pnand %p4374_p7, %p256_p4  ;;  %s5277_s5 = int_to_ptr.hbm [resolvable:$true] %s1171_s5 }
 0x17d   : > { %p4380_p1 = por %p4379_p0, %p4378_p10 }
 0x17e   : > { %p4376_p9 = pneg %p4375_p8 }
 0x180   : > { %p4381_p2 = pnand %p4380_p1, %p4376_p9 }
 0x182   : > { %4384 = shalt.err (!%p4381_p2)
}
 0x183   : > { %s5743_s13 = sld [smem:[#allocation87_spill]]  ;;  %s4786_s8 = smov [#allocation34]  }
 0x184   : > { %3494 = dma.hbm_to_vmem [thread:$0]  (%p256_p4), %s5263_s26, 256, %s1147_s10, [#allocation30], %s5739_s9, %s5739_s9, %s5673_s0  }
 0x185   : > { %s1173_s11 = sshll.u32 %s4786_s8, 4  ;;  %s4399_s3 = sshra.s32 %s5277_s5, 4  ;;  %s1174_s11 = int_to_ptr.vmem [resolvable:$true] %s1173_s11  ;;  %s4400_s3 = int_to_ptr.hbm [resolvable:$true] %s4399_s3 }
 0x186   : > { %s4401_s4 = scalar_lea.hbm %s4400_s3, 1  ;;  %s4405_s24 = scalar_lea.hbm %s5742_s6, 1 }
 0x187   : > { %p4402_p3 = scmp.ne.s32.totalorder %s4400_s3, %s4401_s4  ;;  %p4406_p9 = scmp.lt.s32.totalorder %s4400_s3, %s5742_s6 }
 0x188   : > { %p4407_p10 = scmp.lt.s32.totalorder %s4405_s24, %s4401_s4 }
 0x189   : > { %s1194_s14 = sshll.u32 %s5743_s13, 4  ;;  %p4403_p7 = pnand %p4402_p3, %p256_p4  ;;  %s5291_s14 = int_to_ptr.hbm [resolvable:$true] %s1194_s14 }
 0x18a   : > { %p4408_p0 = por %p4407_p10, %p4406_p9 }
 0x18b   : > { %p4404_p8 = pneg %p4403_p7 }
 0x18d   : > { %p4409_p1 = pnand %p4408_p0, %p4404_p8 }
 0x18f   : > { %4412 = shalt.err (!%p4409_p1)
}
 0x190   : > { %s5744_s26 = sld [smem:[#allocation90_spill]]  ;;  %s4787_s10 = smov [#allocation37]  }
 0x191   : > { %3498 = dma.hbm_to_vmem [thread:$0]  (%p256_p4), %s5277_s5, 16, %s1174_s11, [#allocation33]  }
 0x192   : > { %s1196_s8 = sshll.u32 %s4787_s10, 4  ;;  %s4427_s3 = sshra.s32 %s5291_s14, 4  ;;  %s1197_s8 = int_to_ptr.vmem [resolvable:$true] %s1196_s8  ;;  %s4428_s3 = int_to_ptr.hbm [resolvable:$true] %s4427_s3 }
 0x193   : > { %s4429_s4 = scalar_lea.hbm %s4428_s3, 16  ;;  %s4433_s24 = scalar_lea.hbm %s5743_s13, 16 }
 0x194   : > { %p4430_p2 = scmp.ne.s32.totalorder %s4428_s3, %s4429_s4  ;;  %p4434_p8 = scmp.lt.s32.totalorder %s4428_s3, %s5743_s13 }
 0x195   : > { %p4435_p9 = scmp.lt.s32.totalorder %s4433_s24, %s4429_s4 }
 0x196   : > { %s1224_s0 = sshll.u32 %s5744_s26, 4  ;;  %p4431_p3 = pnand %p4430_p2, %p256_p4  ;;  %s5302_s0 = int_to_ptr.hbm [resolvable:$true] %s1224_s0 }
 0x197   : > { %p4436_p10 = por %p4435_p9, %p4434_p8 }
 0x198   : > { %p4432_p7 = pneg %p4431_p3 }
 0x19a   : > { %p4437_p0 = pnand %p4436_p10, %p4432_p7 }
 0x19c   : > { %4440 = shalt.err (!%p4437_p0)
}
 0x19d   : > { %s5745_s5 = smov 4   ;;  %s5746_s11 = sld [smem:[#allocation91_spill]] }
 0x19e   : > { %3502 = dma.hbm_to_vmem [thread:$0]  (%p256_p4), %s5291_s14, 256, %s1197_s8, [#allocation36], %s5739_s9, %s5739_s9, %s5745_s5  }
 0x19f   : > { %s4788_s6 = smov [#allocation40]   ;;  %s4455_s3 = sshra.s32 %s5302_s0, 4  ;;  %s4456_s3 = int_to_ptr.hbm [resolvable:$true] %s4455_s3 }
 0x1a0   : > { %s1226_s12 = sshll.u32 %s4788_s6, 4  ;;  %s4457_s4 = scalar_lea.hbm %s4456_s3, 1  ;;  %s1227_s12 = int_to_ptr.vmem [resolvable:$true] %s1226_s12 }
 0x1a1   : > { %p4458_p1 = scmp.ne.s32.totalorder %s4456_s3, %s4457_s4  ;;  %s4461_s24 = scalar_lea.hbm %s5744_s26, 1 }
 0x1a2   : > { %p4462_p7 = scmp.lt.s32.totalorder %s4456_s3, %s5744_s26  ;;  %p4463_p8 = scmp.lt.s32.totalorder %s4461_s24, %s4457_s4 }
 0x1a3   : > { %s1248_s10 = sshll.u32 %s5746_s11, 4  ;;  %p4459_p2 = pnand %p4458_p1, %p256_p4  ;;  %s5316_s10 = int_to_ptr.hbm [resolvable:$true] %s1248_s10 }
 0x1a4   : > { %p4464_p9 = por %p4463_p8, %p4462_p7 }
 0x1a5   : > { %p4460_p3 = pneg %p4459_p2 }
 0x1a7   : > { %p4465_p10 = pnand %p4464_p9, %p4460_p3 }
 0x1a9   : > { %4468 = shalt.err (!%p4465_p10)
}
 0x1aa   : > { %3506 = dma.hbm_to_vmem [thread:$0]  (%p256_p4), %s5302_s0, 16, %s1227_s12, [#allocation39]  }
 0x1ab   : > { %s4789_s6 = smov [#allocation43]   ;;  %s1262_s8 = sshll.u32 %s4974_s20, 4  ;;  %s1263_s8 = int_to_ptr.hbm [resolvable:$true] %s1262_s8 }
 0x1ac   : > { %s1250_s14 = sshll.u32 %s4789_s6, 4  ;;  %s4483_s13 = sshra.s32 %s5316_s10, 4  ;;  %s1251_s14 = int_to_ptr.vmem [resolvable:$true] %s1250_s14  ;;  %s4484_s13 = int_to_ptr.hbm [resolvable:$true] %s4483_s13 }
 0x1ad   : > { %s4485_s3 = scalar_lea.hbm %s4484_s13, 1  ;;  %s4489_s4 = scalar_lea.hbm %s5746_s11, 1 }
 0x1ae   : > { %p4486_p0 = scmp.ne.s32.totalorder %s4484_s13, %s4485_s3  ;;  %p4490_p3 = scmp.lt.s32.totalorder %s4484_s13, %s5746_s11 }
 0x1af   : > { %p4491_p7 = scmp.lt.s32.totalorder %s4489_s4, %s4485_s3 }
 0x1b0   : > { %p4487_p1 = pnand %p4486_p0, %p256_p4 }
 0x1b1   : > { %p4492_p8 = por %p4491_p7, %p4490_p3 }
 0x1b2   : > { %p4488_p2 = pneg %p4487_p1 }
 0x1b4   : > { %p4493_p9 = pnand %p4492_p8, %p4488_p2 }
 0x1b6   : > { %4496 = shalt.err (!%p4493_p9)
}
 0x1b7   : > { %3510 = dma.hbm_to_vmem [thread:$0]  (%p256_p4), %s5316_s10, 16, %s1251_s14, [#allocation42]  }
 0x1b8   : > { %s4790_s0 = smov [#allocation44]   ;;  %s4511_s24 = sshra.s32 %s1263_s8, 4  ;;  %s4512_s24 = int_to_ptr.hbm [resolvable:$true] %s4511_s24 }
 0x1b9   : > { %s1264_s12 = sshll.u32 %s4790_s0, 4  ;;  %s4513_s6 = scalar_lea.hbm %s4512_s24, 16  ;;  %s1265_s12 = int_to_ptr.vmem [resolvable:$true] %s1264_s12 }
 0x1ba   : > { %p4514_p10 = scmp.ne.s32.totalorder %s4512_s24, %s4513_s6  ;;  %s4517_s13 = scalar_lea.hbm %s4974_s20, 16 }
 0x1bb   : > { %p4518_p2 = scmp.lt.s32.totalorder %s4512_s24, %s4974_s20  ;;  %p4519_p3 = scmp.lt.s32.totalorder %s4517_s13, %s4513_s6 }
 0x1bc   : > { %p4515_p0 = pnand %p4514_p10, %p256_p4 }
 0x1bd   : > { %p4520_p7 = por %p4519_p3, %p4518_p2 }
 0x1be   : > { %p4516_p1 = pneg %p4515_p0 }
 0x1c0   : > { %p4521_p8 = pnand %p4520_p7, %p4516_p1 }
 0x1c2   : > { %4524 = shalt.err (!%p4521_p8)
}
 0x1c3   : > { %3512 = dma.hbm_to_vmem [thread:$0]  (%p256_p4), %s1263_s8, 256, %s1265_s12, [#allocation45], %s5739_s9, %s5739_s9, %s5745_s5  }
 0x1c4 PF: > { %s5747_s10 = sld [smem:[#allocation69_spill]]  ;;  %p3608_p10 = scmp.lt.s32.totalorder %s4725_s2, 2 }
 0x1c5   : > { %s5748_s14 = sld [smem:[#allocation70_spill]]  ;;  %s1316_s3 = sand.u32 1, %s4721_s1  }
 0x1c6   : > { %s3261_s4 = sshll.u32 %s4725_s2, 3  ;;  %s3260_s0 = sshll.u32 %s1316_s3, 3 }
 0x1c7   : > { %s1320_s13 = scalar_lea.vmem [#allocation2], %s3260_s0  ;;  %p5351_p0 = pnand %p3608_p10, %p5025_p5 }
 0x1c8   : > { %s1328_s9 = sshll.u32 %s1320_s13, 4  ;;  %s1335_s8 = sand.u32 1, %s4725_s2   ;;  %s1329_s9 = int_to_ptr.vmem [resolvable:$true] %s1328_s9 }
 0x1c9   : > { %s1317_s11 = scalar_lea.sflag [#allocation3], %s1316_s3  ;;  %p4543_p2 = pneg %p5351_p0 }
 0x1ca   : > { %s1324_s24 = scalar_lea.hbm %s5747_s10, %s3261_s4  ;;  %s4546_s22 = scalar_lea.hbm %s5747_s10, 16 }
 0x1cb   : > { %s1326_s6 = sshll.u32 %s1324_s24, 4  ;;  %s1343_s12 = scalar_lea.hbm %s5748_s14, %s3261_s4  ;;  %s1327_s6 = int_to_ptr.hbm [resolvable:$true] %s1326_s6 }
 0x1cc   : > { %s4539_s15 = sshra.s32 %s1327_s6, 4  ;;  %s4540_s15 = int_to_ptr.hbm [resolvable:$true] %s4539_s15 }
 0x1cd   : > { %s4541_s17 = scalar_lea.hbm %s4540_s15, 8  ;;  %p4547_p5 = scmp.lt.s32.totalorder %s4540_s15, %s5747_s10 }
 0x1ce   : > { %p4542_p1 = scmp.ne.s32.totalorder %s4540_s15, %s4541_s17  ;;  %p4548_p8 = scmp.lt.s32.totalorder %s4546_s22, %s4541_s17 }
 0x1d0   : > { %p4544_p3 = pnand %p4543_p2, %p4542_p1  ;;  %p4549_p10 = por %p4548_p8, %p4547_p5 }
 0x1d2   : > { %p4545_p7 = pneg %p4544_p3 }
 0x1d4   : > { %p4550_p9 = pnand %p4549_p10, %p4545_p7 }
 0x1d6   : > { %4553 = shalt.err (!%p4550_p9)
}
 0x1d7   : > { %3574 = dma.hbm_to_vmem [thread:$0]  (!%p5351_p0), %s1327_s6, 128, %s1329_s9, %s1317_s11  }
 0x1d8   : > { %s1345_s3 = sshll.u32 %s1343_s12, 4  ;;  %s1339_s4 = scalar_lea.vmem [#allocation5], %s3260_s0  ;;  %s1346_s3 = int_to_ptr.hbm [resolvable:$true] %s1345_s3 }
 0x1d9   : > { %s1347_s24 = sshll.u32 %s1339_s4, 4  ;;  %s1336_s13 = scalar_lea.sflag [#allocation6], %s1335_s8  ;;  %s1348_s24 = int_to_ptr.vmem [resolvable:$true] %s1347_s24 }
 0x1da   : > { %s4569_s18 = sshra.s32 %s1346_s3, 4  ;;  %s4576_s17 = scalar_lea.hbm %s5748_s14, 16  ;;  %s4570_s18 = int_to_ptr.hbm [resolvable:$true] %s4569_s18 }
 0x1db   : > { %s4571_s19 = scalar_lea.hbm %s4570_s18, 8  ;;  %p4577_p7 = scmp.lt.s32.totalorder %s4570_s18, %s5748_s14 }
 0x1dc   : > { %p4572_p1 = scmp.ne.s32.totalorder %s4570_s18, %s4571_s19  ;;  %p4578_p5 = scmp.lt.s32.totalorder %s4576_s17, %s4571_s19 }
 0x1de   : > { %p4574_p3 = pnand %p4572_p1, %p4543_p2  ;;  %p4579_p8 = por %p4578_p5, %p4577_p7 }
 0x1e0   : > { %p4575_p9 = pneg %p4574_p3 }
 0x1e2   : > { %p4580_p10 = pnand %p4579_p8, %p4575_p9 }
 0x1e4   : > { %4583 = shalt.err (!%p4580_p10)
}
 0x1e5   : > { %3577 = dma.hbm_to_vmem [thread:$0]  (!%p5351_p0), %s1346_s3, 128, %s1348_s24, %s1336_s13  }
 0x1e6   : > { %1356 = sbr.rel (%p5046_p13) target bundleno = 3857 (0xf11), region = 164  ;;  %s5376_s11 = sand.u32 (!%p5046_p13), 1, %s4717_s28  }
 0x1e7   : > { %s5379_s0 = sshll.u32 (!%p5046_p13), %s5376_s11, 3  ;;  %s1359_s18 = scalar_lea.sflag (!%p5046_p13), [#allocation3], %s5376_s11 }
 0x1e8   : > { %s1362_s19 = scalar_lea.vmem (!%p5046_p13), [#allocation2], %s5379_s0 }
 0x1eb   : > { %4644 = dma.done.wait (%p5031_p6), %s1359_s18, 128  }
 0x1ec   : > { %4646 = vsyncadd (%p5031_p6), %s1359_s18, 4294967168  ;;  %s1368_s16 = sand.u32 1, %s5007_s7   ;;  %s1372_s9 = scalar_lea.vmem [#allocation5], %s5379_s0 }
 0x1ed   : > { %s1369_s6 = scalar_lea.sflag [#allocation6], %s1368_s16 }
 0x1ee   : > { %4648 = dma.done.wait (%p5031_p6), %s1369_s6, 128  }
 0x1ef   : > { %4650 = vsyncadd (%p5031_p6), %s1369_s6, 4294967168 }
 0x1f0   : > { %4652 = dma.done.wait (%p256_p4), [#allocation6], 256  }
 0x1f1   : > { %4654 = vsyncadd (%p256_p4), [#allocation6], 4294967040 }
 0x1f2   : > { %4656 = dma.done.wait (%p256_p4), [#allocation9], 272  }
 0x1f3   : > { %4658 = vsyncadd (%p256_p4), [#allocation9], 4294967024 }
 0x1f4   : > { %4660 = dma.done.wait (%p256_p4), [#allocation12], 272  }
 0x1f5   : > { %4662 = vsyncadd (%p256_p4), [#allocation12], 4294967024 }
 0x1f6   : > { %4664 = dma.done.wait (%p256_p4), [#allocation15], 272  }
 0x1f7   : > { %4666 = vsyncadd (%p256_p4), [#allocation15], 4294967024 }
 0x1f8   : > { %4668 = dma.done.wait (%p256_p4), [#allocation18], 32  }
 0x1f9   : > { %4670 = vsyncadd (%p256_p4), [#allocation18], 4294967264 }
 0x1fa   : > { %4672 = dma.done.wait (%p256_p4), [#allocation21], 272  }
 0x1fb   : > { %4674 = vsyncadd (%p256_p4), [#allocation21], 4294967024 }
 0x1fc   : > { %4676 = dma.done.wait (%p256_p4), [#allocation24], 272  }
 0x1fd   : > { %4678 = vsyncadd (%p256_p4), [#allocation24], 4294967024 }
 0x1fe   : > { %4680 = dma.done.wait (%p256_p4), [#allocation27], 272  }
 0x1ff   : > { %4682 = vsyncadd (%p256_p4), [#allocation27], 4294967024 }
 0x200   : > { %4684 = dma.done.wait (%p256_p4), [#allocation30], 272  }
 0x201   : > { %4686 = vsyncadd (%p256_p4), [#allocation30], 4294967024 }
 0x202   : > { %4688 = dma.done.wait (%p256_p4), [#allocation33], 32  }
 0x203   : > { %4690 = vsyncadd (%p256_p4), [#allocation33], 4294967264 }
 0x204   : > { %4692 = dma.done.wait (%p256_p4), [#allocation36], 272  }
 0x205   : > { %4694 = vsyncadd (%p256_p4), [#allocation36], 4294967024 }
 0x206   : > { %4696 = dma.done.wait (%p256_p4), [#allocation39], 32  }
 0x207   : > { %4698 = vsyncadd (%p256_p4), [#allocation39], 4294967264 }
 0x208   : > { %4700 = dma.done.wait (%p256_p4), [#allocation42], 32  }
 0x209   : > { %4702 = vsyncadd (%p256_p4), [#allocation42], 4294967264 }
 0x20a   : > { %4704 = dma.done.wait (%p256_p4), [#allocation45], 256  }
 0x20b   : > { %4706 = vsyncadd (%p256_p4), [#allocation45], 4294967040  ;;  %s5751_s5 = sld [smem:[#allocation64_spill]]  ;;  %p1617_p6 = scmp.lt.s32.totalorder %s5007_s7, 1  ;;  %v3436_v0 = vld [vmem:[#allocation7 + $0x8] sm:$0xff]  ;;  %v3438_v1 = vld [vmem:[#allocation10 + $0x8] sm:$0xff] }
 0x20c   : > { %s5752_s8 = sld [smem:[#allocation65_spill]]  ;;  %v3435_v2 = vld [vmem:[#allocation7] sm:$0xff]  ;;  %v3437_v3 = vld [vmem:[#allocation10] sm:$0xff]  ;;  %1697 = vmatpush.bf16.msra.mxu0 %v3436_v0  ;;  %1728 = vmatpush.bf16.msra.mxu1 %v3438_v1  ;;  %vm1687_vm0 = vcmask 261120   ;;  %v3748_v7 = vld [vmem:[#allocation8] ss:$0 sm:$0xff] }
 0x20d   : > { %s1618_s12 = scalar_select %p1617_p6, %s5007_s7, 1  ;;  %v3749_v8 = vld [vmem:[#allocation11] ss:$0 sm:$0xff]  ;;  %vm1768_vm1 = vcmask 130048   ;;  %v3440_v28 = vld [vmem:[#allocation13 + $0x8] sm:$0xff]  ;;  %v4792_v34 = vmov 0.0  }
 0x20e   : > { %s4791_s24 = smov 112   ;;  %1757 = vmatpush.bf16.msra.mxu2 %v3440_v28  ;;  %v1643_v32 = vld [vmem:[%s1362_s19] sm:$0xff]  ;;  %vm1788_vm3 = vcmask 64512   ;;  %v3750_v62 = vld [vmem:[#allocation14] ss:$0 sm:$0xff]  ;;  %vm1804_vm4 = vcmask 1043456  }
 0x20f   : > { %s5451_s22 = sshll.u32 %s1618_s12, 3  ;;  %vm1644_vm2 = vcmp.gt.f32.partialorder %v1643_v32, 0.0  ;;  %v3439_v43 = vld [vmem:[#allocation13] sm:$0xff]  ;;  %s4793_s13 = smov 16  }
 0x210   : > { %1698 = vmatpush.bf16.msra.mxu0 %v3435_v2  ;;  %1729 = vmatpush.bf16.msra.mxu1 %v3437_v3  ;;  %v1645_v35 = vsel %vm1644_vm2, -1e+30, %v4792_v34  ;;  %s5753_s17 = sld [smem:[#allocation68_spill]] }
 0x211   : > { %s1620_s3 = scalar_lea.vmem %s5751_s5, %s5451_s22  ;;  %s5754_s18 = sld [smem:[#allocation66_spill]] }
 0x212   : > { %s1624_s4 = scalar_lea.vmem %s5752_s8, %s5451_s22  ;;  %v5457_v4 = vld [vmem:[%s1620_s3] sm:$0xff]  ;;  %1758 = vmatpush.bf16.msra.mxu2 %v3439_v43  ;;  %s5755_s19 = sld [smem:[#allocation67_spill]] }
 0x213   : > { %v5459_v5 = vld [vmem:[%s1624_s4] sm:$0xff]  ;;  %s5757_s5 = sld [smem:[#allocation92_spill]] }
 0x214   : > { %v1671_v6 = vpack.c.bf16 %v5459_v5, %v5457_v4  ;;  %s5758_s8 = sld [smem:[#allocation93_spill]] }
 0x215   : > { %s5759_s12 = sld [smem:[#allocation94_spill]] }
 0x216   : > { %3307 = vmatmul.msk.bf16.vlgmr.msra.gmra.mxu0 %vm1687_vm0, %v1671_v6  ;;  %3316 = vmatmul.msk.bf16.vlgmr.msra.gmra.mxu1 %vm1687_vm0, %v1671_v6  ;;  %s1636_s15 = scalar_lea.vmem %s5753_s17, %s5451_s22 }
 0x217   : > { %3325 = vmatmul.msk.bf16.vlgmr.msra.gmra.mxu2 %vm1687_vm0, %v1671_v6  ;;  %s1628_s16 = scalar_lea.vmem %s5754_s18, %s5451_s22 }
 0x218   : > { %s1632_s6 = scalar_lea.vmem %s5755_s19, %s5451_s22  ;;  %s3432_s22 = sshll.u32 %s5007_s7, 3 }
 0x219   : > { %s2780_s7 = scalar_lea.sflag [#allocation4], %s5376_s11 }
 0x21b   : > { %s2790_s3 = scalar_lea.hbm %s5759_s12, %s3432_s22 }
 0x21c   : > { %s2794_s17 = sshll.u32 %s2790_s3, 4  ;;  %s2795_s17 = int_to_ptr.hbm [resolvable:$true] %s2794_s17 }
 0x293   : > { %v1700_v9 = vpop.f32.mrf.mxu0  ;;  %v1731_v10 = vpop.f32.mrf.mxu1 }
 0x294   : > { %v1701_v11 = vadd.f32 %v3748_v7, %v1700_v9  ;;  %v1732_v12 = vadd.f32 %v3749_v8, %v1731_v10 }
 0x296   : > { %v1705_v13 = vmul.f32 0.25, %v1701_v11  ;;  %v1766_v14 = vpack.c.bf16 %v1732_v12, %v1732_v12 }
 0x298   : > { %1878 = vrot.lane.b32.xlu0 %v1766_v14, %s4791_s24  ;;  %v1773_v15 = vsel %vm1768_vm1, %v1766_v14, 0  ;;  %v1765_v16 = vpack.c.bf16 %v1705_v13, %v1705_v13 }
 0x299   : > { %1782 = vmatpush.bf16.xpose.msra.mxu3 %v1773_v15 }
 0x29a   : > { %1875 = vrot.lane.b32.xlu1 %v1765_v16, %s4791_s24  ;;  %v1760_v63 = vpop.f32.mrf.mxu2 }
 0x29b   : > { %v1702_v17 = vpop.f32.mrf.mxu0  ;;  %v1733_v18 = vpop.f32.mrf.mxu1  ;;  %v1761_v0 = vadd.f32 %v3750_v62, %v1760_v63 }
 0x29c   : > { %v1703_v19 = vadd.f32 %v3748_v7, %v1702_v17  ;;  %v1734_v20 = vadd.f32 %v3749_v8, %v1733_v18 }
 0x29d   : > { %v1767_v1 = vpack.c.bf16 %v1761_v0, %v1761_v0 }
 0x29e   : > { %v1706_v21 = vmul.f32 0.25, %v1703_v19  ;;  %v1822_v22 = vpack.c.bf16 %v1734_v20, %v1734_v20 }
 0x29f   : > { %v1806_v3 = vsel %vm1804_vm4, %v1767_v1, 0 }
 0x2a0   : > { %v1821_v23 = vpack.c.bf16 %v1706_v21, %v1706_v21  ;;  %1937 = vrot.lane.b32.xlu0 %v1822_v22, %s4791_s24  ;;  %3326 = vmatmul.msk.bf16.vlgmr.msra.gmra.mxu3 %vm1768_vm1, %v1765_v16  ;;  %v1828_v24 = vsel %vm1768_vm1, %v1822_v22, 0 }
 0x2a1   : > { %1837 = vmatpush.bf16.xpose.msrb.mxu1 %v1828_v24  ;;  %1815 = vmatpush.bf16.msrb.mxu0 %v1806_v3 }
 0x2a2   : > { %1934 = vrot.lane.b32.xlu1 %v1821_v23, %s4791_s24  ;;  %v1762_v2 = vpop.f32.mrf.mxu2 }
 0x2a3   : > { %v1763_v7 = vadd.f32 %v3750_v62, %v1762_v2  ;;  %v4794_v2 = vmov 32.0  }
 0x2a5   : > { %v1823_v10 = vpack.c.bf16 %v1763_v7, %v1763_v7  ;;  %v1642_v7 = vld [vmem:[%s1636_s15] sm:$0xff]  ;;  %s4613_s15 = sshra.s32 %s2795_s17, 4  ;;  %s4614_s15 = int_to_ptr.hbm [resolvable:$true] %s4613_s15 }
 0x2a6   : > { %s4615_s18 = scalar_lea.hbm %s4614_s15, 8  ;;  %p4620_p2 = scmp.lt.s32.totalorder %s4614_s15, %s5759_s12 }
 0x2a7   : > { %v1859_v13 = vsel %vm1804_vm4, %v1823_v10, 0  ;;  %p4616_p4 = scmp.ne.s32.totalorder %s4614_s15, %s4615_s18 }
 0x2a8   : > { %3328 = vmatmul.msk.bf16.vlgmr.msrb.gmra.mxu1 %vm1768_vm1, %v1821_v23  ;;  %1868 = vmatpush.bf16.msrb.mxu2 %v1859_v13 }
 0x2a9   : > { %p4617_p13 = pnand %p4616_p4, %p5038_p11 }
 0x2ab   : > { %p4618_p0 = pneg %p4617_p13 }
 0x30a   : > { %v1879_v25 = vpop.permute.xlu0 %1878 }
 0x30b   : > { %v1884_v26 = vsel %vm1768_vm1, %v1879_v25, 0 }
 0x30c   : > { %1893 = vmatpush.bf16.xpose.msrb.mxu3 %v1884_v26  ;;  %v1876_v27 = vpop.permute.xlu1 %1875 }
 0x312   : > { %v1938_v29 = vpop.permute.xlu0 %1937 }
 0x313   : > { %v1943_v30 = vsel %vm1768_vm1, %v1938_v29, 0  ;;  %3330 = vmatmul.msk.bf16.vlgmr.msrb.gmra.mxu3 %vm1768_vm1, %v1876_v27 }
 0x314   : > { %1952 = vmatpush.bf16.xpose.msra.mxu1 %v1943_v30  ;;  %v1935_v31 = vpop.permute.xlu1 %1934 }
 0x31b   : > { %3332 = vmatmul.msk.bf16.vlgmr.msra.gmra.mxu1 %vm1768_vm1, %v1935_v31 }
 0x323   : > { %v1784_v33 = vpop.f32.mrf.mxu3 }
 0x324   : > { %v1785_v40 = vadd.f32 %v1784_v33, %v1645_v35 }
 0x325   : > { %v1839_v36 = vpop.f32.mrf.mxu1 }
 0x326   : > { %v1840_v37 = vadd.f32 %v1839_v36, %v1645_v35  ;;  %v1789_v42 = vsel %vm1788_vm3, %v1785_v40, -inf }
 0x328   : > { %v1843_v38 = vsel %vm1788_vm3, %v1840_v37, -inf }
 0x329   : > { %1844 = vmax.xlane.f32.xlu2 %v1843_v38 }
 0x32b   : > { %v1786_v39 = vpop.f32.mrf.mxu3 }
 0x32d   : > { %v1841_v41 = vpop.f32.mrf.mxu1 }
 0x331   : > { %1790 = vmax.xlane.f32.xlu2 %v1789_v42 }
 0x396   : > { %v1895_v44 = vpop.f32.mrf.mxu3 }
 0x397   : > { %v1896_v45 = vadd.f32 %v1895_v44, %v1645_v35  ;;  %v3442_v44 = vld [vmem:[#allocation16 + $0x8] sm:$0xff] }
 0x398   : > { %v1954_v46 = vpop.f32.mrf.mxu1  ;;  %2027 = vmatpush.bf16.msra.mxu3 %v3442_v44 }
 0x399   : > { %v1955_v47 = vadd.f32 %v1954_v46, %v1645_v35  ;;  %v1899_v48 = vsel %vm1788_vm3, %v1896_v45, -inf }
 0x39a   : > { %1900 = vmax.xlane.f32.xlu1 %v1899_v48 }
 0x39b   : > { %v1958_v49 = vsel %vm1788_vm3, %v1955_v47, -inf }
 0x39c   : > { %v1845_v50 = vpop.xlane.xlu2 %1844  ;;  %1959 = vmax.xlane.f32.xlu0 %v1958_v49 }
 0x39d   : > { %v1846_v55 = vsub.f32 %v1840_v37, %v1845_v50  ;;  %v3441_v50 = vld [vmem:[#allocation16] sm:$0xff] }
 0x39e   : > { %v1897_v51 = vpop.f32.mrf.mxu3  ;;  %2028 = vmatpush.bf16.msra.mxu3 %v3441_v50 }
 0x39f   : > { %v1847_v57 = vmul.f32 1.442695, %v1846_v55 }
 0x3a0   : > { %v1956_v52 = vpop.f32.mrf.mxu1 }
 0x3a4   : > { %v1791_v53 = vpop.xlane.xlu2 %1790 }
 0x3a5   : > { %v1792_v54 = vsub.f32 %v1785_v40, %v1791_v53 }
 0x3a7   : > { %v1793_v56 = vmul.f32 1.442695, %v1792_v54 }
 0x3a9   : > { %3765 = vpow2.f32 %v1793_v56 }
 0x3aa   : > { %3767 = vpow2.f32 %v1847_v57  ;;  %v3751_v57 = vld [vmem:[#allocation17] ss:$0 sm:$0xff] }
 0x3af   : > { %v3766_v58 = vpop.eup %3765 }
 0x3b0   : > { %v1795_v59 = vsel %vm1788_vm3, %v3766_v58, 0.0  ;;  %v3768_v60 = vpop.eup %3767  ;;  %1912 = vrot.lane.b32.xlu0 %v1767_v1, %s4791_s24 }
 0x3b1   : > { %1796 = vadd.xlane.f32.xlu2 %v1795_v59  ;;  %v1849_v61 = vsel %vm1788_vm3, %v3768_v60, 0.0 }
 0x3b9   : > { %1850 = vadd.xlane.f32.xlu2 %v1849_v61 }
 0x40d   : > { %v1901_v6 = vpop.xlane.xlu1 %1900 }
 0x40e   : > { %v1902_v8 = vsub.f32 %v1896_v45, %v1901_v6 }
 0x40f   : > { %v1960_v9 = vpop.xlane.xlu0 %1959 }
 0x410   : > { %v1903_v11 = vmul.f32 1.442695, %v1902_v8  ;;  %v1961_v12 = vsub.f32 %v1955_v47, %v1960_v9  ;;  %v4795_v8 = vmov 0  }
 0x411   : > { %3742 = vset.pattern.permute.xlu0 %v4795_v8  ;;  %v3755_v8 = vld [vmem:[#allocation23] ss:$0 sm:$0xff] }
 0x412   : > { %3769 = vpow2.f32 %v1903_v11  ;;  %v1962_v14 = vmul.f32 1.442695, %v1961_v12 }
 0x414   : > { %3771 = vpow2.f32 %v1962_v14 }
 0x418   : > { %v3770_v15 = vpop.eup %3769 }
 0x419   : > { %v1905_v16 = vsel %vm1788_vm3, %v3770_v15, 0.0 }
 0x41a   : > { %1906 = vadd.xlane.f32.xlu2 %v1905_v16  ;;  %v3772_v17 = vpop.eup %3771 }
 0x41b   : > { %v1964_v18 = vsel %vm1788_vm3, %v3772_v17, 0.0 }
 0x422   : > { %1965 = vadd.xlane.f32.xlu2 %v1964_v18  ;;  %v1913_v27 = vpop.permute.xlu0 %1912 }
 0x423   : > { %v1918_v28 = vsel %vm1804_vm4, %v1913_v27, 0  ;;  %v3444_v27 = vld [vmem:[#allocation22 + $0x8] sm:$0xff] }
 0x424   : > { %v1797_v19 = vpop.xlane.xlu2 %1796  ;;  %1927 = vmatpush.bf16.msra.mxu0 %v1918_v28 }
 0x425   : > { %3773 = vrcp.f32 %v1797_v19 }
 0x42b   : > { %v3774_v20 = vpop.eup %3773 }
 0x42c   : > { %v1799_v21 = vmul.f32 %v3774_v20, %v3766_v58  ;;  %v1851_v22 = vpop.xlane.xlu2 %1850 }
 0x42d   : > { %3775 = vrcp.f32 %v1851_v22  ;;  %v3445_v22 = vld [vmem:[#allocation25] sm:$0xff] }
 0x42e   : > { %v1800_v23 = vpack.c.bf16 %v1799_v21, %v1799_v21  ;;  %v3446_v21 = vld [vmem:[#allocation25 + $0x8] sm:$0xff] }
 0x42f   : > { %2187 = vmatpush.bf16.msrb.mxu1 %v3446_v21 }
 0x430   : > { %3327 = vmatmul.msk.bf16.vlgmr.msrb.gmra.mxu0 %vm1788_vm3, %v1800_v23  ;;  %v1640_v23 = vld [vmem:[%s1628_s16] sm:$0xff] }
 0x431   : > { %2153 = vmatpush.bf16.msrb.mxu0 %v3444_v27 }
 0x433   : > { %v3776_v24 = vpop.eup %3775  ;;  %2188 = vmatpush.bf16.msrb.mxu1 %v3445_v22  ;;  %v1646_v22 = vld [vmem:[%s1372_s9] sm:$0xff]  ;;  %s5756_s9 = sld [smem:[#allocation89_spill]] }
 0x434   : > { %v1853_v25 = vmul.f32 %v3776_v24, %v3768_v60  ;;  %v1641_v24 = vld [vmem:[%s1632_s6] sm:$0xff]  ;;  %vm1647_vm12 = vcmp.gt.f32.partialorder %v1646_v22, 0.0 }
 0x436   : > { %v1854_v26 = vpack.c.bf16 %v1853_v25, %v1853_v25  ;;  %v5519_v25 = vpack.c.bf16 %v1641_v24, %v1640_v23  ;;  %v1648_v23 = vsel %vm1647_vm12, -1e+30, %v4792_v34 }
 0x438   : > { %3329 = vmatmul.msk.bf16.vlgmr.msrb.gmra.mxu2 %vm1788_vm3, %v1854_v26  ;;  %3360 = vmatmul.msk.bf16.vlgmr.msrb.gmra.mxu1 %vm1687_vm0, %v5519_v25 }
 0x43a   : > { %1971 = vrot.lane.b32.xlu2 %v1823_v10, %s4791_s24 }
 0x48d   : > { %v1907_v29 = vpop.xlane.xlu2 %1906 }
 0x48e   : > { %3777 = vrcp.f32 %v1907_v29 }
 0x494   : > { %v3778_v30 = vpop.eup %3777 }
 0x495   : > { %v1909_v31 = vmul.f32 %v3778_v30, %v3770_v15  ;;  %v1966_v32 = vpop.xlane.xlu2 %1965  ;;  %v3443_v30 = vld [vmem:[#allocation22] sm:$0xff] }
 0x496   : > { %3779 = vrcp.f32 %v1966_v32  ;;  %2154 = vmatpush.bf16.msrb.mxu0 %v3443_v30 }
 0x497   : > { %v1910_v33 = vpack.c.bf16 %v1909_v31, %v1909_v31  ;;  %3781 = vrcp.f32 %v4794_v2 }
 0x499   : > { %3331 = vmatmul.msk.bf16.vlgmr.msra.gmra.mxu0 %vm1788_vm3, %v1910_v33 }
 0x49c   : > { %v3780_v35 = vpop.eup %3779 }
 0x49d   : > { %v1968_v36 = vmul.f32 %v3780_v35, %v3772_v17  ;;  %v1972_v37 = vpop.permute.xlu2 %1971  ;;  %v3782_v3 = vpop.eup %3781 }
 0x49e   : > { %v1977_v38 = vsel %vm1804_vm4, %v1972_v37, 0  ;;  %v2044_v6 = vmul.f32 32.0, %v3782_v3  ;;  %vm2048_vm5 = vweird.f32 %v3782_v3 }
 0x49f   : > { %v1969_v39 = vpack.c.bf16 %v1968_v36, %v1968_v36  ;;  %1986 = vmatpush.bf16.msra.mxu2 %v1977_v38 }
 0x4a0   : > { %v2045_v9 = vsub.f32 1.0, %v2044_v6 }
 0x4a2   : > { %3333 = vmatmul.msk.bf16.vlgmr.msra.gmra.mxu2 %vm1788_vm3, %v1969_v39 }
 0x4ad   : > { %v1817_v40 = vpop.f32.mrf.mxu0 }
 0x4b5   : > { %v1819_v41 = vpop.f32.mrf.mxu0 }
 0x4bb   : > { %v1870_v42 = vpop.f32.mrf.mxu2 }
 0x4c3   : > { %v1872_v43 = vpop.f32.mrf.mxu2 }
 0x516   : > { %v1929_v45 = vpop.f32.mrf.mxu0 }
 0x51e   : > { %v1931_v46 = vpop.f32.mrf.mxu0 }
 0x51f   : > { %v3752_v46 = vld [vmem:[#allocation19] ss:$0 sm:$0xff] }
 0x525   : > { %v1988_v47 = vpop.f32.mrf.mxu2 }
 0x526   : > { %v3737_v48 = vpack.i.bf16 %v1988_v47, %v1929_v45 }
 0x528   : > { %3738 = vrot.lane.b32.xlu1 %v3737_v48, %s4793_s13 }
 0x52d   : > { %v1990_v49 = vpop.f32.mrf.mxu2 }
 0x59a   : > { %v3739_v51 = vpop.permute.xlu1 %3738 }
 0x59b   : > { %v3741_v52 = vunpack.i.h.bf16 %v3739_v51  ;;  %v3740_v53 = vunpack.i.l.bf16 %v3739_v51  ;;  %v3753_v51 = vld [vmem:[#allocation20] ss:$0 sm:$0xff] }
 0x59d   : > { %v2001_v54 = vsel %vm1768_vm1, %v1870_v42, %v3741_v52  ;;  %v2000_v55 = vsel %vm1768_vm1, %v1817_v40, %v3740_v53 }
 0x59e   : > { %v2002_v56 = vpack.c.bf16 %v2001_v54, %v2000_v55 }
 0x5a0   : > { %3342 = vmatmul.msk.bf16.vlgmr.msra.gmra.mxu3 %vm1687_vm0, %v2002_v56 }
 0x623   : > { %v2030_v58 = vpop.f32.mrf.mxu3 }
 0x624   : > { %v2031_v59 = vadd.f32 %v3751_v57, %v2030_v58 }
 0x626   : > { %v2035_v60 = vadd.f32 %v2031_v59, %v5457_v4  ;;  %v2046_v4 = vmul.f32 %v3782_v3, %v2045_v9 }
 0x628   : > { %v2037_v61 = vsel %vm1687_vm0, %v2035_v60, 0.0  ;;  %v2047_v10 = vadd.f32 %v3782_v3, %v2046_v4 }
 0x629   : > { %2038 = vadd.xlane.f32.xlu2 %v2037_v61  ;;  %v3754_v61 = vld [vmem:[#allocation26] ss:$0 sm:$0xff] }
 0x62a   : > { %v5509_v11 = vsel %vm2048_vm5, %v3782_v3, %v2047_v10 }
 0x62b   : > { %v2032_v62 = vpop.f32.mrf.mxu3 }
 0x62c   : > { %v2033_v63 = vadd.f32 %v3751_v57, %v2032_v62  ;;  %v2190_v62 = vpop.f32.mrf.mxu1 }
 0x62e   : > { %v2036_v0 = vadd.f32 %v2033_v63, %v5459_v5  ;;  %v2191_v63 = vadd.f32 %v3754_v61, %v2190_v62 }
 0x630   : > { %v2040_v1 = vsel %vm1687_vm0, %v2036_v0, 0.0 }
 0x631   : > { %2041 = vadd.xlane.f32.xlu0 %v2040_v1 }
 0x634   : > { %v2192_v2 = vpop.f32.mrf.mxu1 }
 0x635   : > { %v2193_v3 = vadd.f32 %v3754_v61, %v2192_v2 }
 0x637   : > { %v2278_v6 = vpack.c.bf16 %v2193_v3, %v2193_v3 }
 0x645   : > { %2100 = vperm.xlu0 %3742, %v1642_v7   ;;  %v2284_v7 = vsel %vm1768_vm1, %v2278_v6, 0 }
 0x646   : > { %2293 = vmatpush.bf16.xpose.msra.mxu1 %v2284_v7 }
 0x69c   : > { %v2039_v5 = vpop.xlane.xlu2 %2038 }
 0x69d   : > { %v2050_v12 = vmul.f32 %v5509_v11, %v2039_v5 }
 0x69f   : > { %v2052_v13 = vsub.f32 %v2035_v60, %v2050_v12 }
 0x6a1   : > { %v2054_v14 = vmul.f32 %v2052_v13, %v2052_v13 }
 0x6a3   : > { %v2056_v15 = vsel %vm1687_vm0, %v2054_v14, 0.0 }
 0x6a4   : > { %v2042_v16 = vpop.xlane.xlu0 %2041  ;;  %2057 = vadd.xlane.f32.xlu1 %v2056_v15 }
 0x6a5   : > { %v2051_v17 = vmul.f32 %v5509_v11, %v2042_v16 }
 0x6a7   : > { %v2053_v18 = vsub.f32 %v2036_v0, %v2051_v17  ;;  %v2225_v0 = vpack.c.bf16 %v2191_v63, %v2191_v63 }
 0x6a9   : > { %v2055_v19 = vmul.f32 %v2053_v18, %v2053_v18  ;;  %v2231_v1 = vsel %vm1768_vm1, %v2225_v0, 0 }
 0x6aa   : > { %2240 = vmatpush.bf16.xpose.msrb.mxu3 %v2231_v1 }
 0x6ab   : > { %v2059_v20 = vsel %vm1687_vm0, %v2055_v19, 0.0 }
 0x6ac   : > { %2060 = vadd.xlane.f32.xlu2 %v2059_v20 }
 0x6b7   : > { %v5525_v56 = vpop.permute.xlu0 %2100 }
 0x6bd   : > { %2393 = vrot.lane.b32.xlu1 %v2278_v6, %s4791_s24 }
 0x6c4   : > { %2334 = vrot.lane.b32.xlu2 %v2225_v0, %s4791_s24 }
 0x717   : > { %v2058_v26 = vpop.xlane.xlu1 %2057 }
 0x718   : > { %v2062_v28 = vmul.f32 %v2058_v26, %v5509_v11 }
 0x71a   : > { %v2064_v29 = vadd.f32 1e-05, %v2062_v28 }
 0x71c   : > { %3783 = vrsqrt.f32 %v2064_v29  ;;  %vm2072_vm7 = vweird.f32 %v2064_v29 }
 0x71f   : > { %v2061_v31 = vpop.xlane.xlu2 %2060 }
 0x720   : > { %v2063_v32 = vmul.f32 %v2061_v31, %v5509_v11 }
 0x722   : > { %v3784_v33 = vpop.eup %3783  ;;  %v2065_v35 = vadd.f32 1e-05, %v2063_v32 }
 0x723   : > { %v2067_v36 = vmul.f32 %v3784_v33, %v2064_v29  ;;  %vm2073_vm6 = vweird.f32 %v3784_v33 }
 0x724   : > { %3785 = vrsqrt.f32 %v2065_v35  ;;  %vm2074_vm8 = vmor %vm2072_vm7, %vm2073_vm6  ;;  %vm2082_vm10 = vweird.f32 %v2065_v35 }
 0x725   : > { %v2068_v37 = vmul.f32 %v3784_v33, %v2067_v36 }
 0x727   : > { %v2069_v38 = vmul.f32 0.5, %v2068_v37  ;;  %v2335_v16 = vpop.permute.xlu2 %2334 }
 0x728   : > { %v2340_v17 = vsel %vm1768_vm1, %v2335_v16, 0 }
 0x729   : > { %v2070_v39 = vsub.f32 1.5, %v2069_v38  ;;  %2349 = vmatpush.bf16.xpose.msra.mxu3 %v2340_v17 }
 0x72a   : > { %v3786_v40 = vpop.eup %3785 }
 0x72b   : > { %v2071_v41 = vmul.f32 %v3784_v33, %v2070_v39  ;;  %v2077_v42 = vmul.f32 %v3786_v40, %v2065_v35  ;;  %vm2083_vm9 = vweird.f32 %v3786_v40  ;;  %v3447_v35 = vld [vmem:[#allocation28] sm:$0xff] }
 0x72c   : > { %vm2084_vm11 = vmor %vm2082_vm10, %vm2083_vm9 }
 0x72d   : > { %v2075_v43 = vsel %vm2074_vm8, %v3784_v33, %v2071_v41  ;;  %v2078_v44 = vmul.f32 %v3786_v40, %v2077_v42  ;;  %v3448_v33 = vld [vmem:[#allocation28 + $0x8] sm:$0xff] }
 0x72e   : > { %v2086_v47 = vmul.f32 %v2075_v43, %v2052_v13  ;;  %2216 = vmatpush.bf16.msrb.mxu2 %v3448_v33 }
 0x72f   : > { %v2079_v45 = vmul.f32 0.5, %v2078_v44 }
 0x730   : > { %v2091_v50 = vmul.f32 %v3752_v46, %v2086_v47 }
 0x731   : > { %v2080_v48 = vsub.f32 1.5, %v2079_v45 }
 0x732   : > { %v2096_v55 = vadd.f32 %v3753_v51, %v2091_v50  ;;  %2217 = vmatpush.bf16.msrb.mxu2 %v3447_v35 }
 0x733   : > { %v2081_v49 = vmul.f32 %v3786_v40, %v2080_v48 }
 0x734   : > { %v5528_v58 = vmul.f32 %v5525_v56, %v2096_v55 }
 0x735   : > { %v2085_v52 = vsel %vm2084_vm11, %v3786_v40, %v2081_v49  ;;  %3369 = vmatmul.msk.bf16.vlgmr.msrb.gmra.mxu2 %vm1687_vm0, %v5519_v25 }
 0x736   : > { %v2087_v53 = vmul.f32 %v2085_v52, %v2053_v18  ;;  %v2394_v18 = vpop.permute.xlu1 %2393 }
 0x737   : > { %v2399_v19 = vsel %vm1768_vm1, %v2394_v18, 0 }
 0x738   : > { %v2092_v54 = vmul.f32 %v3752_v46, %v2087_v53  ;;  %2408 = vmatpush.bf16.xpose.msrb.mxu1 %v2399_v19  ;;  %v3756_v53 = vld [vmem:[#allocation29] ss:$0 sm:$0xff] }
 0x73a   : > { %v2097_v57 = vadd.f32 %v3753_v51, %v2092_v54 }
 0x73c   : > { %v5531_v59 = vmul.f32 %v5525_v56, %v2097_v57 }
 0x73e   : > { %v2127_v60 = vpack.c.bf16 %v5531_v59, %v5528_v58 }
 0x740   : > { %3351 = vmatmul.msk.bf16.vlgmr.msrb.gmra.mxu0 %vm1687_vm0, %v2127_v60 }
 0x7b8   : > { %v2219_v52 = vpop.f32.mrf.mxu2 }
 0x7b9   : > { %v2220_v57 = vadd.f32 %v3756_v53, %v2219_v52 }
 0x7bb   : > { %v2226_v62 = vpack.c.bf16 %v2220_v57, %v2220_v57 }
 0x7bd   : > { %v2156_v9 = vpop.f32.mrf.mxu0  ;;  %v2262_v0 = vsel %vm1804_vm4, %v2226_v62, 0 }
 0x7be   : > { %v2157_v4 = vadd.f32 %v3755_v8, %v2156_v9  ;;  %2271 = vmatpush.bf16.msra.mxu0 %v2262_v0 }
 0x7c0   : > { %v2161_v10 = vmul.f32 0.25, %v2157_v4  ;;  %v2221_v60 = vpop.f32.mrf.mxu2 }
 0x7c1   : > { %v2222_v63 = vadd.f32 %v3756_v53, %v2221_v60 }
 0x7c2   : > { %v2224_v5 = vpack.c.bf16 %v2161_v10, %v2161_v10 }
 0x7c3   : > { %v2279_v1 = vpack.c.bf16 %v2222_v63, %v2222_v63 }
 0x7c4   : > { %2331 = vrot.lane.b32.xlu2 %v2224_v5, %s4791_s24  ;;  %3370 = vmatmul.msk.bf16.vlgmr.msrb.gmra.mxu3 %vm1768_vm1, %v2224_v5 }
 0x7c5   : > { %v2158_v12 = vpop.f32.mrf.mxu0  ;;  %v2315_v2 = vsel %vm1804_vm4, %v2279_v1, 0 }
 0x7c6   : > { %v2159_v13 = vadd.f32 %v3755_v8, %v2158_v12  ;;  %2324 = vmatpush.bf16.msra.mxu2 %v2315_v2 }
 0x7c8   : > { %v2162_v14 = vmul.f32 0.25, %v2159_v13 }
 0x7ca   : > { %v2277_v15 = vpack.c.bf16 %v2162_v14, %v2162_v14 }
 0x7cc   : > { %2390 = vrot.lane.b32.xlu1 %v2277_v15, %s4791_s24  ;;  %3372 = vmatmul.msk.bf16.vlgmr.msra.gmra.mxu1 %vm1768_vm1, %v2277_v15 }
 0x81e   : > { %v2332_v20 = vpop.permute.xlu2 %2331 }
 0x81f   : > { %3374 = vmatmul.msk.bf16.vlgmr.msra.gmra.mxu3 %vm1768_vm1, %v2332_v20 }
 0x83e   : > { %v2391_v21 = vpop.permute.xlu1 %2390 }
 0x83f   : > { %3376 = vmatmul.msk.bf16.vlgmr.msrb.gmra.mxu1 %vm1768_vm1, %v2391_v21 }
 0x847   : > { %v2242_v24 = vpop.f32.mrf.mxu3 }
 0x848   : > { %v2243_v26 = vadd.f32 %v2242_v24, %v1648_v23 }
 0x849   : > { %v2295_v27 = vpop.f32.mrf.mxu1 }
 0x84a   : > { %v2296_v28 = vadd.f32 %v2295_v27, %v1648_v23  ;;  %v2246_v29 = vsel %vm1788_vm3, %v2243_v26, -inf }
 0x84b   : > { %2247 = vmax.xlane.f32.xlu1 %v2246_v29 }
 0x84c   : > { %v2299_v30 = vsel %vm1788_vm3, %v2296_v28, -inf }
 0x84d   : > { %2300 = vmax.xlane.f32.xlu2 %v2299_v30 }
 0x84f   : > { %v2244_v31 = vpop.f32.mrf.mxu3 }
 0x851   : > { %v2297_v32 = vpop.f32.mrf.mxu1 }
 0x8a2   : > { %v2351_v34 = vpop.f32.mrf.mxu3 }
 0x8a3   : > { %v2352_v36 = vadd.f32 %v2351_v34, %v1648_v23 }
 0x8a5   : > { %v2355_v37 = vsel %vm1788_vm3, %v2352_v36, -inf }
 0x8a6   : > { %2356 = vmax.xlane.f32.xlu2 %v2355_v37 }
 0x8aa   : > { %v2353_v38 = vpop.f32.mrf.mxu3 }
 0x8bc   : > { %v2410_v39 = vpop.f32.mrf.mxu1 }
 0x8bd   : > { %v2411_v40 = vadd.f32 %v2410_v39, %v1648_v23 }
 0x8be   : > { %v2248_v41 = vpop.xlane.xlu1 %2247 }
 0x8bf   : > { %v2249_v42 = vsub.f32 %v2243_v26, %v2248_v41  ;;  %v2414_v43 = vsel %vm1788_vm3, %v2411_v40, -inf }
 0x8c0   : > { %2415 = vmax.xlane.f32.xlu0 %v2414_v43  ;;  %v2301_v44 = vpop.xlane.xlu2 %2300 }
 0x8c1   : > { %v2250_v45 = vmul.f32 1.442695, %v2249_v42  ;;  %v2302_v46 = vsub.f32 %v2296_v28, %v2301_v44  ;;  %v3449_v42 = vld [vmem:[#allocation31] sm:$0xff] }
 0x8c3   : > { %3787 = vpow2.f32 %v2250_v45  ;;  %v2303_v47 = vmul.f32 1.442695, %v2302_v46 }
 0x8c4   : > { %v2412_v48 = vpop.f32.mrf.mxu1 }
 0x8c5   : > { %3789 = vpow2.f32 %v2303_v47 }
 0x8c9   : > { %v3788_v25 = vpop.eup %3787 }
 0x8ca   : > { %v2252_v49 = vsel %vm1788_vm3, %v3788_v25, 0.0 }
 0x8cb   : > { %v3790_v50 = vpop.eup %3789  ;;  %2253 = vadd.xlane.f32.xlu0 %v2252_v49 }
 0x8cc   : > { %v2305_v51 = vsel %vm1788_vm3, %v3790_v50, 0.0 }
 0x8cd   : > { %2306 = vadd.xlane.f32.xlu1 %v2305_v51 }
 0x8df   : > { %2427 = vrot.lane.b32.xlu0 %v2279_v1, %s4791_s24 }
 0x919   : > { %v2357_v54 = vpop.xlane.xlu2 %2356 }
 0x91a   : > { %v2358_v55 = vsub.f32 %v2352_v36, %v2357_v54  ;;  %v3450_v36 = vld [vmem:[#allocation31 + $0x8] sm:$0xff] }
 0x91b   : > { %2483 = vmatpush.bf16.msrb.mxu3 %v3450_v36 }
 0x91c   : > { %v2359_v61 = vmul.f32 1.442695, %v2358_v55 }
 0x91e   : > { %3791 = vpow2.f32 %v2359_v61 }
 0x91f   : > { %2484 = vmatpush.bf16.msrb.mxu3 %v3449_v42  ;;  %v3453_v42 = vld [vmem:[%s5756_s9] sm:$0xff] }
 0x924   : > { %v3792_v3 = vpop.eup %3791 }
 0x925   : > { %v2361_v6 = vsel %vm1788_vm3, %v3792_v3, 0.0 }
 0x926   : > { %2362 = vadd.xlane.f32.xlu1 %v2361_v6 }
 0x933   : > { %v2416_v7 = vpop.xlane.xlu0 %2415 }
 0x934   : > { %v2417_v8 = vsub.f32 %v2411_v40, %v2416_v7  ;;  %v3452_v7 = vld [vmem:[#allocation37 + $0x8] sm:$0xff] }
 0x936   : > { %v2418_v9 = vmul.f32 1.442695, %v2417_v8 }
 0x938   : > { %3793 = vpow2.f32 %v2418_v9 }
 0x93e   : > { %v3794_v4 = vpop.eup %3793  ;;  %v2254_v10 = vpop.xlane.xlu0 %2253 }
 0x93f   : > { %3795 = vrcp.f32 %v2254_v10  ;;  %v2420_v5 = vsel %vm1788_vm3, %v3794_v4, 0.0 }
 0x940   : > { %2421 = vadd.xlane.f32.xlu2 %v2420_v5  ;;  %v2307_v12 = vpop.xlane.xlu1 %2306 }
 0x941   : > { %3797 = vrcp.f32 %v2307_v12 }
 0x945   : > { %v3796_v13 = vpop.eup %3795 }
 0x946   : > { %v2256_v14 = vmul.f32 %v3796_v13, %v3788_v25  ;;  %v3757_v25 = vld [vmem:[#allocation32] ss:$0 sm:$0xff] }
 0x947   : > { %v3798_v15 = vpop.eup %3797 }
 0x948   : > { %v2257_v16 = vpack.c.bf16 %v2256_v14, %v2256_v14  ;;  %v2309_v17 = vmul.f32 %v3798_v15, %v3790_v50 }
 0x94a   : > { %v2310_v18 = vpack.c.bf16 %v2309_v17, %v2309_v17  ;;  %3371 = vmatmul.msk.bf16.vlgmr.msra.gmra.mxu0 %vm1788_vm3, %v2257_v16 }
 0x94c   : > { %3373 = vmatmul.msk.bf16.vlgmr.msra.gmra.mxu2 %vm1788_vm3, %v2310_v18 }
 0x951   : > { %v2428_v19 = vpop.permute.xlu0 %2427 }
 0x952   : > { %v2433_v20 = vsel %vm1804_vm4, %v2428_v19, 0 }
 0x953   : > { %2442 = vmatpush.bf16.msrb.mxu2 %v2433_v20 }
 0x958   : > { %2368 = vrot.lane.b32.xlu2 %v2226_v62, %s4791_s24  ;;  %s1616_s24 = scalar_lea.vmem [#allocation46], %s5379_s0  ;;  %s4619_s0 = scalar_lea.hbm %s5759_s12, 16 }
 0x959   : > { %p4621_p1 = scmp.lt.s32.totalorder %s4619_s0, %s4615_s18 }
 0x95b   : > { %p4622_p3 = por %p4621_p1, %p4620_p2 }
 0x95d   : > { %p4623_p9 = pnand %p4622_p3, %p4618_p0 }
 0x999   : > { %v2363_v21 = vpop.xlane.xlu1 %2362 }
 0x99a   : > { %3799 = vrcp.f32 %v2363_v21 }
 0x9a0   : > { %v3800_v23 = vpop.eup %3799 }
 0x9a1   : > { %v2365_v26 = vmul.f32 %v3800_v23, %v3792_v3 }
 0x9a3   : > { %v2366_v31 = vpack.c.bf16 %v2365_v26, %v2365_v26 }
 0x9b3   : > { %v2422_v22 = vpop.xlane.xlu2 %2421 }
 0x9b4   : > { %3801 = vrcp.f32 %v2422_v22 }
 0x9ba   : > { %v3802_v24 = vpop.eup %3801 }
 0x9bb   : > { %v2424_v27 = vmul.f32 %v3802_v24, %v3794_v4  ;;  %v2369_v28 = vpop.permute.xlu2 %2368  ;;  %v3451_v4 = vld [vmem:[#allocation37] sm:$0xff]  ;;  %v3758_v24 = vld [vmem:[#allocation34] ss:$0 sm:$0xff] }
 0x9bc   : > { %v2374_v29 = vsel %vm1804_vm4, %v2369_v28, 0  ;;  %vm2628_vm4 = vcmask 523264  }
 0x9bd   : > { %v2425_v30 = vpack.c.bf16 %v2424_v27, %v2424_v27  ;;  %2383 = vmatpush.bf16.msrb.mxu0 %v2374_v29  ;;  %v3759_v29 = vld [vmem:[#allocation35] ss:$0 sm:$0xff] }
 0x9bf   : > { %3377 = vmatmul.msk.bf16.vlgmr.msrb.gmra.mxu2 %vm1788_vm3, %v2425_v30 }
 0x9c0   : > { %3375 = vmatmul.msk.bf16.vlgmr.msrb.gmra.mxu0 %vm1788_vm3, %v2366_v31 }
 0x9c1   : > { %2590 = vmatpush.bf16.msra.mxu0 %v3452_v7 }
 0x9c5   : > { %2591 = vmatpush.bf16.msra.mxu0 %v3451_v4 }
 0x9c7   : > { %v2273_v32 = vpop.f32.mrf.mxu0 }
 0x9cf   : > { %v2275_v33 = vpop.f32.mrf.mxu0  ;;  %v2326_v35 = vpop.f32.mrf.mxu2 }
 0x9d7   : > { %v2328_v34 = vpop.f32.mrf.mxu2 }
 0xa3d   : > { %v2385_v37 = vpop.f32.mrf.mxu0 }
 0xa42   : > { %v2444_v38 = vpop.f32.mrf.mxu2 }
 0xa43   : > { %v3743_v39 = vpack.i.bf16 %v2444_v38, %v2385_v37 }
 0xa45   : > { %3744 = vrot.lane.b32.xlu1 %v3743_v39, %s4793_s13  ;;  %v2387_v40 = vpop.f32.mrf.mxu0  ;;  %v3456_v39 = vld [vmem:[%s5756_s9 + $0x18] sm:$0xff]  ;;  %s2792_s13 = sshll.u32 %s1616_s24, 4  ;;  %s2793_s13 = int_to_ptr.vmem [resolvable:$true] %s2792_s13 }
 0xa46   : > { %2636 = vmatpush.bf16.msra.mxu1 %v3456_v39  ;;  %v3455_v40 = vld [vmem:[%s5756_s9 + $0x10] sm:$0xff] }
 0xa4a   : > { %v2446_v41 = vpop.f32.mrf.mxu2  ;;  %2637 = vmatpush.bf16.msra.mxu1 %v3455_v40 }
 0xa4b   : > { %v3454_v41 = vld [vmem:[%s5756_s9 + $0x8] sm:$0xff] }
 0xa4e   : > { %2638 = vmatpush.bf16.msra.mxu1 %v3454_v41 }
 0xa52   : > { %2639 = vmatpush.bf16.msra.mxu1 %v3453_v42 }
 0xab7   : > { %v3745_v43 = vpop.permute.xlu1 %3744 }
 0xab8   : > { %v3747_v44 = vunpack.i.h.bf16 %v3745_v43  ;;  %v3746_v45 = vunpack.i.l.bf16 %v3745_v43 }
 0xaba   : > { %v2457_v46 = vsel %vm1768_vm1, %v2326_v35, %v3747_v44  ;;  %v2456_v47 = vsel %vm1768_vm1, %v2273_v32, %v3746_v45  ;;  %v3760_v44 = vld [vmem:[#allocation38] ss:$0 sm:$0xff] }
 0xabb   : > { %v2458_v48 = vpack.c.bf16 %v2457_v46, %v2456_v47 }
 0xabd   : > { %3386 = vmatmul.msk.bf16.vlgmr.msrb.gmra.mxu3 %vm1687_vm0, %v2458_v48 }
 0xb40   : > { %v2486_v49 = vpop.f32.mrf.mxu3 }
 0xb41   : > { %v2487_v50 = vadd.f32 %v3757_v25, %v2486_v49 }
 0xb43   : > { %v2491_v51 = vadd.f32 %v2487_v50, %v5528_v58  ;;  %v3761_v50 = vld [vmem:[#allocation40] ss:$0 sm:$0xff] }
 0xb45   : > { %v2493_v52 = vsel %vm1687_vm0, %v2491_v51, 0.0 }
 0xb46   : > { %2494 = vadd.xlane.f32.xlu0 %v2493_v52 }
 0xb48   : > { %v2488_v53 = vpop.f32.mrf.mxu3 }
 0xb49   : > { %v2489_v54 = vadd.f32 %v3757_v25, %v2488_v53 }
 0xb4b   : > { %v2492_v55 = vadd.f32 %v2489_v54, %v5531_v59 }
 0xb4d   : > { %v2496_v57 = vsel %vm1687_vm0, %v2492_v55, 0.0 }
 0xb4e   : > { %2497 = vadd.xlane.f32.xlu2 %v2496_v57 }
 0xbb9   : > { %v2495_v60 = vpop.xlane.xlu0 %2494 }
 0xbba   : > { %v2499_v61 = vmul.f32 %v2495_v60, %v5509_v11 }
 0xbbc   : > { %v2501_v62 = vsub.f32 %v2491_v51, %v2499_v61 }
 0xbbe   : > { %v2503_v63 = vmul.f32 %v2501_v62, %v2501_v62 }
 0xbc0   : > { %v2505_v0 = vsel %vm1687_vm0, %v2503_v63, 0.0 }
 0xbc1   : > { %v2498_v1 = vpop.xlane.xlu2 %2497  ;;  %2506 = vadd.xlane.f32.xlu1 %v2505_v0 }
 0xbc2   : > { %v2500_v58 = vmul.f32 %v2498_v1, %v5509_v11 }
 0xbc4   : > { %v2502_v2 = vsub.f32 %v2492_v55, %v2500_v58 }
 0xbc6   : > { %v2504_v3 = vmul.f32 %v2502_v2, %v2502_v2 }
 0xbc8   : > { %v2508_v6 = vsel %vm1687_vm0, %v2504_v3, 0.0 }
 0xbc9   : > { %2509 = vadd.xlane.f32.xlu0 %v2508_v6 }
 0xc34   : > { %v2507_v59 = vpop.xlane.xlu1 %2506 }
 0xc35   : > { %v2511_v8 = vmul.f32 %v2507_v59, %v5509_v11 }
 0xc37   : > { %v2513_v9 = vadd.f32 1e-05, %v2511_v8  ;;  %v3458_v8 = vld [vmem:[%s5757_s5 + $0x8] sm:$0xff] }
 0xc38   : > { %2763 = vmatpush.bf16.msra.mxu3 %v3458_v8 }
 0xc39   : > { %3803 = vrsqrt.f32 %v2513_v9  ;;  %vm2521_vm14 = vweird.f32 %v2513_v9 }
 0xc3c   : > { %v2510_v10 = vpop.xlane.xlu0 %2509 }
 0xc3d   : > { %v2512_v5 = vmul.f32 %v2510_v10, %v5509_v11  ;;  %v3460_v10 = vld [vmem:[#allocation44 + $0x8] sm:$0xff] }
 0xc3e   : > { %2735 = vmatpush.bf16.msra.mxu2 %v3460_v10 }
 0xc3f   : > { %v3804_v12 = vpop.eup %3803  ;;  %v2514_v13 = vadd.f32 1e-05, %v2512_v5 }
 0xc40   : > { %v2516_v14 = vmul.f32 %v3804_v12, %v2513_v9  ;;  %vm2522_vm13 = vweird.f32 %v3804_v12  ;;  %v3457_v9 = vld [vmem:[%s5757_s5] sm:$0xff] }
 0xc41   : > { %3805 = vrsqrt.f32 %v2514_v13  ;;  %vm2523_vm15 = vmor %vm2521_vm14, %vm2522_vm13  ;;  %vm2531_vm2 = vweird.f32 %v2514_v13  ;;  %2764 = vmatpush.bf16.msra.mxu3 %v3457_v9 }
 0xc42   : > { %v2517_v15 = vmul.f32 %v3804_v12, %v2516_v14 }
 0xc44   : > { %v2518_v16 = vmul.f32 0.5, %v2517_v15 }
 0xc46   : > { %v2519_v17 = vsub.f32 1.5, %v2518_v16 }
 0xc47   : > { %v3806_v18 = vpop.eup %3805 }
 0xc48   : > { %v2520_v19 = vmul.f32 %v3804_v12, %v2519_v17  ;;  %v2526_v20 = vmul.f32 %v3806_v18, %v2514_v13  ;;  %vm2532_vm1 = vweird.f32 %v3806_v18  ;;  %v3459_v13 = vld [vmem:[#allocation44] sm:$0xff] }
 0xc49   : > { %vm2533_vm3 = vmor %vm2531_vm2, %vm2532_vm1  ;;  %2736 = vmatpush.bf16.msra.mxu2 %v3459_v13 }
 0xc4a   : > { %v2524_v21 = vsel %vm2523_vm15, %v3804_v12, %v2520_v19  ;;  %v2527_v22 = vmul.f32 %v3806_v18, %v2526_v20 }
 0xc4b   : > { %v2535_v26 = vmul.f32 %v2524_v21, %v2501_v62 }
 0xc4c   : > { %v2528_v23 = vmul.f32 0.5, %v2527_v22 }
 0xc4d   : > { %v2540_v30 = vmul.f32 %v3758_v24, %v2535_v26  ;;  %v3762_v26 = vld [vmem:[#allocation41] ss:$0 sm:$0xff] }
 0xc4e   : > { %v2529_v27 = vsub.f32 1.5, %v2528_v23 }
 0xc4f   : > { %v2545_v33 = vadd.f32 %v3759_v29, %v2540_v30 }
 0xc50   : > { %v2530_v28 = vmul.f32 %v3806_v18, %v2529_v27 }
 0xc51   : > { %v2547_v36 = vmul.f32 %v2545_v33, %v5525_v56 }
 0xc52   : > { %v2534_v31 = vsel %vm2533_vm3, %v3806_v18, %v2530_v28 }
 0xc53   : > { %v2536_v32 = vmul.f32 %v2534_v31, %v2502_v2 }
 0xc55   : > { %v2541_v35 = vmul.f32 %v3758_v24, %v2536_v32 }
 0xc57   : > { %v2546_v34 = vadd.f32 %v3759_v29, %v2541_v35  ;;  %v3763_v29 = vld [vmem:[#allocation43] ss:$0 sm:$0xff] }
 0xc59   : > { %v2548_v37 = vmul.f32 %v2546_v34, %v5525_v56 }
 0xc5b   : > { %v2565_v38 = vpack.c.bf16 %v2548_v37, %v2547_v36 }
 0xc5d   : > { %3395 = vmatmul.msk.bf16.vlgmr.msra.gmra.mxu0 %vm1687_vm0, %v2565_v38 }
 0xcda   : > { %v2593_v43 = vpop.f32.mrf.mxu0 }
 0xcdb   : > { %v2594_v45 = vadd.f32 %v3760_v44, %v2593_v43 }
 0xcdd   : > { %v2598_v48 = vmax.f32 %v2594_v45, 0.0 }
 0xce2   : > { %v2595_v46 = vpop.f32.mrf.mxu0 }
 0xce3   : > { %v2596_v47 = vadd.f32 %v3760_v44, %v2595_v46  ;;  %v3764_v44 = vld [vmem:[%s5758_s8] ss:$0 sm:$0xff] }
 0xce5   : > { %v2599_v25 = vmax.f32 %v2596_v47, 0.0 }
 0xce7   : > { %v2600_v49 = vpack.c.bf16 %v2599_v25, %v2598_v48 }
 0xce9   : > { %3412 = vmatmul.msk.bf16.vlgmr.msra.gmra.mxu1 %vm2628_vm4, %v2600_v49 }
 0xd66   : > { %v2641_v51 = vpop.f32.mrf.mxu1 }
 0xd67   : > { %v2642_v52 = vadd.f32 %v3761_v50, %v2641_v51 }
 0xd69   : > { %v2646_v53 = vadd.f32 %v2642_v52, %v2547_v36 }
 0xd6b   : > { %v2648_v54 = vsel %vm1687_vm0, %v2646_v53, 0.0 }
 0xd6c   : > { %2649 = vadd.xlane.f32.xlu2 %v2648_v54 }
 0xd6e   : > { %v2643_v55 = vpop.f32.mrf.mxu1 }
 0xd6f   : > { %v2644_v57 = vadd.f32 %v3761_v50, %v2643_v55 }
 0xd71   : > { %v2647_v60 = vadd.f32 %v2644_v57, %v2548_v37 }
 0xd73   : > { %v2651_v61 = vsel %vm1687_vm0, %v2647_v60, 0.0 }
 0xd74   : > { %2652 = vadd.xlane.f32.xlu0 %v2651_v61 }
 0xddf   : > { %v2650_v62 = vpop.xlane.xlu2 %2649 }
 0xde0   : > { %v2654_v63 = vmul.f32 %v2650_v62, %v5509_v11 }
 0xde2   : > { %v2656_v0 = vsub.f32 %v2646_v53, %v2654_v63 }
 0xde4   : > { %v2658_v1 = vmul.f32 %v2656_v0, %v2656_v0 }
 0xde6   : > { %v2660_v58 = vsel %vm1687_vm0, %v2658_v1, 0.0 }
 0xde7   : > { %v2653_v2 = vpop.xlane.xlu0 %2652  ;;  %2661 = vadd.xlane.f32.xlu1 %v2660_v58 }
 0xde8   : > { %v2655_v3 = vmul.f32 %v2653_v2, %v5509_v11 }
 0xdea   : > { %v2657_v6 = vsub.f32 %v2647_v60, %v2655_v3 }
 0xdec   : > { %v2659_v59 = vmul.f32 %v2657_v6, %v2657_v6 }
 0xdee   : > { %v2663_v7 = vsel %vm1687_vm0, %v2659_v59, 0.0 }
 0xdef   : > { %2664 = vadd.xlane.f32.xlu2 %v2663_v7 }
 0xe5a   : > { %v2662_v4 = vpop.xlane.xlu1 %2661 }
 0xe5b   : > { %v2666_v5 = vmul.f32 %v2662_v4, %v5509_v11 }
 0xe5d   : > { %v2668_v12 = vadd.f32 1e-05, %v2666_v5 }
 0xe5f   : > { %3807 = vrsqrt.f32 %v2668_v12  ;;  %vm2676_vm6 = vweird.f32 %v2668_v12 }
 0xe62   : > { %v2665_v14 = vpop.xlane.xlu2 %2664 }
 0xe63   : > { %v2667_v15 = vmul.f32 %v2665_v14, %v5509_v11 }
 0xe65   : > { %v3808_v16 = vpop.eup %3807  ;;  %v2669_v17 = vadd.f32 1e-05, %v2667_v15 }
 0xe66   : > { %v2671_v18 = vmul.f32 %v3808_v16, %v2668_v12  ;;  %vm2677_vm5 = vweird.f32 %v3808_v16 }
 0xe67   : > { %3809 = vrsqrt.f32 %v2669_v17  ;;  %vm2678_vm7 = vmor %vm2676_vm6, %vm2677_vm5  ;;  %vm2686_vm9 = vweird.f32 %v2669_v17 }
 0xe68   : > { %v2672_v19 = vmul.f32 %v3808_v16, %v2671_v18 }
 0xe6a   : > { %v2673_v20 = vmul.f32 0.5, %v2672_v19 }
 0xe6c   : > { %v2674_v21 = vsub.f32 1.5, %v2673_v20 }
 0xe6d   : > { %v3810_v22 = vpop.eup %3809 }
 0xe6e   : > { %v2675_v23 = vmul.f32 %v3808_v16, %v2674_v21  ;;  %v2681_v24 = vmul.f32 %v3810_v22, %v2669_v17  ;;  %vm2687_vm8 = vweird.f32 %v3810_v22 }
 0xe6f   : > { %vm2688_vm10 = vmor %vm2686_vm9, %vm2687_vm8 }
 0xe70   : > { %v2679_v27 = vsel %vm2678_vm7, %v3808_v16, %v2675_v23  ;;  %v2682_v28 = vmul.f32 %v3810_v22, %v2681_v24 }
 0xe71   : > { %v2690_v30 = vmul.f32 %v2679_v27, %v2656_v0 }
 0xe72   : > { %v2683_v31 = vmul.f32 0.5, %v2682_v28 }
 0xe73   : > { %v2695_v11 = vmul.f32 %v3762_v26, %v2690_v30 }
 0xe74   : > { %v2684_v32 = vsub.f32 1.5, %v2683_v31 }
 0xe75   : > { %v2700_v33 = vadd.f32 %v3763_v29, %v2695_v11 }
 0xe76   : > { %v2685_v35 = vmul.f32 %v3810_v22, %v2684_v32 }
 0xe77   : > { %v2702_v34 = vmul.f32 %v2700_v33, %v5525_v56 }
 0xe78   : > { %v2689_v36 = vsel %vm2688_vm10, %v3810_v22, %v2685_v35 }
 0xe79   : > { %v2691_v37 = vmul.f32 %v2689_v36, %v2657_v6  ;;  %v2704_v38 = vpack.c.bf16 %v2702_v34, %v2702_v34 }
 0xe7b   : > { %v2696_v39 = vmul.f32 %v3762_v26, %v2691_v37  ;;  %3430 = vmatmul.msk.bf16.vlgmr.msra.gmra.mxu3 %vm1687_vm0, %v2704_v38 }
 0xe7d   : > { %v2701_v40 = vadd.f32 %v3763_v29, %v2696_v39 }
 0xe7f   : > { %v2703_v41 = vmul.f32 %v2701_v40, %v5525_v56 }
 0xe81   : > { %v2709_v42 = vpack.c.bf16 %v2703_v41, %v2703_v41 }
 0xe83   : > { %3421 = vmatmul.msk.bf16.vlgmr.msra.gmra.mxu2 %vm1687_vm0, %v2709_v42 }
 0xefe   : > { %v2766_v43 = vpop.f32.mrf.mxu3 }
 0xf06   : > { %v2738_v45 = vpop.f32.mrf.mxu2  ;;  %v2768_v46 = vpop.f32.mrf.mxu3 }
 0xf07   : > { %v2767_v47 = vadd.f32 %v2766_v43, %v2738_v45 }
 0xf09   : > { %v2774_v48 = vadd.f32 %v3764_v44, %v2767_v47 }
 0xf0b   : > { %vm2775_vm11 = vcmp.ge.f32.partialorder %v2774_v48, 0.0  ;;  %v2776_v56 = vmul.f32 0.125, %v2774_v48 }
 0xf0d   : > { %v2777_v25 = vsel %vm2775_vm11, %v2774_v48, %v2776_v56 }
 0xf0e   : > { %v2740_v49 = vpop.f32.mrf.mxu2  ;;  %2778 = vst.msk [vmem:[%s1616_s24] sm:$0xff] %vm1687_vm0, %v2777_v25 }
 0xf0f   : > { %4626 = shalt.err (!%p4623_p9)
}
 0xf10   : > { %3569 = dma.vmem_to_hbm [thread:$0]  (%p5038_p11), %s2793_s13, 128, %s2795_s17, %s2780_s7  }
 0xf11 PF: > { %s5761_s19 = sld [smem:[#allocation95_spill]]  ;;  %p5763_p7 = scmp.ge.s32.totalorder %s4725_s2, 2 }
 0xf13   : > { %p3579_p5 = pnand %p5763_p7, %p5042_p12 }
 0xf15   : > { %p3580_p8 = pneg %p3579_p5 }
 0xf17   : > { %s2806_s11 = sand.u32 1, %s5761_s19  }
 0xf18   : > { %s2807_s6 = scalar_lea.sflag [#allocation4], %s2806_s11 }
 0xf19   : > { %4708 = dma.done.wait (%p3580_p8), %s2807_s6, 128  }
 0xf1a   : > { %4710 = vsyncadd (%p3580_p8), %s2807_s6, 4294967168  ;;  %s5764_s2 = sld [smem:[#allocation96_spill]]  ;;  %s5766_s0 = smov %s4717_s28 }
 0xf1b   : > { %s5765_s8 = sld [smem:[#allocation97_spill]]  ;;  %s5767_s28 = smov %s4721_s1 }
 0xf20   : > { %p102_p10 = scmp.ge.s32.totalorder %s5764_s2, 4  }
 0xf21   : > { %s5768_s1 = smov %s5765_s8 }
 0xf22   :  { %104 = sbr.rel (!%p102_p10) target bundleno = 93 (0x5d), region = 377 }
 0xf27   :  { %2813 = vsyncpa [#allocation3], 1 }
 0xf28   :  { %2815 = vsyncpa [#allocation3 + $0x1], 1 }
 0xf29   :  { %2816 = vsyncpa [#allocation6], 1 }
 0xf2a   :  { %2818 = vsyncpa [#allocation6 + $0x1], 1 }
 0xf2b   :  { %2819 = vsyncpa [#allocation9], 1 }
 0xf2c   :  { %2820 = vsyncpa [#allocation12], 1 }
 0xf2d   :  { %2821 = vsyncpa [#allocation15], 1 }
 0xf2e   :  { %2822 = vsyncpa [#allocation18], 1 }
 0xf2f   :  { %2823 = vsyncpa [#allocation21], 1 }
 0xf30   :  { %2824 = vsyncpa [#allocation24], 1 }
 0xf31   :  { %2825 = vsyncpa [#allocation27], 1 }
 0xf32   :  { %2826 = vsyncpa [#allocation30], 1 }
 0xf33   :  { %2827 = vsyncpa [#allocation33], 1 }
 0xf34   :  { %2828 = vsyncpa [#allocation36], 1 }
 0xf35   :  { %2829 = vsyncpa [#allocation39], 1 }
 0xf36   :  { %2830 = vsyncpa [#allocation42], 1 }
 0xf37   :  { %2831 = vsyncpa [#allocation45], 1 }
 0xf38   :  { %2832 = vsyncpa [#allocation4], 1 }
 0xf39   :  { %2834 = vsyncpa [#allocation4 + $0x1], 1 }

</bundles_post_ra>
